<compile_context>
chip_gen: v7x
topology: tpu7x:2x2x1
jax: 0.10.0
libtpu: 0.0.40
codegen_flags: <defaults>
</compile_context>

<pallas_src>
import numpy as np

import jax
import jax.numpy as jnp
from jax import lax
from jax.experimental import pallas as pl
from jax.experimental.pallas import tpu as pltpu

BN_EPS = 1e-5
LPAD = 128  # 128-aligned per-batch / per-channel lane stride after pooling


def cnn1d_kernel(x_ref, w1_ref, chp_ref, w2_ref, wf2_ref, bvec_ref,
                 pool_hbm, wf1_hbm, out_ref,
                 pool_vmem, wf1_vmem, xim_s, flat_s, sems):
    f32 = jnp.float32
    N, L0 = x_ref.shape
    C, K1 = w1_ref.shape
    L1 = L0 - (K1 - 1)                 # after Conv1d(k=5)      -> 306
    K2 = w2_ref.shape[1] // C
    Lp = L1 // 3                       # after AvgPool1d(3)     -> 102
    L2 = Lp - (K2 - 1)                 # after Conv1d(k=3)      -> 100
    Lpp = pool_vmem.shape[1] // N      # padded stride          -> 128
    NLp = N * Lpp                      # merged padded width    -> 256
    H1 = wf1_vmem.shape[1]             # fc1 width              -> 128
    n_cls = wf2_ref.shape[1]           # classes                -> 4

    # ---- kick off async fetches of the two big constant operands -----------
    # (pool needed first, wf1 last) so their HBM time hides behind compute.
    pool_cp = pltpu.make_async_copy(pool_hbm, pool_vmem, sems.at[0])
    pool_cp.start()
    wf1_cp = pltpu.make_async_copy(wf1_hbm, wf1_vmem, sems.at[1])
    wf1_cp.start()

    # ---- unpack packed per-channel params (32, 8) --------------------------
    chp = chp_ref[...]
    b1, g1, be1 = chp[:, 0:1], chp[:, 1:2], chp[:, 2:3]
    b2, g2, be2 = chp[:, 3:4], chp[:, 4:5], chp[:, 5:6]

    # ---- conv1 im2col in VMEM scratch: xim[k, n*L1 + l] = x[n, l + k] ------
    x = x_ref[...]                                             # (N, L0)
    for k in range(K1):
        for n in range(N):
            xim_s[k:k + 1, n * L1:(n + 1) * L1] = x[n:n + 1, k:k + L1]

    # ---- conv1: (C, K1) @ (K1, N*L1) + bias ---------------------------------
    y1 = jnp.dot(w1_ref[...], xim_s[...], preferred_element_type=f32) + b1

    # ---- BatchNorm1d(C), training-mode batch stats (two-pass) + ReLU -------
    cnt1 = float(N * L1)
    mu1 = jnp.sum(y1, axis=1, keepdims=True) / cnt1
    d1 = y1 - mu1
    var1 = jnp.sum(d1 * d1, axis=1, keepdims=True) / cnt1      # biased var
    y1 = jnp.maximum(d1 * (g1 * lax.rsqrt(var1 + BN_EPS)) + be1, 0.0)

    # ---- AvgPool1d(3): one matmul with the host-precomputed band matrix ----
    # The matrix also re-lays lanes out from per-batch stride L1 (=306) to the
    # 128-aligned stride Lpp (=128); its pad columns are all-zero, so the pad
    # lanes of `p` are exactly 0 (finite).
    pool_cp.wait()
    p = jnp.dot(y1, pool_vmem[...], preferred_element_type=f32)  # (C, N*Lpp)

    # ---- conv2: sum of K2 small matmuls on lane-rolled p --------------------
    # shifted_k[:, j] = p[:, j + k]; the roll's wrap-around only lands in pad
    # lanes, which are excluded from BN2 stats and multiplied by zero wf1 rows.
    w2 = w2_ref[...]                                            # (C, K2*C), k-major
    y2 = jnp.dot(w2[:, 0:C], p, preferred_element_type=f32) + b2
    for k in range(1, K2):
        pk = pltpu.roll(p, shift=NLp - k, axis=1)
        y2 = y2 + jnp.dot(w2[:, k * C:(k + 1) * C], pk,
                          preferred_element_type=f32)           # (C, N*Lpp)

    # ---- BatchNorm1d(C) over valid columns only (mask from bvec) + ReLU ----
    mask2 = bvec_ref[:, 2 * H1:2 * H1 + NLp]                    # (1, N*Lpp) 1/0
    cnt2 = float(N * L2)
    mu2 = jnp.sum(y2 * mask2, axis=1, keepdims=True) / cnt2
    d2 = y2 - mu2
    var2 = jnp.sum(d2 * d2 * mask2, axis=1, keepdims=True) / cnt2
    y2 = jnp.maximum(d2 * (g2 * lax.rsqrt(var2 + BN_EPS)) + be2, 0.0)

    # ---- channel-major flatten (torch .view(N, -1)) with 128-aligned strides
    # flat[n, c*128 + l] = y2[c, n*128 + l]; the l >= L2 pad lanes are finite
    # and hit zero rows of the padded wf1, so they contribute nothing.
    for n in range(N):
        for c in range(C):
            flat_s[n:n + 1, c * Lpp:(c + 1) * Lpp] = \
                y2[c:c + 1, n * Lpp:(n + 1) * Lpp]

    # ---- FC head: Linear(3200,128) + ReLU + Linear(128,4) + Softmax(dim=1) -
    wf1_cp.wait()
    bf1 = bvec_ref[:, 0:H1]                                     # (1, 128)
    bf2 = bvec_ref[:, H1:H1 + n_cls]                            # (1, 4)
    h = jnp.dot(flat_s[...], wf1_vmem[...], preferred_element_type=f32) + bf1
    h = jnp.maximum(h, 0.0)
    z = jnp.dot(h, wf2_ref[...], preferred_element_type=f32) + bf2
    z = z - jnp.max(z, axis=1, keepdims=True)
    e = jnp.exp(z)
    out_ref[...] = e / jnp.sum(e, axis=1, keepdims=True)


def _full_spec(shape):
    nd = len(shape)
    return pl.BlockSpec(shape, lambda i, _nd=nd: (0,) * _nd)


def cnn1d_forward(x, params):
    (w1, b1, g1, be1, w2, b2, g2, be2, wf1, bf1, wf2, bf2) = params
    N, Cin, L0 = x.shape
    assert Cin == 1
    C, _, K1 = w1.shape                       # Conv1d(1, 32, 5)
    L1 = L0 - (K1 - 1)
    assert L1 % 3 == 0, "fused kernel assumes AvgPool1d(3) has no remainder"
    Lp = L1 // 3
    K2 = w2.shape[2]                          # Conv1d(32, 32, 3)
    L2 = Lp - (K2 - 1)
    H1 = wf1.shape[0]                         # Linear(3200, 128)
    assert C * L2 == wf1.shape[1], "flatten size must match Linear(3200, 128)"
    assert Lp <= LPAD and L2 <= LPAD and H1 % 128 == 0
    n_cls = wf2.shape[0]
    assert n_cls <= H1

    f32 = jnp.float32
    # ---- host-side one-time re-layouts so every in-kernel op is aligned ----
    x2 = x[:, 0, :].astype(f32)                                        # (N, L0)
    w1k = w1[:, 0, :].astype(f32)                                      # (C, K1)
    w2f = jnp.transpose(w2, (0, 2, 1)).reshape(C, K2 * C).astype(f32)  # col = k*C + ci

    # packed per-channel BN/bias params: cols [b1, g1, be1, b2, g2, be2, 0, 0]
    zc = jnp.zeros_like(b1)
    chp = jnp.stack([b1, g1, be1, b2, g2, be2, zc, zc], axis=1).astype(f32)

    # AvgPool1d(3) band matrix (host constant): (N*L1) x (N*LPAD), entries 1/3.
    # Also re-lays lanes out to the 128-aligned per-batch stride LPAD.
    r = np.arange(N * L1)
    c = np.arange(N * LPAD)
    P = ((r[:, None] // L1 == c[None, :] // LPAD)
         & ((r[:, None] % L1) // 3 == c[None, :] % LPAD)
         & (c[None, :] % LPAD < Lp)).astype(np.float32) / 3.0
    poolM = jnp.asarray(P)                                             # (N*L1, N*LPAD)

    # wf1 reordered + zero-padded to (C*LPAD, H1): row c*LPAD + l = wf1[:, c*L2 + l]
    wf1_r = wf1.astype(f32).T.reshape(C, L2, H1)
    wf1_p = jnp.zeros((C, LPAD, H1), f32).at[:, :L2, :].set(wf1_r)
    wf1_p = wf1_p.reshape(C * LPAD, H1)

    wf2t = wf2.T.astype(f32)                                           # (H1, n_cls)

    # bf1 | bf2 | BN2-validity mask packed into one lane-aligned row vector.
    m = np.zeros((N * LPAD,), np.float32)
    for n in range(N):
        m[n * LPAD:n * LPAD + L2] = 1.0
    bvec = jnp.zeros((1, 2 * H1 + N * LPAD), f32)
    bvec = bvec.at[0, :H1].set(bf1.astype(f32))
    bvec = bvec.at[0, H1:H1 + n_cls].set(bf2.astype(f32))
    bvec = bvec.at[0, 2 * H1:].set(jnp.asarray(m))

    args = (x2, w1k, chp, w2f, wf2t, bvec, poolM, wf1_p)
    in_specs = [_full_spec(x2.shape), _full_spec(w1k.shape),
                _full_spec(chp.shape), _full_spec(w2f.shape),
                _full_spec(wf2t.shape), _full_spec(bvec.shape),
                pl.BlockSpec(memory_space=pl.ANY),    # pool matrix, manual DMA
                pl.BlockSpec(memory_space=pl.ANY)]    # wf1,        manual DMA

    return pl.pallas_call(
        cnn1d_kernel,
        out_shape=jax.ShapeDtypeStruct((N, n_cls), f32),
        grid=(1,),
        in_specs=in_specs,
        out_specs=_full_spec((N, n_cls)),
        scratch_shapes=[pltpu.VMEM((N * L1, N * LPAD), f32),   # pool matrix dst
                        pltpu.VMEM((C * LPAD, H1), f32),       # wf1 dst
                        pltpu.VMEM((K1, N * L1), f32),         # conv1 im2col
                        pltpu.VMEM((N, C * LPAD), f32),        # padded flatten
                        pltpu.SemaphoreType.DMA((2,))],
        compiler_params=pltpu.CompilerParams(
            dimension_semantics=("arbitrary",)),
    )(*args)


def init_params(key):
    ks = jax.random.split(key, 8)
    f32 = jnp.float32
    w1 = 0.2 * jax.random.normal(ks[0], (32, 1, 5), f32)     # Conv1d(1,32,5).weight
    b1 = 0.2 * jax.random.normal(ks[1], (32,), f32)          # Conv1d(1,32,5).bias
    g1 = jnp.ones((32,), f32)                                # BatchNorm1d(32).weight
    be1 = jnp.zeros((32,), f32)                              # BatchNorm1d(32).bias
    w2 = 0.1 * jax.random.normal(ks[2], (32, 32, 3), f32)    # Conv1d(32,32,3).weight
    b2 = 0.1 * jax.random.normal(ks[3], (32,), f32)
    g2 = jnp.ones((32,), f32)
    be2 = jnp.zeros((32,), f32)
    wf1 = 0.02 * jax.random.normal(ks[4], (128, 3200), f32)  # Linear(3200,128).weight
    bf1 = 0.02 * jax.random.normal(ks[5], (128,), f32)
    bf2 = 0.1 * jax.random.normal(ks[7], (4,), f32)
    wf2 = 0.1 * jax.random.normal(ks[6], (4, 128), f32)      # Linear(128,4).weight
    return (w1, b1, g1, be1, w2, b2, g2, be2, wf1, bf1, wf2, bf2)


if __name__ == "__main__":
    key = jax.random.PRNGKey(0)
    k_x, k_p = jax.random.split(key)
    # Input length 310: conv1 -> 306, pool(3) -> 102, conv2 -> 100, 32*100 = 3200.
    x = jax.random.normal(k_x, (2, 1, 310), jnp.float32)
    params = init_params(k_p)

    out = jax.jit(cnn1d_forward)(x, params)
    out = jax.block_until_ready(out)

    assert out.shape == (2, 4)
    assert bool(jnp.all(jnp.isfinite(out)))
    assert bool(jnp.allclose(jnp.sum(out, axis=1), 1.0, atol=1e-5))
    print("KERNEL_OK")
</pallas_src>

<mosaic_0001>
module attributes {stable_mosaic.version = 11 : i64} {
  func.func @cnn1d_kernel(%arg0: i32, %arg1: memref<2x310xf32, #tpu.memory_space<vmem>>, %arg2: memref<32x5xf32, #tpu.memory_space<vmem>>, %arg3: memref<32x8xf32, #tpu.memory_space<vmem>>, %arg4: memref<32x96xf32, #tpu.memory_space<vmem>>, %arg5: memref<128x4xf32, #tpu.memory_space<vmem>>, %arg6: memref<1x512xf32, #tpu.memory_space<vmem>>, %arg7: memref<612x256xf32, #tpu.memory_space<any>>, %arg8: memref<4096x128xf32, #tpu.memory_space<any>>, %arg9: memref<2x4xf32, #tpu.memory_space<vmem>>, %arg10: memref<612x256xf32, #tpu.memory_space<vmem>>, %arg11: memref<4096x128xf32, #tpu.memory_space<vmem>>, %arg12: memref<5x612xf32, #tpu.memory_space<vmem>>, %arg13: memref<2x4096xf32, #tpu.memory_space<vmem>>, %arg14: memref<2x!tpu.dma_semaphore, #tpu.memory_space<semaphore_mem>>) attributes {dimension_semantics = [#tpu.dimension_semantics<arbitrary>], iteration_bounds = array<i64: 1>, scalar_prefetch = 0 : i64, scratch_operands = 5 : i64, tpu.core_type = #tpu.core_type<tc>, window_params = [{pipeline_mode = #tpu.pipeline_mode<synchronous>, transform_indices = @transform_0, window_bounds = array<i64: 2, 310>}, {pipeline_mode = #tpu.pipeline_mode<synchronous>, transform_indices = @transform_1, window_bounds = array<i64: 32, 5>}, {pipeline_mode = #tpu.pipeline_mode<synchronous>, transform_indices = @transform_2, window_bounds = array<i64: 32, 8>}, {pipeline_mode = #tpu.pipeline_mode<synchronous>, transform_indices = @transform_3, window_bounds = array<i64: 32, 96>}, {pipeline_mode = #tpu.pipeline_mode<synchronous>, transform_indices = @transform_4, window_bounds = array<i64: 128, 4>}, {pipeline_mode = #tpu.pipeline_mode<synchronous>, transform_indices = @transform_5, window_bounds = array<i64: 1, 512>}, {}, {}, {pipeline_mode = #tpu.pipeline_mode<synchronous>, transform_indices = @transform_8, window_bounds = array<i64: 2, 4>}]} {
    %c0_i32 = arith.constant 0 : i32
    %0 = tpu.memref_slice %arg14[%c0_i32] : memref<2x!tpu.dma_semaphore, #tpu.memory_space<semaphore_mem>> -> memref<1x!tpu.dma_semaphore, #tpu.memory_space<semaphore_mem>>
    %1 = tpu.memref_squeeze %0 : memref<1x!tpu.dma_semaphore, #tpu.memory_space<semaphore_mem>> -> memref<!tpu.dma_semaphore, #tpu.memory_space<semaphore_mem>>
    tpu.enqueue_dma source(%arg7 : memref<612x256xf32, #tpu.memory_space<any>>) target(%arg10 : memref<612x256xf32, #tpu.memory_space<vmem>>) target_semaphore(%1 : memref<!tpu.dma_semaphore, #tpu.memory_space<semaphore_mem>>)
    %c1_i32 = arith.constant 1 : i32
    %2 = tpu.memref_slice %arg14[%c1_i32] : memref<2x!tpu.dma_semaphore, #tpu.memory_space<semaphore_mem>> -> memref<1x!tpu.dma_semaphore, #tpu.memory_space<semaphore_mem>>
    %3 = tpu.memref_squeeze %2 : memref<1x!tpu.dma_semaphore, #tpu.memory_space<semaphore_mem>> -> memref<!tpu.dma_semaphore, #tpu.memory_space<semaphore_mem>>
    tpu.enqueue_dma source(%arg8 : memref<4096x128xf32, #tpu.memory_space<any>>) target(%arg11 : memref<4096x128xf32, #tpu.memory_space<vmem>>) target_semaphore(%3 : memref<!tpu.dma_semaphore, #tpu.memory_space<semaphore_mem>>)
    %c0 = arith.constant 0 : index
    %c0_0 = arith.constant 0 : index
    %4 = vector.load %arg3[%c0, %c0_0] : memref<32x8xf32, #tpu.memory_space<vmem>>, vector<32x8xf32>
    %5 = vector.extract_strided_slice %4 {offsets = [0, 0], sizes = [32, 1], strides = [1, 1]} : vector<32x8xf32> to vector<32x1xf32>
    %6 = vector.extract_strided_slice %4 {offsets = [0, 1], sizes = [32, 1], strides = [1, 1]} : vector<32x8xf32> to vector<32x1xf32>
    %7 = vector.extract_strided_slice %4 {offsets = [0, 2], sizes = [32, 1], strides = [1, 1]} : vector<32x8xf32> to vector<32x1xf32>
    %8 = vector.extract_strided_slice %4 {offsets = [0, 3], sizes = [32, 1], strides = [1, 1]} : vector<32x8xf32> to vector<32x1xf32>
    %9 = vector.extract_strided_slice %4 {offsets = [0, 4], sizes = [32, 1], strides = [1, 1]} : vector<32x8xf32> to vector<32x1xf32>
    %10 = vector.extract_strided_slice %4 {offsets = [0, 5], sizes = [32, 1], strides = [1, 1]} : vector<32x8xf32> to vector<32x1xf32>
    %c0_1 = arith.constant 0 : index
    %c0_2 = arith.constant 0 : index
    %11 = vector.load %arg1[%c0_1, %c0_2] : memref<2x310xf32, #tpu.memory_space<vmem>>, vector<2x310xf32>
    %12 = vector.extract_strided_slice %11 {offsets = [0, 0], sizes = [1, 306], strides = [1, 1]} : vector<2x310xf32> to vector<1x306xf32>
    %c0_3 = arith.constant 0 : index
    %c0_4 = arith.constant 0 : index
    %13 = vector.load %arg12[%c0_3, %c0_4] : memref<5x612xf32, #tpu.memory_space<vmem>>, vector<1x306xf32>
    tpu.vector_store %arg12[%c0_3, %c0_4], %12 {strides = array<i32>} : memref<5x612xf32, #tpu.memory_space<vmem>>, vector<1x306xf32>,
    %14 = vector.extract_strided_slice %11 {offsets = [1, 0], sizes = [1, 306], strides = [1, 1]} : vector<2x310xf32> to vector<1x306xf32>
    %c0_5 = arith.constant 0 : index
    %c306 = arith.constant 306 : index
    %15 = vector.load %arg12[%c0_5, %c306] : memref<5x612xf32, #tpu.memory_space<vmem>>, vector<1x306xf32>
    tpu.vector_store %arg12[%c0_5, %c306], %14 {strides = array<i32>} : memref<5x612xf32, #tpu.memory_space<vmem>>, vector<1x306xf32>,
    %16 = vector.extract_strided_slice %11 {offsets = [0, 1], sizes = [1, 306], strides = [1, 1]} : vector<2x310xf32> to vector<1x306xf32>
    %c1 = arith.constant 1 : index
    %c0_6 = arith.constant 0 : index
    %17 = vector.load %arg12[%c1, %c0_6] : memref<5x612xf32, #tpu.memory_space<vmem>>, vector<1x306xf32>
    tpu.vector_store %arg12[%c1, %c0_6], %16 {strides = array<i32>} : memref<5x612xf32, #tpu.memory_space<vmem>>, vector<1x306xf32>,
    %18 = vector.extract_strided_slice %11 {offsets = [1, 1], sizes = [1, 306], strides = [1, 1]} : vector<2x310xf32> to vector<1x306xf32>
    %c1_7 = arith.constant 1 : index
    %c306_8 = arith.constant 306 : index
    %19 = vector.load %arg12[%c1_7, %c306_8] : memref<5x612xf32, #tpu.memory_space<vmem>>, vector<1x306xf32>
    tpu.vector_store %arg12[%c1_7, %c306_8], %18 {strides = array<i32>} : memref<5x612xf32, #tpu.memory_space<vmem>>, vector<1x306xf32>,
    %20 = vector.extract_strided_slice %11 {offsets = [0, 2], sizes = [1, 306], strides = [1, 1]} : vector<2x310xf32> to vector<1x306xf32>
    %c2 = arith.constant 2 : index
    %c0_9 = arith.constant 0 : index
    %21 = vector.load %arg12[%c2, %c0_9] : memref<5x612xf32, #tpu.memory_space<vmem>>, vector<1x306xf32>
    tpu.vector_store %arg12[%c2, %c0_9], %20 {strides = array<i32>} : memref<5x612xf32, #tpu.memory_space<vmem>>, vector<1x306xf32>,
    %22 = vector.extract_strided_slice %11 {offsets = [1, 2], sizes = [1, 306], strides = [1, 1]} : vector<2x310xf32> to vector<1x306xf32>
    %c2_10 = arith.constant 2 : index
    %c306_11 = arith.constant 306 : index
    %23 = vector.load %arg12[%c2_10, %c306_11] : memref<5x612xf32, #tpu.memory_space<vmem>>, vector<1x306xf32>
    tpu.vector_store %arg12[%c2_10, %c306_11], %22 {strides = array<i32>} : memref<5x612xf32, #tpu.memory_space<vmem>>, vector<1x306xf32>,
    %24 = vector.extract_strided_slice %11 {offsets = [0, 3], sizes = [1, 306], strides = [1, 1]} : vector<2x310xf32> to vector<1x306xf32>
    %c3 = arith.constant 3 : index
    %c0_12 = arith.constant 0 : index
    %25 = vector.load %arg12[%c3, %c0_12] : memref<5x612xf32, #tpu.memory_space<vmem>>, vector<1x306xf32>
    tpu.vector_store %arg12[%c3, %c0_12], %24 {strides = array<i32>} : memref<5x612xf32, #tpu.memory_space<vmem>>, vector<1x306xf32>,
    %26 = vector.extract_strided_slice %11 {offsets = [1, 3], sizes = [1, 306], strides = [1, 1]} : vector<2x310xf32> to vector<1x306xf32>
    %c3_13 = arith.constant 3 : index
    %c306_14 = arith.constant 306 : index
    %27 = vector.load %arg12[%c3_13, %c306_14] : memref<5x612xf32, #tpu.memory_space<vmem>>, vector<1x306xf32>
    tpu.vector_store %arg12[%c3_13, %c306_14], %26 {strides = array<i32>} : memref<5x612xf32, #tpu.memory_space<vmem>>, vector<1x306xf32>,
    %28 = vector.extract_strided_slice %11 {offsets = [0, 4], sizes = [1, 306], strides = [1, 1]} : vector<2x310xf32> to vector<1x306xf32>
    %c4 = arith.constant 4 : index
    %c0_15 = arith.constant 0 : index
    %29 = vector.load %arg12[%c4, %c0_15] : memref<5x612xf32, #tpu.memory_space<vmem>>, vector<1x306xf32>
    tpu.vector_store %arg12[%c4, %c0_15], %28 {strides = array<i32>} : memref<5x612xf32, #tpu.memory_space<vmem>>, vector<1x306xf32>,
    %30 = vector.extract_strided_slice %11 {offsets = [1, 4], sizes = [1, 306], strides = [1, 1]} : vector<2x310xf32> to vector<1x306xf32>
    %c4_16 = arith.constant 4 : index
    %c306_17 = arith.constant 306 : index
    %31 = vector.load %arg12[%c4_16, %c306_17] : memref<5x612xf32, #tpu.memory_space<vmem>>, vector<1x306xf32>
    tpu.vector_store %arg12[%c4_16, %c306_17], %30 {strides = array<i32>} : memref<5x612xf32, #tpu.memory_space<vmem>>, vector<1x306xf32>,
    %c0_18 = arith.constant 0 : index
    %c0_19 = arith.constant 0 : index
    %32 = vector.load %arg2[%c0_18, %c0_19] : memref<32x5xf32, #tpu.memory_space<vmem>>, vector<32x5xf32>
    %c0_20 = arith.constant 0 : index
    %c0_21 = arith.constant 0 : index
    %33 = vector.load %arg12[%c0_20, %c0_21] : memref<5x612xf32, #tpu.memory_space<vmem>>, vector<5x612xf32>
    %cst = arith.constant dense<0.000000e+00> : vector<32x612xf32>
    %34 = tpu.matmul %32, %33, %cst {dimension_numbers = #tpu.dot_dimension_numbers<[1], [0], [0], [1], [0, 0, 1, 1], [], []>} : vector<32x5xf32>, vector<5x612xf32>, vector<32x612xf32> -> vector<32x612xf32>
    %35 = vector.broadcast %5 : vector<32x1xf32> to vector<32x612xf32>
    %36 = arith.addf %34, %35 : vector<32x612xf32>
    %cst_22 = arith.constant dense<0.000000e+00> : vector<32xf32>
    %37 = vector.multi_reduction <add>, %36, %cst_22 [1] : vector<32x612xf32> to vector<32xf32>
    %38 = vector.shape_cast %37 : vector<32xf32> to vector<32x1xf32>
    %cst_23 = arith.constant 6.120000e+02 : f32
    %39 = vector.broadcast %cst_23 : f32 to vector<32x1xf32>
    %40 = arith.divf %38, %39 : vector<32x1xf32>
    %41 = vector.broadcast %40 : vector<32x1xf32> to vector<32x612xf32>
    %42 = arith.subf %36, %41 : vector<32x612xf32>
    %43 = arith.mulf %42, %42 : vector<32x612xf32>
    %cst_24 = arith.constant dense<0.000000e+00> : vector<32xf32>
    %44 = vector.multi_reduction <add>, %43, %cst_24 [1] : vector<32x612xf32> to vector<32xf32>
    %45 = vector.shape_cast %44 : vector<32xf32> to vector<32x1xf32>
    %cst_25 = arith.constant 6.120000e+02 : f32
    %46 = vector.broadcast %cst_25 : f32 to vector<32x1xf32>
    %47 = arith.divf %45, %46 : vector<32x1xf32>
    %cst_26 = arith.constant 9.99999974E-6 : f32
    %48 = vector.broadcast %cst_26 : f32 to vector<32x1xf32>
    %49 = arith.addf %47, %48 : vector<32x1xf32>
    %50 = math.rsqrt %49 : vector<32x1xf32>
    %51 = arith.mulf %6, %50 : vector<32x1xf32>
    %52 = vector.broadcast %51 : vector<32x1xf32> to vector<32x612xf32>
    %53 = arith.mulf %42, %52 : vector<32x612xf32>
    %54 = vector.broadcast %7 : vector<32x1xf32> to vector<32x612xf32>
    %55 = arith.addf %53, %54 : vector<32x612xf32>
    %cst_27 = arith.constant 0.000000e+00 : f32
    %56 = vector.broadcast %cst_27 : f32 to vector<32x612xf32>
    %57 = arith.maximumf %55, %56 : vector<32x612xf32>
    %c0_i32_28 = arith.constant 0 : i32
    %58 = tpu.memref_slice %arg14[%c0_i32_28] : memref<2x!tpu.dma_semaphore, #tpu.memory_space<semaphore_mem>> -> memref<1x!tpu.dma_semaphore, #tpu.memory_space<semaphore_mem>>
    %59 = tpu.memref_squeeze %58 : memref<1x!tpu.dma_semaphore, #tpu.memory_space<semaphore_mem>> -> memref<!tpu.dma_semaphore, #tpu.memory_space<semaphore_mem>>
    tpu.wait_dma2 semaphore(%59 : memref<!tpu.dma_semaphore, #tpu.memory_space<semaphore_mem>>) src(%arg7 : memref<612x256xf32, #tpu.memory_space<any>>) dst(%arg10 : memref<612x256xf32, #tpu.memory_space<vmem>>)
    %c0_29 = arith.constant 0 : index
    %c0_30 = arith.constant 0 : index
    %60 = vector.load %arg10[%c0_29, %c0_30] : memref<612x256xf32, #tpu.memory_space<vmem>>, vector<612x256xf32>
    %cst_31 = arith.constant dense<0.000000e+00> : vector<32x256xf32>
    %61 = tpu.matmul %57, %60, %cst_31 {dimension_numbers = #tpu.dot_dimension_numbers<[1], [0], [0], [1], [0, 0, 1, 1], [], []>} : vector<32x612xf32>, vector<612x256xf32>, vector<32x256xf32> -> vector<32x256xf32>
    %c0_32 = arith.constant 0 : index
    %c0_33 = arith.constant 0 : index
    %62 = vector.load %arg4[%c0_32, %c0_33] : memref<32x96xf32, #tpu.memory_space<vmem>>, vector<32x96xf32>
    %63 = vector.extract_strided_slice %62 {offsets = [0, 0], sizes = [32, 32], strides = [1, 1]} : vector<32x96xf32> to vector<32x32xf32>
    %cst_34 = arith.constant dense<0.000000e+00> : vector<32x256xf32>
    %64 = tpu.matmul %63, %61, %cst_34 {dimension_numbers = #tpu.dot_dimension_numbers<[1], [0], [0], [1], [0, 0, 1, 1], [], []>} : vector<32x32xf32>, vector<32x256xf32>, vector<32x256xf32> -> vector<32x256xf32>
    %65 = vector.broadcast %8 : vector<32x1xf32> to vector<32x256xf32>
    %66 = arith.addf %64, %65 : vector<32x256xf32>
    %c255_i32 = arith.constant 255 : i32
    %67 = tpu.dynamic_rotate %61 by %c255_i32 dim 1 : vector<32x256xf32>, i32 -> vector<32x256xf32>
    %68 = vector.extract_strided_slice %62 {offsets = [0, 32], sizes = [32, 32], strides = [1, 1]} : vector<32x96xf32> to vector<32x32xf32>
    %cst_35 = arith.constant dense<0.000000e+00> : vector<32x256xf32>
    %69 = tpu.matmul %68, %67, %cst_35 {dimension_numbers = #tpu.dot_dimension_numbers<[1], [0], [0], [1], [0, 0, 1, 1], [], []>} : vector<32x32xf32>, vector<32x256xf32>, vector<32x256xf32> -> vector<32x256xf32>
    %70 = arith.addf %66, %69 : vector<32x256xf32>
    %c254_i32 = arith.constant 254 : i32
    %71 = tpu.dynamic_rotate %61 by %c254_i32 dim 1 : vector<32x256xf32>, i32 -> vector<32x256xf32>
    %72 = vector.extract_strided_slice %62 {offsets = [0, 64], sizes = [32, 32], strides = [1, 1]} : vector<32x96xf32> to vector<32x32xf32>
    %cst_36 = arith.constant dense<0.000000e+00> : vector<32x256xf32>
    %73 = tpu.matmul %72, %71, %cst_36 {dimension_numbers = #tpu.dot_dimension_numbers<[1], [0], [0], [1], [0, 0, 1, 1], [], []>} : vector<32x32xf32>, vector<32x256xf32>, vector<32x256xf32> -> vector<32x256xf32>
    %74 = arith.addf %70, %73 : vector<32x256xf32>
    %c0_37 = arith.constant 0 : index
    %c256 = arith.constant 256 : index
    %75 = vector.load %arg6[%c0_37, %c256] : memref<1x512xf32, #tpu.memory_space<vmem>>, vector<1x256xf32>
    %76 = vector.broadcast %75 : vector<1x256xf32> to vector<32x256xf32>
    %77 = arith.mulf %74, %76 : vector<32x256xf32>
    %cst_38 = arith.constant dense<0.000000e+00> : vector<32xf32>
    %78 = vector.multi_reduction <add>, %77, %cst_38 [1] : vector<32x256xf32> to vector<32xf32>
    %79 = vector.shape_cast %78 : vector<32xf32> to vector<32x1xf32>
    %cst_39 = arith.constant 2.000000e+02 : f32
    %80 = vector.broadcast %cst_39 : f32 to vector<32x1xf32>
    %81 = arith.divf %79, %80 : vector<32x1xf32>
    %82 = vector.broadcast %81 : vector<32x1xf32> to vector<32x256xf32>
    %83 = arith.subf %74, %82 : vector<32x256xf32>
    %84 = arith.mulf %83, %83 : vector<32x256xf32>
    %85 = vector.broadcast %75 : vector<1x256xf32> to vector<32x256xf32>
    %86 = arith.mulf %84, %85 : vector<32x256xf32>
    %cst_40 = arith.constant dense<0.000000e+00> : vector<32xf32>
    %87 = vector.multi_reduction <add>, %86, %cst_40 [1] : vector<32x256xf32> to vector<32xf32>
    %88 = vector.shape_cast %87 : vector<32xf32> to vector<32x1xf32>
    %cst_41 = arith.constant 2.000000e+02 : f32
    %89 = vector.broadcast %cst_41 : f32 to vector<32x1xf32>
    %90 = arith.divf %88, %89 : vector<32x1xf32>
    %cst_42 = arith.constant 9.99999974E-6 : f32
    %91 = vector.broadcast %cst_42 : f32 to vector<32x1xf32>
    %92 = arith.addf %90, %91 : vector<32x1xf32>
    %93 = math.rsqrt %92 : vector<32x1xf32>
    %94 = arith.mulf %9, %93 : vector<32x1xf32>
    %95 = vector.broadcast %94 : vector<32x1xf32> to vector<32x256xf32>
    %96 = arith.mulf %83, %95 : vector<32x256xf32>
    %97 = vector.broadcast %10 : vector<32x1xf32> to vector<32x256xf32>
    %98 = arith.addf %96, %97 : vector<32x256xf32>
    %cst_43 = arith.constant 0.000000e+00 : f32
    %99 = vector.broadcast %cst_43 : f32 to vector<32x256xf32>
    %100 = arith.maximumf %98, %99 : vector<32x256xf32>
    %101 = vector.extract_strided_slice %100 {offsets = [0, 0], sizes = [1, 128], strides = [1, 1]} : vector<32x256xf32> to vector<1x128xf32>
    %c0_44 = arith.constant 0 : index
    %c0_45 = arith.constant 0 : index
    %102 = vector.load %arg13[%c0_44, %c0_45] : memref<2x4096xf32, #tpu.memory_space<vmem>>, vector<1x128xf32>
    tpu.vector_store %arg13[%c0_44, %c0_45], %101 {strides = array<i32>} : memref<2x4096xf32, #tpu.memory_space<vmem>>, vector<1x128xf32>,
    %103 = vector.extract_strided_slice %100 {offsets = [1, 0], sizes = [1, 128], strides = [1, 1]} : vector<32x256xf32> to vector<1x128xf32>
    %c0_46 = arith.constant 0 : index
    %c128 = arith.constant 128 : index
    %104 = vector.load %arg13[%c0_46, %c128] : memref<2x4096xf32, #tpu.memory_space<vmem>>, vector<1x128xf32>
    tpu.vector_store %arg13[%c0_46, %c128], %103 {strides = array<i32>} : memref<2x4096xf32, #tpu.memory_space<vmem>>, vector<1x128xf32>,
    %105 = vector.extract_strided_slice %100 {offsets = [2, 0], sizes = [1, 128], strides = [1, 1]} : vector<32x256xf32> to vector<1x128xf32>
    %c0_47 = arith.constant 0 : index
    %c256_48 = arith.constant 256 : index
    %106 = vector.load %arg13[%c0_47, %c256_48] : memref<2x4096xf32, #tpu.memory_space<vmem>>, vector<1x128xf32>
    tpu.vector_store %arg13[%c0_47, %c256_48], %105 {strides = array<i32>} : memref<2x4096xf32, #tpu.memory_space<vmem>>, vector<1x128xf32>,
    %107 = vector.extract_strided_slice %100 {offsets = [3, 0], sizes = [1, 128], strides = [1, 1]} : vector<32x256xf32> to vector<1x128xf32>
    %c0_49 = arith.constant 0 : index
    %c384 = arith.constant 384 : index
    %108 = vector.load %arg13[%c0_49, %c384] : memref<2x4096xf32, #tpu.memory_space<vmem>>, vector<1x128xf32>
    tpu.vector_store %arg13[%c0_49, %c384], %107 {strides = array<i32>} : memref<2x4096xf32, #tpu.memory_space<vmem>>, vector<1x128xf32>,
    %109 = vector.extract_strided_slice %100 {offsets = [4, 0], sizes = [1, 128], strides = [1, 1]} : vector<32x256xf32> to vector<1x128xf32>
    %c0_50 = arith.constant 0 : index
    %c512 = arith.constant 512 : index
    %110 = vector.load %arg13[%c0_50, %c512] : memref<2x4096xf32, #tpu.memory_space<vmem>>, vector<1x128xf32>
    tpu.vector_store %arg13[%c0_50, %c512], %109 {strides = array<i32>} : memref<2x4096xf32, #tpu.memory_space<vmem>>, vector<1x128xf32>,
    %111 = vector.extract_strided_slice %100 {offsets = [5, 0], sizes = [1, 128], strides = [1, 1]} : vector<32x256xf32> to vector<1x128xf32>
    %c0_51 = arith.constant 0 : index
    %c640 = arith.constant 640 : index
    %112 = vector.load %arg13[%c0_51, %c640] : memref<2x4096xf32, #tpu.memory_space<vmem>>, vector<1x128xf32>
    tpu.vector_store %arg13[%c0_51, %c640], %111 {strides = array<i32>} : memref<2x4096xf32, #tpu.memory_space<vmem>>, vector<1x128xf32>,
    %113 = vector.extract_strided_slice %100 {offsets = [6, 0], sizes = [1, 128], strides = [1, 1]} : vector<32x256xf32> to vector<1x128xf32>
    %c0_52 = arith.constant 0 : index
    %c768 = arith.constant 768 : index
    %114 = vector.load %arg13[%c0_52, %c768] : memref<2x4096xf32, #tpu.memory_space<vmem>>, vector<1x128xf32>
    tpu.vector_store %arg13[%c0_52, %c768], %113 {strides = array<i32>} : memref<2x4096xf32, #tpu.memory_space<vmem>>, vector<1x128xf32>,
    %115 = vector.extract_strided_slice %100 {offsets = [7, 0], sizes = [1, 128], strides = [1, 1]} : vector<32x256xf32> to vector<1x128xf32>
    %c0_53 = arith.constant 0 : index
    %c896 = arith.constant 896 : index
    %116 = vector.load %arg13[%c0_53, %c896] : memref<2x4096xf32, #tpu.memory_space<vmem>>, vector<1x128xf32>
    tpu.vector_store %arg13[%c0_53, %c896], %115 {strides = array<i32>} : memref<2x4096xf32, #tpu.memory_space<vmem>>, vector<1x128xf32>,
    %117 = vector.extract_strided_slice %100 {offsets = [8, 0], sizes = [1, 128], strides = [1, 1]} : vector<32x256xf32> to vector<1x128xf32>
    %c0_54 = arith.constant 0 : index
    %c1024 = arith.constant 1024 : index
    %118 = vector.load %arg13[%c0_54, %c1024] : memref<2x4096xf32, #tpu.memory_space<vmem>>, vector<1x128xf32>
    tpu.vector_store %arg13[%c0_54, %c1024], %117 {strides = array<i32>} : memref<2x4096xf32, #tpu.memory_space<vmem>>, vector<1x128xf32>,
    %119 = vector.extract_strided_slice %100 {offsets = [9, 0], sizes = [1, 128], strides = [1, 1]} : vector<32x256xf32> to vector<1x128xf32>
    %c0_55 = arith.constant 0 : index
    %c1152 = arith.constant 1152 : index
    %120 = vector.load %arg13[%c0_55, %c1152] : memref<2x4096xf32, #tpu.memory_space<vmem>>, vector<1x128xf32>
    tpu.vector_store %arg13[%c0_55, %c1152], %119 {strides = array<i32>} : memref<2x4096xf32, #tpu.memory_space<vmem>>, vector<1x128xf32>,
    %121 = vector.extract_strided_slice %100 {offsets = [10, 0], sizes = [1, 128], strides = [1, 1]} : vector<32x256xf32> to vector<1x128xf32>
    %c0_56 = arith.constant 0 : index
    %c1280 = arith.constant 1280 : index
    %122 = vector.load %arg13[%c0_56, %c1280] : memref<2x4096xf32, #tpu.memory_space<vmem>>, vector<1x128xf32>
    tpu.vector_store %arg13[%c0_56, %c1280], %121 {strides = array<i32>} : memref<2x4096xf32, #tpu.memory_space<vmem>>, vector<1x128xf32>,
    %123 = vector.extract_strided_slice %100 {offsets = [11, 0], sizes = [1, 128], strides = [1, 1]} : vector<32x256xf32> to vector<1x128xf32>
    %c0_57 = arith.constant 0 : index
    %c1408 = arith.constant 1408 : index
    %124 = vector.load %arg13[%c0_57, %c1408] : memref<2x4096xf32, #tpu.memory_space<vmem>>, vector<1x128xf32>
    tpu.vector_store %arg13[%c0_57, %c1408], %123 {strides = array<i32>} : memref<2x4096xf32, #tpu.memory_space<vmem>>, vector<1x128xf32>,
    %125 = vector.extract_strided_slice %100 {offsets = [12, 0], sizes = [1, 128], strides = [1, 1]} : vector<32x256xf32> to vector<1x128xf32>
    %c0_58 = arith.constant 0 : index
    %c1536 = arith.constant 1536 : index
    %126 = vector.load %arg13[%c0_58, %c1536] : memref<2x4096xf32, #tpu.memory_space<vmem>>, vector<1x128xf32>
    tpu.vector_store %arg13[%c0_58, %c1536], %125 {strides = array<i32>} : memref<2x4096xf32, #tpu.memory_space<vmem>>, vector<1x128xf32>,
    %127 = vector.extract_strided_slice %100 {offsets = [13, 0], sizes = [1, 128], strides = [1, 1]} : vector<32x256xf32> to vector<1x128xf32>
    %c0_59 = arith.constant 0 : index
    %c1664 = arith.constant 1664 : index
    %128 = vector.load %arg13[%c0_59, %c1664] : memref<2x4096xf32, #tpu.memory_space<vmem>>, vector<1x128xf32>
    tpu.vector_store %arg13[%c0_59, %c1664], %127 {strides = array<i32>} : memref<2x4096xf32, #tpu.memory_space<vmem>>, vector<1x128xf32>,
    %129 = vector.extract_strided_slice %100 {offsets = [14, 0], sizes = [1, 128], strides = [1, 1]} : vector<32x256xf32> to vector<1x128xf32>
    %c0_60 = arith.constant 0 : index
    %c1792 = arith.constant 1792 : index
    %130 = vector.load %arg13[%c0_60, %c1792] : memref<2x4096xf32, #tpu.memory_space<vmem>>, vector<1x128xf32>
    tpu.vector_store %arg13[%c0_60, %c1792], %129 {strides = array<i32>} : memref<2x4096xf32, #tpu.memory_space<vmem>>, vector<1x128xf32>,
    %131 = vector.extract_strided_slice %100 {offsets = [15, 0], sizes = [1, 128], strides = [1, 1]} : vector<32x256xf32> to vector<1x128xf32>
    %c0_61 = arith.constant 0 : index
    %c1920 = arith.constant 1920 : index
    %132 = vector.load %arg13[%c0_61, %c1920] : memref<2x4096xf32, #tpu.memory_space<vmem>>, vector<1x128xf32>
    tpu.vector_store %arg13[%c0_61, %c1920], %131 {strides = array<i32>} : memref<2x4096xf32, #tpu.memory_space<vmem>>, vector<1x128xf32>,
    %133 = vector.extract_strided_slice %100 {offsets = [16, 0], sizes = [1, 128], strides = [1, 1]} : vector<32x256xf32> to vector<1x128xf32>
    %c0_62 = arith.constant 0 : index
    %c2048 = arith.constant 2048 : index
    %134 = vector.load %arg13[%c0_62, %c2048] : memref<2x4096xf32, #tpu.memory_space<vmem>>, vector<1x128xf32>
    tpu.vector_store %arg13[%c0_62, %c2048], %133 {strides = array<i32>} : memref<2x4096xf32, #tpu.memory_space<vmem>>, vector<1x128xf32>,
    %135 = vector.extract_strided_slice %100 {offsets = [17, 0], sizes = [1, 128], strides = [1, 1]} : vector<32x256xf32> to vector<1x128xf32>
    %c0_63 = arith.constant 0 : index
    %c2176 = arith.constant 2176 : index
    %136 = vector.load %arg13[%c0_63, %c2176] : memref<2x4096xf32, #tpu.memory_space<vmem>>, vector<1x128xf32>
    tpu.vector_store %arg13[%c0_63, %c2176], %135 {strides = array<i32>} : memref<2x4096xf32, #tpu.memory_space<vmem>>, vector<1x128xf32>,
    %137 = vector.extract_strided_slice %100 {offsets = [18, 0], sizes = [1, 128], strides = [1, 1]} : vector<32x256xf32> to vector<1x128xf32>
    %c0_64 = arith.constant 0 : index
    %c2304 = arith.constant 2304 : index
    %138 = vector.load %arg13[%c0_64, %c2304] : memref<2x4096xf32, #tpu.memory_space<vmem>>, vector<1x128xf32>
    tpu.vector_store %arg13[%c0_64, %c2304], %137 {strides = array<i32>} : memref<2x4096xf32, #tpu.memory_space<vmem>>, vector<1x128xf32>,
    %139 = vector.extract_strided_slice %100 {offsets = [19, 0], sizes = [1, 128], strides = [1, 1]} : vector<32x256xf32> to vector<1x128xf32>
    %c0_65 = arith.constant 0 : index
    %c2432 = arith.constant 2432 : index
    %140 = vector.load %arg13[%c0_65, %c2432] : memref<2x4096xf32, #tpu.memory_space<vmem>>, vector<1x128xf32>
    tpu.vector_store %arg13[%c0_65, %c2432], %139 {strides = array<i32>} : memref<2x4096xf32, #tpu.memory_space<vmem>>, vector<1x128xf32>,
    %141 = vector.extract_strided_slice %100 {offsets = [20, 0], sizes = [1, 128], strides = [1, 1]} : vector<32x256xf32> to vector<1x128xf32>
    %c0_66 = arith.constant 0 : index
    %c2560 = arith.constant 2560 : index
    %142 = vector.load %arg13[%c0_66, %c2560] : memref<2x4096xf32, #tpu.memory_space<vmem>>, vector<1x128xf32>
    tpu.vector_store %arg13[%c0_66, %c2560], %141 {strides = array<i32>} : memref<2x4096xf32, #tpu.memory_space<vmem>>, vector<1x128xf32>,
    %143 = vector.extract_strided_slice %100 {offsets = [21, 0], sizes = [1, 128], strides = [1, 1]} : vector<32x256xf32> to vector<1x128xf32>
    %c0_67 = arith.constant 0 : index
    %c2688 = arith.constant 2688 : index
    %144 = vector.load %arg13[%c0_67, %c2688] : memref<2x4096xf32, #tpu.memory_space<vmem>>, vector<1x128xf32>
    tpu.vector_store %arg13[%c0_67, %c2688], %143 {strides = array<i32>} : memref<2x4096xf32, #tpu.memory_space<vmem>>, vector<1x128xf32>,
    %145 = vector.extract_strided_slice %100 {offsets = [22, 0], sizes = [1, 128], strides = [1, 1]} : vector<32x256xf32> to vector<1x128xf32>
    %c0_68 = arith.constant 0 : index
    %c2816 = arith.constant 2816 : index
    %146 = vector.load %arg13[%c0_68, %c2816] : memref<2x4096xf32, #tpu.memory_space<vmem>>, vector<1x128xf32>
    tpu.vector_store %arg13[%c0_68, %c2816], %145 {strides = array<i32>} : memref<2x4096xf32, #tpu.memory_space<vmem>>, vector<1x128xf32>,
    %147 = vector.extract_strided_slice %100 {offsets = [23, 0], sizes = [1, 128], strides = [1, 1]} : vector<32x256xf32> to vector<1x128xf32>
    %c0_69 = arith.constant 0 : index
    %c2944 = arith.constant 2944 : index
    %148 = vector.load %arg13[%c0_69, %c2944] : memref<2x4096xf32, #tpu.memory_space<vmem>>, vector<1x128xf32>
    tpu.vector_store %arg13[%c0_69, %c2944], %147 {strides = array<i32>} : memref<2x4096xf32, #tpu.memory_space<vmem>>, vector<1x128xf32>,
    %149 = vector.extract_strided_slice %100 {offsets = [24, 0], sizes = [1, 128], strides = [1, 1]} : vector<32x256xf32> to vector<1x128xf32>
    %c0_70 = arith.constant 0 : index
    %c3072 = arith.constant 3072 : index
    %150 = vector.load %arg13[%c0_70, %c3072] : memref<2x4096xf32, #tpu.memory_space<vmem>>, vector<1x128xf32>
    tpu.vector_store %arg13[%c0_70, %c3072], %149 {strides = array<i32>} : memref<2x4096xf32, #tpu.memory_space<vmem>>, vector<1x128xf32>,
    %151 = vector.extract_strided_slice %100 {offsets = [25, 0], sizes = [1, 128], strides = [1, 1]} : vector<32x256xf32> to vector<1x128xf32>
    %c0_71 = arith.constant 0 : index
    %c3200 = arith.constant 3200 : index
    %152 = vector.load %arg13[%c0_71, %c3200] : memref<2x4096xf32, #tpu.memory_space<vmem>>, vector<1x128xf32>
    tpu.vector_store %arg13[%c0_71, %c3200], %151 {strides = array<i32>} : memref<2x4096xf32, #tpu.memory_space<vmem>>, vector<1x128xf32>,
    %153 = vector.extract_strided_slice %100 {offsets = [26, 0], sizes = [1, 128], strides = [1, 1]} : vector<32x256xf32> to vector<1x128xf32>
    %c0_72 = arith.constant 0 : index
    %c3328 = arith.constant 3328 : index
    %154 = vector.load %arg13[%c0_72, %c3328] : memref<2x4096xf32, #tpu.memory_space<vmem>>, vector<1x128xf32>
    tpu.vector_store %arg13[%c0_72, %c3328], %153 {strides = array<i32>} : memref<2x4096xf32, #tpu.memory_space<vmem>>, vector<1x128xf32>,
    %155 = vector.extract_strided_slice %100 {offsets = [27, 0], sizes = [1, 128], strides = [1, 1]} : vector<32x256xf32> to vector<1x128xf32>
    %c0_73 = arith.constant 0 : index
    %c3456 = arith.constant 3456 : index
    %156 = vector.load %arg13[%c0_73, %c3456] : memref<2x4096xf32, #tpu.memory_space<vmem>>, vector<1x128xf32>
    tpu.vector_store %arg13[%c0_73, %c3456], %155 {strides = array<i32>} : memref<2x4096xf32, #tpu.memory_space<vmem>>, vector<1x128xf32>,
    %157 = vector.extract_strided_slice %100 {offsets = [28, 0], sizes = [1, 128], strides = [1, 1]} : vector<32x256xf32> to vector<1x128xf32>
    %c0_74 = arith.constant 0 : index
    %c3584 = arith.constant 3584 : index
    %158 = vector.load %arg13[%c0_74, %c3584] : memref<2x4096xf32, #tpu.memory_space<vmem>>, vector<1x128xf32>
    tpu.vector_store %arg13[%c0_74, %c3584], %157 {strides = array<i32>} : memref<2x4096xf32, #tpu.memory_space<vmem>>, vector<1x128xf32>,
    %159 = vector.extract_strided_slice %100 {offsets = [29, 0], sizes = [1, 128], strides = [1, 1]} : vector<32x256xf32> to vector<1x128xf32>
    %c0_75 = arith.constant 0 : index
    %c3712 = arith.constant 3712 : index
    %160 = vector.load %arg13[%c0_75, %c3712] : memref<2x4096xf32, #tpu.memory_space<vmem>>, vector<1x128xf32>
    tpu.vector_store %arg13[%c0_75, %c3712], %159 {strides = array<i32>} : memref<2x4096xf32, #tpu.memory_space<vmem>>, vector<1x128xf32>,
    %161 = vector.extract_strided_slice %100 {offsets = [30, 0], sizes = [1, 128], strides = [1, 1]} : vector<32x256xf32> to vector<1x128xf32>
    %c0_76 = arith.constant 0 : index
    %c3840 = arith.constant 3840 : index
    %162 = vector.load %arg13[%c0_76, %c3840] : memref<2x4096xf32, #tpu.memory_space<vmem>>, vector<1x128xf32>
    tpu.vector_store %arg13[%c0_76, %c3840], %161 {strides = array<i32>} : memref<2x4096xf32, #tpu.memory_space<vmem>>, vector<1x128xf32>,
    %163 = vector.extract_strided_slice %100 {offsets = [31, 0], sizes = [1, 128], strides = [1, 1]} : vector<32x256xf32> to vector<1x128xf32>
    %c0_77 = arith.constant 0 : index
    %c3968 = arith.constant 3968 : index
    %164 = vector.load %arg13[%c0_77, %c3968] : memref<2x4096xf32, #tpu.memory_space<vmem>>, vector<1x128xf32>
    tpu.vector_store %arg13[%c0_77, %c3968], %163 {strides = array<i32>} : memref<2x4096xf32, #tpu.memory_space<vmem>>, vector<1x128xf32>,
    %165 = vector.extract_strided_slice %100 {offsets = [0, 128], sizes = [1, 128], strides = [1, 1]} : vector<32x256xf32> to vector<1x128xf32>
    %c1_78 = arith.constant 1 : index
    %c0_79 = arith.constant 0 : index
    %166 = vector.load %arg13[%c1_78, %c0_79] : memref<2x4096xf32, #tpu.memory_space<vmem>>, vector<1x128xf32>
    tpu.vector_store %arg13[%c1_78, %c0_79], %165 {strides = array<i32>} : memref<2x4096xf32, #tpu.memory_space<vmem>>, vector<1x128xf32>,
    %167 = vector.extract_strided_slice %100 {offsets = [1, 128], sizes = [1, 128], strides = [1, 1]} : vector<32x256xf32> to vector<1x128xf32>
    %c1_80 = arith.constant 1 : index
    %c128_81 = arith.constant 128 : index
    %168 = vector.load %arg13[%c1_80, %c128_81] : memref<2x4096xf32, #tpu.memory_space<vmem>>, vector<1x128xf32>
    tpu.vector_store %arg13[%c1_80, %c128_81], %167 {strides = array<i32>} : memref<2x4096xf32, #tpu.memory_space<vmem>>, vector<1x128xf32>,
    %169 = vector.extract_strided_slice %100 {offsets = [2, 128], sizes = [1, 128], strides = [1, 1]} : vector<32x256xf32> to vector<1x128xf32>
    %c1_82 = arith.constant 1 : index
    %c256_83 = arith.constant 256 : index
    %170 = vector.load %arg13[%c1_82, %c256_83] : memref<2x4096xf32, #tpu.memory_space<vmem>>, vector<1x128xf32>
    tpu.vector_store %arg13[%c1_82, %c256_83], %169 {strides = array<i32>} : memref<2x4096xf32, #tpu.memory_space<vmem>>, vector<1x128xf32>,
    %171 = vector.extract_strided_slice %100 {offsets = [3, 128], sizes = [1, 128], strides = [1, 1]} : vector<32x256xf32> to vector<1x128xf32>
    %c1_84 = arith.constant 1 : index
    %c384_85 = arith.constant 384 : index
    %172 = vector.load %arg13[%c1_84, %c384_85] : memref<2x4096xf32, #tpu.memory_space<vmem>>, vector<1x128xf32>
    tpu.vector_store %arg13[%c1_84, %c384_85], %171 {strides = array<i32>} : memref<2x4096xf32, #tpu.memory_space<vmem>>, vector<1x128xf32>,
    %173 = vector.extract_strided_slice %100 {offsets = [4, 128], sizes = [1, 128], strides = [1, 1]} : vector<32x256xf32> to vector<1x128xf32>
    %c1_86 = arith.constant 1 : index
    %c512_87 = arith.constant 512 : index
    %174 = vector.load %arg13[%c1_86, %c512_87] : memref<2x4096xf32, #tpu.memory_space<vmem>>, vector<1x128xf32>
    tpu.vector_store %arg13[%c1_86, %c512_87], %173 {strides = array<i32>} : memref<2x4096xf32, #tpu.memory_space<vmem>>, vector<1x128xf32>,
    %175 = vector.extract_strided_slice %100 {offsets = [5, 128], sizes = [1, 128], strides = [1, 1]} : vector<32x256xf32> to vector<1x128xf32>
    %c1_88 = arith.constant 1 : index
    %c640_89 = arith.constant 640 : index
    %176 = vector.load %arg13[%c1_88, %c640_89] : memref<2x4096xf32, #tpu.memory_space<vmem>>, vector<1x128xf32>
    tpu.vector_store %arg13[%c1_88, %c640_89], %175 {strides = array<i32>} : memref<2x4096xf32, #tpu.memory_space<vmem>>, vector<1x128xf32>,
    %177 = vector.extract_strided_slice %100 {offsets = [6, 128], sizes = [1, 128], strides = [1, 1]} : vector<32x256xf32> to vector<1x128xf32>
    %c1_90 = arith.constant 1 : index
    %c768_91 = arith.constant 768 : index
    %178 = vector.load %arg13[%c1_90, %c768_91] : memref<2x4096xf32, #tpu.memory_space<vmem>>, vector<1x128xf32>
    tpu.vector_store %arg13[%c1_90, %c768_91], %177 {strides = array<i32>} : memref<2x4096xf32, #tpu.memory_space<vmem>>, vector<1x128xf32>,
    %179 = vector.extract_strided_slice %100 {offsets = [7, 128], sizes = [1, 128], strides = [1, 1]} : vector<32x256xf32> to vector<1x128xf32>
    %c1_92 = arith.constant 1 : index
    %c896_93 = arith.constant 896 : index
    %180 = vector.load %arg13[%c1_92, %c896_93] : memref<2x4096xf32, #tpu.memory_space<vmem>>, vector<1x128xf32>
    tpu.vector_store %arg13[%c1_92, %c896_93], %179 {strides = array<i32>} : memref<2x4096xf32, #tpu.memory_space<vmem>>, vector<1x128xf32>,
    %181 = vector.extract_strided_slice %100 {offsets = [8, 128], sizes = [1, 128], strides = [1, 1]} : vector<32x256xf32> to vector<1x128xf32>
    %c1_94 = arith.constant 1 : index
    %c1024_95 = arith.constant 1024 : index
    %182 = vector.load %arg13[%c1_94, %c1024_95] : memref<2x4096xf32, #tpu.memory_space<vmem>>, vector<1x128xf32>
    tpu.vector_store %arg13[%c1_94, %c1024_95], %181 {strides = array<i32>} : memref<2x4096xf32, #tpu.memory_space<vmem>>, vector<1x128xf32>,
    %183 = vector.extract_strided_slice %100 {offsets = [9, 128], sizes = [1, 128], strides = [1, 1]} : vector<32x256xf32> to vector<1x128xf32>
    %c1_96 = arith.constant 1 : index
    %c1152_97 = arith.constant 1152 : index
    %184 = vector.load %arg13[%c1_96, %c1152_97] : memref<2x4096xf32, #tpu.memory_space<vmem>>, vector<1x128xf32>
    tpu.vector_store %arg13[%c1_96, %c1152_97], %183 {strides = array<i32>} : memref<2x4096xf32, #tpu.memory_space<vmem>>, vector<1x128xf32>,
    %185 = vector.extract_strided_slice %100 {offsets = [10, 128], sizes = [1, 128], strides = [1, 1]} : vector<32x256xf32> to vector<1x128xf32>
    %c1_98 = arith.constant 1 : index
    %c1280_99 = arith.constant 1280 : index
    %186 = vector.load %arg13[%c1_98, %c1280_99] : memref<2x4096xf32, #tpu.memory_space<vmem>>, vector<1x128xf32>
    tpu.vector_store %arg13[%c1_98, %c1280_99], %185 {strides = array<i32>} : memref<2x4096xf32, #tpu.memory_space<vmem>>, vector<1x128xf32>,
    %187 = vector.extract_strided_slice %100 {offsets = [11, 128], sizes = [1, 128], strides = [1, 1]} : vector<32x256xf32> to vector<1x128xf32>
    %c1_100 = arith.constant 1 : index
    %c1408_101 = arith.constant 1408 : index
    %188 = vector.load %arg13[%c1_100, %c1408_101] : memref<2x4096xf32, #tpu.memory_space<vmem>>, vector<1x128xf32>
    tpu.vector_store %arg13[%c1_100, %c1408_101], %187 {strides = array<i32>} : memref<2x4096xf32, #tpu.memory_space<vmem>>, vector<1x128xf32>,
    %189 = vector.extract_strided_slice %100 {offsets = [12, 128], sizes = [1, 128], strides = [1, 1]} : vector<32x256xf32> to vector<1x128xf32>
    %c1_102 = arith.constant 1 : index
    %c1536_103 = arith.constant 1536 : index
    %190 = vector.load %arg13[%c1_102, %c1536_103] : memref<2x4096xf32, #tpu.memory_space<vmem>>, vector<1x128xf32>
    tpu.vector_store %arg13[%c1_102, %c1536_103], %189 {strides = array<i32>} : memref<2x4096xf32, #tpu.memory_space<vmem>>, vector<1x128xf32>,
    %191 = vector.extract_strided_slice %100 {offsets = [13, 128], sizes = [1, 128], strides = [1, 1]} : vector<32x256xf32> to vector<1x128xf32>
    %c1_104 = arith.constant 1 : index
    %c1664_105 = arith.constant 1664 : index
    %192 = vector.load %arg13[%c1_104, %c1664_105] : memref<2x4096xf32, #tpu.memory_space<vmem>>, vector<1x128xf32>
    tpu.vector_store %arg13[%c1_104, %c1664_105], %191 {strides = array<i32>} : memref<2x4096xf32, #tpu.memory_space<vmem>>, vector<1x128xf32>,
    %193 = vector.extract_strided_slice %100 {offsets = [14, 128], sizes = [1, 128], strides = [1, 1]} : vector<32x256xf32> to vector<1x128xf32>
    %c1_106 = arith.constant 1 : index
    %c1792_107 = arith.constant 1792 : index
    %194 = vector.load %arg13[%c1_106, %c1792_107] : memref<2x4096xf32, #tpu.memory_space<vmem>>, vector<1x128xf32>
    tpu.vector_store %arg13[%c1_106, %c1792_107], %193 {strides = array<i32>} : memref<2x4096xf32, #tpu.memory_space<vmem>>, vector<1x128xf32>,
    %195 = vector.extract_strided_slice %100 {offsets = [15, 128], sizes = [1, 128], strides = [1, 1]} : vector<32x256xf32> to vector<1x128xf32>
    %c1_108 = arith.constant 1 : index
    %c1920_109 = arith.constant 1920 : index
    %196 = vector.load %arg13[%c1_108, %c1920_109] : memref<2x4096xf32, #tpu.memory_space<vmem>>, vector<1x128xf32>
    tpu.vector_store %arg13[%c1_108, %c1920_109], %195 {strides = array<i32>} : memref<2x4096xf32, #tpu.memory_space<vmem>>, vector<1x128xf32>,
    %197 = vector.extract_strided_slice %100 {offsets = [16, 128], sizes = [1, 128], strides = [1, 1]} : vector<32x256xf32> to vector<1x128xf32>
    %c1_110 = arith.constant 1 : index
    %c2048_111 = arith.constant 2048 : index
    %198 = vector.load %arg13[%c1_110, %c2048_111] : memref<2x4096xf32, #tpu.memory_space<vmem>>, vector<1x128xf32>
    tpu.vector_store %arg13[%c1_110, %c2048_111], %197 {strides = array<i32>} : memref<2x4096xf32, #tpu.memory_space<vmem>>, vector<1x128xf32>,
    %199 = vector.extract_strided_slice %100 {offsets = [17, 128], sizes = [1, 128], strides = [1, 1]} : vector<32x256xf32> to vector<1x128xf32>
    %c1_112 = arith.constant 1 : index
    %c2176_113 = arith.constant 2176 : index
    %200 = vector.load %arg13[%c1_112, %c2176_113] : memref<2x4096xf32, #tpu.memory_space<vmem>>, vector<1x128xf32>
    tpu.vector_store %arg13[%c1_112, %c2176_113], %199 {strides = array<i32>} : memref<2x4096xf32, #tpu.memory_space<vmem>>, vector<1x128xf32>,
    %201 = vector.extract_strided_slice %100 {offsets = [18, 128], sizes = [1, 128], strides = [1, 1]} : vector<32x256xf32> to vector<1x128xf32>
    %c1_114 = arith.constant 1 : index
    %c2304_115 = arith.constant 2304 : index
    %202 = vector.load %arg13[%c1_114, %c2304_115] : memref<2x4096xf32, #tpu.memory_space<vmem>>, vector<1x128xf32>
    tpu.vector_store %arg13[%c1_114, %c2304_115], %201 {strides = array<i32>} : memref<2x4096xf32, #tpu.memory_space<vmem>>, vector<1x128xf32>,
    %203 = vector.extract_strided_slice %100 {offsets = [19, 128], sizes = [1, 128], strides = [1, 1]} : vector<32x256xf32> to vector<1x128xf32>
    %c1_116 = arith.constant 1 : index
    %c2432_117 = arith.constant 2432 : index
    %204 = vector.load %arg13[%c1_116, %c2432_117] : memref<2x4096xf32, #tpu.memory_space<vmem>>, vector<1x128xf32>
    tpu.vector_store %arg13[%c1_116, %c2432_117], %203 {strides = array<i32>} : memref<2x4096xf32, #tpu.memory_space<vmem>>, vector<1x128xf32>,
    %205 = vector.extract_strided_slice %100 {offsets = [20, 128], sizes = [1, 128], strides = [1, 1]} : vector<32x256xf32> to vector<1x128xf32>
    %c1_118 = arith.constant 1 : index
    %c2560_119 = arith.constant 2560 : index
    %206 = vector.load %arg13[%c1_118, %c2560_119] : memref<2x4096xf32, #tpu.memory_space<vmem>>, vector<1x128xf32>
    tpu.vector_store %arg13[%c1_118, %c2560_119], %205 {strides = array<i32>} : memref<2x4096xf32, #tpu.memory_space<vmem>>, vector<1x128xf32>,
    %207 = vector.extract_strided_slice %100 {offsets = [21, 128], sizes = [1, 128], strides = [1, 1]} : vector<32x256xf32> to vector<1x128xf32>
    %c1_120 = arith.constant 1 : index
    %c2688_121 = arith.constant 2688 : index
    %208 = vector.load %arg13[%c1_120, %c2688_121] : memref<2x4096xf32, #tpu.memory_space<vmem>>, vector<1x128xf32>
    tpu.vector_store %arg13[%c1_120, %c2688_121], %207 {strides = array<i32>} : memref<2x4096xf32, #tpu.memory_space<vmem>>, vector<1x128xf32>,
    %209 = vector.extract_strided_slice %100 {offsets = [22, 128], sizes = [1, 128], strides = [1, 1]} : vector<32x256xf32> to vector<1x128xf32>
    %c1_122 = arith.constant 1 : index
    %c2816_123 = arith.constant 2816 : index
    %210 = vector.load %arg13[%c1_122, %c2816_123] : memref<2x4096xf32, #tpu.memory_space<vmem>>, vector<1x128xf32>
    tpu.vector_store %arg13[%c1_122, %c2816_123], %209 {strides = array<i32>} : memref<2x4096xf32, #tpu.memory_space<vmem>>, vector<1x128xf32>,
    %211 = vector.extract_strided_slice %100 {offsets = [23, 128], sizes = [1, 128], strides = [1, 1]} : vector<32x256xf32> to vector<1x128xf32>
    %c1_124 = arith.constant 1 : index
    %c2944_125 = arith.constant 2944 : index
    %212 = vector.load %arg13[%c1_124, %c2944_125] : memref<2x4096xf32, #tpu.memory_space<vmem>>, vector<1x128xf32>
    tpu.vector_store %arg13[%c1_124, %c2944_125], %211 {strides = array<i32>} : memref<2x4096xf32, #tpu.memory_space<vmem>>, vector<1x128xf32>,
    %213 = vector.extract_strided_slice %100 {offsets = [24, 128], sizes = [1, 128], strides = [1, 1]} : vector<32x256xf32> to vector<1x128xf32>
    %c1_126 = arith.constant 1 : index
    %c3072_127 = arith.constant 3072 : index
    %214 = vector.load %arg13[%c1_126, %c3072_127] : memref<2x4096xf32, #tpu.memory_space<vmem>>, vector<1x128xf32>
    tpu.vector_store %arg13[%c1_126, %c3072_127], %213 {strides = array<i32>} : memref<2x4096xf32, #tpu.memory_space<vmem>>, vector<1x128xf32>,
    %215 = vector.extract_strided_slice %100 {offsets = [25, 128], sizes = [1, 128], strides = [1, 1]} : vector<32x256xf32> to vector<1x128xf32>
    %c1_128 = arith.constant 1 : index
    %c3200_129 = arith.constant 3200 : index
    %216 = vector.load %arg13[%c1_128, %c3200_129] : memref<2x4096xf32, #tpu.memory_space<vmem>>, vector<1x128xf32>
    tpu.vector_store %arg13[%c1_128, %c3200_129], %215 {strides = array<i32>} : memref<2x4096xf32, #tpu.memory_space<vmem>>, vector<1x128xf32>,
    %217 = vector.extract_strided_slice %100 {offsets = [26, 128], sizes = [1, 128], strides = [1, 1]} : vector<32x256xf32> to vector<1x128xf32>
    %c1_130 = arith.constant 1 : index
    %c3328_131 = arith.constant 3328 : index
    %218 = vector.load %arg13[%c1_130, %c3328_131] : memref<2x4096xf32, #tpu.memory_space<vmem>>, vector<1x128xf32>
    tpu.vector_store %arg13[%c1_130, %c3328_131], %217 {strides = array<i32>} : memref<2x4096xf32, #tpu.memory_space<vmem>>, vector<1x128xf32>,
    %219 = vector.extract_strided_slice %100 {offsets = [27, 128], sizes = [1, 128], strides = [1, 1]} : vector<32x256xf32> to vector<1x128xf32>
    %c1_132 = arith.constant 1 : index
    %c3456_133 = arith.constant 3456 : index
    %220 = vector.load %arg13[%c1_132, %c3456_133] : memref<2x4096xf32, #tpu.memory_space<vmem>>, vector<1x128xf32>
    tpu.vector_store %arg13[%c1_132, %c3456_133], %219 {strides = array<i32>} : memref<2x4096xf32, #tpu.memory_space<vmem>>, vector<1x128xf32>,
    %221 = vector.extract_strided_slice %100 {offsets = [28, 128], sizes = [1, 128], strides = [1, 1]} : vector<32x256xf32> to vector<1x128xf32>
    %c1_134 = arith.constant 1 : index
    %c3584_135 = arith.constant 3584 : index
    %222 = vector.load %arg13[%c1_134, %c3584_135] : memref<2x4096xf32, #tpu.memory_space<vmem>>, vector<1x128xf32>
    tpu.vector_store %arg13[%c1_134, %c3584_135], %221 {strides = array<i32>} : memref<2x4096xf32, #tpu.memory_space<vmem>>, vector<1x128xf32>,
    %223 = vector.extract_strided_slice %100 {offsets = [29, 128], sizes = [1, 128], strides = [1, 1]} : vector<32x256xf32> to vector<1x128xf32>
    %c1_136 = arith.constant 1 : index
    %c3712_137 = arith.constant 3712 : index
    %224 = vector.load %arg13[%c1_136, %c3712_137] : memref<2x4096xf32, #tpu.memory_space<vmem>>, vector<1x128xf32>
    tpu.vector_store %arg13[%c1_136, %c3712_137], %223 {strides = array<i32>} : memref<2x4096xf32, #tpu.memory_space<vmem>>, vector<1x128xf32>,
    %225 = vector.extract_strided_slice %100 {offsets = [30, 128], sizes = [1, 128], strides = [1, 1]} : vector<32x256xf32> to vector<1x128xf32>
    %c1_138 = arith.constant 1 : index
    %c3840_139 = arith.constant 3840 : index
    %226 = vector.load %arg13[%c1_138, %c3840_139] : memref<2x4096xf32, #tpu.memory_space<vmem>>, vector<1x128xf32>
    tpu.vector_store %arg13[%c1_138, %c3840_139], %225 {strides = array<i32>} : memref<2x4096xf32, #tpu.memory_space<vmem>>, vector<1x128xf32>,
    %227 = vector.extract_strided_slice %100 {offsets = [31, 128], sizes = [1, 128], strides = [1, 1]} : vector<32x256xf32> to vector<1x128xf32>
    %c1_140 = arith.constant 1 : index
    %c3968_141 = arith.constant 3968 : index
    %228 = vector.load %arg13[%c1_140, %c3968_141] : memref<2x4096xf32, #tpu.memory_space<vmem>>, vector<1x128xf32>
    tpu.vector_store %arg13[%c1_140, %c3968_141], %227 {strides = array<i32>} : memref<2x4096xf32, #tpu.memory_space<vmem>>, vector<1x128xf32>,
    %c1_i32_142 = arith.constant 1 : i32
    %229 = tpu.memref_slice %arg14[%c1_i32_142] : memref<2x!tpu.dma_semaphore, #tpu.memory_space<semaphore_mem>> -> memref<1x!tpu.dma_semaphore, #tpu.memory_space<semaphore_mem>>
    %230 = tpu.memref_squeeze %229 : memref<1x!tpu.dma_semaphore, #tpu.memory_space<semaphore_mem>> -> memref<!tpu.dma_semaphore, #tpu.memory_space<semaphore_mem>>
    tpu.wait_dma2 semaphore(%230 : memref<!tpu.dma_semaphore, #tpu.memory_space<semaphore_mem>>) src(%arg8 : memref<4096x128xf32, #tpu.memory_space<any>>) dst(%arg11 : memref<4096x128xf32, #tpu.memory_space<vmem>>)
    %c0_143 = arith.constant 0 : index
    %c0_144 = arith.constant 0 : index
    %231 = vector.load %arg6[%c0_143, %c0_144] : memref<1x512xf32, #tpu.memory_space<vmem>>, vector<1x128xf32>
    %c0_145 = arith.constant 0 : index
    %c128_146 = arith.constant 128 : index
    %232 = vector.load %arg6[%c0_145, %c128_146] : memref<1x512xf32, #tpu.memory_space<vmem>>, vector<1x4xf32>
    %c0_147 = arith.constant 0 : index
    %c0_148 = arith.constant 0 : index
    %233 = vector.load %arg13[%c0_147, %c0_148] : memref<2x4096xf32, #tpu.memory_space<vmem>>, vector<2x4096xf32>
    %c0_149 = arith.constant 0 : index
    %c0_150 = arith.constant 0 : index
    %234 = vector.load %arg11[%c0_149, %c0_150] : memref<4096x128xf32, #tpu.memory_space<vmem>>, vector<4096x128xf32>
    %cst_151 = arith.constant dense<0.000000e+00> : vector<2x128xf32>
    %235 = tpu.matmul %233, %234, %cst_151 {dimension_numbers = #tpu.dot_dimension_numbers<[1], [0], [0], [1], [0, 0, 1, 1], [], []>} : vector<2x4096xf32>, vector<4096x128xf32>, vector<2x128xf32> -> vector<2x128xf32>
    %236 = vector.broadcast %231 : vector<1x128xf32> to vector<2x128xf32>
    %237 = arith.addf %235, %236 : vector<2x128xf32>
    %cst_152 = arith.constant 0.000000e+00 : f32
    %238 = vector.broadcast %cst_152 : f32 to vector<2x128xf32>
    %239 = arith.maximumf %237, %238 : vector<2x128xf32>
    %c0_153 = arith.constant 0 : index
    %c0_154 = arith.constant 0 : index
    %240 = vector.load %arg5[%c0_153, %c0_154] : memref<128x4xf32, #tpu.memory_space<vmem>>, vector<128x4xf32>
    %cst_155 = arith.constant dense<0.000000e+00> : vector<2x4xf32>
    %241 = tpu.matmul %239, %240, %cst_155 {dimension_numbers = #tpu.dot_dimension_numbers<[1], [0], [0], [1], [0, 0, 1, 1], [], []>} : vector<2x128xf32>, vector<128x4xf32>, vector<2x4xf32> -> vector<2x4xf32>
    %242 = vector.broadcast %232 : vector<1x4xf32> to vector<2x4xf32>
    %243 = arith.addf %241, %242 : vector<2x4xf32>
    %cst_156 = arith.constant dense<0xFF800000> : vector<2xf32>
    %244 = vector.multi_reduction <maximumf>, %243, %cst_156 [1] : vector<2x4xf32> to vector<2xf32>
    %245 = vector.shape_cast %244 : vector<2xf32> to vector<2x1xf32>
    %246 = vector.broadcast %245 : vector<2x1xf32> to vector<2x4xf32>
    %247 = arith.subf %243, %246 : vector<2x4xf32>
    %248 = math.exp %247 : vector<2x4xf32>
    %cst_157 = arith.constant dense<0.000000e+00> : vector<2xf32>
    %249 = vector.multi_reduction <add>, %248, %cst_157 [1] : vector<2x4xf32> to vector<2xf32>
    %250 = vector.shape_cast %249 : vector<2xf32> to vector<2x1xf32>
    %251 = vector.broadcast %250 : vector<2x1xf32> to vector<2x4xf32>
    %252 = arith.divf %248, %251 : vector<2x4xf32>
    %c0_158 = arith.constant 0 : index
    %c0_159 = arith.constant 0 : index
    %253 = vector.load %arg9[%c0_158, %c0_159] : memref<2x4xf32, #tpu.memory_space<vmem>>, vector<2x4xf32>
    tpu.vector_store %arg9[%c0_158, %c0_159], %252 {strides = array<i32>} : memref<2x4xf32, #tpu.memory_space<vmem>>, vector<2x4xf32>,
    return
  }
  func.func @transform_0(%arg0: i32) -> (i32, i32) {
    %c0_i32 = arith.constant 0 : i32
    %c0_i32_0 = arith.constant 0 : i32
    %c0_i32_1 = arith.constant 0 : i32
    return %c0_i32, %c0_i32_0 : i32, i32
  }
  func.func @transform_1(%arg0: i32) -> (i32, i32) {
    %c0_i32 = arith.constant 0 : i32
    %c0_i32_0 = arith.constant 0 : i32
    %c0_i32_1 = arith.constant 0 : i32
    return %c0_i32, %c0_i32_0 : i32, i32
  }
  func.func @transform_2(%arg0: i32) -> (i32, i32) {
    %c0_i32 = arith.constant 0 : i32
    %c0_i32_0 = arith.constant 0 : i32
    %c0_i32_1 = arith.constant 0 : i32
    return %c0_i32, %c0_i32_0 : i32, i32
  }
  func.func @transform_3(%arg0: i32) -> (i32, i32) {
    %c0_i32 = arith.constant 0 : i32
    %c0_i32_0 = arith.constant 0 : i32
    %c0_i32_1 = arith.constant 0 : i32
    return %c0_i32, %c0_i32_0 : i32, i32
  }
  func.func @transform_4(%arg0: i32) -> (i32, i32) {
    %c0_i32 = arith.constant 0 : i32
    %c0_i32_0 = arith.constant 0 : i32
    %c0_i32_1 = arith.constant 0 : i32
    return %c0_i32, %c0_i32_0 : i32, i32
  }
  func.func @transform_5(%arg0: i32) -> (i32, i32) {
    %c0_i32 = arith.constant 0 : i32
    %c0_i32_0 = arith.constant 0 : i32
    %c0_i32_1 = arith.constant 0 : i32
    return %c0_i32, %c0_i32_0 : i32, i32
  }
  func.func @transform_8(%arg0: i32) -> (i32, i32) {
    %c0_i32 = arith.constant 0 : i32
    %c0_i32_0 = arith.constant 0 : i32
    %c0_i32_1 = arith.constant 0 : i32
    return %c0_i32, %c0_i32_0 : i32, i32
  }
}

</mosaic_0001>

<bundles_post_ra>
// kernel: cnn1d_forward.1
= control target key start
LH: loop header
LB: loop body
LE: loop exit
PB: predicated region body
PF: predicated region fallthrough
CT: control target
= control target key end

     0   :  { %13 = vsyncpa [#allocation8], 0  ;;  %s11280_s0 = inlined_call_operand.vmem [shape: f32[2,310], index: 0, kind: input, shape index: {}]   ;;  %s11281_s1 = inlined_call_operand.vmem [shape: f32[32,5], index: 1, kind: input, shape index: {}]   ;;  %s11282_s2 = inlined_call_operand.vmem [shape: f32[32,8], index: 2, kind: input, shape index: {}]   ;;  %s11283_s3 = inlined_call_operand.vmem [shape: f32[32,96], index: 3, kind: input, shape index: {}]   ;;  %s11284_s4 = inlined_call_operand.vmem [shape: f32[128,4], index: 4, kind: input, shape index: {}]   ;;  %s11285_s5 = inlined_call_operand.vmem [shape: f32[1,512], index: 5, kind: input, shape index: {}]   ;;  %s11286_s6 = inlined_call_operand.vmem [shape: f32[612,256], index: 6, kind: input, shape index: {}]   ;;  %s11287_s7 = inlined_call_operand.vmem [shape: f32[4096,128], index: 7, kind: input, shape index: {}]   ;;  %s11288_s8 = inlined_call_operand.hbm [shape: f32[2,4], index: 8, kind: output, shape index: {}]  }
   0x1   :  { %v58_v0 = vld [vmem:[%s11286_s6] sm:$0xff]  ;;  %v60_v1 = vld [vmem:[%s11286_s6 + $0x8] sm:$0xff]  ;;  %v62_v2 = vld [vmem:[%s11286_s6 + $0x10] sm:$0xff] }
   0x2   :  { %59 = vst [vmem:[#allocation2] sm:$0xff] %v58_v0  ;;  %61 = vst [vmem:[#allocation2 + $0x8] sm:$0xff] %v60_v1  ;;  %v64_v3 = vld [vmem:[%s11286_s6 + $0x18] sm:$0xff]  ;;  %v66_v4 = vld [vmem:[%s11286_s6 + $0x20] sm:$0xff] }
   0x3   :  { %63 = vst [vmem:[#allocation2 + $0x10] sm:$0xff] %v62_v2  ;;  %65 = vst [vmem:[#allocation2 + $0x18] sm:$0xff] %v64_v3  ;;  %v68_v5 = vld [vmem:[%s11286_s6 + $0x28] sm:$0xff]  ;;  %v70_v6 = vld [vmem:[%s11286_s6 + $0x30] sm:$0xff] }
   0x4   :  { %67 = vst [vmem:[#allocation2 + $0x20] sm:$0xff] %v66_v4  ;;  %v72_v7 = vld [vmem:[%s11286_s6 + $0x38] sm:$0xff]  ;;  %69 = vst [vmem:[#allocation2 + $0x28] sm:$0xff] %v68_v5  ;;  %v74_v8 = vld [vmem:[%s11286_s6 + $0x40] sm:$0xff] }
   0x5   :  { %71 = vst [vmem:[#allocation2 + $0x30] sm:$0xff] %v70_v6  ;;  %73 = vst [vmem:[#allocation2 + $0x38] sm:$0xff] %v72_v7  ;;  %v76_v9 = vld [vmem:[%s11286_s6 + $0x48] sm:$0xff]  ;;  %v78_v10 = vld [vmem:[%s11286_s6 + $0x50] sm:$0xff] }
   0x6   :  { %75 = vst [vmem:[#allocation2 + $0x40] sm:$0xff] %v74_v8  ;;  %77 = vst [vmem:[#allocation2 + $0x48] sm:$0xff] %v76_v9  ;;  %v80_v11 = vld [vmem:[%s11286_s6 + $0x58] sm:$0xff]  ;;  %v82_v12 = vld [vmem:[%s11286_s6 + $0x60] sm:$0xff] }
   0x7   :  { %79 = vst [vmem:[#allocation2 + $0x50] sm:$0xff] %v78_v10  ;;  %v84_v13 = vld [vmem:[%s11286_s6 + $0x68] sm:$0xff]  ;;  %81 = vst [vmem:[#allocation2 + $0x58] sm:$0xff] %v80_v11  ;;  %v86_v14 = vld [vmem:[%s11286_s6 + $0x70] sm:$0xff] }
   0x8   :  { %83 = vst [vmem:[#allocation2 + $0x60] sm:$0xff] %v82_v12  ;;  %85 = vst [vmem:[#allocation2 + $0x68] sm:$0xff] %v84_v13  ;;  %v88_v15 = vld [vmem:[%s11286_s6 + $0x78] sm:$0xff]  ;;  %v90_v16 = vld [vmem:[%s11286_s6 + $0x80] sm:$0xff] }
   0x9   :  { %87 = vst [vmem:[#allocation2 + $0x70] sm:$0xff] %v86_v14  ;;  %89 = vst [vmem:[#allocation2 + $0x78] sm:$0xff] %v88_v15  ;;  %v92_v17 = vld [vmem:[%s11286_s6 + $0x88] sm:$0xff]  ;;  %v94_v18 = vld [vmem:[%s11286_s6 + $0x90] sm:$0xff] }
   0xa   :  { %91 = vst [vmem:[#allocation2 + $0x80] sm:$0xff] %v90_v16  ;;  %v96_v19 = vld [vmem:[%s11286_s6 + $0x98] sm:$0xff]  ;;  %93 = vst [vmem:[#allocation2 + $0x88] sm:$0xff] %v92_v17  ;;  %v98_v20 = vld [vmem:[%s11286_s6 + $0xa0] sm:$0xff] }
   0xb   :  { %95 = vst [vmem:[#allocation2 + $0x90] sm:$0xff] %v94_v18  ;;  %97 = vst [vmem:[#allocation2 + $0x98] sm:$0xff] %v96_v19  ;;  %v100_v21 = vld [vmem:[%s11286_s6 + $0xa8] sm:$0xff]  ;;  %v102_v22 = vld [vmem:[%s11286_s6 + $0xb0] sm:$0xff] }
   0xc   :  { %99 = vst [vmem:[#allocation2 + $0xa0] sm:$0xff] %v98_v20  ;;  %101 = vst [vmem:[#allocation2 + $0xa8] sm:$0xff] %v100_v21  ;;  %v104_v23 = vld [vmem:[%s11286_s6 + $0xb8] sm:$0xff]  ;;  %v106_v24 = vld [vmem:[%s11286_s6 + $0xc0] sm:$0xff] }
   0xd   :  { %103 = vst [vmem:[#allocation2 + $0xb0] sm:$0xff] %v102_v22  ;;  %v108_v25 = vld [vmem:[%s11286_s6 + $0xc8] sm:$0xff]  ;;  %105 = vst [vmem:[#allocation2 + $0xb8] sm:$0xff] %v104_v23  ;;  %v110_v26 = vld [vmem:[%s11286_s6 + $0xd0] sm:$0xff] }
   0xe   :  { %107 = vst [vmem:[#allocation2 + $0xc0] sm:$0xff] %v106_v24  ;;  %109 = vst [vmem:[#allocation2 + $0xc8] sm:$0xff] %v108_v25  ;;  %v112_v27 = vld [vmem:[%s11286_s6 + $0xd8] sm:$0xff]  ;;  %v114_v28 = vld [vmem:[%s11286_s6 + $0xe0] sm:$0xff] }
   0xf   :  { %111 = vst [vmem:[#allocation2 + $0xd0] sm:$0xff] %v110_v26  ;;  %113 = vst [vmem:[#allocation2 + $0xd8] sm:$0xff] %v112_v27  ;;  %v116_v29 = vld [vmem:[%s11286_s6 + $0xe8] sm:$0xff]  ;;  %v118_v30 = vld [vmem:[%s11286_s6 + $0xf0] sm:$0xff] }
  0x10   :  { %115 = vst [vmem:[#allocation2 + $0xe0] sm:$0xff] %v114_v28  ;;  %v120_v31 = vld [vmem:[%s11286_s6 + $0xf8] sm:$0xff]  ;;  %117 = vst [vmem:[#allocation2 + $0xe8] sm:$0xff] %v116_v29  ;;  %v122_v32 = vld [vmem:[%s11286_s6 + $0x100] sm:$0xff] }
  0x11   :  { %119 = vst [vmem:[#allocation2 + $0xf0] sm:$0xff] %v118_v30  ;;  %121 = vst [vmem:[#allocation2 + $0xf8] sm:$0xff] %v120_v31  ;;  %v124_v33 = vld [vmem:[%s11286_s6 + $0x108] sm:$0xff]  ;;  %v126_v34 = vld [vmem:[%s11286_s6 + $0x110] sm:$0xff] }
  0x12   :  { %123 = vst [vmem:[#allocation2 + $0x100] sm:$0xff] %v122_v32  ;;  %125 = vst [vmem:[#allocation2 + $0x108] sm:$0xff] %v124_v33  ;;  %v128_v35 = vld [vmem:[%s11286_s6 + $0x118] sm:$0xff]  ;;  %v130_v36 = vld [vmem:[%s11286_s6 + $0x120] sm:$0xff] }
  0x13   :  { %127 = vst [vmem:[#allocation2 + $0x110] sm:$0xff] %v126_v34  ;;  %v132_v37 = vld [vmem:[%s11286_s6 + $0x128] sm:$0xff]  ;;  %129 = vst [vmem:[#allocation2 + $0x118] sm:$0xff] %v128_v35  ;;  %v134_v38 = vld [vmem:[%s11286_s6 + $0x130] sm:$0xff] }
  0x14   :  { %131 = vst [vmem:[#allocation2 + $0x120] sm:$0xff] %v130_v36  ;;  %133 = vst [vmem:[#allocation2 + $0x128] sm:$0xff] %v132_v37  ;;  %v136_v39 = vld [vmem:[%s11286_s6 + $0x138] sm:$0xff]  ;;  %v138_v40 = vld [vmem:[%s11286_s6 + $0x140] sm:$0xff] }
  0x15   :  { %135 = vst [vmem:[#allocation2 + $0x130] sm:$0xff] %v134_v38  ;;  %137 = vst [vmem:[#allocation2 + $0x138] sm:$0xff] %v136_v39  ;;  %v140_v41 = vld [vmem:[%s11286_s6 + $0x148] sm:$0xff]  ;;  %v142_v42 = vld [vmem:[%s11286_s6 + $0x150] sm:$0xff] }
  0x16   :  { %139 = vst [vmem:[#allocation2 + $0x140] sm:$0xff] %v138_v40  ;;  %v144_v43 = vld [vmem:[%s11286_s6 + $0x158] sm:$0xff]  ;;  %141 = vst [vmem:[#allocation2 + $0x148] sm:$0xff] %v140_v41  ;;  %v146_v44 = vld [vmem:[%s11286_s6 + $0x160] sm:$0xff] }
  0x17   :  { %143 = vst [vmem:[#allocation2 + $0x150] sm:$0xff] %v142_v42  ;;  %145 = vst [vmem:[#allocation2 + $0x158] sm:$0xff] %v144_v43  ;;  %v148_v45 = vld [vmem:[%s11286_s6 + $0x168] sm:$0xff]  ;;  %v150_v46 = vld [vmem:[%s11286_s6 + $0x170] sm:$0xff] }
  0x18   :  { %147 = vst [vmem:[#allocation2 + $0x160] sm:$0xff] %v146_v44  ;;  %149 = vst [vmem:[#allocation2 + $0x168] sm:$0xff] %v148_v45  ;;  %v152_v47 = vld [vmem:[%s11286_s6 + $0x178] sm:$0xff]  ;;  %v154_v48 = vld [vmem:[%s11286_s6 + $0x180] sm:$0xff] }
  0x19   :  { %151 = vst [vmem:[#allocation2 + $0x170] sm:$0xff] %v150_v46  ;;  %v156_v49 = vld [vmem:[%s11286_s6 + $0x188] sm:$0xff]  ;;  %153 = vst [vmem:[#allocation2 + $0x178] sm:$0xff] %v152_v47  ;;  %v158_v50 = vld [vmem:[%s11286_s6 + $0x190] sm:$0xff] }
  0x1a   :  { %155 = vst [vmem:[#allocation2 + $0x180] sm:$0xff] %v154_v48  ;;  %157 = vst [vmem:[#allocation2 + $0x188] sm:$0xff] %v156_v49  ;;  %v160_v51 = vld [vmem:[%s11286_s6 + $0x198] sm:$0xff]  ;;  %v162_v52 = vld [vmem:[%s11286_s6 + $0x1a0] sm:$0xff] }
  0x1b   :  { %159 = vst [vmem:[#allocation2 + $0x190] sm:$0xff] %v158_v50  ;;  %161 = vst [vmem:[#allocation2 + $0x198] sm:$0xff] %v160_v51  ;;  %v164_v53 = vld [vmem:[%s11286_s6 + $0x1a8] sm:$0xff]  ;;  %v166_v54 = vld [vmem:[%s11286_s6 + $0x1b0] sm:$0xff] }
  0x1c   :  { %163 = vst [vmem:[#allocation2 + $0x1a0] sm:$0xff] %v162_v52  ;;  %v168_v55 = vld [vmem:[%s11286_s6 + $0x1b8] sm:$0xff]  ;;  %165 = vst [vmem:[#allocation2 + $0x1a8] sm:$0xff] %v164_v53  ;;  %v170_v56 = vld [vmem:[%s11286_s6 + $0x1c0] sm:$0xff] }
  0x1d   :  { %167 = vst [vmem:[#allocation2 + $0x1b0] sm:$0xff] %v166_v54  ;;  %169 = vst [vmem:[#allocation2 + $0x1b8] sm:$0xff] %v168_v55  ;;  %v172_v57 = vld [vmem:[%s11286_s6 + $0x1c8] sm:$0xff]  ;;  %v174_v58 = vld [vmem:[%s11286_s6 + $0x1d0] sm:$0xff] }
  0x1e   :  { %171 = vst [vmem:[#allocation2 + $0x1c0] sm:$0xff] %v170_v56  ;;  %173 = vst [vmem:[#allocation2 + $0x1c8] sm:$0xff] %v172_v57  ;;  %v176_v59 = vld [vmem:[%s11286_s6 + $0x1d8] sm:$0xff]  ;;  %v178_v60 = vld [vmem:[%s11286_s6 + $0x1e0] sm:$0xff] }
  0x1f   :  { %175 = vst [vmem:[#allocation2 + $0x1d0] sm:$0xff] %v174_v58  ;;  %v180_v61 = vld [vmem:[%s11286_s6 + $0x1e8] sm:$0xff]  ;;  %177 = vst [vmem:[#allocation2 + $0x1d8] sm:$0xff] %v176_v59  ;;  %v182_v62 = vld [vmem:[%s11286_s6 + $0x1f0] sm:$0xff] }
  0x20   :  { %179 = vst [vmem:[#allocation2 + $0x1e0] sm:$0xff] %v178_v60  ;;  %181 = vst [vmem:[#allocation2 + $0x1e8] sm:$0xff] %v180_v61  ;;  %v184_v63 = vld [vmem:[%s11286_s6 + $0x1f8] sm:$0xff]  ;;  %v186_v0 = vld [vmem:[%s11286_s6 + $0x200] sm:$0xff] }
  0x21   :  { %183 = vst [vmem:[#allocation2 + $0x1f0] sm:$0xff] %v182_v62  ;;  %185 = vst [vmem:[#allocation2 + $0x1f8] sm:$0xff] %v184_v63  ;;  %v188_v1 = vld [vmem:[%s11286_s6 + $0x208] sm:$0xff]  ;;  %v190_v2 = vld [vmem:[%s11286_s6 + $0x210] sm:$0xff] }
  0x22   :  { %187 = vst [vmem:[#allocation2 + $0x200] sm:$0xff] %v186_v0  ;;  %v192_v3 = vld [vmem:[%s11286_s6 + $0x218] sm:$0xff]  ;;  %189 = vst [vmem:[#allocation2 + $0x208] sm:$0xff] %v188_v1  ;;  %v194_v4 = vld [vmem:[%s11286_s6 + $0x220] sm:$0xff] }
  0x23   :  { %191 = vst [vmem:[#allocation2 + $0x210] sm:$0xff] %v190_v2  ;;  %193 = vst [vmem:[#allocation2 + $0x218] sm:$0xff] %v192_v3  ;;  %v196_v5 = vld [vmem:[%s11286_s6 + $0x228] sm:$0xff]  ;;  %v198_v6 = vld [vmem:[%s11286_s6 + $0x230] sm:$0xff] }
  0x24   :  { %195 = vst [vmem:[#allocation2 + $0x220] sm:$0xff] %v194_v4  ;;  %197 = vst [vmem:[#allocation2 + $0x228] sm:$0xff] %v196_v5  ;;  %v200_v7 = vld [vmem:[%s11286_s6 + $0x238] sm:$0xff]  ;;  %v202_v8 = vld [vmem:[%s11286_s6 + $0x240] sm:$0xff] }
  0x25   :  { %199 = vst [vmem:[#allocation2 + $0x230] sm:$0xff] %v198_v6  ;;  %v204_v9 = vld [vmem:[%s11286_s6 + $0x248] sm:$0xff]  ;;  %201 = vst [vmem:[#allocation2 + $0x238] sm:$0xff] %v200_v7  ;;  %v206_v10 = vld [vmem:[%s11286_s6 + $0x250] sm:$0xff] }
  0x26   :  { %203 = vst [vmem:[#allocation2 + $0x240] sm:$0xff] %v202_v8  ;;  %205 = vst [vmem:[#allocation2 + $0x248] sm:$0xff] %v204_v9  ;;  %v208_v11 = vld [vmem:[%s11286_s6 + $0x258] sm:$0xff]  ;;  %v210_v12 = vld [vmem:[%s11286_s6 + $0x260] sm:$0xff] }
  0x27   :  { %207 = vst [vmem:[#allocation2 + $0x250] sm:$0xff] %v206_v10  ;;  %209 = vst [vmem:[#allocation2 + $0x258] sm:$0xff] %v208_v11  ;;  %v212_v13 = vld [vmem:[%s11286_s6 + $0x268] sm:$0xff]  ;;  %v214_v14 = vld [vmem:[%s11286_s6 + $0x270] sm:$0xff] }
  0x28   :  { %211 = vst [vmem:[#allocation2 + $0x260] sm:$0xff] %v210_v12  ;;  %v216_v15 = vld [vmem:[%s11286_s6 + $0x278] sm:$0xff]  ;;  %213 = vst [vmem:[#allocation2 + $0x268] sm:$0xff] %v212_v13  ;;  %v218_v16 = vld [vmem:[%s11286_s6 + $0x280] sm:$0xff] }
  0x29   :  { %215 = vst [vmem:[#allocation2 + $0x270] sm:$0xff] %v214_v14  ;;  %217 = vst [vmem:[#allocation2 + $0x278] sm:$0xff] %v216_v15  ;;  %v220_v17 = vld [vmem:[%s11286_s6 + $0x288] sm:$0xff]  ;;  %v222_v18 = vld [vmem:[%s11286_s6 + $0x290] sm:$0xff] }
  0x2a   :  { %219 = vst [vmem:[#allocation2 + $0x280] sm:$0xff] %v218_v16  ;;  %221 = vst [vmem:[#allocation2 + $0x288] sm:$0xff] %v220_v17  ;;  %v224_v19 = vld [vmem:[%s11286_s6 + $0x298] sm:$0xff]  ;;  %v226_v20 = vld [vmem:[%s11286_s6 + $0x2a0] sm:$0xff] }
  0x2b   :  { %223 = vst [vmem:[#allocation2 + $0x290] sm:$0xff] %v222_v18  ;;  %v228_v21 = vld [vmem:[%s11286_s6 + $0x2a8] sm:$0xff]  ;;  %225 = vst [vmem:[#allocation2 + $0x298] sm:$0xff] %v224_v19  ;;  %v230_v22 = vld [vmem:[%s11286_s6 + $0x2b0] sm:$0xff] }
  0x2c   :  { %227 = vst [vmem:[#allocation2 + $0x2a0] sm:$0xff] %v226_v20  ;;  %229 = vst [vmem:[#allocation2 + $0x2a8] sm:$0xff] %v228_v21  ;;  %v232_v23 = vld [vmem:[%s11286_s6 + $0x2b8] sm:$0xff]  ;;  %v234_v24 = vld [vmem:[%s11286_s6 + $0x2c0] sm:$0xff] }
  0x2d   :  { %231 = vst [vmem:[#allocation2 + $0x2b0] sm:$0xff] %v230_v22  ;;  %233 = vst [vmem:[#allocation2 + $0x2b8] sm:$0xff] %v232_v23  ;;  %v236_v25 = vld [vmem:[%s11286_s6 + $0x2c8] sm:$0xff]  ;;  %v238_v26 = vld [vmem:[%s11286_s6 + $0x2d0] sm:$0xff] }
  0x2e   :  { %235 = vst [vmem:[#allocation2 + $0x2c0] sm:$0xff] %v234_v24  ;;  %v240_v27 = vld [vmem:[%s11286_s6 + $0x2d8] sm:$0xff]  ;;  %237 = vst [vmem:[#allocation2 + $0x2c8] sm:$0xff] %v236_v25  ;;  %v242_v28 = vld [vmem:[%s11286_s6 + $0x2e0] sm:$0xff] }
  0x2f   :  { %239 = vst [vmem:[#allocation2 + $0x2d0] sm:$0xff] %v238_v26  ;;  %241 = vst [vmem:[#allocation2 + $0x2d8] sm:$0xff] %v240_v27  ;;  %v244_v29 = vld [vmem:[%s11286_s6 + $0x2e8] sm:$0xff]  ;;  %v246_v30 = vld [vmem:[%s11286_s6 + $0x2f0] sm:$0xff] }
  0x30   :  { %243 = vst [vmem:[#allocation2 + $0x2e0] sm:$0xff] %v242_v28  ;;  %245 = vst [vmem:[#allocation2 + $0x2e8] sm:$0xff] %v244_v29  ;;  %v248_v31 = vld [vmem:[%s11286_s6 + $0x2f8] sm:$0xff]  ;;  %v250_v32 = vld [vmem:[%s11286_s6 + $0x300] sm:$0xff] }
  0x31   :  { %247 = vst [vmem:[#allocation2 + $0x2f0] sm:$0xff] %v246_v30  ;;  %v252_v33 = vld [vmem:[%s11286_s6 + $0x308] sm:$0xff]  ;;  %249 = vst [vmem:[#allocation2 + $0x2f8] sm:$0xff] %v248_v31  ;;  %v254_v34 = vld [vmem:[%s11286_s6 + $0x310] sm:$0xff] }
  0x32   :  { %251 = vst [vmem:[#allocation2 + $0x300] sm:$0xff] %v250_v32  ;;  %253 = vst [vmem:[#allocation2 + $0x308] sm:$0xff] %v252_v33  ;;  %v256_v35 = vld [vmem:[%s11286_s6 + $0x318] sm:$0xff]  ;;  %v258_v36 = vld [vmem:[%s11286_s6 + $0x320] sm:$0xff] }
  0x33   :  { %255 = vst [vmem:[#allocation2 + $0x310] sm:$0xff] %v254_v34  ;;  %257 = vst [vmem:[#allocation2 + $0x318] sm:$0xff] %v256_v35  ;;  %v260_v37 = vld [vmem:[%s11286_s6 + $0x328] sm:$0xff]  ;;  %v262_v38 = vld [vmem:[%s11286_s6 + $0x330] sm:$0xff] }
  0x34   :  { %259 = vst [vmem:[#allocation2 + $0x320] sm:$0xff] %v258_v36  ;;  %v264_v39 = vld [vmem:[%s11286_s6 + $0x338] sm:$0xff]  ;;  %261 = vst [vmem:[#allocation2 + $0x328] sm:$0xff] %v260_v37  ;;  %v266_v40 = vld [vmem:[%s11286_s6 + $0x340] sm:$0xff] }
  0x35   :  { %263 = vst [vmem:[#allocation2 + $0x330] sm:$0xff] %v262_v38  ;;  %265 = vst [vmem:[#allocation2 + $0x338] sm:$0xff] %v264_v39  ;;  %v268_v41 = vld [vmem:[%s11286_s6 + $0x348] sm:$0xff]  ;;  %v270_v42 = vld [vmem:[%s11286_s6 + $0x350] sm:$0xff] }
  0x36   :  { %267 = vst [vmem:[#allocation2 + $0x340] sm:$0xff] %v266_v40  ;;  %269 = vst [vmem:[#allocation2 + $0x348] sm:$0xff] %v268_v41  ;;  %v272_v43 = vld [vmem:[%s11286_s6 + $0x358] sm:$0xff]  ;;  %v274_v44 = vld [vmem:[%s11286_s6 + $0x360] sm:$0xff] }
  0x37   :  { %271 = vst [vmem:[#allocation2 + $0x350] sm:$0xff] %v270_v42  ;;  %v276_v45 = vld [vmem:[%s11286_s6 + $0x368] sm:$0xff]  ;;  %273 = vst [vmem:[#allocation2 + $0x358] sm:$0xff] %v272_v43  ;;  %v278_v46 = vld [vmem:[%s11286_s6 + $0x370] sm:$0xff] }
  0x38   :  { %275 = vst [vmem:[#allocation2 + $0x360] sm:$0xff] %v274_v44  ;;  %277 = vst [vmem:[#allocation2 + $0x368] sm:$0xff] %v276_v45  ;;  %v280_v47 = vld [vmem:[%s11286_s6 + $0x378] sm:$0xff]  ;;  %v282_v48 = vld [vmem:[%s11286_s6 + $0x380] sm:$0xff] }
  0x39   :  { %279 = vst [vmem:[#allocation2 + $0x370] sm:$0xff] %v278_v46  ;;  %281 = vst [vmem:[#allocation2 + $0x378] sm:$0xff] %v280_v47  ;;  %v284_v49 = vld [vmem:[%s11286_s6 + $0x388] sm:$0xff]  ;;  %v286_v50 = vld [vmem:[%s11286_s6 + $0x390] sm:$0xff] }
  0x3a   :  { %283 = vst [vmem:[#allocation2 + $0x380] sm:$0xff] %v282_v48  ;;  %v288_v51 = vld [vmem:[%s11286_s6 + $0x398] sm:$0xff]  ;;  %285 = vst [vmem:[#allocation2 + $0x388] sm:$0xff] %v284_v49  ;;  %v290_v52 = vld [vmem:[%s11286_s6 + $0x3a0] sm:$0xff] }
  0x3b   :  { %287 = vst [vmem:[#allocation2 + $0x390] sm:$0xff] %v286_v50  ;;  %289 = vst [vmem:[#allocation2 + $0x398] sm:$0xff] %v288_v51  ;;  %v292_v53 = vld [vmem:[%s11286_s6 + $0x3a8] sm:$0xff]  ;;  %v294_v54 = vld [vmem:[%s11286_s6 + $0x3b0] sm:$0xff] }
  0x3c   :  { %291 = vst [vmem:[#allocation2 + $0x3a0] sm:$0xff] %v290_v52  ;;  %293 = vst [vmem:[#allocation2 + $0x3a8] sm:$0xff] %v292_v53  ;;  %v296_v55 = vld [vmem:[%s11286_s6 + $0x3b8] sm:$0xff]  ;;  %v298_v56 = vld [vmem:[%s11286_s6 + $0x3c0] sm:$0xff] }
  0x3d   :  { %295 = vst [vmem:[#allocation2 + $0x3b0] sm:$0xff] %v294_v54  ;;  %v300_v57 = vld [vmem:[%s11286_s6 + $0x3c8] sm:$0xff]  ;;  %297 = vst [vmem:[#allocation2 + $0x3b8] sm:$0xff] %v296_v55  ;;  %v302_v58 = vld [vmem:[%s11286_s6 + $0x3d0] sm:$0xff] }
  0x3e   :  { %299 = vst [vmem:[#allocation2 + $0x3c0] sm:$0xff] %v298_v56  ;;  %301 = vst [vmem:[#allocation2 + $0x3c8] sm:$0xff] %v300_v57  ;;  %v304_v59 = vld [vmem:[%s11286_s6 + $0x3d8] sm:$0xff]  ;;  %v306_v60 = vld [vmem:[%s11286_s6 + $0x3e0] sm:$0xff] }
  0x3f   :  { %303 = vst [vmem:[#allocation2 + $0x3d0] sm:$0xff] %v302_v58  ;;  %305 = vst [vmem:[#allocation2 + $0x3d8] sm:$0xff] %v304_v59  ;;  %v308_v61 = vld [vmem:[%s11286_s6 + $0x3e8] sm:$0xff]  ;;  %v310_v62 = vld [vmem:[%s11286_s6 + $0x3f0] sm:$0xff] }
  0x40   :  { %307 = vst [vmem:[#allocation2 + $0x3e0] sm:$0xff] %v306_v60  ;;  %v312_v63 = vld [vmem:[%s11286_s6 + $0x3f8] sm:$0xff]  ;;  %309 = vst [vmem:[#allocation2 + $0x3e8] sm:$0xff] %v308_v61  ;;  %v314_v0 = vld [vmem:[%s11286_s6 + $0x400] sm:$0xff] }
  0x41   :  { %311 = vst [vmem:[#allocation2 + $0x3f0] sm:$0xff] %v310_v62  ;;  %313 = vst [vmem:[#allocation2 + $0x3f8] sm:$0xff] %v312_v63  ;;  %v316_v1 = vld [vmem:[%s11286_s6 + $0x408] sm:$0xff]  ;;  %v318_v2 = vld [vmem:[%s11286_s6 + $0x410] sm:$0xff] }
  0x42   :  { %315 = vst [vmem:[#allocation2 + $0x400] sm:$0xff] %v314_v0  ;;  %317 = vst [vmem:[#allocation2 + $0x408] sm:$0xff] %v316_v1  ;;  %v320_v3 = vld [vmem:[%s11286_s6 + $0x418] sm:$0xff]  ;;  %v322_v4 = vld [vmem:[%s11286_s6 + $0x420] sm:$0xff] }
  0x43   :  { %319 = vst [vmem:[#allocation2 + $0x410] sm:$0xff] %v318_v2  ;;  %v324_v5 = vld [vmem:[%s11286_s6 + $0x428] sm:$0xff]  ;;  %321 = vst [vmem:[#allocation2 + $0x418] sm:$0xff] %v320_v3  ;;  %v326_v6 = vld [vmem:[%s11286_s6 + $0x430] sm:$0xff] }
  0x44   :  { %323 = vst [vmem:[#allocation2 + $0x420] sm:$0xff] %v322_v4  ;;  %325 = vst [vmem:[#allocation2 + $0x428] sm:$0xff] %v324_v5  ;;  %v328_v7 = vld [vmem:[%s11286_s6 + $0x438] sm:$0xff]  ;;  %v330_v8 = vld [vmem:[%s11286_s6 + $0x440] sm:$0xff] }
  0x45   :  { %327 = vst [vmem:[#allocation2 + $0x430] sm:$0xff] %v326_v6  ;;  %329 = vst [vmem:[#allocation2 + $0x438] sm:$0xff] %v328_v7  ;;  %v332_v9 = vld [vmem:[%s11286_s6 + $0x448] sm:$0xff]  ;;  %v334_v10 = vld [vmem:[%s11286_s6 + $0x450] sm:$0xff] }
  0x46   :  { %331 = vst [vmem:[#allocation2 + $0x440] sm:$0xff] %v330_v8  ;;  %v336_v11 = vld [vmem:[%s11286_s6 + $0x458] sm:$0xff]  ;;  %333 = vst [vmem:[#allocation2 + $0x448] sm:$0xff] %v332_v9  ;;  %v338_v12 = vld [vmem:[%s11286_s6 + $0x460] sm:$0xff] }
  0x47   :  { %335 = vst [vmem:[#allocation2 + $0x450] sm:$0xff] %v334_v10  ;;  %337 = vst [vmem:[#allocation2 + $0x458] sm:$0xff] %v336_v11  ;;  %v340_v13 = vld [vmem:[%s11286_s6 + $0x468] sm:$0xff]  ;;  %v342_v14 = vld [vmem:[%s11286_s6 + $0x470] sm:$0xff] }
  0x48   :  { %339 = vst [vmem:[#allocation2 + $0x460] sm:$0xff] %v338_v12  ;;  %341 = vst [vmem:[#allocation2 + $0x468] sm:$0xff] %v340_v13  ;;  %v344_v15 = vld [vmem:[%s11286_s6 + $0x478] sm:$0xff]  ;;  %v346_v16 = vld [vmem:[%s11286_s6 + $0x480] sm:$0xff] }
  0x49   :  { %343 = vst [vmem:[#allocation2 + $0x470] sm:$0xff] %v342_v14  ;;  %v348_v17 = vld [vmem:[%s11286_s6 + $0x488] sm:$0xff]  ;;  %345 = vst [vmem:[#allocation2 + $0x478] sm:$0xff] %v344_v15  ;;  %v350_v18 = vld [vmem:[%s11286_s6 + $0x490] sm:$0xff] }
  0x4a   :  { %347 = vst [vmem:[#allocation2 + $0x480] sm:$0xff] %v346_v16  ;;  %349 = vst [vmem:[#allocation2 + $0x488] sm:$0xff] %v348_v17  ;;  %v352_v19 = vld [vmem:[%s11286_s6 + $0x498] sm:$0xff]  ;;  %v354_v20 = vld [vmem:[%s11286_s6 + $0x4a0] sm:$0xff] }
  0x4b   :  { %351 = vst [vmem:[#allocation2 + $0x490] sm:$0xff] %v350_v18  ;;  %353 = vst [vmem:[#allocation2 + $0x498] sm:$0xff] %v352_v19  ;;  %v356_v21 = vld [vmem:[%s11286_s6 + $0x4a8] sm:$0xff]  ;;  %v358_v22 = vld [vmem:[%s11286_s6 + $0x4b0] sm:$0xff] }
  0x4c   :  { %355 = vst [vmem:[#allocation2 + $0x4a0] sm:$0xff] %v354_v20  ;;  %v360_v23 = vld [vmem:[%s11286_s6 + $0x4b8] sm:$0xff]  ;;  %357 = vst [vmem:[#allocation2 + $0x4a8] sm:$0xff] %v356_v21  ;;  %v362_v24 = vld [vmem:[%s11286_s6 + $0x4c0] sm:$0xff] }
  0x4d   :  { %359 = vst [vmem:[#allocation2 + $0x4b0] sm:$0xff] %v358_v22  ;;  %361 = vst [vmem:[#allocation2 + $0x4b8] sm:$0xff] %v360_v23  ;;  %v364_v25 = vld [vmem:[%s11286_s6 + $0x4c8] sm:$0xff] }
  0x4e   :  { %363 = vst [vmem:[#allocation2 + $0x4c0] sm:$0xff] %v362_v24  ;;  %365 = vst [vmem:[#allocation2 + $0x4c8] sm:$0xff] %v364_v25 }
  0x4f   :  { %373 = vsyncadd [#allocation6], 19712  ;;  %v7497_v26 = vld [vmem:[%s11287_s7] sm:$0xff]  ;;  %v7502_v27 = vld [vmem:[%s11287_s7 + $0x8] sm:$0xff]  ;;  %s6965_s18 = smov 125   ;;  %s6966_s19 = smov 127  }
  0x50   :  { %v7507_v28 = vld [vmem:[%s11287_s7 + $0x10] sm:$0xff]  ;;  %v7512_v29 = vld [vmem:[%s11287_s7 + $0x18] sm:$0xff]  ;;  %v7517_v30 = vld [vmem:[%s11287_s7 + $0x20] sm:$0xff]  ;;  %s6968_s20 = smov 126  }
  0x51   :  { %v7522_v31 = vld [vmem:[%s11287_s7 + $0x28] sm:$0xff]  ;;  %v7527_v32 = vld [vmem:[%s11287_s7 + $0x30] sm:$0xff]  ;;  %v7532_v33 = vld [vmem:[%s11287_s7 + $0x38] sm:$0xff] }
  0x52   :  { %v7537_v34 = vld [vmem:[%s11287_s7 + $0x40] sm:$0xff]  ;;  %v7542_v35 = vld [vmem:[%s11287_s7 + $0x48] sm:$0xff]  ;;  %v7547_v36 = vld [vmem:[%s11287_s7 + $0x50] sm:$0xff] }
  0x53   :  { %11293 = vst [vmem:[#allocation14_spill] sm:$0xff] %v7537_v34  ;;  %11294 = vst [vmem:[#allocation15_spill] sm:$0xff] %v7542_v35  ;;  %v7552_v37 = vld [vmem:[%s11287_s7 + $0x58] sm:$0xff]  ;;  %v7557_v38 = vld [vmem:[%s11287_s7 + $0x60] sm:$0xff] }
  0x54   :  { %11295 = vst [vmem:[#allocation16_spill] sm:$0xff] %v7547_v36  ;;  %11296 = vst [vmem:[#allocation17_spill] sm:$0xff] %v7552_v37  ;;  %v7562_v39 = vld [vmem:[%s11287_s7 + $0x68] sm:$0xff]  ;;  %v7567_v40 = vld [vmem:[%s11287_s7 + $0x70] sm:$0xff] }
  0x55   :  { %11297 = vst [vmem:[#allocation18_spill] sm:$0xff] %v7557_v38  ;;  %11298 = vst [vmem:[#allocation19_spill] sm:$0xff] %v7562_v39  ;;  %v7572_v41 = vld [vmem:[%s11287_s7 + $0x78] sm:$0xff]  ;;  %v7577_v42 = vld [vmem:[%s11287_s7 + $0x80] sm:$0xff] }
  0x56   :  { %11299 = vst [vmem:[#allocation20_spill] sm:$0xff] %v7567_v40  ;;  %11300 = vst [vmem:[#allocation21_spill] sm:$0xff] %v7572_v41  ;;  %v7582_v43 = vld [vmem:[%s11287_s7 + $0x88] sm:$0xff]  ;;  %v7587_v44 = vld [vmem:[%s11287_s7 + $0x90] sm:$0xff] }
  0x57   :  { %v7592_v45 = vld [vmem:[%s11287_s7 + $0x98] sm:$0xff]  ;;  %v7597_v46 = vld [vmem:[%s11287_s7 + $0xa0] sm:$0xff]  ;;  %v7602_v47 = vld [vmem:[%s11287_s7 + $0xa8] sm:$0xff] }
  0x58   :  { %v7607_v48 = vld [vmem:[%s11287_s7 + $0xb0] sm:$0xff]  ;;  %v7612_v49 = vld [vmem:[%s11287_s7 + $0xb8] sm:$0xff]  ;;  %v7617_v50 = vld [vmem:[%s11287_s7 + $0xc0] sm:$0xff] }
  0x59   :  { %v7622_v51 = vld [vmem:[%s11287_s7 + $0xc8] sm:$0xff]  ;;  %v7627_v52 = vld [vmem:[%s11287_s7 + $0xd0] sm:$0xff]  ;;  %v7632_v53 = vld [vmem:[%s11287_s7 + $0xd8] sm:$0xff] }
  0x5a   :  { %11301 = vst [vmem:[#allocation22_spill] sm:$0xff] %v7627_v52  ;;  %11302 = vst [vmem:[#allocation23_spill] sm:$0xff] %v7632_v53  ;;  %v7637_v54 = vld [vmem:[%s11287_s7 + $0xe0] sm:$0xff]  ;;  %v7642_v55 = vld [vmem:[%s11287_s7 + $0xe8] sm:$0xff] }
  0x5b   :  { %11303 = vst [vmem:[#allocation24_spill] sm:$0xff] %v7637_v54  ;;  %11304 = vst [vmem:[#allocation25_spill] sm:$0xff] %v7642_v55  ;;  %v7647_v56 = vld [vmem:[%s11287_s7 + $0xf0] sm:$0xff]  ;;  %v7652_v57 = vld [vmem:[%s11287_s7 + $0xf8] sm:$0xff] }
  0x5c   :  { %11305 = vst [vmem:[#allocation26_spill] sm:$0xff] %v7647_v56  ;;  %11306 = vst [vmem:[#allocation27_spill] sm:$0xff] %v7652_v57  ;;  %v7657_v58 = vld [vmem:[%s11287_s7 + $0x100] sm:$0xff]  ;;  %v7662_v59 = vld [vmem:[%s11287_s7 + $0x108] sm:$0xff] }
  0x5d   :  { %11307 = vst [vmem:[#allocation28_spill] sm:$0xff] %v7657_v58  ;;  %11308 = vst [vmem:[#allocation29_spill] sm:$0xff] %v7662_v59  ;;  %v7667_v60 = vld [vmem:[%s11287_s7 + $0x110] sm:$0xff]  ;;  %v7672_v61 = vld [vmem:[%s11287_s7 + $0x118] sm:$0xff] }
  0x5e   :  { %11309 = vst [vmem:[#allocation30_spill] sm:$0xff] %v7667_v60  ;;  %11310 = vst [vmem:[#allocation31_spill] sm:$0xff] %v7672_v61  ;;  %v7677_v62 = vld [vmem:[%s11287_s7 + $0x120] sm:$0xff]  ;;  %v7682_v63 = vld [vmem:[%s11287_s7 + $0x128] sm:$0xff] }
  0x5f   :  { %11311 = vst [vmem:[#allocation32_spill] sm:$0xff] %v7677_v62  ;;  %11312 = vst [vmem:[#allocation33_spill] sm:$0xff] %v7682_v63  ;;  %v7687_v0 = vld [vmem:[%s11287_s7 + $0x130] sm:$0xff]  ;;  %v7692_v1 = vld [vmem:[%s11287_s7 + $0x138] sm:$0xff] }
  0x60   :  { %11313 = vst [vmem:[#allocation34_spill] sm:$0xff] %v7687_v0  ;;  %11314 = vst [vmem:[#allocation35_spill] sm:$0xff] %v7692_v1  ;;  %v7697_v2 = vld [vmem:[%s11287_s7 + $0x140] sm:$0xff]  ;;  %v7702_v3 = vld [vmem:[%s11287_s7 + $0x148] sm:$0xff] }
  0x61   :  { %11315 = vst [vmem:[#allocation36_spill] sm:$0xff] %v7697_v2  ;;  %11316 = vst [vmem:[#allocation37_spill] sm:$0xff] %v7702_v3  ;;  %v7707_v4 = vld [vmem:[%s11287_s7 + $0x150] sm:$0xff]  ;;  %v7712_v5 = vld [vmem:[%s11287_s7 + $0x158] sm:$0xff] }
  0x62   :  { %11317 = vst [vmem:[#allocation38_spill] sm:$0xff] %v7707_v4  ;;  %11318 = vst [vmem:[#allocation39_spill] sm:$0xff] %v7712_v5  ;;  %v7717_v6 = vld [vmem:[%s11287_s7 + $0x160] sm:$0xff]  ;;  %v7722_v7 = vld [vmem:[%s11287_s7 + $0x168] sm:$0xff] }
  0x63   :  { %11319 = vst [vmem:[#allocation40_spill] sm:$0xff] %v7717_v6  ;;  %11320 = vst [vmem:[#allocation41_spill] sm:$0xff] %v7722_v7  ;;  %v7727_v8 = vld [vmem:[%s11287_s7 + $0x170] sm:$0xff]  ;;  %v7732_v9 = vld [vmem:[%s11287_s7 + $0x178] sm:$0xff] }
  0x64   :  { %11321 = vst [vmem:[#allocation42_spill] sm:$0xff] %v7727_v8  ;;  %11322 = vst [vmem:[#allocation43_spill] sm:$0xff] %v7732_v9  ;;  %v7737_v10 = vld [vmem:[%s11287_s7 + $0x180] sm:$0xff]  ;;  %v7742_v11 = vld [vmem:[%s11287_s7 + $0x188] sm:$0xff] }
  0x65   :  { %11323 = vst [vmem:[#allocation44_spill] sm:$0xff] %v7737_v10  ;;  %11324 = vst [vmem:[#allocation45_spill] sm:$0xff] %v7742_v11  ;;  %v7747_v12 = vld [vmem:[%s11287_s7 + $0x190] sm:$0xff]  ;;  %v7752_v13 = vld [vmem:[%s11287_s7 + $0x198] sm:$0xff] }
  0x66   :  { %11325 = vst [vmem:[#allocation46_spill] sm:$0xff] %v7747_v12  ;;  %11326 = vst [vmem:[#allocation47_spill] sm:$0xff] %v7752_v13  ;;  %v7757_v14 = vld [vmem:[%s11287_s7 + $0x1a0] sm:$0xff]  ;;  %v7762_v15 = vld [vmem:[%s11287_s7 + $0x1a8] sm:$0xff] }
  0x67   :  { %11327 = vst [vmem:[#allocation48_spill] sm:$0xff] %v7757_v14  ;;  %11328 = vst [vmem:[#allocation49_spill] sm:$0xff] %v7762_v15  ;;  %v7767_v16 = vld [vmem:[%s11287_s7 + $0x1b0] sm:$0xff]  ;;  %v7772_v17 = vld [vmem:[%s11287_s7 + $0x1b8] sm:$0xff] }
  0x68   :  { %11329 = vst [vmem:[#allocation50_spill] sm:$0xff] %v7767_v16  ;;  %11330 = vst [vmem:[#allocation51_spill] sm:$0xff] %v7772_v17  ;;  %v7777_v18 = vld [vmem:[%s11287_s7 + $0x1c0] sm:$0xff]  ;;  %v7782_v19 = vld [vmem:[%s11287_s7 + $0x1c8] sm:$0xff] }
  0x69   :  { %11331 = vst [vmem:[#allocation52_spill] sm:$0xff] %v7777_v18  ;;  %11332 = vst [vmem:[#allocation53_spill] sm:$0xff] %v7782_v19  ;;  %v7787_v20 = vld [vmem:[%s11287_s7 + $0x1d0] sm:$0xff]  ;;  %v7792_v21 = vld [vmem:[%s11287_s7 + $0x1d8] sm:$0xff] }
  0x6a   :  { %11333 = vst [vmem:[#allocation54_spill] sm:$0xff] %v7787_v20  ;;  %11334 = vst [vmem:[#allocation55_spill] sm:$0xff] %v7792_v21  ;;  %v7797_v22 = vld [vmem:[%s11287_s7 + $0x1e0] sm:$0xff]  ;;  %v7802_v23 = vld [vmem:[%s11287_s7 + $0x1e8] sm:$0xff] }
  0x6b   :  { %11335 = vst [vmem:[#allocation56_spill] sm:$0xff] %v7797_v22  ;;  %11336 = vst [vmem:[#allocation57_spill] sm:$0xff] %v7802_v23  ;;  %v7807_v24 = vld [vmem:[%s11287_s7 + $0x1f0] sm:$0xff]  ;;  %v7812_v25 = vld [vmem:[%s11287_s7 + $0x1f8] sm:$0xff] }
  0x6c   :  { %11337 = vst [vmem:[#allocation58_spill] sm:$0xff] %v7807_v24  ;;  %11338 = vst [vmem:[#allocation59_spill] sm:$0xff] %v7812_v25  ;;  %v7817_v9 = vld [vmem:[%s11287_s7 + $0x200] sm:$0xff]  ;;  %v7822_v8 = vld [vmem:[%s11287_s7 + $0x208] sm:$0xff] }
  0x6d   :  { %11339 = vst [vmem:[#allocation60_spill] sm:$0xff] %v7817_v9  ;;  %11340 = vst [vmem:[#allocation61_spill] sm:$0xff] %v7822_v8  ;;  %v7827_v7 = vld [vmem:[%s11287_s7 + $0x210] sm:$0xff]  ;;  %v7832_v24 = vld [vmem:[%s11287_s7 + $0x218] sm:$0xff] }
  0x6e   :  { %11341 = vst [vmem:[#allocation62_spill] sm:$0xff] %v7827_v7  ;;  %11342 = vst [vmem:[#allocation63_spill] sm:$0xff] %v7832_v24  ;;  %v7837_v25 = vld [vmem:[%s11287_s7 + $0x220] sm:$0xff]  ;;  %v7842_v9 = vld [vmem:[%s11287_s7 + $0x228] sm:$0xff] }
  0x6f   :  { %11343 = vst [vmem:[#allocation64_spill] sm:$0xff] %v7837_v25  ;;  %11344 = vst [vmem:[#allocation65_spill] sm:$0xff] %v7842_v9  ;;  %v7847_v8 = vld [vmem:[%s11287_s7 + $0x230] sm:$0xff]  ;;  %v7852_v7 = vld [vmem:[%s11287_s7 + $0x238] sm:$0xff] }
  0x70   :  { %11345 = vst [vmem:[#allocation66_spill] sm:$0xff] %v7847_v8  ;;  %11346 = vst [vmem:[#allocation67_spill] sm:$0xff] %v7852_v7  ;;  %v7857_v24 = vld [vmem:[%s11287_s7 + $0x240] sm:$0xff]  ;;  %v7862_v25 = vld [vmem:[%s11287_s7 + $0x248] sm:$0xff] }
  0x71   :  { %11347 = vst [vmem:[#allocation68_spill] sm:$0xff] %v7857_v24  ;;  %11348 = vst [vmem:[#allocation69_spill] sm:$0xff] %v7862_v25  ;;  %v7867_v9 = vld [vmem:[%s11287_s7 + $0x250] sm:$0xff]  ;;  %v7872_v8 = vld [vmem:[%s11287_s7 + $0x258] sm:$0xff] }
  0x72   :  { %11349 = vst [vmem:[#allocation70_spill] sm:$0xff] %v7867_v9  ;;  %11350 = vst [vmem:[#allocation71_spill] sm:$0xff] %v7872_v8  ;;  %v7877_v7 = vld [vmem:[%s11287_s7 + $0x260] sm:$0xff]  ;;  %v7882_v24 = vld [vmem:[%s11287_s7 + $0x268] sm:$0xff] }
  0x73   :  { %11351 = vst [vmem:[#allocation72_spill] sm:$0xff] %v7877_v7  ;;  %11352 = vst [vmem:[#allocation73_spill] sm:$0xff] %v7882_v24  ;;  %v7887_v25 = vld [vmem:[%s11287_s7 + $0x270] sm:$0xff]  ;;  %v7892_v9 = vld [vmem:[%s11287_s7 + $0x278] sm:$0xff] }
  0x74   :  { %11353 = vst [vmem:[#allocation74_spill] sm:$0xff] %v7887_v25  ;;  %11354 = vst [vmem:[#allocation75_spill] sm:$0xff] %v7892_v9  ;;  %v7897_v8 = vld [vmem:[%s11287_s7 + $0x280] sm:$0xff]  ;;  %v7902_v7 = vld [vmem:[%s11287_s7 + $0x288] sm:$0xff] }
  0x75   :  { %11355 = vst [vmem:[#allocation76_spill] sm:$0xff] %v7897_v8  ;;  %11356 = vst [vmem:[#allocation77_spill] sm:$0xff] %v7902_v7  ;;  %v7907_v24 = vld [vmem:[%s11287_s7 + $0x290] sm:$0xff]  ;;  %v7912_v25 = vld [vmem:[%s11287_s7 + $0x298] sm:$0xff] }
  0x76   :  { %11357 = vst [vmem:[#allocation78_spill] sm:$0xff] %v7907_v24  ;;  %11358 = vst [vmem:[#allocation79_spill] sm:$0xff] %v7912_v25  ;;  %v7917_v9 = vld [vmem:[%s11287_s7 + $0x2a0] sm:$0xff]  ;;  %v7922_v8 = vld [vmem:[%s11287_s7 + $0x2a8] sm:$0xff] }
  0x77   :  { %11359 = vst [vmem:[#allocation80_spill] sm:$0xff] %v7917_v9  ;;  %11360 = vst [vmem:[#allocation81_spill] sm:$0xff] %v7922_v8  ;;  %v7927_v7 = vld [vmem:[%s11287_s7 + $0x2b0] sm:$0xff]  ;;  %v7932_v24 = vld [vmem:[%s11287_s7 + $0x2b8] sm:$0xff] }
  0x78   :  { %11361 = vst [vmem:[#allocation82_spill] sm:$0xff] %v7927_v7  ;;  %11362 = vst [vmem:[#allocation83_spill] sm:$0xff] %v7932_v24  ;;  %v7937_v25 = vld [vmem:[%s11287_s7 + $0x2c0] sm:$0xff]  ;;  %v7942_v9 = vld [vmem:[%s11287_s7 + $0x2c8] sm:$0xff] }
  0x79   :  { %11363 = vst [vmem:[#allocation84_spill] sm:$0xff] %v7937_v25  ;;  %11364 = vst [vmem:[#allocation85_spill] sm:$0xff] %v7942_v9  ;;  %v7947_v8 = vld [vmem:[%s11287_s7 + $0x2d0] sm:$0xff]  ;;  %v7952_v7 = vld [vmem:[%s11287_s7 + $0x2d8] sm:$0xff] }
  0x7a   :  { %11365 = vst [vmem:[#allocation86_spill] sm:$0xff] %v7947_v8  ;;  %11366 = vst [vmem:[#allocation87_spill] sm:$0xff] %v7952_v7  ;;  %v7957_v24 = vld [vmem:[%s11287_s7 + $0x2e0] sm:$0xff]  ;;  %v7962_v25 = vld [vmem:[%s11287_s7 + $0x2e8] sm:$0xff] }
  0x7b   :  { %11367 = vst [vmem:[#allocation88_spill] sm:$0xff] %v7957_v24  ;;  %11368 = vst [vmem:[#allocation89_spill] sm:$0xff] %v7962_v25  ;;  %v7967_v9 = vld [vmem:[%s11287_s7 + $0x2f0] sm:$0xff]  ;;  %v7972_v8 = vld [vmem:[%s11287_s7 + $0x2f8] sm:$0xff] }
  0x7c   :  { %11369 = vst [vmem:[#allocation90_spill] sm:$0xff] %v7967_v9  ;;  %11370 = vst [vmem:[#allocation91_spill] sm:$0xff] %v7972_v8  ;;  %v7977_v7 = vld [vmem:[%s11287_s7 + $0x300] sm:$0xff]  ;;  %v7982_v24 = vld [vmem:[%s11287_s7 + $0x308] sm:$0xff] }
  0x7d   :  { %11371 = vst [vmem:[#allocation92_spill] sm:$0xff] %v7977_v7  ;;  %11372 = vst [vmem:[#allocation93_spill] sm:$0xff] %v7982_v24  ;;  %v7987_v25 = vld [vmem:[%s11287_s7 + $0x310] sm:$0xff]  ;;  %v7992_v9 = vld [vmem:[%s11287_s7 + $0x318] sm:$0xff] }
  0x7e   :  { %11373 = vst [vmem:[#allocation94_spill] sm:$0xff] %v7987_v25  ;;  %11374 = vst [vmem:[#allocation95_spill] sm:$0xff] %v7992_v9  ;;  %v7997_v8 = vld [vmem:[%s11287_s7 + $0x320] sm:$0xff]  ;;  %v8002_v7 = vld [vmem:[%s11287_s7 + $0x328] sm:$0xff] }
  0x7f   :  { %11375 = vst [vmem:[#allocation96_spill] sm:$0xff] %v7997_v8  ;;  %11376 = vst [vmem:[#allocation97_spill] sm:$0xff] %v8002_v7  ;;  %v8007_v24 = vld [vmem:[%s11287_s7 + $0x330] sm:$0xff]  ;;  %v8012_v25 = vld [vmem:[%s11287_s7 + $0x338] sm:$0xff] }
  0x80   :  { %11377 = vst [vmem:[#allocation98_spill] sm:$0xff] %v8007_v24  ;;  %11378 = vst [vmem:[#allocation99_spill] sm:$0xff] %v8012_v25  ;;  %v8017_v9 = vld [vmem:[%s11287_s7 + $0x340] sm:$0xff]  ;;  %v8022_v8 = vld [vmem:[%s11287_s7 + $0x348] sm:$0xff] }
  0x81   :  { %11379 = vst [vmem:[#allocation100_spill] sm:$0xff] %v8017_v9  ;;  %11380 = vst [vmem:[#allocation101_spill] sm:$0xff] %v8022_v8  ;;  %v8027_v7 = vld [vmem:[%s11287_s7 + $0x350] sm:$0xff]  ;;  %v8032_v24 = vld [vmem:[%s11287_s7 + $0x358] sm:$0xff] }
  0x82   :  { %11381 = vst [vmem:[#allocation102_spill] sm:$0xff] %v8027_v7  ;;  %11382 = vst [vmem:[#allocation103_spill] sm:$0xff] %v8032_v24  ;;  %v8037_v25 = vld [vmem:[%s11287_s7 + $0x360] sm:$0xff]  ;;  %v8042_v9 = vld [vmem:[%s11287_s7 + $0x368] sm:$0xff] }
  0x83   :  { %11383 = vst [vmem:[#allocation104_spill] sm:$0xff] %v8037_v25  ;;  %11384 = vst [vmem:[#allocation105_spill] sm:$0xff] %v8042_v9  ;;  %v8047_v8 = vld [vmem:[%s11287_s7 + $0x370] sm:$0xff]  ;;  %v8052_v7 = vld [vmem:[%s11287_s7 + $0x378] sm:$0xff] }
  0x84   :  { %11385 = vst [vmem:[#allocation106_spill] sm:$0xff] %v8047_v8  ;;  %11386 = vst [vmem:[#allocation107_spill] sm:$0xff] %v8052_v7  ;;  %v8057_v24 = vld [vmem:[%s11287_s7 + $0x380] sm:$0xff]  ;;  %v8062_v25 = vld [vmem:[%s11287_s7 + $0x388] sm:$0xff] }
  0x85   :  { %11387 = vst [vmem:[#allocation108_spill] sm:$0xff] %v8057_v24  ;;  %11388 = vst [vmem:[#allocation109_spill] sm:$0xff] %v8062_v25  ;;  %v8067_v9 = vld [vmem:[%s11287_s7 + $0x390] sm:$0xff]  ;;  %v8072_v8 = vld [vmem:[%s11287_s7 + $0x398] sm:$0xff] }
  0x86   :  { %11389 = vst [vmem:[#allocation110_spill] sm:$0xff] %v8067_v9  ;;  %11390 = vst [vmem:[#allocation111_spill] sm:$0xff] %v8072_v8  ;;  %v8077_v7 = vld [vmem:[%s11287_s7 + $0x3a0] sm:$0xff]  ;;  %v8082_v24 = vld [vmem:[%s11287_s7 + $0x3a8] sm:$0xff] }
  0x87   :  { %11391 = vst [vmem:[#allocation112_spill] sm:$0xff] %v8077_v7  ;;  %11392 = vst [vmem:[#allocation113_spill] sm:$0xff] %v8082_v24  ;;  %v8087_v25 = vld [vmem:[%s11287_s7 + $0x3b0] sm:$0xff]  ;;  %v8092_v9 = vld [vmem:[%s11287_s7 + $0x3b8] sm:$0xff] }
  0x88   :  { %11393 = vst [vmem:[#allocation114_spill] sm:$0xff] %v8087_v25  ;;  %11394 = vst [vmem:[#allocation115_spill] sm:$0xff] %v8092_v9  ;;  %v8097_v8 = vld [vmem:[%s11287_s7 + $0x3c0] sm:$0xff]  ;;  %v8102_v7 = vld [vmem:[%s11287_s7 + $0x3c8] sm:$0xff] }
  0x89   :  { %11395 = vst [vmem:[#allocation116_spill] sm:$0xff] %v8097_v8  ;;  %11396 = vst [vmem:[#allocation117_spill] sm:$0xff] %v8102_v7  ;;  %v8107_v24 = vld [vmem:[%s11287_s7 + $0x3d0] sm:$0xff]  ;;  %v8112_v25 = vld [vmem:[%s11287_s7 + $0x3d8] sm:$0xff] }
  0x8a   :  { %11397 = vst [vmem:[#allocation118_spill] sm:$0xff] %v8107_v24  ;;  %11398 = vst [vmem:[#allocation119_spill] sm:$0xff] %v8112_v25  ;;  %v8117_v9 = vld [vmem:[%s11287_s7 + $0x3e0] sm:$0xff]  ;;  %v8122_v8 = vld [vmem:[%s11287_s7 + $0x3e8] sm:$0xff] }
  0x8b   :  { %11399 = vst [vmem:[#allocation120_spill] sm:$0xff] %v8117_v9  ;;  %11400 = vst [vmem:[#allocation121_spill] sm:$0xff] %v8122_v8  ;;  %v8127_v7 = vld [vmem:[%s11287_s7 + $0x3f0] sm:$0xff]  ;;  %v8132_v24 = vld [vmem:[%s11287_s7 + $0x3f8] sm:$0xff] }
  0x8c   :  { %11401 = vst [vmem:[#allocation122_spill] sm:$0xff] %v8127_v7  ;;  %11402 = vst [vmem:[#allocation123_spill] sm:$0xff] %v8132_v24  ;;  %v8137_v25 = vld [vmem:[%s11287_s7 + $0x400] sm:$0xff]  ;;  %v8142_v9 = vld [vmem:[%s11287_s7 + $0x408] sm:$0xff] }
  0x8d   :  { %11403 = vst [vmem:[#allocation124_spill] sm:$0xff] %v8137_v25  ;;  %11404 = vst [vmem:[#allocation125_spill] sm:$0xff] %v8142_v9  ;;  %v8147_v8 = vld [vmem:[%s11287_s7 + $0x410] sm:$0xff]  ;;  %v8152_v7 = vld [vmem:[%s11287_s7 + $0x418] sm:$0xff] }
  0x8e   :  { %11405 = vst [vmem:[#allocation126_spill] sm:$0xff] %v8147_v8  ;;  %11406 = vst [vmem:[#allocation127_spill] sm:$0xff] %v8152_v7  ;;  %v8157_v24 = vld [vmem:[%s11287_s7 + $0x420] sm:$0xff]  ;;  %v8162_v6 = vld [vmem:[%s11287_s7 + $0x428] sm:$0xff] }
  0x8f   :  { %11407 = vst [vmem:[#allocation128_spill] sm:$0xff] %v8157_v24  ;;  %11408 = vst [vmem:[#allocation129_spill] sm:$0xff] %v8162_v6  ;;  %v8167_v23 = vld [vmem:[%s11287_s7 + $0x430] sm:$0xff]  ;;  %v8172_v22 = vld [vmem:[%s11287_s7 + $0x438] sm:$0xff] }
  0x90   :  { %11409 = vst [vmem:[#allocation130_spill] sm:$0xff] %v8167_v23  ;;  %11410 = vst [vmem:[#allocation131_spill] sm:$0xff] %v8172_v22  ;;  %v8177_v5 = vld [vmem:[%s11287_s7 + $0x440] sm:$0xff]  ;;  %v8182_v4 = vld [vmem:[%s11287_s7 + $0x448] sm:$0xff] }
  0x91   :  { %11411 = vst [vmem:[#allocation132_spill] sm:$0xff] %v8177_v5  ;;  %11412 = vst [vmem:[#allocation133_spill] sm:$0xff] %v8182_v4  ;;  %v8187_v21 = vld [vmem:[%s11287_s7 + $0x450] sm:$0xff]  ;;  %v8192_v20 = vld [vmem:[%s11287_s7 + $0x458] sm:$0xff] }
  0x92   :  { %11413 = vst [vmem:[#allocation134_spill] sm:$0xff] %v8187_v21  ;;  %11414 = vst [vmem:[#allocation135_spill] sm:$0xff] %v8192_v20  ;;  %v8197_v3 = vld [vmem:[%s11287_s7 + $0x460] sm:$0xff]  ;;  %v8202_v2 = vld [vmem:[%s11287_s7 + $0x468] sm:$0xff] }
  0x93   :  { %11415 = vst [vmem:[#allocation136_spill] sm:$0xff] %v8197_v3  ;;  %11416 = vst [vmem:[#allocation137_spill] sm:$0xff] %v8202_v2  ;;  %v8207_v19 = vld [vmem:[%s11287_s7 + $0x470] sm:$0xff]  ;;  %v8212_v18 = vld [vmem:[%s11287_s7 + $0x478] sm:$0xff] }
  0x94   :  { %11417 = vst [vmem:[#allocation138_spill] sm:$0xff] %v8207_v19  ;;  %11418 = vst [vmem:[#allocation139_spill] sm:$0xff] %v8212_v18  ;;  %v8217_v1 = vld [vmem:[%s11287_s7 + $0x480] sm:$0xff]  ;;  %v8222_v0 = vld [vmem:[%s11287_s7 + $0x488] sm:$0xff] }
  0x95   :  { %11419 = vst [vmem:[#allocation140_spill] sm:$0xff] %v8222_v0  ;;  %v8227_v17 = vld [vmem:[%s11287_s7 + $0x490] sm:$0xff]  ;;  %v8232_v19 = vld [vmem:[%s11287_s7 + $0x498] sm:$0xff]  ;;  %v8237_v18 = vld [vmem:[%s11287_s7 + $0x4a0] sm:$0xff] }
  0x96   :  { %11420 = vst [vmem:[#allocation141_spill] sm:$0xff] %v8227_v17  ;;  %11421 = vst [vmem:[#allocation142_spill] sm:$0xff] %v8232_v19  ;;  %v8242_v16 = vld [vmem:[%s11287_s7 + $0x4a8] sm:$0xff]  ;;  %v8247_v63 = vld [vmem:[%s11287_s7 + $0x4b0] sm:$0xff] }
  0x97   :  { %11422 = vst [vmem:[#allocation143_spill] sm:$0xff] %v8237_v18  ;;  %11423 = vst [vmem:[#allocation144_spill] sm:$0xff] %v8242_v16  ;;  %v8252_v62 = vld [vmem:[%s11287_s7 + $0x4b8] sm:$0xff]  ;;  %v8257_v2 = vld [vmem:[%s11287_s7 + $0x4c0] sm:$0xff] }
  0x98   :  { %11424 = vst [vmem:[#allocation145_spill] sm:$0xff] %v8247_v63  ;;  %11425 = vst [vmem:[#allocation146_spill] sm:$0xff] %v8252_v62  ;;  %v8262_v3 = vld [vmem:[%s11287_s7 + $0x4c8] sm:$0xff]  ;;  %v8267_v15 = vld [vmem:[%s11287_s7 + $0x4d0] sm:$0xff] }
  0x99   :  { %11426 = vst [vmem:[#allocation147_spill] sm:$0xff] %v8257_v2  ;;  %11427 = vst [vmem:[#allocation148_spill] sm:$0xff] %v8262_v3  ;;  %v8272_v14 = vld [vmem:[%s11287_s7 + $0x4d8] sm:$0xff]  ;;  %v8277_v61 = vld [vmem:[%s11287_s7 + $0x4e0] sm:$0xff] }
  0x9a   :  { %11428 = vst [vmem:[#allocation149_spill] sm:$0xff] %v8267_v15  ;;  %11429 = vst [vmem:[#allocation150_spill] sm:$0xff] %v8272_v14  ;;  %v8282_v60 = vld [vmem:[%s11287_s7 + $0x4e8] sm:$0xff]  ;;  %v8287_v20 = vld [vmem:[%s11287_s7 + $0x4f0] sm:$0xff] }
  0x9b   :  { %11430 = vst [vmem:[#allocation151_spill] sm:$0xff] %v8277_v61  ;;  %11431 = vst [vmem:[#allocation152_spill] sm:$0xff] %v8282_v60  ;;  %v8292_v21 = vld [vmem:[%s11287_s7 + $0x4f8] sm:$0xff]  ;;  %v8297_v13 = vld [vmem:[%s11287_s7 + $0x500] sm:$0xff] }
  0x9c   :  { %11432 = vst [vmem:[#allocation153_spill] sm:$0xff] %v8287_v20  ;;  %11433 = vst [vmem:[#allocation154_spill] sm:$0xff] %v8292_v21  ;;  %v8302_v61 = vld [vmem:[%s11287_s7 + $0x508] sm:$0xff]  ;;  %v8307_v60 = vld [vmem:[%s11287_s7 + $0x510] sm:$0xff] }
  0x9d   :  { %11434 = vst [vmem:[#allocation155_spill] sm:$0xff] %v8297_v13  ;;  %11435 = vst [vmem:[#allocation156_spill] sm:$0xff] %v8302_v61  ;;  %v8312_v20 = vld [vmem:[%s11287_s7 + $0x518] sm:$0xff]  ;;  %v8317_v21 = vld [vmem:[%s11287_s7 + $0x520] sm:$0xff] }
  0x9e   :  { %11436 = vst [vmem:[#allocation157_spill] sm:$0xff] %v8307_v60  ;;  %11437 = vst [vmem:[#allocation158_spill] sm:$0xff] %v8312_v20  ;;  %v8322_v13 = vld [vmem:[%s11287_s7 + $0x528] sm:$0xff]  ;;  %v8327_v61 = vld [vmem:[%s11287_s7 + $0x530] sm:$0xff] }
  0x9f   :  { %11438 = vst [vmem:[#allocation159_spill] sm:$0xff] %v8317_v21  ;;  %11439 = vst [vmem:[#allocation160_spill] sm:$0xff] %v8322_v13  ;;  %v8332_v60 = vld [vmem:[%s11287_s7 + $0x538] sm:$0xff]  ;;  %v8337_v20 = vld [vmem:[%s11287_s7 + $0x540] sm:$0xff] }
  0xa0   :  { %11440 = vst [vmem:[#allocation161_spill] sm:$0xff] %v8327_v61  ;;  %11441 = vst [vmem:[#allocation162_spill] sm:$0xff] %v8332_v60  ;;  %v8342_v21 = vld [vmem:[%s11287_s7 + $0x548] sm:$0xff]  ;;  %v8347_v13 = vld [vmem:[%s11287_s7 + $0x550] sm:$0xff] }
  0xa1   :  { %11442 = vst [vmem:[#allocation163_spill] sm:$0xff] %v8337_v20  ;;  %11443 = vst [vmem:[#allocation164_spill] sm:$0xff] %v8342_v21  ;;  %v8352_v61 = vld [vmem:[%s11287_s7 + $0x558] sm:$0xff]  ;;  %v8357_v60 = vld [vmem:[%s11287_s7 + $0x560] sm:$0xff] }
  0xa2   :  { %11444 = vst [vmem:[#allocation165_spill] sm:$0xff] %v8347_v13  ;;  %11445 = vst [vmem:[#allocation166_spill] sm:$0xff] %v8352_v61  ;;  %v8362_v20 = vld [vmem:[%s11287_s7 + $0x568] sm:$0xff]  ;;  %v8367_v21 = vld [vmem:[%s11287_s7 + $0x570] sm:$0xff] }
  0xa3   :  { %11446 = vst [vmem:[#allocation167_spill] sm:$0xff] %v8357_v60  ;;  %11447 = vst [vmem:[#allocation168_spill] sm:$0xff] %v8362_v20  ;;  %v8372_v13 = vld [vmem:[%s11287_s7 + $0x578] sm:$0xff]  ;;  %v8377_v61 = vld [vmem:[%s11287_s7 + $0x580] sm:$0xff] }
  0xa4   :  { %11448 = vst [vmem:[#allocation169_spill] sm:$0xff] %v8367_v21  ;;  %11449 = vst [vmem:[#allocation170_spill] sm:$0xff] %v8372_v13  ;;  %v8382_v60 = vld [vmem:[%s11287_s7 + $0x588] sm:$0xff]  ;;  %v8387_v20 = vld [vmem:[%s11287_s7 + $0x590] sm:$0xff] }
  0xa5   :  { %11450 = vst [vmem:[#allocation171_spill] sm:$0xff] %v8377_v61  ;;  %11451 = vst [vmem:[#allocation172_spill] sm:$0xff] %v8382_v60  ;;  %v8392_v21 = vld [vmem:[%s11287_s7 + $0x598] sm:$0xff]  ;;  %v8397_v13 = vld [vmem:[%s11287_s7 + $0x5a0] sm:$0xff] }
  0xa6   :  { %11452 = vst [vmem:[#allocation173_spill] sm:$0xff] %v8387_v20  ;;  %11453 = vst [vmem:[#allocation174_spill] sm:$0xff] %v8392_v21  ;;  %v8402_v61 = vld [vmem:[%s11287_s7 + $0x5a8] sm:$0xff]  ;;  %v8407_v60 = vld [vmem:[%s11287_s7 + $0x5b0] sm:$0xff] }
  0xa7   :  { %11454 = vst [vmem:[#allocation175_spill] sm:$0xff] %v8397_v13  ;;  %11455 = vst [vmem:[#allocation176_spill] sm:$0xff] %v8402_v61  ;;  %v8412_v20 = vld [vmem:[%s11287_s7 + $0x5b8] sm:$0xff]  ;;  %v8417_v21 = vld [vmem:[%s11287_s7 + $0x5c0] sm:$0xff] }
  0xa8   :  { %11456 = vst [vmem:[#allocation177_spill] sm:$0xff] %v8407_v60  ;;  %11457 = vst [vmem:[#allocation178_spill] sm:$0xff] %v8412_v20  ;;  %v8422_v13 = vld [vmem:[%s11287_s7 + $0x5c8] sm:$0xff]  ;;  %v8427_v61 = vld [vmem:[%s11287_s7 + $0x5d0] sm:$0xff] }
  0xa9   :  { %11458 = vst [vmem:[#allocation179_spill] sm:$0xff] %v8417_v21  ;;  %11459 = vst [vmem:[#allocation180_spill] sm:$0xff] %v8422_v13  ;;  %v8432_v60 = vld [vmem:[%s11287_s7 + $0x5d8] sm:$0xff]  ;;  %v8437_v20 = vld [vmem:[%s11287_s7 + $0x5e0] sm:$0xff] }
  0xaa   :  { %11460 = vst [vmem:[#allocation181_spill] sm:$0xff] %v8427_v61  ;;  %11461 = vst [vmem:[#allocation182_spill] sm:$0xff] %v8432_v60  ;;  %v8442_v21 = vld [vmem:[%s11287_s7 + $0x5e8] sm:$0xff]  ;;  %v8447_v13 = vld [vmem:[%s11287_s7 + $0x5f0] sm:$0xff] }
  0xab   :  { %11462 = vst [vmem:[#allocation183_spill] sm:$0xff] %v8437_v20  ;;  %11463 = vst [vmem:[#allocation184_spill] sm:$0xff] %v8442_v21  ;;  %v8452_v61 = vld [vmem:[%s11287_s7 + $0x5f8] sm:$0xff]  ;;  %v8457_v60 = vld [vmem:[%s11287_s7 + $0x600] sm:$0xff] }
  0xac   :  { %11464 = vst [vmem:[#allocation185_spill] sm:$0xff] %v8447_v13  ;;  %11465 = vst [vmem:[#allocation186_spill] sm:$0xff] %v8452_v61  ;;  %v8462_v20 = vld [vmem:[%s11287_s7 + $0x608] sm:$0xff]  ;;  %v8467_v21 = vld [vmem:[%s11287_s7 + $0x610] sm:$0xff] }
  0xad   :  { %11466 = vst [vmem:[#allocation187_spill] sm:$0xff] %v8457_v60  ;;  %11467 = vst [vmem:[#allocation188_spill] sm:$0xff] %v8462_v20  ;;  %v8472_v13 = vld [vmem:[%s11287_s7 + $0x618] sm:$0xff]  ;;  %v8477_v61 = vld [vmem:[%s11287_s7 + $0x620] sm:$0xff] }
  0xae   :  { %11468 = vst [vmem:[#allocation189_spill] sm:$0xff] %v8467_v21  ;;  %11469 = vst [vmem:[#allocation190_spill] sm:$0xff] %v8472_v13  ;;  %v8482_v60 = vld [vmem:[%s11287_s7 + $0x628] sm:$0xff]  ;;  %v8487_v20 = vld [vmem:[%s11287_s7 + $0x630] sm:$0xff] }
  0xaf   :  { %11470 = vst [vmem:[#allocation191_spill] sm:$0xff] %v8477_v61  ;;  %11471 = vst [vmem:[#allocation192_spill] sm:$0xff] %v8482_v60  ;;  %v8492_v21 = vld [vmem:[%s11287_s7 + $0x638] sm:$0xff]  ;;  %v8497_v13 = vld [vmem:[%s11287_s7 + $0x640] sm:$0xff] }
  0xb0   :  { %11472 = vst [vmem:[#allocation193_spill] sm:$0xff] %v8487_v20  ;;  %11473 = vst [vmem:[#allocation194_spill] sm:$0xff] %v8492_v21  ;;  %v8502_v61 = vld [vmem:[%s11287_s7 + $0x648] sm:$0xff]  ;;  %v8507_v60 = vld [vmem:[%s11287_s7 + $0x650] sm:$0xff] }
  0xb1   :  { %11474 = vst [vmem:[#allocation195_spill] sm:$0xff] %v8497_v13  ;;  %11475 = vst [vmem:[#allocation196_spill] sm:$0xff] %v8502_v61  ;;  %v8512_v20 = vld [vmem:[%s11287_s7 + $0x658] sm:$0xff]  ;;  %v8517_v21 = vld [vmem:[%s11287_s7 + $0x660] sm:$0xff] }
  0xb2   :  { %11476 = vst [vmem:[#allocation197_spill] sm:$0xff] %v8507_v60  ;;  %11477 = vst [vmem:[#allocation198_spill] sm:$0xff] %v8512_v20  ;;  %v8522_v13 = vld [vmem:[%s11287_s7 + $0x668] sm:$0xff]  ;;  %v8527_v61 = vld [vmem:[%s11287_s7 + $0x670] sm:$0xff] }
  0xb3   :  { %11478 = vst [vmem:[#allocation199_spill] sm:$0xff] %v8517_v21  ;;  %11479 = vst [vmem:[#allocation200_spill] sm:$0xff] %v8522_v13  ;;  %v8532_v60 = vld [vmem:[%s11287_s7 + $0x678] sm:$0xff]  ;;  %v8537_v20 = vld [vmem:[%s11287_s7 + $0x680] sm:$0xff] }
  0xb4   :  { %11480 = vst [vmem:[#allocation201_spill] sm:$0xff] %v8527_v61  ;;  %11481 = vst [vmem:[#allocation202_spill] sm:$0xff] %v8532_v60  ;;  %v8542_v21 = vld [vmem:[%s11287_s7 + $0x688] sm:$0xff]  ;;  %v8547_v13 = vld [vmem:[%s11287_s7 + $0x690] sm:$0xff] }
  0xb5   :  { %11482 = vst [vmem:[#allocation203_spill] sm:$0xff] %v8537_v20  ;;  %11483 = vst [vmem:[#allocation204_spill] sm:$0xff] %v8542_v21  ;;  %v8552_v61 = vld [vmem:[%s11287_s7 + $0x698] sm:$0xff]  ;;  %v8557_v60 = vld [vmem:[%s11287_s7 + $0x6a0] sm:$0xff] }
  0xb6   :  { %11484 = vst [vmem:[#allocation205_spill] sm:$0xff] %v8547_v13  ;;  %11485 = vst [vmem:[#allocation206_spill] sm:$0xff] %v8552_v61  ;;  %v8562_v20 = vld [vmem:[%s11287_s7 + $0x6a8] sm:$0xff]  ;;  %v8567_v21 = vld [vmem:[%s11287_s7 + $0x6b0] sm:$0xff] }
  0xb7   :  { %11486 = vst [vmem:[#allocation207_spill] sm:$0xff] %v8557_v60  ;;  %11487 = vst [vmem:[#allocation208_spill] sm:$0xff] %v8562_v20  ;;  %v8572_v13 = vld [vmem:[%s11287_s7 + $0x6b8] sm:$0xff]  ;;  %v8577_v61 = vld [vmem:[%s11287_s7 + $0x6c0] sm:$0xff] }
  0xb8   :  { %11488 = vst [vmem:[#allocation209_spill] sm:$0xff] %v8567_v21  ;;  %11489 = vst [vmem:[#allocation210_spill] sm:$0xff] %v8572_v13  ;;  %v8582_v60 = vld [vmem:[%s11287_s7 + $0x6c8] sm:$0xff]  ;;  %v8587_v20 = vld [vmem:[%s11287_s7 + $0x6d0] sm:$0xff] }
  0xb9   :  { %11490 = vst [vmem:[#allocation211_spill] sm:$0xff] %v8577_v61  ;;  %11491 = vst [vmem:[#allocation212_spill] sm:$0xff] %v8582_v60  ;;  %v8592_v21 = vld [vmem:[%s11287_s7 + $0x6d8] sm:$0xff]  ;;  %v8597_v13 = vld [vmem:[%s11287_s7 + $0x6e0] sm:$0xff] }
  0xba   :  { %11492 = vst [vmem:[#allocation213_spill] sm:$0xff] %v8587_v20  ;;  %11493 = vst [vmem:[#allocation214_spill] sm:$0xff] %v8592_v21  ;;  %v8602_v61 = vld [vmem:[%s11287_s7 + $0x6e8] sm:$0xff]  ;;  %v8607_v60 = vld [vmem:[%s11287_s7 + $0x6f0] sm:$0xff] }
  0xbb   :  { %11494 = vst [vmem:[#allocation215_spill] sm:$0xff] %v8597_v13  ;;  %11495 = vst [vmem:[#allocation216_spill] sm:$0xff] %v8602_v61  ;;  %v8612_v20 = vld [vmem:[%s11287_s7 + $0x6f8] sm:$0xff]  ;;  %v8617_v21 = vld [vmem:[%s11287_s7 + $0x700] sm:$0xff] }
  0xbc   :  { %11496 = vst [vmem:[#allocation217_spill] sm:$0xff] %v8607_v60  ;;  %11497 = vst [vmem:[#allocation218_spill] sm:$0xff] %v8612_v20  ;;  %v8622_v13 = vld [vmem:[%s11287_s7 + $0x708] sm:$0xff]  ;;  %v8627_v61 = vld [vmem:[%s11287_s7 + $0x710] sm:$0xff] }
  0xbd   :  { %11498 = vst [vmem:[#allocation219_spill] sm:$0xff] %v8617_v21  ;;  %11499 = vst [vmem:[#allocation220_spill] sm:$0xff] %v8622_v13  ;;  %v8632_v60 = vld [vmem:[%s11287_s7 + $0x718] sm:$0xff]  ;;  %v8637_v20 = vld [vmem:[%s11287_s7 + $0x720] sm:$0xff] }
  0xbe   :  { %11500 = vst [vmem:[#allocation221_spill] sm:$0xff] %v8627_v61  ;;  %11501 = vst [vmem:[#allocation222_spill] sm:$0xff] %v8632_v60  ;;  %v8642_v21 = vld [vmem:[%s11287_s7 + $0x728] sm:$0xff]  ;;  %v8647_v13 = vld [vmem:[%s11287_s7 + $0x730] sm:$0xff] }
  0xbf   :  { %11502 = vst [vmem:[#allocation223_spill] sm:$0xff] %v8637_v20  ;;  %11503 = vst [vmem:[#allocation224_spill] sm:$0xff] %v8642_v21  ;;  %v8652_v61 = vld [vmem:[%s11287_s7 + $0x738] sm:$0xff]  ;;  %v8657_v60 = vld [vmem:[%s11287_s7 + $0x740] sm:$0xff] }
  0xc0   :  { %11504 = vst [vmem:[#allocation225_spill] sm:$0xff] %v8647_v13  ;;  %11505 = vst [vmem:[#allocation226_spill] sm:$0xff] %v8652_v61  ;;  %v8662_v20 = vld [vmem:[%s11287_s7 + $0x748] sm:$0xff]  ;;  %v8667_v21 = vld [vmem:[%s11287_s7 + $0x750] sm:$0xff] }
  0xc1   :  { %11506 = vst [vmem:[#allocation227_spill] sm:$0xff] %v8657_v60  ;;  %11507 = vst [vmem:[#allocation228_spill] sm:$0xff] %v8662_v20  ;;  %v8672_v13 = vld [vmem:[%s11287_s7 + $0x758] sm:$0xff]  ;;  %v8677_v61 = vld [vmem:[%s11287_s7 + $0x760] sm:$0xff] }
  0xc2   :  { %11508 = vst [vmem:[#allocation229_spill] sm:$0xff] %v8667_v21  ;;  %11509 = vst [vmem:[#allocation230_spill] sm:$0xff] %v8672_v13  ;;  %v8682_v60 = vld [vmem:[%s11287_s7 + $0x768] sm:$0xff]  ;;  %v8687_v20 = vld [vmem:[%s11287_s7 + $0x770] sm:$0xff] }
  0xc3   :  { %11510 = vst [vmem:[#allocation231_spill] sm:$0xff] %v8677_v61  ;;  %11511 = vst [vmem:[#allocation232_spill] sm:$0xff] %v8682_v60  ;;  %v8692_v21 = vld [vmem:[%s11287_s7 + $0x778] sm:$0xff]  ;;  %v8697_v13 = vld [vmem:[%s11287_s7 + $0x780] sm:$0xff] }
  0xc4   :  { %11512 = vst [vmem:[#allocation233_spill] sm:$0xff] %v8687_v20  ;;  %11513 = vst [vmem:[#allocation234_spill] sm:$0xff] %v8692_v21  ;;  %v8702_v61 = vld [vmem:[%s11287_s7 + $0x788] sm:$0xff]  ;;  %v8707_v60 = vld [vmem:[%s11287_s7 + $0x790] sm:$0xff] }
  0xc5   :  { %11514 = vst [vmem:[#allocation235_spill] sm:$0xff] %v8697_v13  ;;  %11515 = vst [vmem:[#allocation236_spill] sm:$0xff] %v8702_v61  ;;  %v8712_v20 = vld [vmem:[%s11287_s7 + $0x798] sm:$0xff]  ;;  %v8717_v21 = vld [vmem:[%s11287_s7 + $0x7a0] sm:$0xff] }
  0xc6   :  { %11516 = vst [vmem:[#allocation237_spill] sm:$0xff] %v8707_v60  ;;  %11517 = vst [vmem:[#allocation238_spill] sm:$0xff] %v8712_v20  ;;  %v8722_v13 = vld [vmem:[%s11287_s7 + $0x7a8] sm:$0xff]  ;;  %v8727_v61 = vld [vmem:[%s11287_s7 + $0x7b0] sm:$0xff] }
  0xc7   :  { %11518 = vst [vmem:[#allocation239_spill] sm:$0xff] %v8717_v21  ;;  %11519 = vst [vmem:[#allocation240_spill] sm:$0xff] %v8722_v13  ;;  %v8732_v60 = vld [vmem:[%s11287_s7 + $0x7b8] sm:$0xff]  ;;  %v8737_v20 = vld [vmem:[%s11287_s7 + $0x7c0] sm:$0xff] }
  0xc8   :  { %11520 = vst [vmem:[#allocation241_spill] sm:$0xff] %v8727_v61  ;;  %11521 = vst [vmem:[#allocation242_spill] sm:$0xff] %v8732_v60  ;;  %v8742_v21 = vld [vmem:[%s11287_s7 + $0x7c8] sm:$0xff]  ;;  %v8747_v13 = vld [vmem:[%s11287_s7 + $0x7d0] sm:$0xff] }
  0xc9   :  { %11522 = vst [vmem:[#allocation243_spill] sm:$0xff] %v8737_v20  ;;  %11523 = vst [vmem:[#allocation244_spill] sm:$0xff] %v8742_v21  ;;  %v8752_v61 = vld [vmem:[%s11287_s7 + $0x7d8] sm:$0xff]  ;;  %v8757_v60 = vld [vmem:[%s11287_s7 + $0x7e0] sm:$0xff] }
  0xca   :  { %11524 = vst [vmem:[#allocation245_spill] sm:$0xff] %v8747_v13  ;;  %11525 = vst [vmem:[#allocation246_spill] sm:$0xff] %v8752_v61  ;;  %v8762_v20 = vld [vmem:[%s11287_s7 + $0x7e8] sm:$0xff]  ;;  %v8767_v21 = vld [vmem:[%s11287_s7 + $0x7f0] sm:$0xff] }
  0xcb   :  { %11526 = vst [vmem:[#allocation247_spill] sm:$0xff] %v8757_v60  ;;  %11527 = vst [vmem:[#allocation248_spill] sm:$0xff] %v8762_v20  ;;  %v8772_v13 = vld [vmem:[%s11287_s7 + $0x7f8] sm:$0xff]  ;;  %v8777_v61 = vld [vmem:[%s11287_s7 + $0x800] sm:$0xff] }
  0xcc   :  { %11528 = vst [vmem:[#allocation249_spill] sm:$0xff] %v8767_v21  ;;  %11529 = vst [vmem:[#allocation250_spill] sm:$0xff] %v8772_v13  ;;  %v8782_v60 = vld [vmem:[%s11287_s7 + $0x808] sm:$0xff]  ;;  %v8787_v20 = vld [vmem:[%s11287_s7 + $0x810] sm:$0xff] }
  0xcd   :  { %11530 = vst [vmem:[#allocation251_spill] sm:$0xff] %v8777_v61  ;;  %11531 = vst [vmem:[#allocation252_spill] sm:$0xff] %v8782_v60  ;;  %v8792_v21 = vld [vmem:[%s11287_s7 + $0x818] sm:$0xff]  ;;  %v8797_v13 = vld [vmem:[%s11287_s7 + $0x820] sm:$0xff] }
  0xce   :  { %11532 = vst [vmem:[#allocation253_spill] sm:$0xff] %v8787_v20  ;;  %11533 = vst [vmem:[#allocation254_spill] sm:$0xff] %v8792_v21  ;;  %v8802_v61 = vld [vmem:[%s11287_s7 + $0x828] sm:$0xff]  ;;  %v8807_v60 = vld [vmem:[%s11287_s7 + $0x830] sm:$0xff] }
  0xcf   :  { %11534 = vst [vmem:[#allocation255_spill] sm:$0xff] %v8797_v13  ;;  %11535 = vst [vmem:[#allocation256_spill] sm:$0xff] %v8802_v61  ;;  %v8812_v20 = vld [vmem:[%s11287_s7 + $0x838] sm:$0xff]  ;;  %v8817_v21 = vld [vmem:[%s11287_s7 + $0x840] sm:$0xff] }
  0xd0   :  { %11536 = vst [vmem:[#allocation257_spill] sm:$0xff] %v8807_v60  ;;  %11537 = vst [vmem:[#allocation258_spill] sm:$0xff] %v8812_v20  ;;  %v8822_v13 = vld [vmem:[%s11287_s7 + $0x848] sm:$0xff]  ;;  %v8827_v61 = vld [vmem:[%s11287_s7 + $0x850] sm:$0xff] }
  0xd1   :  { %11538 = vst [vmem:[#allocation259_spill] sm:$0xff] %v8817_v21  ;;  %11539 = vst [vmem:[#allocation260_spill] sm:$0xff] %v8822_v13  ;;  %v8832_v60 = vld [vmem:[%s11287_s7 + $0x858] sm:$0xff]  ;;  %v8837_v20 = vld [vmem:[%s11287_s7 + $0x860] sm:$0xff] }
  0xd2   :  { %11540 = vst [vmem:[#allocation261_spill] sm:$0xff] %v8827_v61  ;;  %11541 = vst [vmem:[#allocation262_spill] sm:$0xff] %v8832_v60  ;;  %v8842_v21 = vld [vmem:[%s11287_s7 + $0x868] sm:$0xff]  ;;  %v8847_v13 = vld [vmem:[%s11287_s7 + $0x870] sm:$0xff] }
  0xd3   :  { %11542 = vst [vmem:[#allocation263_spill] sm:$0xff] %v8837_v20  ;;  %11543 = vst [vmem:[#allocation264_spill] sm:$0xff] %v8842_v21  ;;  %v8852_v61 = vld [vmem:[%s11287_s7 + $0x878] sm:$0xff]  ;;  %v8857_v60 = vld [vmem:[%s11287_s7 + $0x880] sm:$0xff] }
  0xd4   :  { %11544 = vst [vmem:[#allocation265_spill] sm:$0xff] %v8847_v13  ;;  %11545 = vst [vmem:[#allocation266_spill] sm:$0xff] %v8852_v61  ;;  %v8862_v20 = vld [vmem:[%s11287_s7 + $0x888] sm:$0xff]  ;;  %v8867_v21 = vld [vmem:[%s11287_s7 + $0x890] sm:$0xff] }
  0xd5   :  { %11546 = vst [vmem:[#allocation267_spill] sm:$0xff] %v8857_v60  ;;  %11547 = vst [vmem:[#allocation268_spill] sm:$0xff] %v8862_v20  ;;  %v8872_v13 = vld [vmem:[%s11287_s7 + $0x898] sm:$0xff]  ;;  %v8877_v61 = vld [vmem:[%s11287_s7 + $0x8a0] sm:$0xff] }
  0xd6   :  { %11548 = vst [vmem:[#allocation269_spill] sm:$0xff] %v8867_v21  ;;  %11549 = vst [vmem:[#allocation270_spill] sm:$0xff] %v8872_v13  ;;  %v8882_v60 = vld [vmem:[%s11287_s7 + $0x8a8] sm:$0xff]  ;;  %v8887_v20 = vld [vmem:[%s11287_s7 + $0x8b0] sm:$0xff] }
  0xd7   :  { %11550 = vst [vmem:[#allocation271_spill] sm:$0xff] %v8877_v61  ;;  %11551 = vst [vmem:[#allocation272_spill] sm:$0xff] %v8882_v60  ;;  %v8892_v21 = vld [vmem:[%s11287_s7 + $0x8b8] sm:$0xff]  ;;  %v8897_v13 = vld [vmem:[%s11287_s7 + $0x8c0] sm:$0xff] }
  0xd8   :  { %11552 = vst [vmem:[#allocation273_spill] sm:$0xff] %v8887_v20  ;;  %11553 = vst [vmem:[#allocation274_spill] sm:$0xff] %v8892_v21  ;;  %v8902_v61 = vld [vmem:[%s11287_s7 + $0x8c8] sm:$0xff]  ;;  %v8907_v60 = vld [vmem:[%s11287_s7 + $0x8d0] sm:$0xff] }
  0xd9   :  { %11554 = vst [vmem:[#allocation275_spill] sm:$0xff] %v8897_v13  ;;  %11555 = vst [vmem:[#allocation276_spill] sm:$0xff] %v8902_v61  ;;  %v8912_v20 = vld [vmem:[%s11287_s7 + $0x8d8] sm:$0xff]  ;;  %v8917_v21 = vld [vmem:[%s11287_s7 + $0x8e0] sm:$0xff] }
  0xda   :  { %11556 = vst [vmem:[#allocation277_spill] sm:$0xff] %v8907_v60  ;;  %11557 = vst [vmem:[#allocation278_spill] sm:$0xff] %v8912_v20  ;;  %v8922_v13 = vld [vmem:[%s11287_s7 + $0x8e8] sm:$0xff]  ;;  %v8927_v61 = vld [vmem:[%s11287_s7 + $0x8f0] sm:$0xff] }
  0xdb   :  { %11558 = vst [vmem:[#allocation279_spill] sm:$0xff] %v8917_v21  ;;  %11559 = vst [vmem:[#allocation280_spill] sm:$0xff] %v8922_v13  ;;  %v8932_v60 = vld [vmem:[%s11287_s7 + $0x8f8] sm:$0xff]  ;;  %v8937_v20 = vld [vmem:[%s11287_s7 + $0x900] sm:$0xff] }
  0xdc   :  { %11560 = vst [vmem:[#allocation281_spill] sm:$0xff] %v8927_v61  ;;  %11561 = vst [vmem:[#allocation282_spill] sm:$0xff] %v8932_v60  ;;  %v8942_v21 = vld [vmem:[%s11287_s7 + $0x908] sm:$0xff]  ;;  %v8947_v13 = vld [vmem:[%s11287_s7 + $0x910] sm:$0xff] }
  0xdd   :  { %11562 = vst [vmem:[#allocation283_spill] sm:$0xff] %v8937_v20  ;;  %11563 = vst [vmem:[#allocation284_spill] sm:$0xff] %v8942_v21  ;;  %v8952_v61 = vld [vmem:[%s11287_s7 + $0x918] sm:$0xff]  ;;  %v8957_v60 = vld [vmem:[%s11287_s7 + $0x920] sm:$0xff] }
  0xde   :  { %11564 = vst [vmem:[#allocation285_spill] sm:$0xff] %v8947_v13  ;;  %11565 = vst [vmem:[#allocation286_spill] sm:$0xff] %v8952_v61  ;;  %v8962_v20 = vld [vmem:[%s11287_s7 + $0x928] sm:$0xff]  ;;  %v8967_v21 = vld [vmem:[%s11287_s7 + $0x930] sm:$0xff] }
  0xdf   :  { %11566 = vst [vmem:[#allocation287_spill] sm:$0xff] %v8957_v60  ;;  %11567 = vst [vmem:[#allocation288_spill] sm:$0xff] %v8962_v20  ;;  %v8972_v13 = vld [vmem:[%s11287_s7 + $0x938] sm:$0xff]  ;;  %v8977_v61 = vld [vmem:[%s11287_s7 + $0x940] sm:$0xff] }
  0xe0   :  { %11568 = vst [vmem:[#allocation289_spill] sm:$0xff] %v8967_v21  ;;  %11569 = vst [vmem:[#allocation290_spill] sm:$0xff] %v8972_v13  ;;  %v8982_v60 = vld [vmem:[%s11287_s7 + $0x948] sm:$0xff]  ;;  %v8987_v20 = vld [vmem:[%s11287_s7 + $0x950] sm:$0xff] }
  0xe1   :  { %11570 = vst [vmem:[#allocation291_spill] sm:$0xff] %v8977_v61  ;;  %11571 = vst [vmem:[#allocation292_spill] sm:$0xff] %v8982_v60  ;;  %v8992_v21 = vld [vmem:[%s11287_s7 + $0x958] sm:$0xff]  ;;  %v8997_v13 = vld [vmem:[%s11287_s7 + $0x960] sm:$0xff] }
  0xe2   :  { %11572 = vst [vmem:[#allocation293_spill] sm:$0xff] %v8987_v20  ;;  %11573 = vst [vmem:[#allocation294_spill] sm:$0xff] %v8992_v21  ;;  %v9002_v61 = vld [vmem:[%s11287_s7 + $0x968] sm:$0xff]  ;;  %v9007_v60 = vld [vmem:[%s11287_s7 + $0x970] sm:$0xff] }
  0xe3   :  { %11574 = vst [vmem:[#allocation295_spill] sm:$0xff] %v8997_v13  ;;  %11575 = vst [vmem:[#allocation296_spill] sm:$0xff] %v9002_v61  ;;  %v9012_v20 = vld [vmem:[%s11287_s7 + $0x978] sm:$0xff]  ;;  %v9017_v21 = vld [vmem:[%s11287_s7 + $0x980] sm:$0xff] }
  0xe4   :  { %11576 = vst [vmem:[#allocation297_spill] sm:$0xff] %v9007_v60  ;;  %11577 = vst [vmem:[#allocation298_spill] sm:$0xff] %v9012_v20  ;;  %v9022_v13 = vld [vmem:[%s11287_s7 + $0x988] sm:$0xff]  ;;  %v9027_v61 = vld [vmem:[%s11287_s7 + $0x990] sm:$0xff] }
  0xe5   :  { %11578 = vst [vmem:[#allocation299_spill] sm:$0xff] %v9017_v21  ;;  %11579 = vst [vmem:[#allocation300_spill] sm:$0xff] %v9022_v13  ;;  %v9032_v60 = vld [vmem:[%s11287_s7 + $0x998] sm:$0xff]  ;;  %v9037_v20 = vld [vmem:[%s11287_s7 + $0x9a0] sm:$0xff] }
  0xe6   :  { %11580 = vst [vmem:[#allocation301_spill] sm:$0xff] %v9027_v61  ;;  %11581 = vst [vmem:[#allocation302_spill] sm:$0xff] %v9032_v60  ;;  %v9042_v21 = vld [vmem:[%s11287_s7 + $0x9a8] sm:$0xff]  ;;  %v9047_v13 = vld [vmem:[%s11287_s7 + $0x9b0] sm:$0xff] }
  0xe7   :  { %11582 = vst [vmem:[#allocation303_spill] sm:$0xff] %v9037_v20  ;;  %11583 = vst [vmem:[#allocation304_spill] sm:$0xff] %v9042_v21  ;;  %v9052_v61 = vld [vmem:[%s11287_s7 + $0x9b8] sm:$0xff]  ;;  %v9057_v60 = vld [vmem:[%s11287_s7 + $0x9c0] sm:$0xff] }
  0xe8   :  { %11584 = vst [vmem:[#allocation305_spill] sm:$0xff] %v9047_v13  ;;  %11585 = vst [vmem:[#allocation306_spill] sm:$0xff] %v9052_v61  ;;  %v9062_v20 = vld [vmem:[%s11287_s7 + $0x9c8] sm:$0xff]  ;;  %v9067_v21 = vld [vmem:[%s11287_s7 + $0x9d0] sm:$0xff] }
  0xe9   :  { %11586 = vst [vmem:[#allocation307_spill] sm:$0xff] %v9057_v60  ;;  %11587 = vst [vmem:[#allocation308_spill] sm:$0xff] %v9062_v20  ;;  %v9072_v13 = vld [vmem:[%s11287_s7 + $0x9d8] sm:$0xff]  ;;  %v9077_v61 = vld [vmem:[%s11287_s7 + $0x9e0] sm:$0xff] }
  0xea   :  { %11588 = vst [vmem:[#allocation309_spill] sm:$0xff] %v9067_v21  ;;  %11589 = vst [vmem:[#allocation310_spill] sm:$0xff] %v9072_v13  ;;  %v9082_v60 = vld [vmem:[%s11287_s7 + $0x9e8] sm:$0xff]  ;;  %v9087_v20 = vld [vmem:[%s11287_s7 + $0x9f0] sm:$0xff] }
  0xeb   :  { %11590 = vst [vmem:[#allocation311_spill] sm:$0xff] %v9077_v61  ;;  %11591 = vst [vmem:[#allocation312_spill] sm:$0xff] %v9082_v60  ;;  %v9092_v21 = vld [vmem:[%s11287_s7 + $0x9f8] sm:$0xff]  ;;  %v9097_v13 = vld [vmem:[%s11287_s7 + $0xa00] sm:$0xff] }
  0xec   :  { %11592 = vst [vmem:[#allocation313_spill] sm:$0xff] %v9087_v20  ;;  %11593 = vst [vmem:[#allocation314_spill] sm:$0xff] %v9092_v21  ;;  %v9102_v61 = vld [vmem:[%s11287_s7 + $0xa08] sm:$0xff]  ;;  %v9107_v60 = vld [vmem:[%s11287_s7 + $0xa10] sm:$0xff] }
  0xed   :  { %11594 = vst [vmem:[#allocation315_spill] sm:$0xff] %v9097_v13  ;;  %11595 = vst [vmem:[#allocation316_spill] sm:$0xff] %v9102_v61  ;;  %v9112_v20 = vld [vmem:[%s11287_s7 + $0xa18] sm:$0xff]  ;;  %v9117_v21 = vld [vmem:[%s11287_s7 + $0xa20] sm:$0xff] }
  0xee   :  { %11596 = vst [vmem:[#allocation317_spill] sm:$0xff] %v9107_v60  ;;  %11597 = vst [vmem:[#allocation318_spill] sm:$0xff] %v9112_v20  ;;  %v9122_v13 = vld [vmem:[%s11287_s7 + $0xa28] sm:$0xff]  ;;  %v9127_v61 = vld [vmem:[%s11287_s7 + $0xa30] sm:$0xff] }
  0xef   :  { %11598 = vst [vmem:[#allocation319_spill] sm:$0xff] %v9117_v21  ;;  %11599 = vst [vmem:[#allocation320_spill] sm:$0xff] %v9122_v13  ;;  %v9132_v60 = vld [vmem:[%s11287_s7 + $0xa38] sm:$0xff]  ;;  %v9137_v20 = vld [vmem:[%s11287_s7 + $0xa40] sm:$0xff] }
  0xf0   :  { %11600 = vst [vmem:[#allocation321_spill] sm:$0xff] %v9127_v61  ;;  %11601 = vst [vmem:[#allocation322_spill] sm:$0xff] %v9132_v60  ;;  %v9142_v21 = vld [vmem:[%s11287_s7 + $0xa48] sm:$0xff]  ;;  %v9147_v13 = vld [vmem:[%s11287_s7 + $0xa50] sm:$0xff] }
  0xf1   :  { %11602 = vst [vmem:[#allocation323_spill] sm:$0xff] %v9137_v20  ;;  %11603 = vst [vmem:[#allocation324_spill] sm:$0xff] %v9142_v21  ;;  %v9152_v61 = vld [vmem:[%s11287_s7 + $0xa58] sm:$0xff]  ;;  %v9157_v60 = vld [vmem:[%s11287_s7 + $0xa60] sm:$0xff] }
  0xf2   :  { %11604 = vst [vmem:[#allocation325_spill] sm:$0xff] %v9147_v13  ;;  %11605 = vst [vmem:[#allocation326_spill] sm:$0xff] %v9152_v61  ;;  %v9162_v20 = vld [vmem:[%s11287_s7 + $0xa68] sm:$0xff]  ;;  %v9167_v21 = vld [vmem:[%s11287_s7 + $0xa70] sm:$0xff] }
  0xf3   :  { %11606 = vst [vmem:[#allocation327_spill] sm:$0xff] %v9157_v60  ;;  %11607 = vst [vmem:[#allocation328_spill] sm:$0xff] %v9162_v20  ;;  %v9172_v13 = vld [vmem:[%s11287_s7 + $0xa78] sm:$0xff]  ;;  %v9177_v61 = vld [vmem:[%s11287_s7 + $0xa80] sm:$0xff] }
  0xf4   :  { %11608 = vst [vmem:[#allocation329_spill] sm:$0xff] %v9167_v21  ;;  %11609 = vst [vmem:[#allocation330_spill] sm:$0xff] %v9172_v13  ;;  %v9182_v60 = vld [vmem:[%s11287_s7 + $0xa88] sm:$0xff]  ;;  %v9187_v20 = vld [vmem:[%s11287_s7 + $0xa90] sm:$0xff] }
  0xf5   :  { %11610 = vst [vmem:[#allocation331_spill] sm:$0xff] %v9177_v61  ;;  %11611 = vst [vmem:[#allocation332_spill] sm:$0xff] %v9182_v60  ;;  %v9192_v21 = vld [vmem:[%s11287_s7 + $0xa98] sm:$0xff]  ;;  %v9197_v13 = vld [vmem:[%s11287_s7 + $0xaa0] sm:$0xff] }
  0xf6   :  { %11612 = vst [vmem:[#allocation333_spill] sm:$0xff] %v9187_v20  ;;  %11613 = vst [vmem:[#allocation334_spill] sm:$0xff] %v9192_v21  ;;  %v9202_v61 = vld [vmem:[%s11287_s7 + $0xaa8] sm:$0xff]  ;;  %v9207_v60 = vld [vmem:[%s11287_s7 + $0xab0] sm:$0xff] }
  0xf7   :  { %11614 = vst [vmem:[#allocation335_spill] sm:$0xff] %v9197_v13  ;;  %11615 = vst [vmem:[#allocation336_spill] sm:$0xff] %v9202_v61  ;;  %v9212_v20 = vld [vmem:[%s11287_s7 + $0xab8] sm:$0xff]  ;;  %v9217_v21 = vld [vmem:[%s11287_s7 + $0xac0] sm:$0xff] }
  0xf8   :  { %11616 = vst [vmem:[#allocation337_spill] sm:$0xff] %v9207_v60  ;;  %11617 = vst [vmem:[#allocation338_spill] sm:$0xff] %v9212_v20  ;;  %v9222_v13 = vld [vmem:[%s11287_s7 + $0xac8] sm:$0xff]  ;;  %v9227_v61 = vld [vmem:[%s11287_s7 + $0xad0] sm:$0xff] }
  0xf9   :  { %11618 = vst [vmem:[#allocation339_spill] sm:$0xff] %v9217_v21  ;;  %11619 = vst [vmem:[#allocation340_spill] sm:$0xff] %v9222_v13  ;;  %v9232_v60 = vld [vmem:[%s11287_s7 + $0xad8] sm:$0xff]  ;;  %v9237_v20 = vld [vmem:[%s11287_s7 + $0xae0] sm:$0xff] }
  0xfa   :  { %11620 = vst [vmem:[#allocation341_spill] sm:$0xff] %v9227_v61  ;;  %11621 = vst [vmem:[#allocation342_spill] sm:$0xff] %v9232_v60  ;;  %v9242_v21 = vld [vmem:[%s11287_s7 + $0xae8] sm:$0xff]  ;;  %v9247_v13 = vld [vmem:[%s11287_s7 + $0xaf0] sm:$0xff] }
  0xfb   :  { %11622 = vst [vmem:[#allocation343_spill] sm:$0xff] %v9237_v20  ;;  %11623 = vst [vmem:[#allocation344_spill] sm:$0xff] %v9242_v21  ;;  %v9252_v61 = vld [vmem:[%s11287_s7 + $0xaf8] sm:$0xff]  ;;  %v9257_v60 = vld [vmem:[%s11287_s7 + $0xb00] sm:$0xff] }
  0xfc   :  { %11624 = vst [vmem:[#allocation345_spill] sm:$0xff] %v9247_v13  ;;  %11625 = vst [vmem:[#allocation346_spill] sm:$0xff] %v9252_v61  ;;  %v9262_v20 = vld [vmem:[%s11287_s7 + $0xb08] sm:$0xff]  ;;  %v9267_v21 = vld [vmem:[%s11287_s7 + $0xb10] sm:$0xff] }
  0xfd   :  { %11626 = vst [vmem:[#allocation347_spill] sm:$0xff] %v9257_v60  ;;  %11627 = vst [vmem:[#allocation348_spill] sm:$0xff] %v9262_v20  ;;  %v9272_v13 = vld [vmem:[%s11287_s7 + $0xb18] sm:$0xff]  ;;  %v9277_v61 = vld [vmem:[%s11287_s7 + $0xb20] sm:$0xff] }
  0xfe   :  { %11628 = vst [vmem:[#allocation349_spill] sm:$0xff] %v9267_v21  ;;  %11629 = vst [vmem:[#allocation350_spill] sm:$0xff] %v9272_v13  ;;  %v9282_v60 = vld [vmem:[%s11287_s7 + $0xb28] sm:$0xff]  ;;  %v9287_v20 = vld [vmem:[%s11287_s7 + $0xb30] sm:$0xff] }
  0xff   :  { %11630 = vst [vmem:[#allocation351_spill] sm:$0xff] %v9277_v61  ;;  %11631 = vst [vmem:[#allocation352_spill] sm:$0xff] %v9282_v60  ;;  %v9292_v21 = vld [vmem:[%s11287_s7 + $0xb38] sm:$0xff]  ;;  %v9297_v13 = vld [vmem:[%s11287_s7 + $0xb40] sm:$0xff] }
 0x100   :  { %11632 = vst [vmem:[#allocation353_spill] sm:$0xff] %v9287_v20  ;;  %11633 = vst [vmem:[#allocation354_spill] sm:$0xff] %v9292_v21  ;;  %v9302_v61 = vld [vmem:[%s11287_s7 + $0xb48] sm:$0xff]  ;;  %v9307_v60 = vld [vmem:[%s11287_s7 + $0xb50] sm:$0xff] }
 0x101   :  { %11634 = vst [vmem:[#allocation355_spill] sm:$0xff] %v9297_v13  ;;  %11635 = vst [vmem:[#allocation356_spill] sm:$0xff] %v9302_v61  ;;  %v9312_v20 = vld [vmem:[%s11287_s7 + $0xb58] sm:$0xff]  ;;  %v9317_v21 = vld [vmem:[%s11287_s7 + $0xb60] sm:$0xff] }
 0x102   :  { %11636 = vst [vmem:[#allocation357_spill] sm:$0xff] %v9307_v60  ;;  %11637 = vst [vmem:[#allocation358_spill] sm:$0xff] %v9312_v20  ;;  %v9322_v13 = vld [vmem:[%s11287_s7 + $0xb68] sm:$0xff]  ;;  %v9327_v61 = vld [vmem:[%s11287_s7 + $0xb70] sm:$0xff] }
 0x103   :  { %11638 = vst [vmem:[#allocation359_spill] sm:$0xff] %v9317_v21  ;;  %11639 = vst [vmem:[#allocation360_spill] sm:$0xff] %v9322_v13  ;;  %v9332_v60 = vld [vmem:[%s11287_s7 + $0xb78] sm:$0xff]  ;;  %v9337_v20 = vld [vmem:[%s11287_s7 + $0xb80] sm:$0xff] }
 0x104   :  { %11640 = vst [vmem:[#allocation361_spill] sm:$0xff] %v9327_v61  ;;  %11641 = vst [vmem:[#allocation362_spill] sm:$0xff] %v9332_v60  ;;  %v9342_v21 = vld [vmem:[%s11287_s7 + $0xb88] sm:$0xff]  ;;  %v9347_v13 = vld [vmem:[%s11287_s7 + $0xb90] sm:$0xff] }
 0x105   :  { %11642 = vst [vmem:[#allocation363_spill] sm:$0xff] %v9337_v20  ;;  %11643 = vst [vmem:[#allocation364_spill] sm:$0xff] %v9342_v21  ;;  %v9352_v61 = vld [vmem:[%s11287_s7 + $0xb98] sm:$0xff]  ;;  %v9357_v60 = vld [vmem:[%s11287_s7 + $0xba0] sm:$0xff] }
 0x106   :  { %11644 = vst [vmem:[#allocation365_spill] sm:$0xff] %v9347_v13  ;;  %11645 = vst [vmem:[#allocation366_spill] sm:$0xff] %v9352_v61  ;;  %v9362_v20 = vld [vmem:[%s11287_s7 + $0xba8] sm:$0xff]  ;;  %v9367_v21 = vld [vmem:[%s11287_s7 + $0xbb0] sm:$0xff] }
 0x107   :  { %11646 = vst [vmem:[#allocation367_spill] sm:$0xff] %v9357_v60  ;;  %11647 = vst [vmem:[#allocation368_spill] sm:$0xff] %v9362_v20  ;;  %v9372_v13 = vld [vmem:[%s11287_s7 + $0xbb8] sm:$0xff]  ;;  %v9377_v61 = vld [vmem:[%s11287_s7 + $0xbc0] sm:$0xff] }
 0x108   :  { %11648 = vst [vmem:[#allocation369_spill] sm:$0xff] %v9367_v21  ;;  %11649 = vst [vmem:[#allocation370_spill] sm:$0xff] %v9372_v13  ;;  %v9382_v60 = vld [vmem:[%s11287_s7 + $0xbc8] sm:$0xff]  ;;  %v9387_v20 = vld [vmem:[%s11287_s7 + $0xbd0] sm:$0xff] }
 0x109   :  { %11650 = vst [vmem:[#allocation371_spill] sm:$0xff] %v9377_v61  ;;  %11651 = vst [vmem:[#allocation372_spill] sm:$0xff] %v9382_v60  ;;  %v9392_v21 = vld [vmem:[%s11287_s7 + $0xbd8] sm:$0xff]  ;;  %v9397_v13 = vld [vmem:[%s11287_s7 + $0xbe0] sm:$0xff] }
 0x10a   :  { %11652 = vst [vmem:[#allocation373_spill] sm:$0xff] %v9387_v20  ;;  %11653 = vst [vmem:[#allocation374_spill] sm:$0xff] %v9392_v21  ;;  %v9402_v61 = vld [vmem:[%s11287_s7 + $0xbe8] sm:$0xff]  ;;  %v9407_v60 = vld [vmem:[%s11287_s7 + $0xbf0] sm:$0xff] }
 0x10b   :  { %11654 = vst [vmem:[#allocation375_spill] sm:$0xff] %v9397_v13  ;;  %11655 = vst [vmem:[#allocation376_spill] sm:$0xff] %v9402_v61  ;;  %v9412_v20 = vld [vmem:[%s11287_s7 + $0xbf8] sm:$0xff]  ;;  %v9417_v21 = vld [vmem:[%s11287_s7 + $0xc00] sm:$0xff] }
 0x10c   :  { %11656 = vst [vmem:[#allocation377_spill] sm:$0xff] %v9407_v60  ;;  %11657 = vst [vmem:[#allocation378_spill] sm:$0xff] %v9412_v20  ;;  %v9422_v13 = vld [vmem:[%s11287_s7 + $0xc08] sm:$0xff]  ;;  %v9427_v61 = vld [vmem:[%s11287_s7 + $0xc10] sm:$0xff] }
 0x10d   :  { %11658 = vst [vmem:[#allocation379_spill] sm:$0xff] %v9417_v21  ;;  %11659 = vst [vmem:[#allocation380_spill] sm:$0xff] %v9422_v13  ;;  %v9432_v60 = vld [vmem:[%s11287_s7 + $0xc18] sm:$0xff]  ;;  %v9437_v20 = vld [vmem:[%s11287_s7 + $0xc20] sm:$0xff] }
 0x10e   :  { %11660 = vst [vmem:[#allocation381_spill] sm:$0xff] %v9427_v61  ;;  %11661 = vst [vmem:[#allocation382_spill] sm:$0xff] %v9432_v60  ;;  %v9442_v21 = vld [vmem:[%s11287_s7 + $0xc28] sm:$0xff]  ;;  %v9447_v13 = vld [vmem:[%s11287_s7 + $0xc30] sm:$0xff] }
 0x10f   :  { %11662 = vst [vmem:[#allocation383_spill] sm:$0xff] %v9437_v20  ;;  %11663 = vst [vmem:[#allocation384_spill] sm:$0xff] %v9442_v21  ;;  %v9452_v61 = vld [vmem:[%s11287_s7 + $0xc38] sm:$0xff]  ;;  %v9457_v60 = vld [vmem:[%s11287_s7 + $0xc40] sm:$0xff] }
 0x110   :  { %11664 = vst [vmem:[#allocation385_spill] sm:$0xff] %v9447_v13  ;;  %11665 = vst [vmem:[#allocation386_spill] sm:$0xff] %v9452_v61  ;;  %v9462_v20 = vld [vmem:[%s11287_s7 + $0xc48] sm:$0xff]  ;;  %v9467_v21 = vld [vmem:[%s11287_s7 + $0xc50] sm:$0xff] }
 0x111   :  { %11666 = vst [vmem:[#allocation387_spill] sm:$0xff] %v9457_v60  ;;  %11667 = vst [vmem:[#allocation388_spill] sm:$0xff] %v9462_v20  ;;  %v9472_v13 = vld [vmem:[%s11287_s7 + $0xc58] sm:$0xff]  ;;  %v9477_v61 = vld [vmem:[%s11287_s7 + $0xc60] sm:$0xff] }
 0x112   :  { %11668 = vst [vmem:[#allocation389_spill] sm:$0xff] %v9467_v21  ;;  %11669 = vst [vmem:[#allocation390_spill] sm:$0xff] %v9472_v13  ;;  %v9482_v60 = vld [vmem:[%s11287_s7 + $0xc68] sm:$0xff]  ;;  %v9487_v20 = vld [vmem:[%s11287_s7 + $0xc70] sm:$0xff] }
 0x113   :  { %11670 = vst [vmem:[#allocation391_spill] sm:$0xff] %v9477_v61  ;;  %11671 = vst [vmem:[#allocation392_spill] sm:$0xff] %v9482_v60  ;;  %v9492_v21 = vld [vmem:[%s11287_s7 + $0xc78] sm:$0xff]  ;;  %v9497_v13 = vld [vmem:[%s11287_s7 + $0xc80] sm:$0xff] }
 0x114   :  { %11672 = vst [vmem:[#allocation393_spill] sm:$0xff] %v9487_v20  ;;  %11673 = vst [vmem:[#allocation394_spill] sm:$0xff] %v9492_v21  ;;  %v9502_v61 = vld [vmem:[%s11287_s7 + $0xc88] sm:$0xff]  ;;  %v9507_v60 = vld [vmem:[%s11287_s7 + $0xc90] sm:$0xff] }
 0x115   :  { %11674 = vst [vmem:[#allocation395_spill] sm:$0xff] %v9497_v13  ;;  %11675 = vst [vmem:[#allocation396_spill] sm:$0xff] %v9502_v61  ;;  %v9512_v20 = vld [vmem:[%s11287_s7 + $0xc98] sm:$0xff]  ;;  %v9517_v21 = vld [vmem:[%s11287_s7 + $0xca0] sm:$0xff] }
 0x116   :  { %11676 = vst [vmem:[#allocation397_spill] sm:$0xff] %v9507_v60  ;;  %11677 = vst [vmem:[#allocation398_spill] sm:$0xff] %v9512_v20  ;;  %v9522_v13 = vld [vmem:[%s11287_s7 + $0xca8] sm:$0xff]  ;;  %v9527_v61 = vld [vmem:[%s11287_s7 + $0xcb0] sm:$0xff] }
 0x117   :  { %11678 = vst [vmem:[#allocation399_spill] sm:$0xff] %v9517_v21  ;;  %11679 = vst [vmem:[#allocation400_spill] sm:$0xff] %v9522_v13  ;;  %v9532_v60 = vld [vmem:[%s11287_s7 + $0xcb8] sm:$0xff]  ;;  %v9537_v20 = vld [vmem:[%s11287_s7 + $0xcc0] sm:$0xff] }
 0x118   :  { %11680 = vst [vmem:[#allocation401_spill] sm:$0xff] %v9527_v61  ;;  %11681 = vst [vmem:[#allocation402_spill] sm:$0xff] %v9532_v60  ;;  %v9542_v21 = vld [vmem:[%s11287_s7 + $0xcc8] sm:$0xff]  ;;  %v9547_v13 = vld [vmem:[%s11287_s7 + $0xcd0] sm:$0xff] }
 0x119   :  { %11682 = vst [vmem:[#allocation403_spill] sm:$0xff] %v9537_v20  ;;  %11683 = vst [vmem:[#allocation404_spill] sm:$0xff] %v9542_v21  ;;  %v9552_v61 = vld [vmem:[%s11287_s7 + $0xcd8] sm:$0xff]  ;;  %v9557_v60 = vld [vmem:[%s11287_s7 + $0xce0] sm:$0xff] }
 0x11a   :  { %11684 = vst [vmem:[#allocation405_spill] sm:$0xff] %v9547_v13  ;;  %11685 = vst [vmem:[#allocation406_spill] sm:$0xff] %v9552_v61  ;;  %v9562_v20 = vld [vmem:[%s11287_s7 + $0xce8] sm:$0xff]  ;;  %v9567_v21 = vld [vmem:[%s11287_s7 + $0xcf0] sm:$0xff] }
 0x11b   :  { %11686 = vst [vmem:[#allocation407_spill] sm:$0xff] %v9557_v60  ;;  %11687 = vst [vmem:[#allocation408_spill] sm:$0xff] %v9562_v20  ;;  %v9572_v13 = vld [vmem:[%s11287_s7 + $0xcf8] sm:$0xff]  ;;  %v9577_v61 = vld [vmem:[%s11287_s7 + $0xd00] sm:$0xff] }
 0x11c   :  { %11688 = vst [vmem:[#allocation409_spill] sm:$0xff] %v9567_v21  ;;  %11689 = vst [vmem:[#allocation410_spill] sm:$0xff] %v9572_v13  ;;  %v9582_v60 = vld [vmem:[%s11287_s7 + $0xd08] sm:$0xff]  ;;  %v9587_v20 = vld [vmem:[%s11287_s7 + $0xd10] sm:$0xff] }
 0x11d   :  { %11690 = vst [vmem:[#allocation411_spill] sm:$0xff] %v9577_v61  ;;  %11691 = vst [vmem:[#allocation412_spill] sm:$0xff] %v9582_v60  ;;  %v9592_v21 = vld [vmem:[%s11287_s7 + $0xd18] sm:$0xff]  ;;  %v9597_v13 = vld [vmem:[%s11287_s7 + $0xd20] sm:$0xff] }
 0x11e   :  { %11692 = vst [vmem:[#allocation413_spill] sm:$0xff] %v9587_v20  ;;  %11693 = vst [vmem:[#allocation414_spill] sm:$0xff] %v9592_v21  ;;  %v9602_v61 = vld [vmem:[%s11287_s7 + $0xd28] sm:$0xff]  ;;  %v9607_v60 = vld [vmem:[%s11287_s7 + $0xd30] sm:$0xff] }
 0x11f   :  { %11694 = vst [vmem:[#allocation415_spill] sm:$0xff] %v9597_v13  ;;  %11695 = vst [vmem:[#allocation416_spill] sm:$0xff] %v9602_v61  ;;  %v9612_v20 = vld [vmem:[%s11287_s7 + $0xd38] sm:$0xff]  ;;  %v9617_v21 = vld [vmem:[%s11287_s7 + $0xd40] sm:$0xff] }
 0x120   :  { %11696 = vst [vmem:[#allocation417_spill] sm:$0xff] %v9607_v60  ;;  %11697 = vst [vmem:[#allocation418_spill] sm:$0xff] %v9612_v20  ;;  %v9622_v13 = vld [vmem:[%s11287_s7 + $0xd48] sm:$0xff]  ;;  %v9627_v61 = vld [vmem:[%s11287_s7 + $0xd50] sm:$0xff] }
 0x121   :  { %11698 = vst [vmem:[#allocation419_spill] sm:$0xff] %v9617_v21  ;;  %11699 = vst [vmem:[#allocation420_spill] sm:$0xff] %v9622_v13  ;;  %v9632_v60 = vld [vmem:[%s11287_s7 + $0xd58] sm:$0xff]  ;;  %v9637_v20 = vld [vmem:[%s11287_s7 + $0xd60] sm:$0xff] }
 0x122   :  { %11700 = vst [vmem:[#allocation421_spill] sm:$0xff] %v9627_v61  ;;  %11701 = vst [vmem:[#allocation422_spill] sm:$0xff] %v9632_v60  ;;  %v9642_v21 = vld [vmem:[%s11287_s7 + $0xd68] sm:$0xff]  ;;  %v9647_v13 = vld [vmem:[%s11287_s7 + $0xd70] sm:$0xff] }
 0x123   :  { %11702 = vst [vmem:[#allocation423_spill] sm:$0xff] %v9637_v20  ;;  %11703 = vst [vmem:[#allocation424_spill] sm:$0xff] %v9642_v21  ;;  %v9652_v61 = vld [vmem:[%s11287_s7 + $0xd78] sm:$0xff]  ;;  %v9657_v60 = vld [vmem:[%s11287_s7 + $0xd80] sm:$0xff] }
 0x124   :  { %11704 = vst [vmem:[#allocation425_spill] sm:$0xff] %v9647_v13  ;;  %11705 = vst [vmem:[#allocation426_spill] sm:$0xff] %v9652_v61  ;;  %v9662_v20 = vld [vmem:[%s11287_s7 + $0xd88] sm:$0xff]  ;;  %v9667_v21 = vld [vmem:[%s11287_s7 + $0xd90] sm:$0xff] }
 0x125   :  { %11706 = vst [vmem:[#allocation427_spill] sm:$0xff] %v9657_v60  ;;  %11707 = vst [vmem:[#allocation428_spill] sm:$0xff] %v9662_v20  ;;  %v9672_v13 = vld [vmem:[%s11287_s7 + $0xd98] sm:$0xff]  ;;  %v9677_v61 = vld [vmem:[%s11287_s7 + $0xda0] sm:$0xff] }
 0x126   :  { %11708 = vst [vmem:[#allocation429_spill] sm:$0xff] %v9667_v21  ;;  %11709 = vst [vmem:[#allocation430_spill] sm:$0xff] %v9672_v13  ;;  %v9682_v60 = vld [vmem:[%s11287_s7 + $0xda8] sm:$0xff]  ;;  %v9687_v20 = vld [vmem:[%s11287_s7 + $0xdb0] sm:$0xff] }
 0x127   :  { %11710 = vst [vmem:[#allocation431_spill] sm:$0xff] %v9677_v61  ;;  %11711 = vst [vmem:[#allocation432_spill] sm:$0xff] %v9682_v60  ;;  %v9692_v21 = vld [vmem:[%s11287_s7 + $0xdb8] sm:$0xff]  ;;  %v9697_v13 = vld [vmem:[%s11287_s7 + $0xdc0] sm:$0xff] }
 0x128   :  { %11712 = vst [vmem:[#allocation433_spill] sm:$0xff] %v9687_v20  ;;  %11713 = vst [vmem:[#allocation434_spill] sm:$0xff] %v9692_v21  ;;  %v9702_v61 = vld [vmem:[%s11287_s7 + $0xdc8] sm:$0xff]  ;;  %v9707_v60 = vld [vmem:[%s11287_s7 + $0xdd0] sm:$0xff] }
 0x129   :  { %11714 = vst [vmem:[#allocation435_spill] sm:$0xff] %v9697_v13  ;;  %11715 = vst [vmem:[#allocation436_spill] sm:$0xff] %v9702_v61  ;;  %v9712_v20 = vld [vmem:[%s11287_s7 + $0xdd8] sm:$0xff]  ;;  %v9717_v21 = vld [vmem:[%s11287_s7 + $0xde0] sm:$0xff] }
 0x12a   :  { %11716 = vst [vmem:[#allocation437_spill] sm:$0xff] %v9707_v60  ;;  %11717 = vst [vmem:[#allocation438_spill] sm:$0xff] %v9712_v20  ;;  %v9722_v13 = vld [vmem:[%s11287_s7 + $0xde8] sm:$0xff]  ;;  %v9727_v61 = vld [vmem:[%s11287_s7 + $0xdf0] sm:$0xff] }
 0x12b   :  { %11718 = vst [vmem:[#allocation439_spill] sm:$0xff] %v9717_v21  ;;  %11719 = vst [vmem:[#allocation440_spill] sm:$0xff] %v9722_v13  ;;  %v9732_v60 = vld [vmem:[%s11287_s7 + $0xdf8] sm:$0xff]  ;;  %v9737_v20 = vld [vmem:[%s11287_s7 + $0xe00] sm:$0xff] }
 0x12c   :  { %11720 = vst [vmem:[#allocation441_spill] sm:$0xff] %v9727_v61  ;;  %11721 = vst [vmem:[#allocation442_spill] sm:$0xff] %v9732_v60  ;;  %v9742_v21 = vld [vmem:[%s11287_s7 + $0xe08] sm:$0xff]  ;;  %v9747_v13 = vld [vmem:[%s11287_s7 + $0xe10] sm:$0xff] }
 0x12d   :  { %11722 = vst [vmem:[#allocation443_spill] sm:$0xff] %v9737_v20  ;;  %11723 = vst [vmem:[#allocation444_spill] sm:$0xff] %v9742_v21  ;;  %v9752_v61 = vld [vmem:[%s11287_s7 + $0xe18] sm:$0xff]  ;;  %v9757_v60 = vld [vmem:[%s11287_s7 + $0xe20] sm:$0xff] }
 0x12e   :  { %11724 = vst [vmem:[#allocation445_spill] sm:$0xff] %v9747_v13  ;;  %11725 = vst [vmem:[#allocation446_spill] sm:$0xff] %v9752_v61  ;;  %v9762_v20 = vld [vmem:[%s11287_s7 + $0xe28] sm:$0xff]  ;;  %v9767_v21 = vld [vmem:[%s11287_s7 + $0xe30] sm:$0xff] }
 0x12f   :  { %11726 = vst [vmem:[#allocation447_spill] sm:$0xff] %v9757_v60  ;;  %11727 = vst [vmem:[#allocation448_spill] sm:$0xff] %v9762_v20  ;;  %v9772_v13 = vld [vmem:[%s11287_s7 + $0xe38] sm:$0xff]  ;;  %v9777_v61 = vld [vmem:[%s11287_s7 + $0xe40] sm:$0xff] }
 0x130   :  { %11728 = vst [vmem:[#allocation449_spill] sm:$0xff] %v9767_v21  ;;  %11729 = vst [vmem:[#allocation450_spill] sm:$0xff] %v9772_v13  ;;  %v9782_v60 = vld [vmem:[%s11287_s7 + $0xe48] sm:$0xff]  ;;  %v9787_v20 = vld [vmem:[%s11287_s7 + $0xe50] sm:$0xff] }
 0x131   :  { %11730 = vst [vmem:[#allocation451_spill] sm:$0xff] %v9777_v61  ;;  %11731 = vst [vmem:[#allocation452_spill] sm:$0xff] %v9782_v60  ;;  %v9792_v21 = vld [vmem:[%s11287_s7 + $0xe58] sm:$0xff]  ;;  %v9797_v13 = vld [vmem:[%s11287_s7 + $0xe60] sm:$0xff] }
 0x132   :  { %11732 = vst [vmem:[#allocation453_spill] sm:$0xff] %v9787_v20  ;;  %11733 = vst [vmem:[#allocation454_spill] sm:$0xff] %v9792_v21  ;;  %v9802_v61 = vld [vmem:[%s11287_s7 + $0xe68] sm:$0xff]  ;;  %v9807_v60 = vld [vmem:[%s11287_s7 + $0xe70] sm:$0xff] }
 0x133   :  { %11734 = vst [vmem:[#allocation455_spill] sm:$0xff] %v9797_v13  ;;  %11735 = vst [vmem:[#allocation456_spill] sm:$0xff] %v9802_v61  ;;  %v9812_v20 = vld [vmem:[%s11287_s7 + $0xe78] sm:$0xff]  ;;  %v9817_v21 = vld [vmem:[%s11287_s7 + $0xe80] sm:$0xff] }
 0x134   :  { %11736 = vst [vmem:[#allocation457_spill] sm:$0xff] %v9807_v60  ;;  %11737 = vst [vmem:[#allocation458_spill] sm:$0xff] %v9812_v20  ;;  %v9822_v13 = vld [vmem:[%s11287_s7 + $0xe88] sm:$0xff]  ;;  %v9827_v61 = vld [vmem:[%s11287_s7 + $0xe90] sm:$0xff] }
 0x135   :  { %11738 = vst [vmem:[#allocation459_spill] sm:$0xff] %v9817_v21  ;;  %11739 = vst [vmem:[#allocation460_spill] sm:$0xff] %v9822_v13  ;;  %v9832_v60 = vld [vmem:[%s11287_s7 + $0xe98] sm:$0xff]  ;;  %v9837_v20 = vld [vmem:[%s11287_s7 + $0xea0] sm:$0xff] }
 0x136   :  { %11740 = vst [vmem:[#allocation461_spill] sm:$0xff] %v9827_v61  ;;  %11741 = vst [vmem:[#allocation462_spill] sm:$0xff] %v9832_v60  ;;  %v9842_v21 = vld [vmem:[%s11287_s7 + $0xea8] sm:$0xff]  ;;  %v9847_v13 = vld [vmem:[%s11287_s7 + $0xeb0] sm:$0xff] }
 0x137   :  { %11742 = vst [vmem:[#allocation463_spill] sm:$0xff] %v9837_v20  ;;  %11743 = vst [vmem:[#allocation464_spill] sm:$0xff] %v9842_v21  ;;  %v9852_v61 = vld [vmem:[%s11287_s7 + $0xeb8] sm:$0xff]  ;;  %v9857_v60 = vld [vmem:[%s11287_s7 + $0xec0] sm:$0xff] }
 0x138   :  { %11744 = vst [vmem:[#allocation465_spill] sm:$0xff] %v9847_v13  ;;  %11745 = vst [vmem:[#allocation466_spill] sm:$0xff] %v9852_v61  ;;  %v9862_v20 = vld [vmem:[%s11287_s7 + $0xec8] sm:$0xff]  ;;  %v9867_v21 = vld [vmem:[%s11287_s7 + $0xed0] sm:$0xff] }
 0x139   :  { %11746 = vst [vmem:[#allocation467_spill] sm:$0xff] %v9857_v60  ;;  %11747 = vst [vmem:[#allocation468_spill] sm:$0xff] %v9862_v20  ;;  %v9872_v13 = vld [vmem:[%s11287_s7 + $0xed8] sm:$0xff]  ;;  %v9877_v61 = vld [vmem:[%s11287_s7 + $0xee0] sm:$0xff] }
 0x13a   :  { %11748 = vst [vmem:[#allocation469_spill] sm:$0xff] %v9867_v21  ;;  %11749 = vst [vmem:[#allocation470_spill] sm:$0xff] %v9872_v13  ;;  %v9882_v60 = vld [vmem:[%s11287_s7 + $0xee8] sm:$0xff]  ;;  %v9887_v20 = vld [vmem:[%s11287_s7 + $0xef0] sm:$0xff] }
 0x13b   :  { %11750 = vst [vmem:[#allocation471_spill] sm:$0xff] %v9877_v61  ;;  %11751 = vst [vmem:[#allocation472_spill] sm:$0xff] %v9882_v60  ;;  %v9892_v21 = vld [vmem:[%s11287_s7 + $0xef8] sm:$0xff]  ;;  %v9897_v13 = vld [vmem:[%s11287_s7 + $0xf00] sm:$0xff] }
 0x13c   :  { %11752 = vst [vmem:[#allocation473_spill] sm:$0xff] %v9887_v20  ;;  %11753 = vst [vmem:[#allocation474_spill] sm:$0xff] %v9892_v21  ;;  %v9902_v61 = vld [vmem:[%s11287_s7 + $0xf08] sm:$0xff]  ;;  %v9907_v60 = vld [vmem:[%s11287_s7 + $0xf10] sm:$0xff] }
 0x13d   :  { %11754 = vst [vmem:[#allocation475_spill] sm:$0xff] %v9897_v13  ;;  %11755 = vst [vmem:[#allocation476_spill] sm:$0xff] %v9902_v61  ;;  %v9912_v20 = vld [vmem:[%s11287_s7 + $0xf18] sm:$0xff]  ;;  %v9917_v21 = vld [vmem:[%s11287_s7 + $0xf20] sm:$0xff] }
 0x13e   :  { %11756 = vst [vmem:[#allocation477_spill] sm:$0xff] %v9907_v60  ;;  %11757 = vst [vmem:[#allocation478_spill] sm:$0xff] %v9912_v20  ;;  %v9922_v13 = vld [vmem:[%s11287_s7 + $0xf28] sm:$0xff]  ;;  %v9927_v61 = vld [vmem:[%s11287_s7 + $0xf30] sm:$0xff] }
 0x13f   :  { %11758 = vst [vmem:[#allocation479_spill] sm:$0xff] %v9917_v21  ;;  %11759 = vst [vmem:[#allocation480_spill] sm:$0xff] %v9922_v13  ;;  %v9932_v60 = vld [vmem:[%s11287_s7 + $0xf38] sm:$0xff]  ;;  %v9937_v20 = vld [vmem:[%s11287_s7 + $0xf40] sm:$0xff] }
 0x140   :  { %11760 = vst [vmem:[#allocation481_spill] sm:$0xff] %v9927_v61  ;;  %11761 = vst [vmem:[#allocation482_spill] sm:$0xff] %v9932_v60  ;;  %v9942_v21 = vld [vmem:[%s11287_s7 + $0xf48] sm:$0xff]  ;;  %v9947_v13 = vld [vmem:[%s11287_s7 + $0xf50] sm:$0xff] }
 0x141   :  { %11762 = vst [vmem:[#allocation483_spill] sm:$0xff] %v9937_v20  ;;  %11763 = vst [vmem:[#allocation484_spill] sm:$0xff] %v9942_v21  ;;  %v9952_v61 = vld [vmem:[%s11287_s7 + $0xf58] sm:$0xff]  ;;  %v9957_v60 = vld [vmem:[%s11287_s7 + $0xf60] sm:$0xff] }
 0x142   :  { %11764 = vst [vmem:[#allocation485_spill] sm:$0xff] %v9947_v13  ;;  %11765 = vst [vmem:[#allocation486_spill] sm:$0xff] %v9952_v61  ;;  %v9962_v20 = vld [vmem:[%s11287_s7 + $0xf68] sm:$0xff]  ;;  %v9967_v21 = vld [vmem:[%s11287_s7 + $0xf70] sm:$0xff] }
 0x143   :  { %11766 = vst [vmem:[#allocation487_spill] sm:$0xff] %v9957_v60  ;;  %11767 = vst [vmem:[#allocation488_spill] sm:$0xff] %v9962_v20  ;;  %v9972_v13 = vld [vmem:[%s11287_s7 + $0xf78] sm:$0xff]  ;;  %v9977_v61 = vld [vmem:[%s11287_s7 + $0xf80] sm:$0xff] }
 0x144   :  { %11768 = vst [vmem:[#allocation489_spill] sm:$0xff] %v9967_v21  ;;  %11769 = vst [vmem:[#allocation490_spill] sm:$0xff] %v9972_v13  ;;  %v9982_v60 = vld [vmem:[%s11287_s7 + $0xf88] sm:$0xff]  ;;  %v9987_v20 = vld [vmem:[%s11287_s7 + $0xf90] sm:$0xff] }
 0x145   :  { %11770 = vst [vmem:[#allocation491_spill] sm:$0xff] %v9977_v61  ;;  %11771 = vst [vmem:[#allocation492_spill] sm:$0xff] %v9982_v60  ;;  %v9992_v21 = vld [vmem:[%s11287_s7 + $0xf98] sm:$0xff]  ;;  %v9997_v13 = vld [vmem:[%s11287_s7 + $0xfa0] sm:$0xff] }
 0x146   :  { %11772 = vst [vmem:[#allocation493_spill] sm:$0xff] %v9987_v20  ;;  %11773 = vst [vmem:[#allocation494_spill] sm:$0xff] %v9992_v21  ;;  %v10002_v61 = vld [vmem:[%s11287_s7 + $0xfa8] sm:$0xff]  ;;  %v10007_v60 = vld [vmem:[%s11287_s7 + $0xfb0] sm:$0xff] }
 0x147   :  { %11774 = vst [vmem:[#allocation495_spill] sm:$0xff] %v9997_v13  ;;  %11775 = vst [vmem:[#allocation496_spill] sm:$0xff] %v10002_v61  ;;  %v10012_v20 = vld [vmem:[%s11287_s7 + $0xfb8] sm:$0xff]  ;;  %v10017_v21 = vld [vmem:[%s11287_s7 + $0xfc0] sm:$0xff] }
 0x148   :  { %11776 = vst [vmem:[#allocation497_spill] sm:$0xff] %v10007_v60  ;;  %11777 = vst [vmem:[#allocation498_spill] sm:$0xff] %v10012_v20  ;;  %v10022_v13 = vld [vmem:[%s11287_s7 + $0xfc8] sm:$0xff]  ;;  %v10027_v61 = vld [vmem:[%s11287_s7 + $0xfd0] sm:$0xff] }
 0x149   :  { %11778 = vst [vmem:[#allocation499_spill] sm:$0xff] %v10017_v21  ;;  %11779 = vst [vmem:[#allocation500_spill] sm:$0xff] %v10022_v13  ;;  %v10032_v60 = vld [vmem:[%s11287_s7 + $0xfd8] sm:$0xff]  ;;  %v10037_v20 = vld [vmem:[%s11287_s7 + $0xfe0] sm:$0xff] }
 0x14a   :  { %11780 = vst [vmem:[#allocation501_spill] sm:$0xff] %v10027_v61  ;;  %11781 = vst [vmem:[#allocation502_spill] sm:$0xff] %v10032_v60  ;;  %v10042_v21 = vld [vmem:[%s11287_s7 + $0xfe8] sm:$0xff]  ;;  %v10047_v13 = vld [vmem:[%s11287_s7 + $0xff0] sm:$0xff] }
 0x14b   :  { %11782 = vst [vmem:[#allocation503_spill] sm:$0xff] %v10037_v20  ;;  %11783 = vst [vmem:[#allocation504_spill] sm:$0xff] %v10042_v21  ;;  %v10052_v61 = vld [vmem:[%s11287_s7 + $0xff8] sm:$0xff]  ;;  %v11289_v20 = vlaneseq  ;;  %s6967_s7 = smov 124  }
 0x14c   :  { %11784 = vst [vmem:[#allocation505_spill] sm:$0xff] %v10047_v13  ;;  %11785 = vst [vmem:[#allocation506_spill] sm:$0xff] %v10052_v61  ;;  %v5376_v60 = vld.sshfl [vmem:[%s11280_s0] sm:$0x77 pattern:$0x75316420] }
 0x14d   :  { %1508 = vrot.lane.b32.xlu1 %v5376_v60, %s6965_s18  ;;  %1472 = vrot.lane.b32.xlu0 %v5376_v60, %s6966_s19  ;;  %vm10059_vm0 = vcmp.lt.s32.totalorder %v11289_v20, 306  ;;  %v1459_v61 = vcombine.high %v5376_v60, %v5376_v60 }
 0x14e   :  { %1457 = vst.msk [vmem:[#allocation4] ss:$8 sm:$0x7] %vm10059_vm0, %v5376_v60 }
 0x151   :  { %1526 = vrot.lane.b32.xlu1 %v5376_v60, %s6967_s7  ;;  %1490 = vrot.lane.b32.xlu0 %v5376_v60, %s6968_s20 }
 0x152   :  { %1438 = vsyncadd [#allocation6 + $0x1], 65536  ;;  %v11291_v13 = vmov 0.0   ;;  %s6970_s0 = smov 50   ;;  %s6971_s21 = smov 49   ;;  %v10071_v60 = vld [vmem:[%s11282_s2] sm:$0xff]  ;;  %v11788_v40 = vlaneseq }
 0x153   :  { %1666 = vmatprep.mubr.f32.mxu0 %v11291_v13  ;;  %1755 = vmatprep.mubr.f32.mxu1 %v11291_v13  ;;  %s6972_s22 = smov 48   ;;  %s6973_s23 = smov 47   ;;  %v10076_v20 = vld [vmem:[%s11282_s2 + $0x8] sm:$0xff]  ;;  %v6975_v13 = vmov 0   ;;  %v10089_v12 = vld [vmem:[%s11282_s2 + $0x18] sm:$0xff]  ;;  %vm1511_vm1 = vcmask 1022976  }
 0x154   :  { %s6974_s24 = smov 46   ;;  %6855 = vset.pattern.permute.xlu1 %v6975_v13  ;;  %6856 = vset.pattern.permute.xlu0 %v6975_v13  ;;  %vm1475_vm2 = vcmask 1039360   ;;  %vm1529_vm3 = vcmask 1014784   ;;  %vm1493_vm4 = vcmask 1031168   ;;  %vm1466_vm5 = vcmp.ge.s32.totalorder %v11788_v40, 50 }
 0x155   :  { %1460 = vrot.lane.b32.xlu0 %v1459_v61, %s6970_s0  ;;  %1481 = vrot.lane.b32.xlu1 %v1459_v61, %s6971_s21  ;;  %vm1467_vm6 = vcmp.lt.s32.totalorder %v11788_v40, 356  ;;  %vm1463_vm7 = vcmask 408576   ;;  %vm1484_vm8 = vcmask 400384   ;;  %vm1502_vm10 = vcmask 392192  }
 0x156   :  { %vm10102_vm9 = vmand %vm1466_vm5, %vm1467_vm6  ;;  %vm1520_vm11 = vcmask 384000   ;;  %vm1586_vm12 = vcmask 1044480   ;;  %vm1573_vm13 = vcmask 39936   ;;  %vm1538_vm14 = vcmask 375808  }
 0x157   :  { %vm1868_vm15 = vcmask 818176  }
 0x159   :  { %1499 = vrot.lane.b32.xlu0 %v1459_v61, %s6972_s22  ;;  %1517 = vrot.lane.b32.xlu1 %v1459_v61, %s6973_s23 }
 0x15d   :  { %1535 = vrot.lane.b32.xlu0 %v1459_v61, %s6974_s24  ;;  %1555 = vperm.xlu1 %6855, %v10071_v60   ;;  %v10083_v61 = vld [vmem:[%s11282_s2 + $0x10] sm:$0xff] }
 0x161   :  { %1560 = vperm.xlu0 %6856, %v10076_v20   ;;  %1565 = vperm.xlu1 %6855, %v10083_v61  }
 0x165   :  { %1570 = vperm.xlu1 %6855, %v10089_v12  }
 0x1bf   :  { %v1509_v13 = vpop.permute.xlu1 %1508  ;;  %v1473_v59 = vpop.permute.xlu0 %1472 }
 0x1c0   :  { %v1510_v58 = vrot.slane %v1509_v13, 1  ;;  %v1474_v14 = vrot.slane %v1473_v59, 1 }
 0x1c2   :  { %v1512_v15 = vsel %vm1511_vm1, %v1509_v13, %v1510_v58  ;;  %v1476_v4 = vsel %vm1475_vm2, %v1473_v59, %v1474_v14 }
 0x1c3   :  { %1515 = vst.msk [vmem:[#allocation4 + $0x3] ss:$8 sm:$0x7] %vm10059_vm0, %v1512_v15  ;;  %1479 = vst.msk [vmem:[#allocation4 + $0x1] ss:$8 sm:$0x7] %vm10059_vm0, %v1476_v4  ;;  %v1527_v5 = vpop.permute.xlu1 %1526  ;;  %v1491_v11 = vpop.permute.xlu0 %1490 }
 0x1c4   :  { %v1528_v10 = vrot.slane %v1527_v5, 1  ;;  %v1492_v41 = vrot.slane %v1491_v11, 1 }
 0x1c6   :  { %v1530_v3 = vsel %vm1529_vm3, %v1527_v5, %v1528_v10  ;;  %v1494_v2 = vsel %vm1493_vm4, %v1491_v11, %v1492_v41 }
 0x1c7   :  { %1533 = vst.msk [vmem:[#allocation4 + $0x4] ss:$8 sm:$0x7] %vm10059_vm0, %v1530_v3  ;;  %1497 = vst.msk [vmem:[#allocation4 + $0x2] ss:$8 sm:$0x7] %vm10059_vm0, %v1494_v2  ;;  %v1461_v58 = vpop.permute.xlu0 %1460  ;;  %v1482_v59 = vpop.permute.xlu1 %1481 }
 0x1c8   :  { %v1462_v14 = vrot.slane %v1461_v58, 7  ;;  %v1483_v15 = vrot.slane %v1482_v59, 7 }
 0x1ca   :  { %v1464_v13 = vsel %vm1463_vm7, %v1462_v14, %v1461_v58  ;;  %v1485_v22 = vsel %vm1484_vm8, %v1483_v15, %v1482_v59  ;;  %v1544_v58 = vld [vmem:[%s11281_s1] sm:$0xff]  ;;  %v11791_v15 = vmov 0.0  }
 0x1cb   :  { %1470 = vst.msk [vmem:[#allocation4 + $0x10] ss:$8 sm:$0x7] %vm10102_vm9, %v1464_v13  ;;  %1488 = vst.msk [vmem:[#allocation4 + $0x11] ss:$8 sm:$0x7] %vm10102_vm9, %v1485_v22  ;;  %v1500_v41 = vpop.permute.xlu0 %1499  ;;  %v1518_v2 = vpop.permute.xlu1 %1517 }
 0x1cc   :  { %v1501_v3 = vrot.slane %v1500_v41, 7  ;;  %v1519_v5 = vrot.slane %v1518_v2, 7  ;;  %v1545_v13 = vld [vmem:[%s11281_s1 + $0x8] sm:$0xff] }
 0x1ce   :  { %v1503_v10 = vsel %vm1502_vm10, %v1501_v3, %v1500_v41  ;;  %v1521_v11 = vsel %vm1520_vm11, %v1519_v5, %v1518_v2  ;;  %v1549_v21 = vld [vmem:[#allocation4 + $0x8] sm:$0x1f]  ;;  %v1548_v23 = vld [vmem:[#allocation4] sm:$0x1f] }
 0x1cf   :  { %1506 = vst.msk [vmem:[#allocation4 + $0x12] ss:$8 sm:$0x7] %vm10102_vm9, %v1503_v10  ;;  %1524 = vst.msk [vmem:[#allocation4 + $0x13] ss:$8 sm:$0x7] %vm10102_vm9, %v1521_v11  ;;  %v1536_v22 = vpop.permute.xlu0 %1535  ;;  %5377 = vmatprep.subr.msk.mxu0 %vm1586_vm12, %v1549_v21 }
 0x1d0   :  { %v1537_v59 = vrot.slane %v1536_v22, 7  ;;  %5378 = vmatpush1.msk.msra.mxu0 %vm1586_vm12, %v1548_v23  ;;  %v1546_v23 = vld [vmem:[%s11281_s1 + $0x10] sm:$0xff]  ;;  %v1547_v41 = vld [vmem:[%s11281_s1 + $0x18] sm:$0xff] }
 0x1d1   :  { %5379 = vmatmul.mubr.msk.f32.vlgmr.msra.gmra.mrb[0].mxu0 %vm1573_vm13, %v1544_v58 }
 0x1d2   :  { %v1539_v14 = vsel %vm1538_vm14, %v1537_v59, %v1536_v22  ;;  %1672 = vmatprep.mubr.f32.mxu0 %v11791_v15 }
 0x1d3   :  { %1542 = vst.msk [vmem:[#allocation4 + $0x14] ss:$8 sm:$0x7] %vm10102_vm9, %v1539_v14 }
 0x1d5   :  { %5380 = vmatmul.mubr.msk.f32.gmra.mrb[2].mxu0 %vm1573_vm13, %v1545_v13 }
 0x1d6   :  { %1678 = vmatprep.mubr.f32.mxu0 %v11791_v15 }
 0x1d9   :  { %5381 = vmatmul.mubr.msk.f32.gmra.mrb[4].mxu0 %vm1573_vm13, %v1546_v23 }
 0x1da   :  { %v1551_v2 = vld [vmem:[#allocation4 + $0x18] sm:$0x1f]  ;;  %v1552_v3 = vld [vmem:[#allocation4 + $0x20] sm:$0x1f]  ;;  %1684 = vmatprep.mubr.f32.mxu0 %v11791_v15  ;;  %v1550_v4 = vld [vmem:[#allocation4 + $0x10] sm:$0x1f] }
 0x1db   :  { %5383 = vmatprep.subr.msk.mxu1 %vm1586_vm12, %v1551_v2  ;;  %6038 = vmatprep.subr.msk.mxu0 %vm1586_vm12, %v1552_v3 }
 0x1dc   :  { %5384 = vmatpush1.msk.msra.mxu1 %vm1586_vm12, %v1550_v4  ;;  %6039 = vmatpush3.msk.msra.mxu0 %vm1586_vm12, %v1552_v3 }
 0x1dd   :  { %5382 = vmatmul.mubr.msk.f32.gmra.mrb[6].mxu0 %vm1573_vm13, %v1547_v41  ;;  %5385 = vmatmul.mubr.msk.f32.vlgmr.msra.gmra.mrb[0].mxu1 %vm1573_vm13, %v1544_v58 }
 0x1de   :  { %1761 = vmatprep.mubr.f32.mxu1 %v11791_v15  ;;  %6040 = vmatprep.mubr.msk.f32.mxu0 %vm1573_vm13, %v1544_v58  ;;  %v1556_v58 = vpop.permute.xlu1 %1555 }
 0x1e0   :  { %v1561_v3 = vpop.permute.xlu0 %1560 }
 0x1e1   :  { %5386 = vmatmul.mubr.msk.f32.gmra.mrb[2].mxu1 %vm1573_vm13, %v1545_v13  ;;  %6041 = vmatmul.mubr.msk.f32.vlgmr.msra.gmra.mrb[8].mxu0 %vm1573_vm13, %v1545_v13 }
 0x1e2   :  { %1767 = vmatprep.mubr.f32.mxu1 %v11791_v15  ;;  %6043 = vmatprep.mubr.msk.f32.mxu0 %vm1573_vm13, %v1546_v23  ;;  %v1566_v2 = vpop.permute.xlu1 %1565 }
 0x1e5   :  { %5387 = vmatmul.mubr.msk.f32.gmra.mrb[4].mxu1 %vm1573_vm13, %v1546_v23  ;;  %6044 = vmatmul.mubr.msk.f32.gmra.mrb[10].mxu0 %vm1573_vm13, %v1547_v41 }
 0x1e6   :  { %1773 = vmatprep.mubr.f32.mxu1 %v11791_v15 }
 0x1e9   :  { %5388 = vmatmul.mubr.msk.f32.gmra.mrb[6].mxu1 %vm1573_vm13, %v1547_v41 }
 0x2a4   :  { %v1668_v5 = vpop.f32.mrb[0].mxu0 }
 0x2a5   :  { %v1670_v10 = vpop.f32.mrb[1].mxu0  ;;  %v10152_v14 = vadd.f32 %v1668_v5, %v1556_v58  ;;  %v1571_v5 = vpop.permute.xlu1 %1570 }
 0x2a6   :  { %v10154_v13 = vadd.f32 %v1670_v10, %v1556_v58 }
 0x2a8   :  { %v1674_v11 = vpop.f32.mrb[2].mxu0  ;;  %v1865_v56 = vadd.f32 %v10154_v13, %v10152_v14 }
 0x2a9   :  { %v1676_v21 = vpop.f32.mrb[3].mxu0  ;;  %v10158_v38 = vadd.f32 %v1674_v11, %v1561_v3 }
 0x2aa   :  { %v10160_v62 = vadd.f32 %v1676_v21, %v1561_v3 }
 0x2ac   :  { %v1680_v22 = vpop.f32.mrb[4].mxu0 }
 0x2ad   :  { %v1682_v59 = vpop.f32.mrb[5].mxu0  ;;  %v10162_v55 = vadd.f32 %v1680_v22, %v1566_v2 }
 0x2ae   :  { %v10164_v54 = vadd.f32 %v1682_v59, %v1566_v2 }
 0x2b0   :  { %v1757_v23 = vpop.f32.mrb[0].mxu1  ;;  %v1686_v4 = vpop.f32.mrb[6].mxu0  ;;  %v1880_v8 = vadd.f32 %v10164_v54, %v10162_v55 }
 0x2b1   :  { %v1758_v57 = vadd.f32 %v1757_v23, %v1556_v58  ;;  %v1688_v41 = vpop.f32.mrb[7].mxu0  ;;  %v1759_v39 = vpop.f32.mrb[1].mxu1  ;;  %v1873_v23 = vadd.f32 %v10160_v62, %v10158_v38  ;;  %v10171_v53 = vadd.f32 %v1686_v4, %v1571_v5 }
 0x2b2   :  { %v1760_v6 = vadd.f32 %v1759_v39, %v1556_v58 }
 0x2b3   :  { %v1866_v63 = vadd.f32 %v1865_v56, %v1758_v57 }
 0x2b4   :  { %v1763_v24 = vpop.f32.mrb[2].mxu1  ;;  %v6042_v10 = vpop.f32.mrb[8].mxu0 }
 0x2b5   :  { %v1764_v37 = vadd.f32 %v1763_v24, %v1561_v3  ;;  %v1852_v36 = vadd.f32 %v6042_v10, %v1561_v3  ;;  %v1846_v16 = vpop.f32.mrb[9].mxu0  ;;  %v1765_v18 = vpop.f32.mrb[3].mxu1  ;;  %v1867_v7 = vadd.f32 %v1866_v63, %v1760_v6 }
 0x2b6   :  { %v1847_v11 = vadd.f32 %v1846_v16, %v1556_v58  ;;  %v1766_v21 = vadd.f32 %v1765_v18, %v1561_v3  ;;  %v10174_v16 = vadd.f32 %v1688_v41, %v1571_v5 }
 0x2b7   :  { %v1874_v56 = vadd.f32 %v1873_v23, %v1764_v37  ;;  %v1876_v24 = vsel %vm1868_vm15, %v1852_v36, 0.0 }
 0x2b8   :  { %v1769_v39 = vpop.f32.mrb[4].mxu1  ;;  %v6045_v22 = vpop.f32.mrb[10].mxu0  ;;  %v1869_v59 = vsel %vm1868_vm15, %v1847_v11, 0.0  ;;  %v1887_v4 = vadd.f32 %v10174_v16, %v10171_v53 }
 0x2b9   :  { %v1875_v52 = vadd.f32 %v1874_v56, %v1766_v21  ;;  %v1770_v10 = vadd.f32 %v1769_v39, %v1566_v2  ;;  %v1771_v19 = vpop.f32.mrb[5].mxu1  ;;  %v1856_v17 = vpop.f32.mrb[11].mxu0  ;;  %v1870_v35 = vadd.f32 %v1869_v59, %v1867_v7  ;;  %v1862_v7 = vadd.f32 %v6045_v22, %v1571_v5 }
 0x2ba   :  { %v1772_v63 = vadd.f32 %v1771_v19, %v1566_v2  ;;  %v1857_v18 = vadd.f32 %v1856_v17, %v1566_v2 }
 0x2bb   :  { %v1881_v58 = vadd.f32 %v1880_v8, %v1770_v10  ;;  %1871 = vadd.xlane.f32.xlu0 %v1870_v35  ;;  %v1877_v3 = vadd.f32 %v1876_v24, %v1875_v52  ;;  %v1890_v35 = vsel %vm1868_vm15, %v1862_v7, 0.0 }
 0x2bc   :  { %v1775_v23 = vpop.f32.mrb[6].mxu1  ;;  %v1883_v39 = vsel %vm1868_vm15, %v1857_v18, 0.0 }
 0x2bd   :  { %v1882_v34 = vadd.f32 %v1881_v58, %v1772_v63  ;;  %v1776_v9 = vadd.f32 %v1775_v23, %v1571_v5  ;;  %v1777_v25 = vpop.f32.mrb[7].mxu1  ;;  %1878 = vadd.xlane.f32.xlu1 %v1877_v3 }
 0x2be   :  { %v10178_v56 = vadd.f32 %v1777_v25, %v1571_v5 }
 0x2bf   :  { %v1888_v41 = vadd.f32 %v1887_v4, %v1776_v9  ;;  %v1884_v59 = vadd.f32 %v1883_v39, %v1882_v34 }
 0x2c1   :  { %v1889_v17 = vadd.f32 %v1888_v41, %v10178_v56  ;;  %1885 = vadd.xlane.f32.xlu0 %v1884_v59 }
 0x2c3   :  { %v1891_v52 = vadd.f32 %v1890_v35, %v1889_v17 }
 0x2c5   :  { %1892 = vadd.xlane.f32.xlu0 %v1891_v52 }
 0x348   :  { %v1872_v8 = vpop.xlane.xlu0 %1871 }
 0x349   :  { %v1895_v19 = vmul.f32 0.001633987, %v1872_v8 }
 0x34a   :  { %v1879_v2 = vpop.xlane.xlu1 %1878 }
 0x34b   :  { %v1896_v24 = vmul.f32 0.001633987, %v1879_v2  ;;  %v10184_v58 = vsub.f32 %v10152_v14, %v1895_v19  ;;  %v10187_v25 = vsub.f32 %v10154_v13, %v1895_v19  ;;  %v10189_v5 = vsub.f32 %v1758_v57, %v1895_v19 }
 0x34c   :  { %v10191_v34 = vsub.f32 %v1760_v6, %v1895_v19  ;;  %v10193_v22 = vsub.f32 %v1847_v11, %v1895_v19 }
 0x34d   :  { %v1919_v3 = vmul.f32 %v10184_v58, %v10184_v58  ;;  %v1920_v23 = vmul.f32 %v10187_v25, %v10187_v25  ;;  %v10200_v4 = vsub.f32 %v10158_v38, %v1896_v24  ;;  %v10205_v57 = vsub.f32 %v10160_v62, %v1896_v24 }
 0x34e   :  { %v1886_v14 = vpop.xlane.xlu0 %1885  ;;  %v1923_v13 = vmul.f32 %v10193_v22, %v10193_v22  ;;  %v10207_v6 = vsub.f32 %v1764_v37, %v1896_v24  ;;  %v1921_v39 = vmul.f32 %v10189_v5, %v10189_v5  ;;  %v10211_v59 = vsub.f32 %v1852_v36, %v1896_v24 }
 0x34f   :  { %v1897_v11 = vmul.f32 0.001633987, %v1886_v14  ;;  %v1939_v41 = vadd.f32 %v1920_v23, %v1919_v3  ;;  %v1922_v38 = vmul.f32 %v10191_v34, %v10191_v34  ;;  %v10215_v17 = vsub.f32 %v1766_v21, %v1896_v24 }
 0x350   :  { %v1924_v35 = vmul.f32 %v10200_v4, %v10200_v4  ;;  %v1925_v62 = vmul.f32 %v10205_v57, %v10205_v57  ;;  %v1942_v52 = vsel %vm1868_vm15, %v1923_v13, 0.0  ;;  %v1928_v8 = vmul.f32 %v10211_v59, %v10211_v59 }
 0x351   :  { %v1940_v37 = vadd.f32 %v1939_v41, %v1921_v39  ;;  %v10225_v36 = vsub.f32 %v10162_v55, %v1897_v11  ;;  %v1926_v21 = vmul.f32 %v10207_v6, %v10207_v6  ;;  %v10230_v24 = vsub.f32 %v10164_v54, %v1897_v11 }
 0x352   :  { %v1893_v19 = vpop.xlane.xlu0 %1892  ;;  %v1946_v2 = vadd.f32 %v1925_v62, %v1924_v35  ;;  %v10232_v3 = vsub.f32 %v1770_v10, %v1897_v11  ;;  %v10234_v39 = vsub.f32 %v1772_v63, %v1897_v11  ;;  %v10236_v13 = vsub.f32 %v1857_v18, %v1897_v11 }
 0x353   :  { %v1898_v23 = vmul.f32 0.001633987, %v1893_v19  ;;  %v1941_v14 = vadd.f32 %v1940_v37, %v1922_v38  ;;  %v1927_v55 = vmul.f32 %v10215_v17, %v10215_v17  ;;  %v1929_v0 = vmul.f32 %v10225_v36, %v10225_v36 }
 0x354   :  { %v1947_v41 = vadd.f32 %v1946_v2, %v1926_v21  ;;  %v1930_v35 = vmul.f32 %v10230_v24, %v10230_v24  ;;  %v1949_v10 = vsel %vm1868_vm15, %v1928_v8, 0.0  ;;  %v1931_v38 = vmul.f32 %v10232_v3, %v10232_v3 }
 0x355   :  { %v1943_v54 = vadd.f32 %v1942_v52, %v1941_v14  ;;  %v10248_v63 = vsub.f32 %v10171_v53, %v1898_v23  ;;  %v10251_v62 = vsub.f32 %v10174_v16, %v1898_v23  ;;  %v10253_v37 = vsub.f32 %v1776_v9, %v1898_v23 }
 0x356   :  { %v1948_v18 = vadd.f32 %v1947_v41, %v1927_v55  ;;  %v1953_v11 = vadd.f32 %v1930_v35, %v1929_v0  ;;  %v1932_v19 = vmul.f32 %v10234_v39, %v10234_v39  ;;  %v1933_v52 = vmul.f32 %v10236_v13, %v10236_v13 }
 0x357   :  { %1944 = vadd.xlane.f32.xlu1 %v1943_v54  ;;  %v10259_v8 = vsub.f32 %v1862_v7, %v1898_v23  ;;  %v1934_v53 = vmul.f32 %v10248_v63, %v10248_v63  ;;  %v10264_v0 = vsub.f32 %v10178_v56, %v1898_v23  ;;  %v1935_v9 = vmul.f32 %v10251_v62, %v10251_v62 }
 0x358   :  { %v1950_v21 = vadd.f32 %v1949_v10, %v1948_v18  ;;  %v1954_v2 = vadd.f32 %v1953_v11, %v1931_v38  ;;  %v1936_v14 = vmul.f32 %v10253_v37, %v10253_v37  ;;  %v1956_v7 = vsel %vm1868_vm15, %v1933_v52, 0.0 }
 0x359   :  { %v1960_v55 = vadd.f32 %v1935_v9, %v1934_v53  ;;  %v1938_v41 = vmul.f32 %v10259_v8, %v10259_v8  ;;  %v1937_v54 = vmul.f32 %v10264_v0, %v10264_v0  ;;  %v6976_v18 = vmov 2  }
 0x35a   :  { %1951 = vadd.xlane.f32.xlu0 %v1950_v21  ;;  %v1955_v16 = vadd.f32 %v1954_v2, %v1932_v19  ;;  %6858 = vset.pattern.permute.xlu1 %v6976_v18  ;;  %v6977_v11 = vmov 1  }
 0x35b   :  { %v1961_v56 = vadd.f32 %v1960_v55, %v1936_v14  ;;  %v1963_v10 = vsel %vm1868_vm15, %v1938_v41, 0.0  ;;  %6857 = vset.pattern.permute.xlu0 %v6977_v11 }
 0x35c   :  { %v1957_v35 = vadd.f32 %v1956_v7, %v1955_v16 }
 0x35d   :  { %v1962_v23 = vadd.f32 %v1961_v56, %v1937_v54 }
 0x35e   :  { %1958 = vadd.xlane.f32.xlu1 %v1957_v35 }
 0x35f   :  { %v1964_v38 = vadd.f32 %v1963_v10, %v1962_v23 }
 0x361   :  { %1965 = vadd.xlane.f32.xlu0 %v1964_v38 }
 0x36f   :  { %2024 = vperm.xlu1 %6858, %v10071_v60  }
 0x373   :  { %2028 = vperm.xlu1 %6858, %v10076_v20  }
 0x377   :  { %2032 = vperm.xlu1 %6858, %v10083_v61  }
 0x37b   :  { %6859 = vset.pattern.permute.xlu1 %v6977_v11 }
 0x3e4   :  { %v1945_v19 = vpop.xlane.xlu1 %1944 }
 0x3e5   :  { %v1967_v52 = vmul.f32 0.001633987, %v1945_v19 }
 0x3e7   :  { %v1971_v53 = vadd.f32 1e-05, %v1967_v52  ;;  %v1952_v21 = vpop.xlane.xlu0 %1951 }
 0x3e8   :  { %v1968_v2 = vmul.f32 0.001633987, %v1952_v21 }
 0x3e9   :  { %6862 = vrsqrt.f32 %v1971_v53 }
 0x3ea   :  { %v1972_v9 = vadd.f32 1e-05, %v1968_v2 }
 0x3eb   :  { %v1959_v16 = vpop.xlane.xlu1 %1958 }
 0x3ec   :  { %6864 = vrsqrt.f32 %v1972_v9  ;;  %v1969_v14 = vmul.f32 0.001633987, %v1959_v16 }
 0x3ee   :  { %v1966_v55 = vpop.xlane.xlu0 %1965  ;;  %v1973_v41 = vadd.f32 1e-05, %v1969_v14 }
 0x3ef   :  { %v1970_v7 = vmul.f32 0.001633987, %v1966_v55  ;;  %v2025_v53 = vpop.permute.xlu1 %2024 }
 0x3f1   :  { %v1974_v35 = vadd.f32 1e-05, %v1970_v7 }
 0x3f3   :  { %v6863_v54 = vpop.eup %6862  ;;  %6866 = vrsqrt.f32 %v1974_v35  ;;  %v2029_v21 = vpop.permute.xlu1 %2028 }
 0x3f4   :  { %v1979_v56 = vmul.f32 %v6863_v54, %v10071_v60  ;;  %6868 = vrsqrt.f32 %v1973_v41 }
 0x3f6   :  { %v6865_v23 = vpop.eup %6864  ;;  %1985 = vperm.xlu1 %6859, %v1979_v56  }
 0x3f7   :  { %v1980_v10 = vmul.f32 %v6865_v23, %v10076_v20  ;;  %v2033_v2 = vpop.permute.xlu1 %2032 }
 0x3f9   :  { %1990 = vperm.xlu0 %6857, %v1980_v10  }
 0x3fd   :  { %6861 = vset.pattern.permute.xlu0 %v6976_v18  ;;  %v6867_v38 = vpop.eup %6866 }
 0x3fe   :  { %v1982_v11 = vmul.f32 %v6867_v38, %v10089_v12  ;;  %v6869_v19 = vpop.eup %6868 }
 0x3ff   :  { %v1981_v52 = vmul.f32 %v6869_v19, %v10083_v61 }
 0x400   :  { %2000 = vperm.xlu1 %6859, %v1982_v11  }
 0x404   :  { %1995 = vperm.xlu1 %6859, %v1981_v52  }
 0x408   :  { %6860 = vset.pattern.permute.xlu1 %v6976_v18 }
 0x409   :  { %2036 = vperm.xlu1 %6860, %v10089_v12  }
 0x475   :  { %v1986_v9 = vpop.permute.xlu1 %1985 }
 0x476   :  { %v2003_v16 = vmul.f32 %v1986_v9, %v10184_v58  ;;  %v2004_v14 = vmul.f32 %v1986_v9, %v10187_v25  ;;  %v2005_v55 = vmul.f32 %v1986_v9, %v10189_v5  ;;  %v2006_v7 = vmul.f32 %v1986_v9, %v10191_v34 }
 0x477   :  { %v2007_v41 = vmul.f32 %v1986_v9, %v10193_v22 }
 0x478   :  { %v10289_v35 = vadd.f32 %v2025_v53, %v2003_v16  ;;  %v2040_v54 = vadd.f32 %v2025_v53, %v2004_v14  ;;  %v10291_v18 = vadd.f32 %v2025_v53, %v2005_v55  ;;  %v10293_v56 = vadd.f32 %v2025_v53, %v2006_v7  ;;  %v1991_v23 = vpop.permute.xlu0 %1990 }
 0x479   :  { %v10295_v10 = vadd.f32 %v2025_v53, %v2007_v41  ;;  %v2008_v58 = vmul.f32 %v1991_v23, %v10200_v4  ;;  %v2009_v25 = vmul.f32 %v1991_v23, %v10205_v57  ;;  %v2010_v5 = vmul.f32 %v1991_v23, %v10207_v6 }
 0x47a   :  { %v2060_v38 = vmax.f32 %v2040_v54, 0.0  ;;  %v2011_v52 = vmul.f32 %v1991_v23, %v10215_v17  ;;  %v2012_v53 = vmul.f32 %v1991_v23, %v10211_v59 }
 0x47b   :  { %v10306_v9 = vadd.f32 %v2029_v21, %v2008_v58  ;;  %v10308_v4 = vadd.f32 %v2029_v21, %v2009_v25  ;;  %v10310_v57 = vadd.f32 %v2029_v21, %v2010_v5 }
 0x47c   :  { %v10312_v6 = vadd.f32 %v2029_v21, %v2011_v52  ;;  %v10314_v16 = vadd.f32 %v2029_v21, %v2012_v53 }
 0x47f   :  { %v2001_v41 = vpop.permute.xlu1 %2000 }
 0x480   :  { %v2018_v52 = vmul.f32 %v2001_v41, %v10248_v63  ;;  %v2019_v53 = vmul.f32 %v2001_v41, %v10251_v62 }
 0x483   :  { %v1996_v54 = vpop.permute.xlu1 %1995 }
 0x484   :  { %v2013_v23 = vmul.f32 %v1996_v54, %v10225_v36  ;;  %v2014_v58 = vmul.f32 %v1996_v54, %v10230_v24  ;;  %v2015_v25 = vmul.f32 %v1996_v54, %v10232_v3  ;;  %v2016_v21 = vmul.f32 %v1996_v54, %v10234_v39 }
 0x485   :  { %v2017_v5 = vmul.f32 %v1996_v54, %v10236_v13  ;;  %v2020_v24 = vmul.f32 %v2001_v41, %v10253_v37  ;;  %v2021_v3 = vmul.f32 %v2001_v41, %v10264_v0  ;;  %v2022_v39 = vmul.f32 %v2001_v41, %v10259_v8 }
 0x486   :  { %v10328_v19 = vadd.f32 %v2033_v2, %v2013_v23  ;;  %v10330_v7 = vadd.f32 %v2033_v2, %v2014_v58  ;;  %v10332_v59 = vadd.f32 %v2033_v2, %v2015_v25  ;;  %v10334_v17 = vadd.f32 %v2033_v2, %v2016_v21 }
 0x487   :  { %v10336_v36 = vadd.f32 %v2033_v2, %v2017_v5 }
 0x488   :  { %v2037_v23 = vpop.permute.xlu1 %2036 }
 0x489   :  { %v10346_v25 = vadd.f32 %v2037_v23, %v2018_v52  ;;  %v10348_v2 = vadd.f32 %v2037_v23, %v2019_v53  ;;  %v10350_v37 = vadd.f32 %v2037_v23, %v2020_v24  ;;  %v10352_v0 = vadd.f32 %v2037_v23, %v2021_v3 }
 0x48a   :  { %v10354_v8 = vadd.f32 %v2037_v23, %v2022_v39 }
 0x48b   :  { %6959 = dma.done.wait [#allocation6], 19712 }
 0x48c   :  { %6960 = vsyncadd [#allocation6], 4294947584  ;;  %2320 = vmatprep.mubr.f32.mxu1 %v2060_v38  ;;  %2620 = vmatprep.mubr.f32.mxu0 %v11791_v15  ;;  %v2084_v52 = vld [vmem:[#allocation2 + $0x8] sm:$0xff]  ;;  %v2086_v53 = vld [vmem:[#allocation2 + $0x18] sm:$0xff]  ;;  %vm2249_vm0 = vcmask 1043456   ;;  %s6978_s18 = smov 96  }
 0x48d   :  { %v2083_v24 = vld [vmem:[#allocation2] sm:$0xff]  ;;  %v6081_v3 = vpack.c.bf16 %v2086_v53, %v2084_v52  ;;  %v2085_v39 = vld [vmem:[#allocation2 + $0x10] sm:$0xff]  ;;  %v2088_v23 = vld [vmem:[#allocation2 + $0x28] sm:$0xff]  ;;  %vm2543_vm1 = vcmask 261120   ;;  %s6979_s24 = smov 64  }
 0x48e   :  { %v2090_v54 = vld [vmem:[#allocation2 + $0x38] sm:$0xff]  ;;  %v6083_v22 = vpack.c.bf16 %v2085_v39, %v2083_v24  ;;  %v2087_v41 = vld [vmem:[#allocation2 + $0x20] sm:$0xff]  ;;  %v2089_v5 = vld [vmem:[#allocation2 + $0x30] sm:$0xff] }
 0x48f   :  { %v6085_v11 = vpack.c.bf16 %v2090_v54, %v2088_v23  ;;  %v2092_v21 = vld [vmem:[#allocation2 + $0x48] sm:$0xff]  ;;  %6082 = vmatprep.subr.bf16.mxu1 %v6081_v3  ;;  %v2094_v62 = vld [vmem:[#allocation2 + $0x58] sm:$0xff]  ;;  %v6087_v58 = vpack.c.bf16 %v2089_v5, %v2087_v41  ;;  %v2091_v13 = vld [vmem:[#allocation2 + $0x40] sm:$0xff] }
 0x490   :  { %6084 = vmatpush1.bf16.msra.mxu1 %v6083_v22  ;;  %v6089_v38 = vpack.c.bf16 %v2094_v62, %v2092_v21  ;;  %v2093_v63 = vld [vmem:[#allocation2 + $0x50] sm:$0xff]  ;;  %v2096_v14 = vld [vmem:[#allocation2 + $0x68] sm:$0xff]  ;;  %v2098_v55 = vld [vmem:[#allocation2 + $0x78] sm:$0xff] }
 0x491   :  { %6086 = vmatprep.subr.bf16.mxu1 %v6085_v11  ;;  %v6091_v52 = vpack.c.bf16 %v2093_v63, %v2091_v13  ;;  %v6093_v53 = vpack.c.bf16 %v2098_v55, %v2096_v14  ;;  %v2095_v34 = vld [vmem:[#allocation2 + $0x60] sm:$0xff]  ;;  %v2097_v24 = vld [vmem:[#allocation2 + $0x70] sm:$0xff]  ;;  %v2100_v54 = vld [vmem:[#allocation2 + $0x88] sm:$0xff] }
 0x492   :  { %v2102_v39 = vld [vmem:[#allocation2 + $0x98] sm:$0xff]  ;;  %v6095_v23 = vpack.c.bf16 %v2097_v24, %v2095_v34  ;;  %v2099_v22 = vld [vmem:[#allocation2 + $0x80] sm:$0xff]  ;;  %v2101_v41 = vld [vmem:[#allocation2 + $0x90] sm:$0xff] }
 0x493   :  { %v6097_v3 = vpack.c.bf16 %v2102_v39, %v2100_v54  ;;  %v2104_v11 = vld [vmem:[#allocation2 + $0xa8] sm:$0xff]  ;;  %v2106_v62 = vld [vmem:[#allocation2 + $0xb8] sm:$0xff]  ;;  %v6099_v21 = vpack.c.bf16 %v2101_v41, %v2099_v22  ;;  %v2105_v13 = vld [vmem:[#allocation2 + $0xb0] sm:$0xff] }
 0x494   :  { %6088 = vmatpush1.bf16.msra.mxu1 %v6087_v58  ;;  %v6101_v5 = vpack.c.bf16 %v2106_v62, %v2104_v11  ;;  %v2103_v58 = vld [vmem:[#allocation2 + $0xa0] sm:$0xff]  ;;  %v2108_v63 = vld [vmem:[#allocation2 + $0xc8] sm:$0xff]  ;;  %v2110_v14 = vld [vmem:[#allocation2 + $0xd8] sm:$0xff] }
 0x495   :  { %6090 = vmatprep.subr.bf16.mxu1 %v6089_v38  ;;  %v6103_v55 = vpack.c.bf16 %v2105_v13, %v2103_v58  ;;  %v6105_v38 = vpack.c.bf16 %v2110_v14, %v2108_v63  ;;  %v2109_v34 = vld [vmem:[#allocation2 + $0xd0] sm:$0xff]  ;;  %v2114_v24 = vld [vmem:[#allocation2 + $0xf8] sm:$0xff] }
 0x496   :  { %v2113_v22 = vld [vmem:[#allocation2 + $0xf0] sm:$0xff]  ;;  %v2118_v41 = vld [vmem:[#allocation2 + $0x118] sm:$0xff] }
 0x497   :  { %v2117_v58 = vld [vmem:[#allocation2 + $0x110] sm:$0xff]  ;;  %v2122_v13 = vld [vmem:[#allocation2 + $0x138] sm:$0xff] }
 0x498   :  { %6092 = vmatpush1.bf16.msra.mxu1 %v6091_v52  ;;  %v2107_v52 = vld [vmem:[#allocation2 + $0xc0] sm:$0xff] }
 0x499   :  { %6094 = vmatprep.subr.bf16.mxu1 %v6093_v53  ;;  %v2112_v53 = vld [vmem:[#allocation2 + $0xe8] sm:$0xff]  ;;  %v6107_v54 = vpack.c.bf16 %v2109_v34, %v2107_v52  ;;  %v2121_v52 = vld [vmem:[#allocation2 + $0x130] sm:$0xff]  ;;  %v2126_v34 = vld [vmem:[#allocation2 + $0x158] sm:$0xff] }
 0x49a   :  { %v6109_v39 = vpack.c.bf16 %v2114_v24, %v2112_v53 }
 0x49c   :  { %6096 = vmatpush1.bf16.msra.mxu1 %v6095_v23  ;;  %v2111_v23 = vld [vmem:[#allocation2 + $0xe0] sm:$0xff] }
 0x49d   :  { %6098 = vmatprep.subr.bf16.mxu1 %v6097_v3  ;;  %v2116_v3 = vld [vmem:[#allocation2 + $0x108] sm:$0xff]  ;;  %v6111_v11 = vpack.c.bf16 %v2113_v22, %v2111_v23  ;;  %v2125_v23 = vld [vmem:[#allocation2 + $0x150] sm:$0xff]  ;;  %v2130_v22 = vld [vmem:[#allocation2 + $0x178] sm:$0xff] }
 0x49e   :  { %v6113_v62 = vpack.c.bf16 %v2118_v41, %v2116_v3 }
 0x4a0   :  { %6100 = vmatpush1.bf16.msra.mxu1 %v6099_v21  ;;  %v2115_v21 = vld [vmem:[#allocation2 + $0x100] sm:$0xff] }
 0x4a1   :  { %6102 = vmatprep.subr.bf16.mxu1 %v6101_v5  ;;  %v2120_v5 = vld [vmem:[#allocation2 + $0x128] sm:$0xff]  ;;  %v6115_v63 = vpack.c.bf16 %v2117_v58, %v2115_v21  ;;  %v2129_v21 = vld [vmem:[#allocation2 + $0x170] sm:$0xff]  ;;  %v2134_v58 = vld [vmem:[#allocation2 + $0x198] sm:$0xff] }
 0x4a2   :  { %v6117_v14 = vpack.c.bf16 %v2122_v13, %v2120_v5 }
 0x4a4   :  { %6104 = vmatpush1.bf16.msra.mxu1 %v6103_v55  ;;  %v2119_v55 = vld [vmem:[#allocation2 + $0x120] sm:$0xff] }
 0x4a5   :  { %6106 = vmatprep.subr.bf16.mxu1 %v6105_v38  ;;  %v2124_v38 = vld [vmem:[#allocation2 + $0x148] sm:$0xff]  ;;  %v6119_v53 = vpack.c.bf16 %v2121_v52, %v2119_v55  ;;  %v2133_v55 = vld [vmem:[#allocation2 + $0x190] sm:$0xff]  ;;  %v2138_v52 = vld [vmem:[#allocation2 + $0x1b8] sm:$0xff] }
 0x4a6   :  { %v6121_v24 = vpack.c.bf16 %v2126_v34, %v2124_v38 }
 0x4a8   :  { %6108 = vmatpush1.bf16.msra.mxu1 %v6107_v54  ;;  %v2123_v54 = vld [vmem:[#allocation2 + $0x140] sm:$0xff] }
 0x4a9   :  { %6110 = vmatprep.subr.bf16.mxu1 %v6109_v39  ;;  %v2128_v39 = vld [vmem:[#allocation2 + $0x168] sm:$0xff]  ;;  %v6123_v3 = vpack.c.bf16 %v2125_v23, %v2123_v54  ;;  %v2137_v54 = vld [vmem:[#allocation2 + $0x1b0] sm:$0xff]  ;;  %v2142_v23 = vld [vmem:[#allocation2 + $0x1d8] sm:$0xff] }
 0x4aa   :  { %v6125_v41 = vpack.c.bf16 %v2130_v22, %v2128_v39 }
 0x4ac   :  { %6112 = vmatpush1.bf16.msra.mxu1 %v6111_v11  ;;  %v2127_v11 = vld [vmem:[#allocation2 + $0x160] sm:$0xff] }
 0x4ad   :  { %6114 = vmatprep.subr.bf16.mxu1 %v6113_v62  ;;  %v2132_v62 = vld [vmem:[#allocation2 + $0x188] sm:$0xff]  ;;  %v6127_v5 = vpack.c.bf16 %v2129_v21, %v2127_v11  ;;  %v2141_v11 = vld [vmem:[#allocation2 + $0x1d0] sm:$0xff]  ;;  %v2146_v21 = vld [vmem:[#allocation2 + $0x1f8] sm:$0xff] }
 0x4ae   :  { %v6129_v13 = vpack.c.bf16 %v2134_v58, %v2132_v62 }
 0x4b0   :  { %6116 = vmatpush1.bf16.msra.mxu1 %v6115_v63  ;;  %v2131_v63 = vld [vmem:[#allocation2 + $0x180] sm:$0xff] }
 0x4b1   :  { %6118 = vmatprep.subr.bf16.mxu1 %v6117_v14  ;;  %v2136_v14 = vld [vmem:[#allocation2 + $0x1a8] sm:$0xff]  ;;  %v6131_v38 = vpack.c.bf16 %v2133_v55, %v2131_v63  ;;  %v2145_v63 = vld [vmem:[#allocation2 + $0x1f0] sm:$0xff]  ;;  %v2150_v55 = vld [vmem:[#allocation2 + $0x218] sm:$0xff] }
 0x4b2   :  { %v6133_v34 = vpack.c.bf16 %v2138_v52, %v2136_v14 }
 0x4b4   :  { %6120 = vmatpush1.bf16.msra.mxu1 %v6119_v53  ;;  %v2135_v53 = vld [vmem:[#allocation2 + $0x1a0] sm:$0xff] }
 0x4b5   :  { %6122 = vmatprep.subr.bf16.mxu1 %v6121_v24  ;;  %v2140_v24 = vld [vmem:[#allocation2 + $0x1c8] sm:$0xff]  ;;  %v6135_v39 = vpack.c.bf16 %v2137_v54, %v2135_v53  ;;  %v2149_v53 = vld [vmem:[#allocation2 + $0x210] sm:$0xff]  ;;  %v2154_v54 = vld [vmem:[#allocation2 + $0x238] sm:$0xff] }
 0x4b6   :  { %v6137_v22 = vpack.c.bf16 %v2142_v23, %v2140_v24 }
 0x4b8   :  { %6124 = vmatpush1.bf16.msra.mxu1 %v6123_v3  ;;  %v2139_v3 = vld [vmem:[#allocation2 + $0x1c0] sm:$0xff] }
 0x4b9   :  { %6126 = vmatprep.subr.bf16.mxu1 %v6125_v41  ;;  %v2144_v41 = vld [vmem:[#allocation2 + $0x1e8] sm:$0xff]  ;;  %v6139_v62 = vpack.c.bf16 %v2141_v11, %v2139_v3  ;;  %v2153_v3 = vld [vmem:[#allocation2 + $0x230] sm:$0xff]  ;;  %v2158_v11 = vld [vmem:[#allocation2 + $0x258] sm:$0xff] }
 0x4ba   :  { %v6141_v58 = vpack.c.bf16 %v2146_v21, %v2144_v41  ;;  %v11792_v41 = vmax.f32 %v10289_v35, 0.0 }
 0x4bc   :  { %6128 = vmatpush1.bf16.msra.mxu1 %v6127_v5  ;;  %v2143_v5 = vld [vmem:[#allocation2 + $0x1e0] sm:$0xff] }
 0x4bd   :  { %6130 = vmatprep.subr.bf16.mxu1 %v6129_v13  ;;  %v2148_v13 = vld [vmem:[#allocation2 + $0x208] sm:$0xff]  ;;  %v6143_v14 = vpack.c.bf16 %v2145_v63, %v2143_v5  ;;  %v2155_v5 = vld [vmem:[#allocation2 + $0x240] sm:$0xff]  ;;  %v2157_v63 = vld [vmem:[#allocation2 + $0x250] sm:$0xff] }
 0x4be   :  { %v6145_v52 = vpack.c.bf16 %v2150_v55, %v2148_v13  ;;  %v2160_v13 = vld [vmem:[#allocation2 + $0x268] sm:$0xff]  ;;  %v2162_v55 = vld [vmem:[#allocation2 + $0x278] sm:$0xff] }
 0x4bf   :  { %v6157_v35 = vpack.c.bf16 %v2162_v55, %v2160_v13 }
 0x4c0   :  { %6132 = vmatpush1.bf16.msra.mxu1 %v6131_v38  ;;  %v2147_v38 = vld [vmem:[#allocation2 + $0x200] sm:$0xff] }
 0x4c1   :  { %6134 = vmatprep.subr.bf16.mxu1 %v6133_v34  ;;  %v2152_v34 = vld [vmem:[#allocation2 + $0x228] sm:$0xff]  ;;  %v6147_v24 = vpack.c.bf16 %v2149_v53, %v2147_v38  ;;  %v11795_v38 = vmax.f32 %v10330_v7, 0.0  ;;  %v2159_v53 = vld [vmem:[#allocation2 + $0x260] sm:$0xff] }
 0x4c2   :  { %v6149_v23 = vpack.c.bf16 %v2154_v54, %v2152_v34  ;;  %v2161_v34 = vld [vmem:[#allocation2 + $0x270] sm:$0xff]  ;;  %v2166_v54 = vld [vmem:[#allocation2 + $0x298] sm:$0xff]  ;;  %v2168_v7 = vld [vmem:[#allocation2 + $0x2a8] sm:$0xff] }
 0x4c4   :  { %6136 = vmatpush1.bf16.msra.mxu1 %v6135_v39  ;;  %v2151_v39 = vld [vmem:[#allocation2 + $0x220] sm:$0xff] }
 0x4c5   :  { %6138 = vmatprep.subr.bf16.mxu1 %v6137_v22  ;;  %v2156_v22 = vld [vmem:[#allocation2 + $0x248] sm:$0xff]  ;;  %v6151_v21 = vpack.c.bf16 %v2153_v3, %v2151_v39  ;;  %v11797_v39 = vmax.f32 %v10348_v2, 0.0  ;;  %v2163_v3 = vld [vmem:[#allocation2 + $0x280] sm:$0xff] }
 0x4c6   :  { %v2172_v2 = vld [vmem:[#allocation2 + $0x2c8] sm:$0xff] }
 0x4c8   :  { %6140 = vmatpush1.bf16.msra.mxu1 %v6139_v62  ;;  %v11793_v62 = vmax.f32 %v10308_v4, 0.0  ;;  %v2164_v4 = vld [vmem:[#allocation2 + $0x288] sm:$0xff] }
 0x4c9   :  { %6142 = vmatprep.subr.bf16.mxu1 %v6141_v58  ;;  %v6153_v58 = vpack.c.bf16 %v2158_v11, %v2156_v22  ;;  %v2165_v22 = vld [vmem:[#allocation2 + $0x290] sm:$0xff]  ;;  %v2170_v11 = vld [vmem:[#allocation2 + $0x2b8] sm:$0xff] }
 0x4cc   :  { %6144 = vmatpush1.bf16.msra.mxu1 %v6143_v14  ;;  %v11794_v14 = vmax.f32 %v10306_v9, 0.0  ;;  %v6161_v9 = vpack.c.bf16 %v2166_v54, %v2164_v4  ;;  %v2180_v4 = vld [vmem:[#allocation2 + $0x308] sm:$0xff]  ;;  %v2182_v54 = vld [vmem:[#allocation2 + $0x318] sm:$0xff] }
 0x4cd   :  { %6146 = vmatprep.subr.bf16.mxu1 %v6145_v52  ;;  %v6155_v52 = vpack.c.bf16 %v2157_v63, %v2155_v5  ;;  %v2169_v5 = vld [vmem:[#allocation2 + $0x2b0] sm:$0xff]  ;;  %v2174_v63 = vld [vmem:[#allocation2 + $0x2d8] sm:$0xff] }
 0x4ce   :  { %v6169_v55 = vpack.c.bf16 %v2174_v63, %v2172_v2  ;;  %v2187_v2 = vld [vmem:[#allocation2 + $0x340] sm:$0xff]  ;;  %v2189_v63 = vld [vmem:[#allocation2 + $0x350] sm:$0xff] }
 0x4cf   :  { %2321 = vmatmul.mubr.f32.vlgmr.msra.gmra.mrb[8].mxu1 %v11792_v41  ;;  %v11798_v41 = vmax.f32 %v10346_v25, 0.0  ;;  %v2178_v25 = vld [vmem:[#allocation2 + $0x2f8] sm:$0xff] }
 0x4d0   :  { %6148 = vmatpush1.bf16.msra.mxu1 %v6147_v24  ;;  %2326 = vmatprep.mubr.f32.mxu1 %v11793_v62  ;;  %v11796_v24 = vmax.f32 %v10328_v19, 0.0  ;;  %v11799_v62 = vmax.f32 %v10293_v56, 0.0  ;;  %v6165_v19 = vpack.c.bf16 %v2170_v11, %v2168_v7  ;;  %v2175_v56 = vld [vmem:[#allocation2 + $0x2e0] sm:$0xff] }
 0x4d1   :  { %6150 = vmatprep.subr.bf16.mxu1 %v6149_v23  ;;  %v6159_v23 = vpack.c.bf16 %v2161_v34, %v2159_v53  ;;  %v2177_v34 = vld [vmem:[#allocation2 + $0x2f0] sm:$0xff] }
 0x4d3   :  { %2327 = vmatmul.mubr.f32.gmra.mrb[10].mxu1 %v11794_v14  ;;  %v2171_v14 = vld [vmem:[#allocation2 + $0x2c0] sm:$0xff] }
 0x4d4   :  { %6152 = vmatpush1.bf16.msra.mxu1 %v6151_v21  ;;  %2332 = vmatprep.mubr.f32.mxu1 %v11795_v38  ;;  %v6163_v21 = vpack.c.bf16 %v2165_v22, %v2163_v3  ;;  %v2176_v38 = vld [vmem:[#allocation2 + $0x2e8] sm:$0xff]  ;;  %v2186_v22 = vld [vmem:[#allocation2 + $0x338] sm:$0xff] }
 0x4d5   :  { %6154 = vmatprep.subr.bf16.mxu1 %v6153_v58  ;;  %v2167_v58 = vld [vmem:[#allocation2 + $0x2a0] sm:$0xff]  ;;  %v6173_v53 = vpack.c.bf16 %v2178_v25, %v2176_v38  ;;  %v2184_v3 = vld [vmem:[#allocation2 + $0x328] sm:$0xff]  ;;  %v2193_v25 = vld [vmem:[#allocation2 + $0x370] sm:$0xff] }
 0x4d6   :  { %v6167_v13 = vpack.c.bf16 %v2169_v5, %v2167_v58  ;;  %v6181_v11 = vpack.c.bf16 %v2186_v22, %v2184_v3  ;;  %v2191_v38 = vld [vmem:[#allocation2 + $0x360] sm:$0xff]  ;;  %v2201_v22 = vld [vmem:[#allocation2 + $0x3b0] sm:$0xff] }
 0x4d7   :  { %2333 = vmatmul.mubr.f32.gmra.mrb[12].mxu1 %v11796_v24  ;;  %v6175_v24 = vpack.c.bf16 %v2177_v34, %v2175_v56  ;;  %v6191_v56 = vpack.c.bf16 %v2193_v25, %v2191_v38  ;;  %v2199_v3 = vld [vmem:[#allocation2 + $0x3a0] sm:$0xff] }
 0x4d8   :  { %6156 = vmatpush1.bf16.msra.mxu1 %v6155_v52  ;;  %2338 = vmatprep.mubr.f32.mxu1 %v11797_v39  ;;  %v2173_v52 = vld [vmem:[#allocation2 + $0x2d0] sm:$0xff]  ;;  %v2179_v39 = vld [vmem:[#allocation2 + $0x300] sm:$0xff] }
 0x4d9   :  { %6158 = vmatprep.subr.bf16.mxu1 %v6157_v35  ;;  %v6171_v35 = vpack.c.bf16 %v2173_v52, %v2171_v14  ;;  %v6187_v14 = vpack.c.bf16 %v2189_v63, %v2187_v2 }
 0x4db   :  { %2339 = vmatmul.mubr.f32.gmra.mrb[14].mxu1 %v11798_v41  ;;  %v2183_v41 = vld [vmem:[#allocation2 + $0x320] sm:$0xff] }
 0x4dc   :  { %6160 = vmatpush1.bf16.msra.mxu1 %v6159_v23  ;;  %2409 = vmatprep.mubr.f32.mxu1 %v11799_v62  ;;  %v6177_v23 = vpack.c.bf16 %v2182_v54, %v2180_v4  ;;  %v2188_v62 = vld [vmem:[#allocation2 + $0x348] sm:$0xff]  ;;  %v2195_v4 = vld [vmem:[#allocation2 + $0x380] sm:$0xff]  ;;  %v2197_v54 = vld [vmem:[#allocation2 + $0x390] sm:$0xff] }
 0x4dd   :  { %6162 = vmatprep.subr.bf16.mxu1 %v6161_v9  ;;  %v2181_v9 = vld [vmem:[#allocation2 + $0x310] sm:$0xff] }
 0x4de   :  { %v6179_v7 = vpack.c.bf16 %v2181_v9, %v2179_v39  ;;  %v6195_v39 = vpack.c.bf16 %v2197_v54, %v2195_v4 }
 0x4e0   :  { %6164 = vmatpush1.bf16.msra.mxu1 %v6163_v21  ;;  %v2185_v21 = vld [vmem:[#allocation2 + $0x330] sm:$0xff] }
 0x4e1   :  { %6166 = vmatprep.subr.bf16.mxu1 %v6165_v19  ;;  %v2190_v19 = vld [vmem:[#allocation2 + $0x358] sm:$0xff]  ;;  %v6183_v58 = vpack.c.bf16 %v2185_v21, %v2183_v41  ;;  %v6199_v41 = vpack.c.bf16 %v2201_v22, %v2199_v3  ;;  %v11800_v3 = vmax.f32 %v10291_v18, 0.0 }
 0x4e2   :  { %v6185_v5 = vpack.c.bf16 %v2190_v19, %v2188_v62  ;;  %v2203_v62 = vld [vmem:[#allocation2 + $0x3c0] sm:$0xff]  ;;  %v2205_v19 = vld [vmem:[#allocation2 + $0x3d0] sm:$0xff] }
 0x4e3   :  { %v6203_v2 = vpack.c.bf16 %v2205_v19, %v2203_v62  ;;  %v2224_v62 = vld [vmem:[#allocation2 + $0x468] sm:$0xff]  ;;  %v2226_v19 = vld [vmem:[#allocation2 + $0x478] sm:$0xff] }
 0x4e4   :  { %6168 = vmatpush1.bf16.msra.mxu1 %v6167_v13  ;;  %v2192_v13 = vld [vmem:[#allocation2 + $0x368] sm:$0xff]  ;;  %v6221_v18 = vpack.c.bf16 %v2226_v19, %v2224_v62 }
 0x4e5   :  { %6170 = vmatprep.subr.bf16.mxu1 %v6169_v55  ;;  %v2194_v55 = vld [vmem:[#allocation2 + $0x378] sm:$0xff] }
 0x4e6   :  { %v6189_v52 = vpack.c.bf16 %v2194_v55, %v2192_v13  ;;  %v2207_v13 = vld [vmem:[#allocation2 + $0x3e0] sm:$0xff]  ;;  %v2209_v55 = vld [vmem:[#allocation2 + $0x3f0] sm:$0xff] }
 0x4e7   :  { %v6207_v38 = vpack.c.bf16 %v2209_v55, %v2207_v13  ;;  %v2225_v13 = vld [vmem:[#allocation2 + $0x470] sm:$0xff]  ;;  %v2230_v55 = vld [vmem:[#allocation2 + $0x498] sm:$0xff] }
 0x4e8   :  { %6172 = vmatpush1.bf16.msra.mxu1 %v6171_v35  ;;  %v2196_v35 = vld [vmem:[#allocation2 + $0x388] sm:$0xff] }
 0x4e9   :  { %6174 = vmatprep.subr.bf16.mxu1 %v6173_v53  ;;  %v2198_v53 = vld [vmem:[#allocation2 + $0x398] sm:$0xff] }
 0x4ea   :  { %v6193_v34 = vpack.c.bf16 %v2198_v53, %v2196_v35  ;;  %v2211_v35 = vld [vmem:[#allocation2 + $0x400] sm:$0xff]  ;;  %v2213_v53 = vld [vmem:[#allocation2 + $0x410] sm:$0xff] }
 0x4eb   :  { %v6211_v4 = vpack.c.bf16 %v2213_v53, %v2211_v35  ;;  %v2229_v35 = vld [vmem:[#allocation2 + $0x490] sm:$0xff]  ;;  %v2234_v53 = vld [vmem:[#allocation2 + $0x4b8] sm:$0xff] }
 0x4ec   :  { %6176 = vmatpush1.bf16.msra.mxu1 %v6175_v24  ;;  %v2200_v24 = vld [vmem:[#allocation2 + $0x3a8] sm:$0xff] }
 0x4ed   :  { %6178 = vmatprep.subr.bf16.mxu1 %v6177_v23  ;;  %v2202_v23 = vld [vmem:[#allocation2 + $0x3b8] sm:$0xff] }
 0x4ee   :  { %v6197_v9 = vpack.c.bf16 %v2202_v23, %v2200_v24  ;;  %v2215_v24 = vld [vmem:[#allocation2 + $0x420] sm:$0xff]  ;;  %v2217_v23 = vld [vmem:[#allocation2 + $0x430] sm:$0xff] }
 0x4ef   :  { %v6215_v22 = vpack.c.bf16 %v2217_v23, %v2215_v24  ;;  %v2236_v24 = vld [vmem:[#allocation2 + $0x4c8] sm:$0xf]  ;;  %v2235_v23 = vld [vmem:[#allocation2 + $0x4c0] sm:$0xf] }
 0x4f0   :  { %6180 = vmatpush1.bf16.msra.mxu1 %v6179_v7  ;;  %v2204_v7 = vld [vmem:[#allocation2 + $0x3c8] sm:$0xff] }
 0x4f1   :  { %6182 = vmatprep.subr.bf16.mxu1 %v6181_v11  ;;  %v2206_v11 = vld [vmem:[#allocation2 + $0x3d8] sm:$0xff] }
 0x4f2   :  { %v6201_v21 = vpack.c.bf16 %v2206_v11, %v2204_v7  ;;  %v11801_v7 = vmax.f32 %v10312_v6, 0.0  ;;  %v2228_v6 = vld [vmem:[#allocation2 + $0x488] sm:$0xff] }
 0x4f4   :  { %6184 = vmatpush1.bf16.msra.mxu1 %v6183_v58  ;;  %v2208_v58 = vld [vmem:[#allocation2 + $0x3e8] sm:$0xff] }
 0x4f5   :  { %6186 = vmatprep.subr.bf16.mxu1 %v6185_v5  ;;  %v2210_v5 = vld [vmem:[#allocation2 + $0x3f8] sm:$0xff] }
 0x4f6   :  { %v6205_v63 = vpack.c.bf16 %v2210_v5, %v2208_v58  ;;  %v11802_v58 = vmax.f32 %v10310_v57, 0.0  ;;  %v6225_v57 = vpack.c.bf16 %v2230_v55, %v2228_v6  ;;  %v2525_v6 = vld [vmem:[%s11283_s3 + $0x10] sm:$0xff]  ;;  %v2524_v55 = vld [vmem:[%s11283_s3 + $0x8] sm:$0xff] }
 0x4f8   :  { %6188 = vmatpush1.bf16.msra.mxu1 %v6187_v14  ;;  %v2212_v14 = vld [vmem:[#allocation2 + $0x408] sm:$0xff] }
 0x4f9   :  { %6190 = vmatprep.subr.bf16.mxu1 %v6189_v52  ;;  %v2214_v52 = vld [vmem:[#allocation2 + $0x418] sm:$0xff] }
 0x4fa   :  { %v6209_v25 = vpack.c.bf16 %v2214_v52, %v2212_v14  ;;  %v11804_v14 = vmax.f32 %v10332_v59, 0.0 }
 0x4fc   :  { %6192 = vmatpush1.bf16.msra.mxu1 %v6191_v56  ;;  %v2216_v56 = vld [vmem:[#allocation2 + $0x428] sm:$0xff] }
 0x4fd   :  { %6194 = vmatprep.subr.bf16.mxu1 %v6193_v34  ;;  %v2218_v34 = vld [vmem:[#allocation2 + $0x438] sm:$0xff] }
 0x4fe   :  { %v6213_v54 = vpack.c.bf16 %v2218_v34, %v2216_v56  ;;  %v11806_v56 = vmax.f32 %v10350_v37, 0.0  ;;  %v11807_v37 = vmax.f32 %v10295_v10, 0.0 }
 0x500   :  { %6196 = vmatpush1.bf16.msra.mxu1 %v6195_v39  ;;  %v2220_v39 = vld [vmem:[#allocation2 + $0x448] sm:$0xff] }
 0x501   :  { %6198 = vmatprep.subr.bf16.mxu1 %v6197_v9  ;;  %v2222_v9 = vld [vmem:[#allocation2 + $0x458] sm:$0xff] }
 0x502   :  { %v6217_v11 = vpack.c.bf16 %v2222_v9, %v2220_v39  ;;  %v11808_v39 = vmax.f32 %v10314_v16, 0.0  ;;  %v11809_v9 = vmax.f32 %v10336_v36, 0.0 }
 0x504   :  { %6200 = vmatpush1.bf16.msra.mxu1 %v6199_v41  ;;  %v2219_v41 = vld [vmem:[#allocation2 + $0x440] sm:$0xff] }
 0x505   :  { %6202 = vmatprep.subr.bf16.mxu1 %v6201_v21  ;;  %v2221_v21 = vld [vmem:[#allocation2 + $0x450] sm:$0xff] }
 0x506   :  { %v6219_v5 = vpack.c.bf16 %v2221_v21, %v2219_v41 }
 0x508   :  { %6204 = vmatpush1.bf16.msra.mxu1 %v6203_v2  ;;  %v11803_v2 = vmax.f32 %v10334_v17, 0.0  ;;  %v2232_v17 = vld [vmem:[#allocation2 + $0x4a8] sm:$0xff] }
 0x509   :  { %6206 = vmatprep.subr.bf16.mxu1 %v6205_v63  ;;  %v2223_v63 = vld [vmem:[#allocation2 + $0x460] sm:$0xff]  ;;  %v6229_v59 = vpack.c.bf16 %v2234_v53, %v2232_v17 }
 0x50a   :  { %v6223_v52 = vpack.c.bf16 %v2225_v13, %v2223_v63 }
 0x50c   :  { %6208 = vmatpush1.bf16.msra.mxu1 %v6207_v38  ;;  %v11805_v38 = vmax.f32 %v10352_v0, 0.0 }
 0x50d   :  { %6210 = vmatprep.subr.bf16.mxu1 %v6209_v25  ;;  %v2227_v25 = vld [vmem:[#allocation2 + $0x480] sm:$0xff] }
 0x50e   :  { %v6227_v34 = vpack.c.bf16 %v2229_v35, %v2227_v25 }
 0x50f   :  { %2410 = vmatmul.mubr.f32.vlgmr.msra.gmra.mrb[8].mxu1 %v11800_v3  ;;  %v11810_v3 = vmax.f32 %v10354_v8, 0.0  ;;  %v2523_v8 = vld [vmem:[%s11283_s3] sm:$0xff] }
 0x510   :  { %6212 = vmatpush1.bf16.msra.mxu1 %v6211_v4  ;;  %2415 = vmatprep.mubr.f32.mxu1 %v11801_v7  ;;  %v2231_v4 = vld [vmem:[#allocation2 + $0x4a0] sm:$0xff] }
 0x511   :  { %6214 = vmatprep.subr.bf16.mxu1 %v6213_v54  ;;  %v2233_v54 = vld [vmem:[#allocation2 + $0x4b0] sm:$0xff] }
 0x512   :  { %v6231_v0 = vpack.c.bf16 %v2233_v54, %v2231_v4 }
 0x513   :  { %2416 = vmatmul.mubr.f32.gmra.mrb[10].mxu1 %v11802_v58 }
 0x514   :  { %6216 = vmatpush1.bf16.msra.mxu1 %v6215_v22  ;;  %2421 = vmatprep.mubr.f32.mxu1 %v11803_v2 }
 0x515   :  { %6218 = vmatprep.subr.bf16.mxu1 %v6217_v11 }
 0x517   :  { %2422 = vmatmul.mubr.f32.gmra.mrb[12].mxu1 %v11804_v14  ;;  %v2526_v14 = vld [vmem:[%s11283_s3 + $0x18] sm:$0xff] }
 0x518   :  { %6220 = vmatpush1.bf16.msra.mxu1 %v6219_v5  ;;  %2427 = vmatprep.mubr.f32.mxu1 %v11805_v38 }
 0x519   :  { %6222 = vmatprep.subr.bf16.mxu1 %v6221_v18 }
 0x51b   :  { %2428 = vmatmul.mubr.f32.gmra.mrb[14].mxu1 %v11806_v56 }
 0x51c   :  { %6224 = vmatpush1.bf16.msra.mxu1 %v6223_v52  ;;  %2498 = vmatprep.mubr.f32.mxu1 %v11791_v15  ;;  %v6980_v52 = vmov 3  }
 0x51d   :  { %6226 = vmatprep.subr.bf16.mxu1 %v6225_v57  ;;  %6910 = vset.pattern.permute.xlu0 %v6980_v52  ;;  %v10441_v57 = vand.u32 127, %v11788_v40 }
 0x51e   :  { %6911 = vset.pattern.permute.xlu1 %v6980_v52 }
 0x51f   :  { %vm2663_vm2 = vcmp.lt.s32.totalorder %v10441_v57, 127  ;;  %vm2801_vm3 = vcmp.lt.s32.totalorder %v10441_v57, 126 }
 0x520   :  { %6228 = vmatpush1.bf16.msra.mxu1 %v6227_v34 }
 0x521   :  { %6230 = vmatprep.subr.bf16.mxu1 %v6229_v59 }
 0x524   :  { %6232 = vmatpush1.bf16.msra.mxu1 %v6231_v0 }
 0x525   :  { %5394 = vmatprep.subr.msk.mxu1 %vm2249_vm0, %v2236_v24 }
 0x528   :  { %5395 = vmatpush1.msk.msra.mxu1 %vm2249_vm0, %v2235_v23 }
 0x529   :  { %5396 = vmatmul.mubr.msk.f32.vlgmr.msra.gmra.mrb[8].mxu1 %vm1868_vm15, %v11807_v37 }
 0x52a   :  { %2504 = vmatprep.mubr.f32.mxu1 %v11791_v15 }
 0x52d   :  { %5397 = vmatmul.mubr.msk.f32.gmra.mrb[10].mxu1 %vm1868_vm15, %v11808_v39 }
 0x52e   :  { %2510 = vmatprep.mubr.f32.mxu1 %v11791_v15 }
 0x531   :  { %5398 = vmatmul.mubr.msk.f32.gmra.mrb[12].mxu1 %vm1868_vm15, %v11809_v9 }
 0x532   :  { %2516 = vmatprep.mubr.f32.mxu1 %v11791_v15 }
 0x535   :  { %5399 = vmatmul.mubr.msk.f32.gmra.mrb[14].mxu1 %vm1868_vm15, %v11810_v3 }
 0x5fc   :  { %v2500_v10 = vpop.f32.mrb[8].mxu1 }
 0x5fd   :  { %v2502_v22 = vpop.f32.mrb[9].mxu1 }
 0x600   :  { %v2506_v7 = vpop.f32.mrb[10].mxu1 }
 0x601   :  { %v2508_v11 = vpop.f32.mrb[11].mxu1  ;;  %v6870_v41 = vpack.i.bf16 %v2506_v7, %v2500_v10  ;;  %v6235_v16 = vpack.c.bf16 %v2506_v7, %v2500_v10 }
 0x602   :  { %v6233_v21 = vpack.c.bf16 %v2508_v11, %v2502_v22  ;;  %v6875_v62 = vpack.i.bf16 %v2508_v11, %v2502_v22 }
 0x603   :  { %6871 = vrot.lane.b32.xlu0 %v6870_v41, %s6966_s19 }
 0x604   :  { %v2512_v19 = vpop.f32.mrb[12].mxu1  ;;  %6234 = vmatprep.subr.bf16.mxu0 %v6233_v21 }
 0x605   :  { %v2514_v36 = vpop.f32.mrb[13].mxu1  ;;  %6236 = vmatpush1.bf16.msra.mxu0 %v6235_v16 }
 0x607   :  { %6876 = vrot.lane.b32.xlu0 %v6875_v62, %s6966_s19 }
 0x608   :  { %v2518_v58 = vpop.f32.mrb[14].mxu1 }
 0x609   :  { %v6239_v5 = vpack.c.bf16 %v2518_v58, %v2512_v19  ;;  %v2520_v2 = vpop.f32.mrb[15].mxu1  ;;  %v6880_v18 = vpack.i.bf16 %v2518_v58, %v2512_v19 }
 0x60a   :  { %v6237_v63 = vpack.c.bf16 %v2520_v2, %v2514_v36  ;;  %v6885_v13 = vpack.i.bf16 %v2520_v2, %v2514_v36 }
 0x60b   :  { %2672 = vrot.lane.b32.xlu0 %v2523_v8, %s6978_s18  ;;  %6881 = vrot.lane.b32.xlu1 %v6880_v18, %s6966_s19 }
 0x60c   :  { %6238 = vmatprep.subr.bf16.mxu0 %v6237_v63 }
 0x60d   :  { %6240 = vmatpush1.bf16.msra.mxu0 %v6239_v5 }
 0x60f   :  { %6891 = vrot.lane.b32.xlu0 %v6870_v41, %s6968_s20  ;;  %6886 = vrot.lane.b32.xlu1 %v6885_v13, %s6966_s19 }
 0x610   :  { %5400 = vmatmul.mubr.msk.f32.vlgmr.msra.gmra.mrb[12].mxu0 %vm2543_vm1, %v2523_v8 }
 0x611   :  { %2626 = vmatprep.mubr.f32.mxu0 %v11791_v15 }
 0x613   :  { %2676 = vrot.lane.b32.xlu0 %v2525_v6, %s6978_s18  ;;  %2674 = vrot.lane.b32.xlu1 %v2524_v55, %s6978_s18 }
 0x614   :  { %5401 = vmatmul.mubr.msk.f32.gmra.mrb[14].mxu0 %vm2543_vm1, %v2524_v55 }
 0x615   :  { %2632 = vmatprep.mubr.f32.mxu0 %v11791_v15 }
 0x617   :  { %6906 = vrot.lane.b32.xlu0 %v6885_v13, %s6968_s20  ;;  %6896 = vrot.lane.b32.xlu1 %v6875_v62, %s6968_s20 }
 0x618   :  { %5402 = vmatmul.mubr.msk.f32.gmra.mrb[16].mxu0 %vm2543_vm1, %v2525_v6 }
 0x619   :  { %2638 = vmatprep.mubr.f32.mxu0 %v11791_v15 }
 0x61b   :  { %6901 = vrot.lane.b32.xlu1 %v6880_v18, %s6968_s20  ;;  %2810 = vrot.lane.b32.xlu0 %v2523_v8, %s6979_s24 }
 0x61c   :  { %5403 = vmatmul.mubr.msk.f32.gmra.mrb[18].mxu0 %vm2543_vm1, %v2526_v14 }
 0x61d   :  { %2752 = vmatprep.mubr.f32.mxu0 %v11791_v15 }
 0x61f   :  { %2678 = vrot.lane.b32.xlu1 %v2526_v14, %s6978_s18  ;;  %2814 = vrot.lane.b32.xlu0 %v2525_v6, %s6979_s24 }
 0x623   :  { %2812 = vrot.lane.b32.xlu1 %v2524_v55, %s6979_s24  ;;  %2528 = vperm.xlu0 %6910, %v10071_v60  }
 0x627   :  { %2816 = vrot.lane.b32.xlu1 %v2526_v14, %s6979_s24  ;;  %2540 = vperm.xlu0 %6910, %v10089_v12  }
 0x62b   :  { %2532 = vperm.xlu1 %6911, %v10076_v20  }
 0x62f   :  { %2536 = vperm.xlu1 %6911, %v10083_v61  }
 0x675   :  { %v6872_v38 = vpop.permute.xlu0 %6871 }
 0x676   :  { %v6874_v35 = vunpack.i.h.bf16 %v6872_v38  ;;  %v6873_v17 = vunpack.i.l.bf16 %v6872_v38 }
 0x679   :  { %v6877_v25 = vpop.permute.xlu0 %6876 }
 0x67a   :  { %v6879_v53 = vunpack.i.h.bf16 %v6877_v25  ;;  %v6878_v56 = vunpack.i.l.bf16 %v6877_v25 }
 0x67c   :  { %v2665_v34 = vsel %vm2663_vm2, %v6874_v35, %v6879_v53  ;;  %v2664_v59 = vsel %vm2663_vm2, %v6873_v17, %v6878_v56  ;;  %v2668_v4 = vsel %vm2663_vm2, %v6878_v56, %v6873_v17  ;;  %v2669_v54 = vsel %vm2663_vm2, %v6879_v53, %v6874_v35 }
 0x67d   :  { %v6243_v0 = vpack.c.bf16 %v2665_v34, %v2664_v59  ;;  %v2673_v24 = vpop.permute.xlu0 %2672  ;;  %v6882_v23 = vpop.permute.xlu1 %6881  ;;  %v6241_v37 = vpack.c.bf16 %v2669_v54, %v2668_v4 }
 0x67e   :  { %v6884_v3 = vunpack.i.h.bf16 %v6882_v23  ;;  %v6883_v10 = vunpack.i.l.bf16 %v6882_v23 }
 0x67f   :  { %6242 = vmatprep.subr.bf16.mxu0 %v6241_v37 }
 0x680   :  { %6244 = vmatpush1.bf16.msra.mxu0 %v6243_v0 }
 0x681   :  { %v6892_v39 = vpop.permute.xlu0 %6891  ;;  %v6887_v9 = vpop.permute.xlu1 %6886 }
 0x682   :  { %v6889_v22 = vunpack.i.h.bf16 %v6887_v9  ;;  %v6888_v7 = vunpack.i.l.bf16 %v6887_v9  ;;  %v6894_v5 = vunpack.i.h.bf16 %v6892_v39  ;;  %v6893_v2 = vunpack.i.l.bf16 %v6892_v39 }
 0x684   :  { %v2667_v11 = vsel %vm2663_vm2, %v6884_v3, %v6889_v22  ;;  %v2666_v41 = vsel %vm2663_vm2, %v6883_v10, %v6888_v7  ;;  %v2670_v16 = vsel %vm2663_vm2, %v6888_v7, %v6883_v10  ;;  %v2671_v21 = vsel %vm2663_vm2, %v6889_v22, %v6884_v3  ;;  %v2923_v7 = vld [vmem:[%s11285_s5 + $0x2] sm:$0x3] }
 0x685   :  { %v6247_v62 = vpack.c.bf16 %v2667_v11, %v2666_v41  ;;  %v2677_v19 = vpop.permute.xlu0 %2676  ;;  %v2675_v36 = vpop.permute.xlu1 %2674  ;;  %v6245_v58 = vpack.c.bf16 %v2671_v21, %v2670_v16  ;;  %v10493_v10 = vshrl.u32 %v11788_v40, 7 }
 0x687   :  { %6246 = vmatprep.subr.bf16.mxu0 %v6245_v58  ;;  %v2927_v22 = vsub.s32 0, %v10493_v10  ;;  %v2931_v11 = vsub.s32 1, %v10493_v10 }
 0x688   :  { %6248 = vmatpush1.bf16.msra.mxu0 %v6247_v62 }
 0x689   :  { %v6897_v8 = vpop.permute.xlu1 %6896  ;;  %v6907_v13 = vpop.permute.xlu0 %6906  ;;  %v10500_v16 = vrot.slane %v2923_v7, %v2927_v22  ;;  %v10502_v62 = vrot.slane %v2923_v7, %v2931_v11 }
 0x68a   :  { %v6899_v18 = vunpack.i.h.bf16 %v6897_v8  ;;  %v6898_v63 = vunpack.i.l.bf16 %v6897_v8  ;;  %v6909_v17 = vunpack.i.h.bf16 %v6907_v13  ;;  %v6908_v53 = vunpack.i.l.bf16 %v6907_v13 }
 0x68b   :  { %5404 = vmatmul.mubr.msk.f32.vlgmr.msra.gmra.mrb[12].mxu0 %vm2543_vm1, %v2673_v24 }
 0x68c   :  { %v2803_v6 = vsel %vm2801_vm3, %v6894_v5, %v6899_v18  ;;  %v2802_v55 = vsel %vm2801_vm3, %v6893_v2, %v6898_v63  ;;  %2758 = vmatprep.mubr.f32.mxu0 %v11791_v15  ;;  %v2806_v14 = vsel %vm2801_vm3, %v6898_v63, %v6893_v2  ;;  %v2807_v52 = vsel %vm2801_vm3, %v6899_v18, %v6894_v5 }
 0x68d   :  { %v6251_v38 = vpack.c.bf16 %v2803_v6, %v2802_v55  ;;  %v6902_v25 = vpop.permute.xlu1 %6901  ;;  %v6249_v35 = vpack.c.bf16 %v2807_v52, %v2806_v14  ;;  %v2811_v39 = vpop.permute.xlu0 %2810 }
 0x68e   :  { %v6904_v56 = vunpack.i.h.bf16 %v6902_v25  ;;  %v6903_v34 = vunpack.i.l.bf16 %v6902_v25 }
 0x68f   :  { %5405 = vmatmul.mubr.msk.f32.gmra.mrb[14].mxu0 %vm2543_vm1, %v2675_v36  ;;  %6250 = vmatprep.subr.bf16.mxu0 %v6249_v35 }
 0x690   :  { %v2805_v59 = vsel %vm2801_vm3, %v6904_v56, %v6909_v17  ;;  %v2804_v4 = vsel %vm2801_vm3, %v6903_v34, %v6908_v53  ;;  %6252 = vmatpush1.bf16.msra.mxu0 %v6251_v38  ;;  %2764 = vmatprep.mubr.f32.mxu0 %v11791_v15  ;;  %v2808_v54 = vsel %vm2801_vm3, %v6908_v53, %v6903_v34 }
 0x691   :  { %v6255_v0 = vpack.c.bf16 %v2805_v59, %v2804_v4  ;;  %v2809_v24 = vsel %vm2801_vm3, %v6909_v17, %v6904_v56  ;;  %v2679_v37 = vpop.permute.xlu1 %2678  ;;  %v2815_v57 = vpop.permute.xlu0 %2814 }
 0x692   :  { %v6253_v23 = vpack.c.bf16 %v2809_v24, %v2808_v54 }
 0x693   :  { %5406 = vmatmul.mubr.msk.f32.gmra.mrb[16].mxu0 %vm2543_vm1, %v2677_v19 }
 0x694   :  { %6254 = vmatprep.subr.bf16.mxu0 %v6253_v23  ;;  %2770 = vmatprep.mubr.f32.mxu0 %v11791_v15 }
 0x695   :  { %6256 = vmatpush1.bf16.msra.mxu0 %v6255_v0  ;;  %v2813_v9 = vpop.permute.xlu1 %2812 }
 0x697   :  { %5407 = vmatmul.mubr.msk.f32.gmra.mrb[18].mxu0 %vm2543_vm1, %v2679_v37 }
 0x698   :  { %2890 = vmatprep.mubr.f32.mxu0 %v11791_v15 }
 0x699   :  { %v2817_v3 = vpop.permute.xlu1 %2816 }
 0x69b   :  { %5408 = vmatmul.mubr.msk.f32.vlgmr.msra.gmra.mrb[12].mxu0 %vm2543_vm1, %v2811_v39 }
 0x69c   :  { %2896 = vmatprep.mubr.f32.mxu0 %v11791_v15 }
 0x69f   :  { %5409 = vmatmul.mubr.msk.f32.gmra.mrb[14].mxu0 %vm2543_vm1, %v2813_v9 }
 0x6a0   :  { %2902 = vmatprep.mubr.f32.mxu0 %v11791_v15 }
 0x6a2   :  { %v2529_v41 = vpop.permute.xlu0 %2528 }
 0x6a3   :  { %5410 = vmatmul.mubr.msk.f32.gmra.mrb[16].mxu0 %vm2543_vm1, %v2815_v57 }
 0x6a4   :  { %2908 = vmatprep.mubr.f32.mxu0 %v11791_v15 }
 0x6a6   :  { %v2541_v59 = vpop.permute.xlu0 %2540 }
 0x6a7   :  { %5411 = vmatmul.mubr.msk.f32.gmra.mrb[18].mxu0 %vm2543_vm1, %v2817_v3 }
 0x6aa   :  { %v2533_v8 = vpop.permute.xlu1 %2532 }
 0x6ae   :  { %v2537_v52 = vpop.permute.xlu1 %2536 }
 0x76e   :  { %v2892_v21 = vpop.f32.mrb[12].mxu0 }
 0x76f   :  { %v6793_v19 = vadd.f32 %v2892_v21, %v2529_v41  ;;  %v2894_v36 = vpop.f32.mrb[13].mxu0 }
 0x770   :  { %v6794_v58 = vadd.f32 %v2894_v36, %v2529_v41 }
 0x771   :  { %v2935_v40 = vmul.f32 %v6793_v19, %v10500_v16 }
 0x772   :  { %v2936_v5 = vmul.f32 %v6794_v58, %v10502_v62  ;;  %v2898_v2 = vpop.f32.mrb[14].mxu0 }
 0x773   :  { %v6795_v18 = vadd.f32 %v2898_v2, %v2533_v8  ;;  %v2900_v63 = vpop.f32.mrb[15].mxu0 }
 0x774   :  { %v6796_v13 = vadd.f32 %v2900_v63, %v2533_v8  ;;  %v2943_v6 = vadd.f32 %v2936_v5, %v2935_v40 }
 0x775   :  { %v2937_v55 = vmul.f32 %v6795_v18, %v10500_v16 }
 0x776   :  { %v2938_v14 = vmul.f32 %v6796_v13, %v10502_v62  ;;  %2944 = vadd.xlane.f32.xlu1 %v2943_v6  ;;  %v2904_v38 = vpop.f32.mrb[16].mxu0 }
 0x777   :  { %v6797_v25 = vadd.f32 %v2904_v38, %v2537_v52  ;;  %v2906_v35 = vpop.f32.mrb[17].mxu0 }
 0x778   :  { %v6798_v17 = vadd.f32 %v2906_v35, %v2537_v52  ;;  %v2946_v53 = vadd.f32 %v2938_v14, %v2937_v55 }
 0x779   :  { %v2939_v56 = vmul.f32 %v6797_v25, %v10500_v16 }
 0x77a   :  { %v2940_v34 = vmul.f32 %v6798_v17, %v10502_v62  ;;  %2947 = vadd.xlane.f32.xlu0 %v2946_v53  ;;  %v2910_v4 = vpop.f32.mrb[18].mxu0 }
 0x77b   :  { %v6799_v54 = vadd.f32 %v2910_v4, %v2541_v59  ;;  %v2912_v0 = vpop.f32.mrb[19].mxu0 }
 0x77c   :  { %v6800_v24 = vadd.f32 %v2912_v0, %v2541_v59  ;;  %v2949_v23 = vadd.f32 %v2940_v34, %v2939_v56 }
 0x77d   :  { %v2941_v37 = vmul.f32 %v6799_v54, %v10500_v16 }
 0x77e   :  { %v2942_v39 = vmul.f32 %v6800_v24, %v10502_v62  ;;  %2950 = vadd.xlane.f32.xlu0 %v2949_v23 }
 0x780   :  { %v2952_v9 = vadd.f32 %v2942_v39, %v2941_v37 }
 0x782   :  { %2953 = vadd.xlane.f32.xlu1 %v2952_v9 }
 0x803   :  { %v2945_v57 = vpop.xlane.xlu1 %2944 }
 0x804   :  { %v2956_v3 = vmul.f32 0.005, %v2945_v57  ;;  %v6982_v57 = vmov 4  }
 0x805   :  { %6912 = vset.pattern.permute.xlu0 %v6982_v57 }
 0x806   :  { %v10512_v22 = vsub.f32 %v6793_v19, %v2956_v3  ;;  %v10514_v7 = vsub.f32 %v6794_v58, %v2956_v3 }
 0x807   :  { %v2948_v11 = vpop.xlane.xlu0 %2947 }
 0x808   :  { %v2968_v41 = vmul.f32 %v10512_v22, %v10512_v22  ;;  %v2969_v21 = vmul.f32 %v10514_v7, %v10514_v7  ;;  %v2957_v36 = vmul.f32 0.005, %v2948_v11 }
 0x80a   :  { %v10520_v8 = vsub.f32 %v6795_v18, %v2957_v36  ;;  %v10522_v40 = vsub.f32 %v6796_v13, %v2957_v36  ;;  %v2976_v5 = vmul.f32 %v2968_v41, %v10500_v16  ;;  %v2977_v2 = vmul.f32 %v2969_v21, %v10502_v62 }
 0x80b   :  { %v2951_v19 = vpop.xlane.xlu0 %2950 }
 0x80c   :  { %v2970_v58 = vmul.f32 %v10520_v8, %v10520_v8  ;;  %v2971_v63 = vmul.f32 %v10522_v40, %v10522_v40  ;;  %v2958_v6 = vmul.f32 0.005, %v2951_v19  ;;  %v2984_v55 = vadd.f32 %v2977_v2, %v2976_v5 }
 0x80e   :  { %v10530_v14 = vsub.f32 %v6797_v25, %v2958_v6  ;;  %v10532_v52 = vsub.f32 %v6798_v17, %v2958_v6  ;;  %2985 = vadd.xlane.f32.xlu0 %v2984_v55  ;;  %v2978_v18 = vmul.f32 %v2970_v58, %v10500_v16  ;;  %v2979_v13 = vmul.f32 %v2971_v63, %v10502_v62 }
 0x80f   :  { %v2954_v38 = vpop.xlane.xlu1 %2953 }
 0x810   :  { %v2972_v35 = vmul.f32 %v10530_v14, %v10530_v14  ;;  %v2973_v53 = vmul.f32 %v10532_v52, %v10532_v52  ;;  %v2959_v56 = vmul.f32 0.005, %v2954_v38  ;;  %v2987_v34 = vadd.f32 %v2979_v13, %v2978_v18 }
 0x812   :  { %v10540_v59 = vsub.f32 %v6799_v54, %v2959_v56  ;;  %v10542_v25 = vsub.f32 %v6800_v24, %v2959_v56  ;;  %2988 = vadd.xlane.f32.xlu1 %v2987_v34  ;;  %v2980_v17 = vmul.f32 %v2972_v35, %v10500_v16  ;;  %v2981_v4 = vmul.f32 %v2973_v53, %v10502_v62 }
 0x813   :  { %v6981_v24 = vmov 5  }
 0x814   :  { %v2974_v0 = vmul.f32 %v10540_v59, %v10540_v59  ;;  %v2975_v23 = vmul.f32 %v10542_v25, %v10542_v25  ;;  %v2990_v37 = vadd.f32 %v2981_v4, %v2980_v17  ;;  %6913 = vset.pattern.permute.xlu1 %v6981_v24  ;;  %v6983_v17 = vmov 1983009808  }
 0x815   :  { %v3075_v4 = vunpack.c.l.s4 %v6983_v17 }
 0x816   :  { %2991 = vadd.xlane.f32.xlu0 %v2990_v37  ;;  %v2982_v39 = vmul.f32 %v2974_v0, %v10500_v16  ;;  %v2983_v54 = vmul.f32 %v2975_v23, %v10502_v62 }
 0x817   :  { %v3076_v0 = vunpack.c.0.s8 %v3075_v4 }
 0x818   :  { %v2993_v9 = vadd.f32 %v2983_v54, %v2982_v39 }
 0x819   :  { %v10565_v39 = vsub.s32 %v3076_v0, %v10493_v10 }
 0x81a   :  { %2994 = vadd.xlane.f32.xlu1 %v2993_v9 }
 0x82b   :  { %3041 = vperm.xlu1 %6913, %v10071_v60  }
 0x82f   :  { %3045 = vperm.xlu1 %6913, %v10076_v20  }
 0x833   :  { %3049 = vperm.xlu1 %6913, %v10083_v61  }
 0x837   :  { %6914 = vset.pattern.permute.xlu1 %v6982_v57 }
 0x89b   :  { %v2986_v3 = vpop.xlane.xlu0 %2985 }
 0x89c   :  { %v2996_v11 = vmul.f32 0.005, %v2986_v3 }
 0x89e   :  { %v3000_v41 = vadd.f32 1e-05, %v2996_v11 }
 0x89f   :  { %v2989_v21 = vpop.xlane.xlu1 %2988 }
 0x8a0   :  { %6917 = vrsqrt.f32 %v3000_v41  ;;  %v2997_v16 = vmul.f32 0.005, %v2989_v21 }
 0x8a2   :  { %v3001_v62 = vadd.f32 1e-05, %v2997_v16 }
 0x8a3   :  { %v2992_v36 = vpop.xlane.xlu0 %2991 }
 0x8a4   :  { %6919 = vrsqrt.f32 %v3001_v62  ;;  %v2998_v5 = vmul.f32 0.005, %v2992_v36 }
 0x8a6   :  { %v3002_v2 = vadd.f32 1e-05, %v2998_v5 }
 0x8a7   :  { %v2995_v19 = vpop.xlane.xlu1 %2994 }
 0x8a8   :  { %6921 = vrsqrt.f32 %v3002_v2  ;;  %v2999_v58 = vmul.f32 0.005, %v2995_v19 }
 0x8aa   :  { %v6918_v63 = vpop.eup %6917  ;;  %v3003_v6 = vadd.f32 1e-05, %v2999_v58 }
 0x8ab   :  { %v3008_v55 = vmul.f32 %v6918_v63, %v10071_v60  ;;  %v3042_v34 = vpop.permute.xlu1 %3041 }
 0x8ac   :  { %6923 = vrsqrt.f32 %v3003_v6 }
 0x8ad   :  { %3014 = vperm.xlu0 %6912, %v3008_v55  }
 0x8ae   :  { %v6920_v18 = vpop.eup %6919 }
 0x8af   :  { %v3009_v13 = vmul.f32 %v6920_v18, %v10076_v20  ;;  %v3046_v60 = vpop.permute.xlu1 %3045 }
 0x8b1   :  { %3019 = vperm.xlu1 %6914, %v3009_v13   ;;  %6916 = vset.pattern.permute.xlu0 %v6981_v24 }
 0x8b2   :  { %v6922_v38 = vpop.eup %6921 }
 0x8b3   :  { %v3010_v35 = vmul.f32 %v6922_v38, %v10083_v61  ;;  %v10560_v23 = vpop.permute.xlu1 %3049 }
 0x8b5   :  { %3024 = vperm.xlu1 %6914, %v3010_v35  }
 0x8b6   :  { %v6924_v53 = vpop.eup %6923 }
 0x8b7   :  { %v3011_v56 = vmul.f32 %v6924_v53, %v10089_v12 }
 0x8b9   :  { %3029 = vperm.xlu1 %6914, %v3011_v56  }
 0x8bd   :  { %6915 = vset.pattern.permute.xlu1 %v6981_v24 }
 0x8be   :  { %3053 = vperm.xlu1 %6915, %v10089_v12  }
 0x92c   :  { %v3015_v20 = vpop.permute.xlu0 %3014 }
 0x92d   :  { %v3032_v37 = vmul.f32 %v3015_v20, %v10512_v22  ;;  %v3033_v61 = vmul.f32 %v3015_v20, %v10514_v7 }
 0x92f   :  { %v3056_v54 = vadd.f32 %v3042_v34, %v3032_v37  ;;  %v3057_v9 = vadd.f32 %v3042_v34, %v3033_v61 }
 0x930   :  { %v3020_v24 = vpop.permute.xlu1 %3019 }
 0x931   :  { %v3064_v57 = vmax.f32 %v3056_v54, 0.0  ;;  %v3065_v12 = vmax.f32 %v3057_v9, 0.0  ;;  %v3034_v3 = vmul.f32 %v3020_v24, %v10520_v8  ;;  %v3035_v11 = vmul.f32 %v3020_v24, %v10522_v40 }
 0x933   :  { %3072 = vst [vmem:[#allocation5] sm:$0x1] %v3064_v57  ;;  %v3080_v41 = vrot.slane %v3064_v57, %v10565_v39  ;;  %v3092_v21 = vcombine.high %v3064_v57, %v3064_v57  ;;  %3236 = vst [vmem:[#allocation5 + $0x1] sm:$0x1] %v3065_v12  ;;  %v3244_v22 = vrot.slane %v3065_v12, %v10565_v39 }
 0x934   :  { %v3256_v7 = vcombine.high %v3065_v12, %v3065_v12  ;;  %v3058_v16 = vadd.f32 %v3046_v60, %v3034_v3  ;;  %v3059_v10 = vadd.f32 %v3046_v60, %v3035_v11  ;;  %v3025_v62 = vpop.permute.xlu1 %3024 }
 0x935   :  { %v5412_v36 = vrot.slane %v3080_v41, 9  ;;  %v3085_v5 = vcombine.high %v3080_v41, %v3080_v41  ;;  %v3099_v2 = vrot.slane %v3092_v21, %v10565_v39  ;;  %5414 = vst.sshfl [vmem:[#allocation5 + $0x8] sm:$0x1 pattern:$0x76325410] %v3092_v21  ;;  %v5432_v19 = vrot.slane %v3244_v22, 9 }
 0x936   :  { %5434 = vst.sshfl [vmem:[#allocation5 + $0x9] sm:$0x1 pattern:$0x76325410] %v3256_v7  ;;  %v3249_v8 = vcombine.high %v3244_v22, %v3244_v22  ;;  %v3263_v40 = vrot.slane %v3256_v7, %v10565_v39  ;;  %v3066_v58 = vmax.f32 %v3058_v16, 0.0  ;;  %v3067_v63 = vmax.f32 %v3059_v10, 0.0 }
 0x937   :  { %3084 = vst [vmem:[#allocation5 + $0x2] sm:$0x1] %v5412_v36  ;;  %3087 = vst [vmem:[#allocation5 + $0x4] sm:$0x1] %v3085_v5  ;;  %v5413_v6 = vrot.slane %v3085_v5, 9  ;;  %v5415_v55 = vrot.slane %v3099_v2, 9  ;;  %v3106_v18 = vcombine.high %v3099_v2, %v3099_v2  ;;  %v3036_v13 = vmul.f32 %v3025_v62, %v10530_v14 }
 0x938   :  { %3248 = vst [vmem:[#allocation5 + $0x3] sm:$0x1] %v5432_v19  ;;  %3251 = vst [vmem:[#allocation5 + $0x5] sm:$0x1] %v3249_v8  ;;  %v5433_v38 = vrot.slane %v3249_v8, 9  ;;  %v5435_v35 = vrot.slane %v3263_v40, 9  ;;  %v3270_v53 = vcombine.high %v3263_v40, %v3263_v40  ;;  %v3121_v56 = vrot.slane %v3066_v58, %v10565_v39  ;;  %v3030_v34 = vpop.permute.xlu1 %3029 }
 0x939   :  { %3113 = vst [vmem:[#allocation5 + $0x10] sm:$0x1] %v3066_v58  ;;  %3277 = vst [vmem:[#allocation5 + $0x11] sm:$0x1] %v3067_v63  ;;  %v5416_v60 = vrot.slane %v3106_v18, 9  ;;  %v3133_v17 = vcombine.high %v3066_v58, %v3066_v58  ;;  %v3285_v4 = vrot.slane %v3067_v63, %v10565_v39  ;;  %v3297_v0 = vcombine.high %v3067_v63, %v3067_v63 }
 0x93a   :  { %3091 = vst [vmem:[#allocation5 + $0x6] sm:$0x1] %v5413_v6  ;;  %3105 = vst [vmem:[#allocation5 + $0xa] sm:$0x1] %v5415_v55  ;;  %v5436_v14 = vrot.slane %v3270_v53, 9  ;;  %v5417_v20 = vrot.slane %v3121_v56, 9  ;;  %v3126_v37 = vcombine.high %v3121_v56, %v3121_v56  ;;  %v3037_v61 = vmul.f32 %v3025_v62, %v10532_v52 }
 0x93b   :  { %3108 = vst [vmem:[#allocation5 + $0xc] sm:$0x1] %v3106_v18  ;;  %3255 = vst [vmem:[#allocation5 + $0x7] sm:$0x1] %v5433_v38  ;;  %v3140_v54 = vrot.slane %v3133_v17, %v10565_v39  ;;  %v5437_v9 = vrot.slane %v3285_v4, 9  ;;  %v3290_v24 = vcombine.high %v3285_v4, %v3285_v4  ;;  %v3304_v57 = vrot.slane %v3297_v0, %v10565_v39 }
 0x93c   :  { %3269 = vst [vmem:[#allocation5 + $0xb] sm:$0x1] %v5435_v35  ;;  %3272 = vst [vmem:[#allocation5 + $0xd] sm:$0x1] %v3270_v53  ;;  %v5418_v12 = vrot.slane %v3126_v37, 9  ;;  %v3060_v3 = vadd.f32 %v10560_v23, %v3036_v13  ;;  %v3061_v11 = vadd.f32 %v10560_v23, %v3037_v61  ;;  %v3038_v41 = vmul.f32 %v3030_v34, %v10540_v59 }
 0x93d   :  { %3112 = vst [vmem:[#allocation5 + $0xe] sm:$0x1] %v5416_v60  ;;  %5419 = vst.sshfl [vmem:[#allocation5 + $0x18] sm:$0x1 pattern:$0x76325410] %v3133_v17  ;;  %v3147_v21 = vcombine.high %v3140_v54, %v3140_v54  ;;  %v3054_v16 = vpop.permute.xlu1 %3053  ;;  %v3311_v10 = vcombine.high %v3304_v57, %v3304_v57  ;;  %v3039_v23 = vmul.f32 %v3030_v34, %v10542_v25 }
 0x93e   :  { %5439 = vst.sshfl [vmem:[#allocation5 + $0x19] sm:$0x1 pattern:$0x76325410] %v3297_v0  ;;  %3276 = vst [vmem:[#allocation5 + $0xf] sm:$0x1] %v5436_v14  ;;  %v3062_v2 = vadd.f32 %v3054_v16, %v3038_v41 }
 0x93f   :  { %3125 = vst [vmem:[#allocation5 + $0x12] sm:$0x1] %v5417_v20  ;;  %3128 = vst [vmem:[#allocation5 + $0x14] sm:$0x1] %v3126_v37  ;;  %v5420_v52 = vrot.slane %v3140_v54, 9  ;;  %v5438_v22 = vrot.slane %v3290_v24, 9  ;;  %v3063_v63 = vadd.f32 %v3054_v16, %v3039_v23  ;;  %v6259_v23 = vpack.c.bf16 %v7502_v27, %v7497_v26 }
 0x940   :  { %3289 = vst [vmem:[#allocation5 + $0x13] sm:$0x1] %v5437_v9  ;;  %3292 = vst [vmem:[#allocation5 + $0x15] sm:$0x1] %v3290_v24  ;;  %v5440_v7 = vrot.slane %v3304_v57, 9  ;;  %v3068_v62 = vmax.f32 %v3060_v3, 0.0 }
 0x941   :  { %3132 = vst [vmem:[#allocation5 + $0x16] sm:$0x1] %v5418_v12  ;;  %v3069_v36 = vmax.f32 %v3061_v11, 0.0  ;;  %3146 = vst [vmem:[#allocation5 + $0x1a] sm:$0x1] %v5420_v52  ;;  %v5421_v5 = vrot.slane %v3147_v21, 9 }
 0x942   :  { %3149 = vst [vmem:[#allocation5 + $0x1c] sm:$0x1] %v3147_v21  ;;  %3296 = vst [vmem:[#allocation5 + $0x17] sm:$0x1] %v5438_v22  ;;  %v5441_v59 = vrot.slane %v3311_v10, 9  ;;  %v3162_v19 = vrot.slane %v3068_v62, %v10565_v39  ;;  %v3174_v8 = vcombine.high %v3068_v62, %v3068_v62  ;;  %v3070_v6 = vmax.f32 %v3062_v2, 0.0 }
 0x943   :  { %3310 = vst [vmem:[#allocation5 + $0x1b] sm:$0x1] %v5440_v7  ;;  %3313 = vst [vmem:[#allocation5 + $0x1d] sm:$0x1] %v3311_v10  ;;  %v3326_v40 = vrot.slane %v3069_v36, %v10565_v39  ;;  %v3338_v58 = vcombine.high %v3069_v36, %v3069_v36  ;;  %v3071_v53 = vmax.f32 %v3063_v63, 0.0  ;;  %v6261_v2 = vpack.c.bf16 %v7592_v45, %v7587_v44 }
 0x944   :  { %3154 = vst [vmem:[#allocation5 + $0x20] sm:$0x1] %v3068_v62  ;;  %3318 = vst [vmem:[#allocation5 + $0x21] sm:$0x1] %v3069_v36  ;;  %v5422_v55 = vrot.slane %v3162_v19, 9  ;;  %v3167_v18 = vcombine.high %v3162_v19, %v3162_v19  ;;  %v3181_v13 = vrot.slane %v3174_v8, %v10565_v39  ;;  %v3203_v56 = vrot.slane %v3070_v6, %v10565_v39 }
 0x945   :  { %3153 = vst [vmem:[#allocation5 + $0x1e] sm:$0x1] %v5421_v5  ;;  %3317 = vst [vmem:[#allocation5 + $0x1f] sm:$0x1] %v5441_v59  ;;  %v5442_v25 = vrot.slane %v3326_v40, 9  ;;  %v3331_v38 = vcombine.high %v3326_v40, %v3326_v40  ;;  %v3345_v35 = vrot.slane %v3338_v58, %v10565_v39  ;;  %v3215_v4 = vcombine.high %v3070_v6, %v3070_v6 }
 0x946   :  { %5424 = vst.sshfl [vmem:[#allocation5 + $0x28] sm:$0x1 pattern:$0x76325410] %v3174_v8  ;;  %3195 = vst [vmem:[#allocation5 + $0x30] sm:$0x1] %v3070_v6  ;;  %v3188_v17 = vcombine.high %v3181_v13, %v3181_v13  ;;  %v3208_v54 = vcombine.high %v3203_v56, %v3203_v56  ;;  %v3367_v24 = vrot.slane %v3071_v53, %v10565_v39 }
 0x947   :  { %5444 = vst.sshfl [vmem:[#allocation5 + $0x29] sm:$0x1 pattern:$0x76325410] %v3338_v58  ;;  %3166 = vst [vmem:[#allocation5 + $0x22] sm:$0x1] %v5422_v55  ;;  %v3352_v20 = vcombine.high %v3345_v35, %v3345_v35  ;;  %v3222_v9 = vrot.slane %v3215_v4, %v10565_v39  ;;  %v3379_v12 = vcombine.high %v3071_v53, %v3071_v53 }
 0x948   :  { %3169 = vst [vmem:[#allocation5 + $0x24] sm:$0x1] %v3167_v18  ;;  %v5423_v34 = vrot.slane %v3167_v18, 9  ;;  %v5425_v60 = vrot.slane %v3181_v13, 9  ;;  %3330 = vst [vmem:[#allocation5 + $0x23] sm:$0x1] %v5442_v25  ;;  %v3372_v21 = vcombine.high %v3367_v24, %v3367_v24  ;;  %v6257_v5 = vpack.c.bf16 %v7582_v43, %v7577_v42 }
 0x949   :  { %3333 = vst [vmem:[#allocation5 + $0x25] sm:$0x1] %v3331_v38  ;;  %v5443_v0 = vrot.slane %v3331_v38, 9  ;;  %v5445_v14 = vrot.slane %v3345_v35, 9  ;;  %v5427_v37 = vrot.slane %v3203_v56, 9  ;;  %v5426_v61 = vrot.slane %v3188_v17, 9 }
 0x94a   :  { %3359 = vst [vmem:[#allocation5 + $0x31] sm:$0x1] %v3071_v53  ;;  %3173 = vst [vmem:[#allocation5 + $0x26] sm:$0x1] %v5423_v34  ;;  %v5446_v57 = vrot.slane %v3352_v20, 9  ;;  %v5428_v3 = vrot.slane %v3208_v54, 9  ;;  %v3229_v41 = vcombine.high %v3222_v9, %v3222_v9  ;;  %v3386_v22 = vrot.slane %v3379_v12, %v10565_v39 }
 0x94b   :  { %3187 = vst [vmem:[#allocation5 + $0x2a] sm:$0x1] %v5425_v60  ;;  %3190 = vst [vmem:[#allocation5 + $0x2c] sm:$0x1] %v3188_v17  ;;  %v5430_v11 = vrot.slane %v3222_v9, 9  ;;  %v5447_v52 = vrot.slane %v3367_v24, 9 }
 0x94c   :  { %5429 = vst.sshfl [vmem:[#allocation5 + $0x38] sm:$0x1 pattern:$0x76325410] %v3215_v4  ;;  %3337 = vst [vmem:[#allocation5 + $0x27] sm:$0x1] %v5443_v0  ;;  %v3393_v62 = vcombine.high %v3386_v22, %v3386_v22 }
 0x94d   :  { %3351 = vst [vmem:[#allocation5 + $0x2b] sm:$0x1] %v5445_v14  ;;  %3354 = vst [vmem:[#allocation5 + $0x2d] sm:$0x1] %v3352_v20  ;;  %v5431_v7 = vrot.slane %v3229_v41, 9  ;;  %v5448_v16 = vrot.slane %v3372_v21, 9 }
 0x94e   :  { %3207 = vst [vmem:[#allocation5 + $0x32] sm:$0x1] %v5427_v37  ;;  %3194 = vst [vmem:[#allocation5 + $0x2e] sm:$0x1] %v5426_v61  ;;  %v5450_v10 = vrot.slane %v3386_v22, 9  ;;  %v5451_v36 = vrot.slane %v3393_v62, 9 }
 0x94f   :  { %3210 = vst [vmem:[#allocation5 + $0x34] sm:$0x1] %v3208_v54  ;;  %3358 = vst [vmem:[#allocation5 + $0x2f] sm:$0x1] %v5446_v57 }
 0x950   :  { %5449 = vst.sshfl [vmem:[#allocation5 + $0x39] sm:$0x1 pattern:$0x76325410] %v3379_v12  ;;  %3214 = vst [vmem:[#allocation5 + $0x36] sm:$0x1] %v5428_v3 }
 0x951   :  { %3228 = vst [vmem:[#allocation5 + $0x3a] sm:$0x1] %v5430_v11  ;;  %3231 = vst [vmem:[#allocation5 + $0x3c] sm:$0x1] %v3229_v41 }
 0x952   :  { %3371 = vst [vmem:[#allocation5 + $0x33] sm:$0x1] %v5447_v52  ;;  %3374 = vst [vmem:[#allocation5 + $0x35] sm:$0x1] %v3372_v21 }
 0x953   :  { %3235 = vst [vmem:[#allocation5 + $0x3e] sm:$0x1] %v5431_v7  ;;  %3378 = vst [vmem:[#allocation5 + $0x37] sm:$0x1] %v5448_v16 }
 0x954   :  { %3392 = vst [vmem:[#allocation5 + $0x3b] sm:$0x1] %v5450_v10  ;;  %3395 = vst [vmem:[#allocation5 + $0x3d] sm:$0x1] %v3393_v62 }
 0x955   :  { %3399 = vst [vmem:[#allocation5 + $0x3f] sm:$0x1] %v5451_v36 }
 0x956   :  { %6961 = dma.done.wait [#allocation6 + $0x1], 65536 }
 0x957   :  { %6962 = vsyncadd [#allocation6 + $0x1], 4294901760  ;;  %6258 = vmatprep.subr.bf16.mxu0 %v6257_v5  ;;  %v6263_v59 = vpack.c.bf16 %v7512_v29, %v7507_v28  ;;  %v6265_v19 = vpack.c.bf16 %v7602_v47, %v7597_v46  ;;  %v6267_v42 = vpack.c.bf16 %v7522_v31, %v7517_v30  ;;  %v3405_v43 = vld [vmem:[#allocation5] sm:$0xff]  ;;  %v6269_v26 = vpack.c.bf16 %v7612_v49, %v7607_v48  ;;  %v11811_v45 = vld [vmem:[#allocation140_spill] sm:$0xff]  ;;  %s6986_s10 = smov [#allocation7]  }
 0x958   :  { %6260 = vmatpush3.bf16.msra.mxu0 %v6259_v23  ;;  %v3946_v27 = vrot.slane %v3405_v43, %v10565_v39  ;;  %v6271_v28 = vpack.c.bf16 %v7532_v33, %v7527_v32  ;;  %v6273_v29 = vpack.c.bf16 %v7622_v51, %v7617_v50  ;;  %v6385_v30 = vpack.c.bf16 %v11811_v45, %v8217_v1  ;;  %v11812_v31 = vld [vmem:[#allocation124_spill] sm:$0xff]  ;;  %v11813_v46 = vld [vmem:[#allocation125_spill] sm:$0xff]  ;;  %v11814_v48 = vld [vmem:[#allocation14_spill] sm:$0xff]  ;;  %s5339_s2 = sshll.u32 %s6986_s10, 4  ;;  %s5340_s2 = int_to_ptr.vmem [resolvable:$true] %s5339_s2 }
 0x959   :  { %6262 = vmatprep.subr.bf16.mxu0 %v6261_v2  ;;  %v6387_v47 = vpack.c.bf16 %v11813_v46, %v11812_v31  ;;  %v11815_v49 = vld [vmem:[#allocation15_spill] sm:$0xff]  ;;  %v11816_v40 = vld [vmem:[#allocation141_spill] sm:$0xff]  ;;  %v11817_v58 = vld [vmem:[#allocation142_spill] sm:$0xff]  ;;  %v3939_v24 = vcombine.high %v3405_v43, %v3405_v43  ;;  %vm6985_vm4 = vmmov 0   ;;  %vm5320_vm5 = vcmask 25600   ;;  %p6942_p1 = scmp.lt.s32.totalorder %s5340_s2, %s5340_s2 }
 0x95a   :  { %v3954_v44 = vcombine.high %v3946_v27, %v3946_v27  ;;  %v6275_v8 = vpack.c.bf16 %v11815_v49, %v11814_v48  ;;  %v6389_v63 = vpack.c.bf16 %v11817_v58, %v11816_v40  ;;  %v11818_v32 = vld [vmem:[#allocation22_spill] sm:$0xff]  ;;  %v11819_v33 = vld [vmem:[#allocation23_spill] sm:$0xff]  ;;  %6386 = vmatprep.subr.bf16.mxu1 %v6385_v30  ;;  %v11823_v18 = vld [vmem:[#allocation144_spill] sm:$0xff] }
 0x95b   :  { %v6277_v6 = vpack.c.bf16 %v11819_v33, %v11818_v32  ;;  %6388 = vmatpush3.bf16.msra.mxu1 %v6387_v47  ;;  %v11820_v50 = vld [vmem:[#allocation126_spill] sm:$0xff]  ;;  %v11821_v51 = vld [vmem:[#allocation127_spill] sm:$0xff]  ;;  %v11824_v25 = vld [vmem:[#allocation16_spill] sm:$0xff]  ;;  %v10647_v23 = vrot.slane %v3939_v24, %v10565_v39 }
 0x95c   :  { %6264 = vmatpush3.bf16.msra.mxu0 %v6263_v59  ;;  %4171 = vmatprep.mubr.f32.mxu0 %v3954_v44  ;;  %v6391_v55 = vpack.c.bf16 %v11821_v51, %v11820_v50  ;;  %v11822_v1 = vld [vmem:[#allocation143_spill] sm:$0xff]  ;;  %v11825_v38 = vld [vmem:[#allocation17_spill] sm:$0xff]  ;;  %v11826_v53 = vld [vmem:[#allocation24_spill] sm:$0xff] }
 0x95d   :  { %6266 = vmatprep.subr.bf16.mxu0 %v6265_v19  ;;  %6390 = vmatprep.subr.bf16.mxu1 %v6389_v63  ;;  %v6393_v13 = vpack.c.bf16 %v11823_v18, %v11822_v1  ;;  %v6279_v35 = vpack.c.bf16 %v11825_v38, %v11824_v25  ;;  %v11827_v56 = vld [vmem:[#allocation25_spill] sm:$0xff]  ;;  %v10628_v60 = vld [vmem:[#allocation5 + $0x10] sm:$0xff]  ;;  %v11831_v20 = vld [vmem:[#allocation146_spill] sm:$0xff]  ;;  %v3955_v46 = vcombine.high %v10647_v23, %v10647_v23 }
 0x95e   :  { %v6281_v34 = vpack.c.bf16 %v11827_v56, %v11826_v53  ;;  %v11828_v17 = vld [vmem:[#allocation128_spill] sm:$0xff]  ;;  %v11829_v4 = vld [vmem:[#allocation129_spill] sm:$0xff]  ;;  %v11832_v61 = vld [vmem:[#allocation18_spill] sm:$0xff]  ;;  %v3980_v57 = vrot.slane %v10628_v60, %v10565_v39 }
 0x95f   :  { %6392 = vmatpush3.bf16.msra.mxu1 %v6391_v55  ;;  %v6395_v0 = vpack.c.bf16 %v11829_v4, %v11828_v17  ;;  %v11830_v14 = vld [vmem:[#allocation145_spill] sm:$0xff]  ;;  %v11833_v54 = vld [vmem:[#allocation19_spill] sm:$0xff]  ;;  %v11834_v12 = vld [vmem:[#allocation26_spill] sm:$0xff] }
 0x960   :  { %6268 = vmatpush3.bf16.msra.mxu0 %v6267_v42  ;;  %6394 = vmatprep.subr.bf16.mxu1 %v6393_v13  ;;  %v6397_v37 = vpack.c.bf16 %v11831_v20, %v11830_v14  ;;  %v6283_v9 = vpack.c.bf16 %v11833_v54, %v11832_v61  ;;  %v11835_v3 = vld [vmem:[#allocation27_spill] sm:$0xff]  ;;  %v11836_v41 = vld [vmem:[#allocation130_spill] sm:$0xff]  ;;  %v3988_v22 = vcombine.high %v3980_v57, %v3980_v57  ;;  %v11839_v16 = vld [vmem:[#allocation148_spill] sm:$0xff] }
 0x961   :  { %6270 = vmatprep.subr.bf16.mxu0 %v6269_v26  ;;  %v6285_v11 = vpack.c.bf16 %v11835_v3, %v11834_v12  ;;  %v11837_v52 = vld [vmem:[#allocation131_spill] sm:$0xff]  ;;  %v11840_v62 = vld [vmem:[#allocation20_spill] sm:$0xff]  ;;  %v11841_v36 = vld [vmem:[#allocation21_spill] sm:$0xff] }
 0x962   :  { %v6399_v21 = vpack.c.bf16 %v11837_v52, %v11836_v41  ;;  %v11838_v7 = vld [vmem:[#allocation147_spill] sm:$0xff]  ;;  %v6287_v5 = vpack.c.bf16 %v11841_v36, %v11840_v62  ;;  %4451 = vmatprep.mubr.f32.mxu1 %v3988_v22  ;;  %v11842_v2 = vld [vmem:[#allocation44_spill] sm:$0xff]  ;;  %v11843_v59 = vld [vmem:[#allocation45_spill] sm:$0xff] }
 0x963   :  { %6396 = vmatpush3.bf16.msra.mxu1 %v6395_v0  ;;  %v6401_v10 = vpack.c.bf16 %v11839_v16, %v11838_v7  ;;  %v6289_v19 = vpack.c.bf16 %v11843_v59, %v11842_v2  ;;  %v11844_v42 = vld [vmem:[#allocation132_spill] sm:$0xff]  ;;  %v11845_v43 = vld [vmem:[#allocation133_spill] sm:$0xff]  ;;  %v11850_v47 = vld [vmem:[#allocation46_spill] sm:$0xff] }
 0x964   :  { %6272 = vmatpush3.bf16.msra.mxu0 %v6271_v28  ;;  %6398 = vmatprep.subr.bf16.mxu1 %v6397_v37  ;;  %v6403_v26 = vpack.c.bf16 %v11845_v43, %v11844_v42  ;;  %v11846_v44 = vld [vmem:[#allocation149_spill] sm:$0xff]  ;;  %v11847_v28 = vld [vmem:[#allocation150_spill] sm:$0xff]  ;;  %v11848_v45 = vld [vmem:[#allocation28_spill] sm:$0xff] }
 0x965   :  { %6274 = vmatprep.subr.bf16.mxu0 %v6273_v29  ;;  %v6405_v29 = vpack.c.bf16 %v11847_v28, %v11846_v44  ;;  %v11849_v30 = vld [vmem:[#allocation29_spill] sm:$0xff]  ;;  %v11851_v48 = vld [vmem:[#allocation47_spill] sm:$0xff]  ;;  %v11855_v32 = vld [vmem:[#allocation152_spill] sm:$0xff] }
 0x966   :  { %v6291_v31 = vpack.c.bf16 %v11849_v30, %v11848_v45  ;;  %v6293_v49 = vpack.c.bf16 %v11851_v48, %v11850_v47  ;;  %v11853_v40 = vld [vmem:[#allocation135_spill] sm:$0xff]  ;;  %v11858_v55 = vld [vmem:[#allocation48_spill] sm:$0xff]  ;;  %v11859_v1 = vld [vmem:[#allocation49_spill] sm:$0xff] }
 0x967   :  { %6400 = vmatpush3.bf16.msra.mxu1 %v6399_v21  ;;  %v11854_v63 = vld [vmem:[#allocation151_spill] sm:$0xff]  ;;  %v6297_v18 = vpack.c.bf16 %v11859_v1, %v11858_v55  ;;  %v11860_v13 = vld [vmem:[#allocation136_spill] sm:$0xff]  ;;  %v11861_v25 = vld [vmem:[#allocation137_spill] sm:$0xff] }
 0x968   :  { %6276 = vmatpush3.bf16.msra.mxu0 %v6275_v8  ;;  %6402 = vmatprep.subr.bf16.mxu1 %v6401_v10  ;;  %v11852_v8 = vld [vmem:[#allocation134_spill] sm:$0xff]  ;;  %v6409_v33 = vpack.c.bf16 %v11855_v32, %v11854_v63  ;;  %v11857_v50 = vld [vmem:[#allocation31_spill] sm:$0xff]  ;;  %v6411_v38 = vpack.c.bf16 %v11861_v25, %v11860_v13  ;;  %v10673_v56 = vld [vmem:[#allocation5 + $0x18] sm:$0xff] }
 0x969   :  { %6278 = vmatprep.subr.bf16.mxu0 %v6277_v6  ;;  %v6407_v58 = vpack.c.bf16 %v11853_v40, %v11852_v8  ;;  %v11856_v6 = vld [vmem:[#allocation30_spill] sm:$0xff]  ;;  %v11865_v17 = vld [vmem:[#allocation33_spill] sm:$0xff]  ;;  %v11867_v14 = vld [vmem:[#allocation51_spill] sm:$0xff] }
 0x96a   :  { %v6295_v51 = vpack.c.bf16 %v11857_v50, %v11856_v6  ;;  %v11866_v0 = vld [vmem:[#allocation50_spill] sm:$0xff]  ;;  %v11869_v61 = vld [vmem:[#allocation139_spill] sm:$0xff]  ;;  %v11871_v12 = vld [vmem:[#allocation204_spill] sm:$0xff] }
 0x96b   :  { %6404 = vmatpush3.bf16.msra.mxu1 %v6403_v26  ;;  %v6301_v20 = vpack.c.bf16 %v11867_v14, %v11866_v0  ;;  %v11868_v37 = vld [vmem:[#allocation138_spill] sm:$0xff]  ;;  %v11870_v24 = vld [vmem:[#allocation203_spill] sm:$0xff]  ;;  %v11874_v21 = vld [vmem:[#allocation52_spill] sm:$0xff] }
 0x96c   :  { %6280 = vmatpush3.bf16.msra.mxu0 %v6279_v35  ;;  %6406 = vmatprep.subr.bf16.mxu1 %v6405_v29  ;;  %v11862_v35 = vld [vmem:[#allocation153_spill] sm:$0xff]  ;;  %v6415_v54 = vpack.c.bf16 %v11869_v61, %v11868_v37  ;;  %v6449_v3 = vpack.c.bf16 %v11871_v12, %v11870_v24  ;;  %v11873_v41 = vld [vmem:[#allocation35_spill] sm:$0xff]  ;;  %v11877_v10 = vld [vmem:[#allocation188_spill] sm:$0xff] }
 0x96d   :  { %6282 = vmatprep.subr.bf16.mxu0 %v6281_v34  ;;  %v11864_v34 = vld [vmem:[#allocation32_spill] sm:$0xff]  ;;  %v11875_v22 = vld [vmem:[#allocation53_spill] sm:$0xff]  ;;  %v11876_v16 = vld [vmem:[#allocation187_spill] sm:$0xff] }
 0x96e   :  { %v6299_v4 = vpack.c.bf16 %v11865_v17, %v11864_v34  ;;  %v6305_v7 = vpack.c.bf16 %v11875_v22, %v11874_v21  ;;  %v6451_v62 = vpack.c.bf16 %v11877_v10, %v11876_v16  ;;  %v11879_v2 = vld [vmem:[#allocation206_spill] sm:$0xff]  ;;  %v11881_v42 = vld [vmem:[#allocation37_spill] sm:$0xff]  ;;  %v11883_v44 = vld [vmem:[#allocation55_spill] sm:$0xff] }
 0x96f   :  { %6408 = vmatpush3.bf16.msra.mxu1 %v6407_v58  ;;  %v11882_v26 = vld [vmem:[#allocation54_spill] sm:$0xff]  ;;  %v11884_v29 = vld [vmem:[#allocation189_spill] sm:$0xff]  ;;  %v11890_v40 = vld [vmem:[#allocation56_spill] sm:$0xff] }
 0x970   :  { %6284 = vmatpush3.bf16.msra.mxu0 %v6283_v9  ;;  %6410 = vmatprep.subr.bf16.mxu1 %v6409_v33  ;;  %v10683_v9 = vrot.slane %v10673_v56, %v10565_v39  ;;  %v6309_v28 = vpack.c.bf16 %v11883_v44, %v11882_v26  ;;  %v11885_v45 = vld [vmem:[#allocation190_spill] sm:$0xff]  ;;  %v11891_v58 = vld [vmem:[#allocation57_spill] sm:$0xff]  ;;  %v11892_v32 = vld [vmem:[#allocation191_spill] sm:$0xff] }
 0x971   :  { %6286 = vmatprep.subr.bf16.mxu0 %v6285_v11  ;;  %v11872_v11 = vld [vmem:[#allocation34_spill] sm:$0xff]  ;;  %v6455_v30 = vpack.c.bf16 %v11885_v45, %v11884_v29  ;;  %v6313_v63 = vpack.c.bf16 %v11891_v58, %v11890_v40  ;;  %v11894_v6 = vld [vmem:[#allocation209_spill] sm:$0xff]  ;;  %v11896_v55 = vld [vmem:[#allocation40_spill] sm:$0xff] }
 0x972   :  { %v6303_v52 = vpack.c.bf16 %v11873_v41, %v11872_v11  ;;  %v4005_v36 = vcombine.high %v10683_v9, %v10683_v9  ;;  %v11888_v48 = vld [vmem:[#allocation38_spill] sm:$0xff]  ;;  %v11897_v1 = vld [vmem:[#allocation41_spill] sm:$0xff]  ;;  %v11899_v25 = vld [vmem:[#allocation59_spill] sm:$0xff] }
 0x973   :  { %6412 = vmatpush3.bf16.msra.mxu1 %v6411_v38  ;;  %v11895_v50 = vld [vmem:[#allocation210_spill] sm:$0xff]  ;;  %v11902_v17 = vld [vmem:[#allocation211_spill] sm:$0xff]  ;;  %v11907_v24 = vld [vmem:[#allocation77_spill] sm:$0xff] }
 0x974   :  { %6288 = vmatpush3.bf16.msra.mxu0 %v6287_v5  ;;  %v11878_v5 = vld [vmem:[#allocation205_spill] sm:$0xff]  ;;  %v11898_v13 = vld [vmem:[#allocation58_spill] sm:$0xff]  ;;  %v11909_v11 = vld [vmem:[#allocation196_spill] sm:$0xff] }
 0x975   :  { %6290 = vmatprep.subr.bf16.mxu0 %v6289_v19  ;;  %v6453_v59 = vpack.c.bf16 %v11879_v2, %v11878_v5  ;;  %v11880_v19 = vld [vmem:[#allocation36_spill] sm:$0xff]  ;;  %v6317_v38 = vpack.c.bf16 %v11899_v25, %v11898_v13  ;;  %v11904_v14 = vld [vmem:[#allocation42_spill] sm:$0xff]  ;;  %v11913_v16 = vld [vmem:[#allocation61_spill] sm:$0xff] }
 0x976   :  { %v6307_v43 = vpack.c.bf16 %v11881_v42, %v11880_v19  ;;  %v11911_v21 = vld [vmem:[#allocation214_spill] sm:$0xff]  ;;  %v11915_v5 = vld [vmem:[#allocation79_spill] sm:$0xff]  ;;  %v11919_v26 = vld [vmem:[#allocation216_spill] sm:$0xff] }
 0x977   :  { %4172 = vmatmul.mubr.f32.vlgmr.msra.gmra.mrb[20].mxu0 %v3946_v27  ;;  %v11863_v27 = vld [vmem:[#allocation154_spill] sm:$0xff]  ;;  %v11921_v29 = vld [vmem:[#allocation63_spill] sm:$0xff]  ;;  %v11935_v25 = vld [vmem:[#allocation268_spill] sm:$0xff] }
 0x978   :  { %6292 = vmatpush3.bf16.msra.mxu0 %v6291_v31  ;;  %4241 = vmatprep.mubr.f32.mxu0 %v3955_v46  ;;  %v6413_v53 = vpack.c.bf16 %v11863_v27, %v11862_v35  ;;  %v11886_v31 = vld [vmem:[#allocation207_spill] sm:$0xff]  ;;  %v11887_v46 = vld [vmem:[#allocation208_spill] sm:$0xff]  ;;  %v11900_v27 = vld [vmem:[#allocation193_spill] sm:$0xff] }
 0x979   :  { %6294 = vmatprep.subr.bf16.mxu0 %v6293_v49  ;;  %v6457_v47 = vpack.c.bf16 %v11887_v46, %v11886_v31  ;;  %v11889_v49 = vld [vmem:[#allocation39_spill] sm:$0xff]  ;;  %v11917_v19 = vld [vmem:[#allocation198_spill] sm:$0xff]  ;;  %v11923_v31 = vld [vmem:[#allocation81_spill] sm:$0xff] }
 0x97a   :  { %6414 = vmatprep.subr.bf16.mxu1 %v6413_v53  ;;  %v6311_v8 = vpack.c.bf16 %v11889_v49, %v11888_v48  ;;  %v10717_v35 = vld [vmem:[#allocation5 + $0x8] sm:$0xff]  ;;  %v11925_v48 = vld [vmem:[#allocation200_spill] sm:$0xff]  ;;  %v10754_v58 = vld [vmem:[#allocation5 + $0x20] sm:$0xff] }
 0x97b   :  { %6416 = vmatpush3.bf16.msra.mxu1 %v6415_v54  ;;  %v11901_v53 = vld [vmem:[#allocation194_spill] sm:$0xff]  ;;  %v10727_v61 = vrot.slane %v10717_v35, %v10565_v39  ;;  %v11906_v54 = vld [vmem:[#allocation76_spill] sm:$0xff]  ;;  %v11934_v13 = vld [vmem:[#allocation267_spill] sm:$0xff] }
 0x97c   :  { %6296 = vmatpush3.bf16.msra.mxu0 %v6295_v51  ;;  %6450 = vmatprep.subr.bf16.mxu1 %v6449_v3  ;;  %v6461_v51 = vpack.c.bf16 %v11895_v50, %v11894_v6  ;;  %v6463_v34 = vpack.c.bf16 %v11901_v53, %v11900_v27  ;;  %v6321_v12 = vpack.c.bf16 %v11907_v24, %v11906_v54  ;;  %v11908_v3 = vld [vmem:[#allocation195_spill] sm:$0xff]  ;;  %v11936_v27 = vld [vmem:[#allocation66_spill] sm:$0xff]  ;;  %v11942_v24 = vld [vmem:[#allocation269_spill] sm:$0xff] }
 0x97d   :  { %6298 = vmatprep.subr.bf16.mxu0 %v6297_v18  ;;  %v6315_v18 = vpack.c.bf16 %v11897_v1, %v11896_v55  ;;  %v6467_v41 = vpack.c.bf16 %v11909_v11, %v11908_v3  ;;  %v11931_v6 = vld [vmem:[#allocation83_spill] sm:$0xff]  ;;  %v11933_v55 = vld [vmem:[#allocation202_spill] sm:$0xff]  ;;  %v11944_v11 = vld [vmem:[#allocation68_spill] sm:$0xff] }
 0x97e   :  { %4452 = vmatmul.mubr.f32.vlgmr.msra.gmra.mrb[16].mxu1 %v3980_v57  ;;  %v11893_v57 = vld [vmem:[#allocation192_spill] sm:$0xff]  ;;  %v11937_v53 = vld [vmem:[#allocation67_spill] sm:$0xff] }
 0x97f   :  { %6452 = vmatpush3.bf16.msra.mxu1 %v6451_v62  ;;  %4591 = vmatprep.mubr.f32.mxu1 %v4005_v36  ;;  %v6459_v33 = vpack.c.bf16 %v11893_v57, %v11892_v32  ;;  %v3971_v62 = vcombine.high %v10727_v61, %v10727_v61  ;;  %v11914_v36 = vld [vmem:[#allocation78_spill] sm:$0xff]  ;;  %v11929_v32 = vld [vmem:[#allocation65_spill] sm:$0xff] }
 0x980   :  { %6300 = vmatpush3.bf16.msra.mxu0 %v6299_v4  ;;  %6454 = vmatprep.subr.bf16.mxu1 %v6453_v59  ;;  %v11903_v4 = vld [vmem:[#allocation212_spill] sm:$0xff]  ;;  %v6325_v2 = vpack.c.bf16 %v11915_v5, %v11914_v36  ;;  %v11916_v59 = vld [vmem:[#allocation197_spill] sm:$0xff]  ;;  %v11950_v36 = vld [vmem:[#allocation271_spill] sm:$0xff] }
 0x981   :  { %6302 = vmatprep.subr.bf16.mxu0 %v6301_v20  ;;  %v6465_v0 = vpack.c.bf16 %v11903_v4, %v11902_v17  ;;  %v11905_v20 = vld [vmem:[#allocation43_spill] sm:$0xff]  ;;  %v6471_v42 = vpack.c.bf16 %v11917_v19, %v11916_v59  ;;  %v11938_v17 = vld [vmem:[#allocation84_spill] sm:$0xff]  ;;  %v11939_v4 = vld [vmem:[#allocation85_spill] sm:$0xff] }
 0x982   :  { %v6319_v37 = vpack.c.bf16 %v11905_v20, %v11904_v14  ;;  %v11940_v14 = vld [vmem:[#allocation251_spill] sm:$0xff]  ;;  %v11941_v20 = vld [vmem:[#allocation252_spill] sm:$0xff]  ;;  %v11952_v59 = vld [vmem:[#allocation70_spill] sm:$0xff] }
 0x983   :  { %6456 = vmatpush3.bf16.msra.mxu1 %v6455_v30  ;;  %v11922_v30 = vld [vmem:[#allocation80_spill] sm:$0xff]  ;;  %v11953_v19 = vld [vmem:[#allocation71_spill] sm:$0xff] }
 0x984   :  { %6304 = vmatpush3.bf16.msra.mxu0 %v6303_v52  ;;  %6458 = vmatprep.subr.bf16.mxu1 %v6457_v47  ;;  %v11910_v52 = vld [vmem:[#allocation213_spill] sm:$0xff]  ;;  %v6329_v46 = vpack.c.bf16 %v11923_v31, %v11922_v30  ;;  %v11924_v47 = vld [vmem:[#allocation199_spill] sm:$0xff]  ;;  %v11951_v5 = vld [vmem:[#allocation272_spill] sm:$0xff] }
 0x985   :  { %6306 = vmatprep.subr.bf16.mxu0 %v6305_v7  ;;  %v6469_v22 = vpack.c.bf16 %v11911_v21, %v11910_v52  ;;  %v11912_v7 = vld [vmem:[#allocation60_spill] sm:$0xff]  ;;  %v6475_v49 = vpack.c.bf16 %v11925_v48, %v11924_v47  ;;  %v11946_v21 = vld [vmem:[#allocation86_spill] sm:$0xff]  ;;  %v11961_v47 = vld [vmem:[#allocation73_spill] sm:$0xff] }
 0x986   :  { %v6323_v10 = vpack.c.bf16 %v11913_v16, %v11912_v7  ;;  %v11948_v16 = vld [vmem:[#allocation253_spill] sm:$0xff]  ;;  %v11959_v30 = vld [vmem:[#allocation274_spill] sm:$0xff] }
 0x987   :  { %6460 = vmatpush3.bf16.msra.mxu1 %v6459_v33  ;;  %v11930_v33 = vld [vmem:[#allocation82_spill] sm:$0xff] }
 0x988   :  { %6308 = vmatpush3.bf16.msra.mxu0 %v6307_v43  ;;  %6462 = vmatprep.subr.bf16.mxu1 %v6461_v51  ;;  %v11918_v43 = vld [vmem:[#allocation215_spill] sm:$0xff]  ;;  %v6333_v50 = vpack.c.bf16 %v11931_v6, %v11930_v33  ;;  %v11932_v51 = vld [vmem:[#allocation201_spill] sm:$0xff]  ;;  %v11967_v6 = vld [vmem:[#allocation276_spill] sm:$0xff] }
 0x989   :  { %6310 = vmatprep.subr.bf16.mxu0 %v6309_v28  ;;  %v6473_v44 = vpack.c.bf16 %v11919_v26, %v11918_v43  ;;  %v11920_v28 = vld [vmem:[#allocation62_spill] sm:$0xff]  ;;  %v6479_v1 = vpack.c.bf16 %v11933_v55, %v11932_v51  ;;  %v11954_v43 = vld [vmem:[#allocation88_spill] sm:$0xff]  ;;  %v11955_v26 = vld [vmem:[#allocation89_spill] sm:$0xff] }
 0x98a   :  { %v6327_v45 = vpack.c.bf16 %v11921_v29, %v11920_v28  ;;  %v11956_v28 = vld [vmem:[#allocation255_spill] sm:$0xff]  ;;  %v11968_v51 = vld [vmem:[#allocation74_spill] sm:$0xff] }
 0x98b   :  { %6464 = vmatpush3.bf16.msra.mxu1 %v6463_v34  ;;  %v6335_v34 = vpack.c.bf16 %v11937_v53, %v11936_v27  ;;  %v11966_v33 = vld [vmem:[#allocation275_spill] sm:$0xff]  ;;  %v11973_v53 = vld [vmem:[#allocation260_spill] sm:$0xff] }
 0x98c   :  { %6312 = vmatpush3.bf16.msra.mxu0 %v6311_v8  ;;  %6466 = vmatprep.subr.bf16.mxu1 %v6465_v0  ;;  %v11926_v8 = vld [vmem:[#allocation217_spill] sm:$0xff]  ;;  %v6337_v0 = vpack.c.bf16 %v11939_v4, %v11938_v17  ;;  %v11969_v55 = vld [vmem:[#allocation75_spill] sm:$0xff]  ;;  %v11975_v4 = vld [vmem:[#allocation278_spill] sm:$0xff] }
 0x98d   :  { %6314 = vmatprep.subr.bf16.mxu0 %v6313_v63  ;;  %v11928_v63 = vld [vmem:[#allocation64_spill] sm:$0xff]  ;;  %v11972_v27 = vld [vmem:[#allocation259_spill] sm:$0xff]  ;;  %v11974_v17 = vld [vmem:[#allocation277_spill] sm:$0xff] }
 0x98e   :  { %v6331_v57 = vpack.c.bf16 %v11929_v32, %v11928_v63  ;;  %v11964_v63 = vld [vmem:[#allocation257_spill] sm:$0xff]  ;;  %v11965_v32 = vld [vmem:[#allocation258_spill] sm:$0xff] }
 0x98f   :  { %6468 = vmatpush3.bf16.msra.mxu1 %v6467_v41  ;;  %v11945_v41 = vld [vmem:[#allocation69_spill] sm:$0xff] }
 0x990   :  { %6316 = vmatpush3.bf16.msra.mxu0 %v6315_v18  ;;  %6470 = vmatprep.subr.bf16.mxu1 %v6469_v22  ;;  %v10764_v18 = vrot.slane %v10754_v58, %v10565_v39  ;;  %v6339_v52 = vpack.c.bf16 %v11945_v41, %v11944_v11  ;;  %v11947_v22 = vld [vmem:[#allocation87_spill] sm:$0xff]  ;;  %v11980_v11 = vld [vmem:[#allocation261_spill] sm:$0xff]  ;;  %v11981_v41 = vld [vmem:[#allocation262_spill] sm:$0xff] }
 0x991   :  { %6318 = vmatprep.subr.bf16.mxu0 %v6317_v38  ;;  %v6513_v38 = vpack.c.bf16 %v11935_v25, %v11934_v13  ;;  %v6341_v7 = vpack.c.bf16 %v11947_v22, %v11946_v21  ;;  %v11971_v25 = vld [vmem:[#allocation109_spill] sm:$0xff]  ;;  %v11982_v21 = vld [vmem:[#allocation279_spill] sm:$0xff]  ;;  %v11983_v22 = vld [vmem:[#allocation280_spill] sm:$0xff] }
 0x992   :  { %v4022_v54 = vcombine.high %v10764_v18, %v10764_v18 }
 0x993   :  { %6472 = vmatpush3.bf16.msra.mxu1 %v6471_v42  ;;  %v6343_v42 = vpack.c.bf16 %v11953_v19, %v11952_v59  ;;  %v11988_v59 = vld [vmem:[#allocation263_spill] sm:$0xff]  ;;  %v11989_v19 = vld [vmem:[#allocation264_spill] sm:$0xff] }
 0x994   :  { %6320 = vmatpush3.bf16.msra.mxu0 %v6319_v37  ;;  %6474 = vmatprep.subr.bf16.mxu1 %v6473_v44  ;;  %v6515_v37 = vpack.c.bf16 %v11941_v20, %v11940_v14  ;;  %v6345_v44 = vpack.c.bf16 %v11955_v26, %v11954_v43  ;;  %v11976_v14 = vld [vmem:[#allocation92_spill] sm:$0xff]  ;;  %v11977_v20 = vld [vmem:[#allocation93_spill] sm:$0xff] }
 0x995   :  { %6322 = vmatprep.subr.bf16.mxu0 %v6321_v12  ;;  %v11943_v12 = vld [vmem:[#allocation270_spill] sm:$0xff]  ;;  %v11990_v43 = vld [vmem:[#allocation281_spill] sm:$0xff] }
 0x996   :  { %v6517_v3 = vpack.c.bf16 %v11943_v12, %v11942_v24  ;;  %v11978_v24 = vld [vmem:[#allocation110_spill] sm:$0xff]  ;;  %v11979_v12 = vld [vmem:[#allocation111_spill] sm:$0xff] }
 0x997   :  { %4242 = vmatmul.mubr.f32.vlgmr.msra.gmra.mrb[22].mxu0 %v10647_v23  ;;  %v11927_v23 = vld [vmem:[#allocation218_spill] sm:$0xff]  ;;  %6476 = vmatpush3.bf16.msra.mxu1 %v6475_v49  ;;  %v3956_v49 = vcombine.high %v10717_v35, %v10717_v35  ;;  %v11970_v35 = vld [vmem:[#allocation108_spill] sm:$0xff] }
 0x998   :  { %6324 = vmatpush3.bf16.msra.mxu0 %v6323_v10  ;;  %4311 = vmatprep.mubr.f32.mxu0 %v3971_v62  ;;  %v6477_v40 = vpack.c.bf16 %v11927_v23, %v11926_v8  ;;  %v11949_v10 = vld [vmem:[#allocation254_spill] sm:$0xff]  ;;  %v11963_v23 = vld [vmem:[#allocation91_spill] sm:$0xff] }
 0x999   :  { %6326 = vmatprep.subr.bf16.mxu0 %v6325_v2  ;;  %v6519_v62 = vpack.c.bf16 %v11949_v10, %v11948_v16  ;;  %v6521_v2 = vpack.c.bf16 %v11951_v5, %v11950_v36  ;;  %v11962_v8 = vld [vmem:[#allocation90_spill] sm:$0xff]  ;;  %v10808_v13 = vrot.slane %v3956_v49, %v10565_v39  ;;  %v11985_v10 = vld [vmem:[#allocation95_spill] sm:$0xff]  ;;  %v11986_v36 = vld [vmem:[#allocation112_spill] sm:$0xff] }
 0x99a   :  { %6478 = vmatprep.subr.bf16.mxu1 %v6477_v40  ;;  %v6349_v40 = vpack.c.bf16 %v11963_v23, %v11962_v8  ;;  %v11984_v16 = vld [vmem:[#allocation94_spill] sm:$0xff]  ;;  %v11987_v5 = vld [vmem:[#allocation113_spill] sm:$0xff]  ;;  %v11998_v8 = vld [vmem:[#allocation331_spill] sm:$0xff] }
 0x99b   :  { %6480 = vmatpush3.bf16.msra.mxu1 %v6479_v1  ;;  %v6351_v1 = vpack.c.bf16 %v11969_v55, %v11968_v51  ;;  %v11999_v23 = vld [vmem:[#allocation332_spill] sm:$0xff]  ;;  %v12004_v51 = vld [vmem:[#allocation315_spill] sm:$0xff] }
 0x99c   :  { %6328 = vmatpush3.bf16.msra.mxu0 %v6327_v45  ;;  %6514 = vmatprep.subr.bf16.mxu1 %v6513_v38  ;;  %v11958_v45 = vld [vmem:[#allocation273_spill] sm:$0xff]  ;;  %v6353_v38 = vpack.c.bf16 %v11971_v25, %v11970_v35  ;;  %v12005_v55 = vld [vmem:[#allocation316_spill] sm:$0xff] }
 0x99d   :  { %6330 = vmatprep.subr.bf16.mxu0 %v6329_v46  ;;  %v6525_v31 = vpack.c.bf16 %v11959_v30, %v11958_v45  ;;  %v11960_v46 = vld [vmem:[#allocation72_spill] sm:$0xff]  ;;  %v11994_v45 = vld [vmem:[#allocation114_spill] sm:$0xff]  ;;  %v11995_v30 = vld [vmem:[#allocation115_spill] sm:$0xff] }
 0x99e   :  { %4592 = vmatmul.mubr.f32.vlgmr.msra.gmra.mrb[18].mxu1 %v10683_v9  ;;  %v11957_v9 = vld [vmem:[#allocation256_spill] sm:$0xff]  ;;  %v6347_v48 = vpack.c.bf16 %v11961_v47, %v11960_v46  ;;  %v11996_v46 = vld [vmem:[#allocation265_spill] sm:$0xff]  ;;  %v11997_v47 = vld [vmem:[#allocation266_spill] sm:$0xff] }
 0x99f   :  { %6516 = vmatpush3.bf16.msra.mxu1 %v6515_v37  ;;  %4731 = vmatprep.mubr.f32.mxu1 %v4022_v54  ;;  %v6523_v29 = vpack.c.bf16 %v11957_v9, %v11956_v28  ;;  %v6355_v37 = vpack.c.bf16 %v11977_v20, %v11976_v14  ;;  %v3972_v54 = vcombine.high %v10808_v13, %v10808_v13  ;;  %v11992_v28 = vld [vmem:[#allocation96_spill] sm:$0xff]  ;;  %v11993_v9 = vld [vmem:[#allocation97_spill] sm:$0xff] }
 0x9a0   :  { %6332 = vmatpush3.bf16.msra.mxu0 %v6331_v57  ;;  %6518 = vmatprep.subr.bf16.mxu1 %v6517_v3  ;;  %v6527_v57 = vpack.c.bf16 %v11965_v32, %v11964_v63  ;;  %v6357_v3 = vpack.c.bf16 %v11979_v12, %v11978_v24  ;;  %v12000_v63 = vld [vmem:[#allocation98_spill] sm:$0xff]  ;;  %v12001_v32 = vld [vmem:[#allocation99_spill] sm:$0xff]  ;;  %v12006_v25 = vld [vmem:[#allocation333_spill] sm:$0xff] }
 0x9a1   :  { %6334 = vmatprep.subr.bf16.mxu0 %v6333_v50  ;;  %v6529_v50 = vpack.c.bf16 %v11967_v6, %v11966_v33  ;;  %v12002_v33 = vld [vmem:[#allocation116_spill] sm:$0xff]  ;;  %v12003_v6 = vld [vmem:[#allocation117_spill] sm:$0xff]  ;;  %v12014_v24 = vld [vmem:[#allocation335_spill] sm:$0xff] }
 0x9a2   :  { %v12012_v20 = vld [vmem:[#allocation317_spill] sm:$0xff]  ;;  %v12015_v12 = vld [vmem:[#allocation336_spill] sm:$0xff] }
 0x9a3   :  { %6520 = vmatpush3.bf16.msra.mxu1 %v6519_v62  ;;  %v6359_v62 = vpack.c.bf16 %v11985_v10, %v11984_v16  ;;  %v12020_v16 = vld [vmem:[#allocation319_spill] sm:$0xff] }
 0x9a4   :  { %6336 = vmatpush3.bf16.msra.mxu0 %v6335_v34  ;;  %6522 = vmatprep.subr.bf16.mxu1 %v6521_v2  ;;  %v6531_v34 = vpack.c.bf16 %v11973_v53, %v11972_v27  ;;  %v6361_v2 = vpack.c.bf16 %v11987_v5, %v11986_v36  ;;  %v12008_v53 = vld [vmem:[#allocation100_spill] sm:$0xff]  ;;  %v12023_v36 = vld [vmem:[#allocation338_spill] sm:$0xff] }
 0x9a5   :  { %6338 = vmatprep.subr.bf16.mxu0 %v6337_v0  ;;  %v6533_v0 = vpack.c.bf16 %v11975_v4, %v11974_v17  ;;  %v12010_v4 = vld [vmem:[#allocation118_spill] sm:$0xff] }
 0x9a7   :  { %6524 = vmatpush3.bf16.msra.mxu1 %v6523_v29  ;;  %v6363_v29 = vpack.c.bf16 %v11993_v9, %v11992_v28  ;;  %v12028_v28 = vld [vmem:[#allocation321_spill] sm:$0xff]  ;;  %v12029_v9 = vld [vmem:[#allocation322_spill] sm:$0xff] }
 0x9a8   :  { %6340 = vmatpush3.bf16.msra.mxu0 %v6339_v52  ;;  %6526 = vmatprep.subr.bf16.mxu1 %v6525_v31  ;;  %v6535_v52 = vpack.c.bf16 %v11981_v41, %v11980_v11  ;;  %v6365_v31 = vpack.c.bf16 %v11995_v30, %v11994_v45  ;;  %v12016_v11 = vld [vmem:[#allocation102_spill] sm:$0xff]  ;;  %v12017_v41 = vld [vmem:[#allocation103_spill] sm:$0xff]  ;;  %v12031_v30 = vld [vmem:[#allocation340_spill] sm:$0xff] }
 0x9a9   :  { %6342 = vmatprep.subr.bf16.mxu0 %v6341_v7  ;;  %v6537_v7 = vpack.c.bf16 %v11983_v22, %v11982_v21  ;;  %v12018_v21 = vld [vmem:[#allocation120_spill] sm:$0xff]  ;;  %v12019_v22 = vld [vmem:[#allocation121_spill] sm:$0xff]  ;;  %v12030_v45 = vld [vmem:[#allocation339_spill] sm:$0xff] }
 0x9ab   :  { %6528 = vmatpush3.bf16.msra.mxu1 %v6527_v57  ;;  %v6367_v57 = vpack.c.bf16 %v12001_v32, %v12000_v63  ;;  %v12036_v63 = vld [vmem:[#allocation323_spill] sm:$0xff]  ;;  %v12037_v32 = vld [vmem:[#allocation324_spill] sm:$0xff] }
 0x9ac   :  { %6344 = vmatpush3.bf16.msra.mxu0 %v6343_v42  ;;  %6530 = vmatprep.subr.bf16.mxu1 %v6529_v50  ;;  %v6539_v42 = vpack.c.bf16 %v11989_v19, %v11988_v59  ;;  %v6369_v50 = vpack.c.bf16 %v12003_v6, %v12002_v33  ;;  %v12025_v59 = vld [vmem:[#allocation105_spill] sm:$0xff]  ;;  %v12039_v6 = vld [vmem:[#allocation342_spill] sm:$0xff] }
 0x9ad   :  { %6346 = vmatprep.subr.bf16.mxu0 %v6345_v44  ;;  %v10835_v44 = vld [vmem:[#allocation5 + $0x28] sm:$0xff]  ;;  %v12038_v33 = vld [vmem:[#allocation341_spill] sm:$0xff] }
 0x9ae   :  { %v10845_v49 = vrot.slane %v10835_v44, %v10565_v39 }
 0x9af   :  { %6532 = vmatpush3.bf16.msra.mxu1 %v6531_v34  ;;  %v12009_v34 = vld [vmem:[#allocation101_spill] sm:$0xff] }
 0x9b0   :  { %6348 = vmatpush3.bf16.msra.mxu0 %v6347_v48  ;;  %6534 = vmatprep.subr.bf16.mxu1 %v6533_v0  ;;  %v6543_v48 = vpack.c.bf16 %v11997_v47, %v11996_v46  ;;  %v4039_v35 = vcombine.high %v10845_v49, %v10845_v49  ;;  %v6371_v17 = vpack.c.bf16 %v12009_v34, %v12008_v53  ;;  %v12011_v0 = vld [vmem:[#allocation119_spill] sm:$0xff]  ;;  %v12032_v46 = vld [vmem:[#allocation106_spill] sm:$0xff]  ;;  %v12044_v53 = vld [vmem:[#allocation325_spill] sm:$0xff] }
 0x9b1   :  { %6350 = vmatprep.subr.bf16.mxu0 %v6349_v40  ;;  %v6577_v40 = vpack.c.bf16 %v11999_v23, %v11998_v8  ;;  %v6373_v14 = vpack.c.bf16 %v12011_v0, %v12010_v4  ;;  %v12033_v47 = vld [vmem:[#allocation107_spill] sm:$0xff]  ;;  %v12035_v23 = vld [vmem:[#allocation172_spill] sm:$0xff]  ;;  %v12045_v34 = vld [vmem:[#allocation326_spill] sm:$0xff] }
 0x9b2   :  { %v12046_v4 = vld [vmem:[#allocation343_spill] sm:$0xff]  ;;  %v12047_v0 = vld [vmem:[#allocation344_spill] sm:$0xff] }
 0x9b3   :  { %6536 = vmatpush3.bf16.msra.mxu1 %v6535_v52  ;;  %v6375_v52 = vpack.c.bf16 %v12017_v41, %v12016_v11  ;;  %v12052_v11 = vld [vmem:[#allocation327_spill] sm:$0xff]  ;;  %v12053_v41 = vld [vmem:[#allocation328_spill] sm:$0xff] }
 0x9b4   :  { %6352 = vmatpush3.bf16.msra.mxu0 %v6351_v1  ;;  %6538 = vmatprep.subr.bf16.mxu1 %v6537_v7  ;;  %v6579_v1 = vpack.c.bf16 %v12005_v55, %v12004_v51  ;;  %v6377_v7 = vpack.c.bf16 %v12019_v22, %v12018_v21  ;;  %v12040_v51 = vld [vmem:[#allocation155_spill] sm:$0xff]  ;;  %v12041_v55 = vld [vmem:[#allocation156_spill] sm:$0xff]  ;;  %v12054_v21 = vld [vmem:[#allocation345_spill] sm:$0xff] }
 0x9b5   :  { %6354 = vmatprep.subr.bf16.mxu0 %v6353_v38  ;;  %v12007_v38 = vld [vmem:[#allocation334_spill] sm:$0xff] }
 0x9b6   :  { %v6581_v27 = vpack.c.bf16 %v12007_v38, %v12006_v25  ;;  %v12042_v25 = vld [vmem:[#allocation173_spill] sm:$0xff]  ;;  %v12043_v38 = vld [vmem:[#allocation174_spill] sm:$0xff] }
 0x9b7   :  { %4312 = vmatmul.mubr.f32.vlgmr.msra.gmra.mrb[24].mxu0 %v10727_v61  ;;  %v11991_v61 = vld [vmem:[#allocation282_spill] sm:$0xff]  ;;  %6540 = vmatpush3.bf16.msra.mxu1 %v6539_v42  ;;  %v3973_v42 = vcombine.high %v10628_v60, %v10628_v60  ;;  %v12034_v60 = vld [vmem:[#allocation171_spill] sm:$0xff] }
 0x9b8   :  { %6356 = vmatpush3.bf16.msra.mxu0 %v6355_v37  ;;  %4381 = vmatprep.mubr.f32.mxu0 %v3972_v54  ;;  %v6541_v26 = vpack.c.bf16 %v11991_v61, %v11990_v43  ;;  %v12013_v37 = vld [vmem:[#allocation318_spill] sm:$0xff]  ;;  %v12027_v61 = vld [vmem:[#allocation123_spill] sm:$0xff] }
 0x9b9   :  { %6358 = vmatprep.subr.bf16.mxu0 %v6357_v3  ;;  %v6583_v54 = vpack.c.bf16 %v12013_v37, %v12012_v20  ;;  %v6585_v3 = vpack.c.bf16 %v12015_v12, %v12014_v24  ;;  %v12026_v43 = vld [vmem:[#allocation122_spill] sm:$0xff]  ;;  %v10889_v8 = vrot.slane %v3973_v42, %v10565_v39  ;;  %v12048_v20 = vld [vmem:[#allocation157_spill] sm:$0xff]  ;;  %v12050_v24 = vld [vmem:[#allocation175_spill] sm:$0xff] }
 0x9ba   :  { %6542 = vmatprep.subr.bf16.mxu1 %v6541_v26  ;;  %v6381_v26 = vpack.c.bf16 %v12027_v61, %v12026_v43  ;;  %v12049_v37 = vld [vmem:[#allocation158_spill] sm:$0xff]  ;;  %v12051_v12 = vld [vmem:[#allocation176_spill] sm:$0xff]  ;;  %v12062_v43 = vld [vmem:[#allocation395_spill] sm:$0xff] }
 0x9bb   :  { %6544 = vmatpush3.bf16.msra.mxu1 %v6543_v48  ;;  %v6383_v48 = vpack.c.bf16 %v12033_v47, %v12032_v46  ;;  %v12063_v61 = vld [vmem:[#allocation396_spill] sm:$0xff]  ;;  %v12068_v46 = vld [vmem:[#allocation379_spill] sm:$0xff] }
 0x9bc   :  { %6360 = vmatpush3.bf16.msra.mxu0 %v6359_v62  ;;  %6578 = vmatprep.subr.bf16.mxu1 %v6577_v40  ;;  %v12022_v62 = vld [vmem:[#allocation337_spill] sm:$0xff]  ;;  %v6417_v40 = vpack.c.bf16 %v12035_v23, %v12034_v60  ;;  %v12069_v47 = vld [vmem:[#allocation380_spill] sm:$0xff] }
 0x9bd   :  { %6362 = vmatprep.subr.bf16.mxu0 %v6361_v2  ;;  %v6589_v5 = vpack.c.bf16 %v12023_v36, %v12022_v62  ;;  %v12024_v2 = vld [vmem:[#allocation104_spill] sm:$0xff]  ;;  %v12058_v62 = vld [vmem:[#allocation177_spill] sm:$0xff]  ;;  %v12059_v36 = vld [vmem:[#allocation178_spill] sm:$0xff] }
 0x9be   :  { %4732 = vmatmul.mubr.f32.vlgmr.msra.gmra.mrb[20].mxu1 %v10764_v18  ;;  %v12021_v18 = vld [vmem:[#allocation320_spill] sm:$0xff]  ;;  %v6379_v19 = vpack.c.bf16 %v12025_v59, %v12024_v2  ;;  %v12060_v2 = vld [vmem:[#allocation329_spill] sm:$0xff]  ;;  %v12061_v59 = vld [vmem:[#allocation330_spill] sm:$0xff] }
 0x9bf   :  { %6580 = vmatpush3.bf16.msra.mxu1 %v6579_v1  ;;  %4871 = vmatprep.mubr.f32.mxu1 %v4039_v35  ;;  %v6587_v10 = vpack.c.bf16 %v12021_v18, %v12020_v16  ;;  %v6419_v1 = vpack.c.bf16 %v12041_v55, %v12040_v51  ;;  %v3989_v35 = vcombine.high %v10889_v8, %v10889_v8  ;;  %v12056_v16 = vld [vmem:[#allocation159_spill] sm:$0xff]  ;;  %v12057_v18 = vld [vmem:[#allocation160_spill] sm:$0xff]  ;;  %v12070_v23 = vld [vmem:[#allocation397_spill] sm:$0xff] }
 0x9c0   :  { %6364 = vmatpush3.bf16.msra.mxu0 %v6363_v29  ;;  %6582 = vmatprep.subr.bf16.mxu1 %v6581_v27  ;;  %v6591_v29 = vpack.c.bf16 %v12029_v9, %v12028_v28  ;;  %v6421_v27 = vpack.c.bf16 %v12043_v38, %v12042_v25  ;;  %v12064_v28 = vld [vmem:[#allocation161_spill] sm:$0xff]  ;;  %v12065_v9 = vld [vmem:[#allocation162_spill] sm:$0xff]  ;;  %v12078_v25 = vld [vmem:[#allocation399_spill] sm:$0xff] }
 0x9c1   :  { %6366 = vmatprep.subr.bf16.mxu0 %v6365_v31  ;;  %v6593_v31 = vpack.c.bf16 %v12031_v30, %v12030_v45  ;;  %v12066_v45 = vld [vmem:[#allocation179_spill] sm:$0xff]  ;;  %v12067_v30 = vld [vmem:[#allocation180_spill] sm:$0xff]  ;;  %v12076_v55 = vld [vmem:[#allocation381_spill] sm:$0xff] }
 0x9c2   :  { %v12079_v38 = vld [vmem:[#allocation400_spill] sm:$0xff] }
 0x9c3   :  { %6584 = vmatpush3.bf16.msra.mxu1 %v6583_v54  ;;  %v6423_v54 = vpack.c.bf16 %v12049_v37, %v12048_v20  ;;  %v12084_v20 = vld [vmem:[#allocation383_spill] sm:$0xff] }
 0x9c4   :  { %6368 = vmatpush3.bf16.msra.mxu0 %v6367_v57  ;;  %6586 = vmatprep.subr.bf16.mxu1 %v6585_v3  ;;  %v6595_v57 = vpack.c.bf16 %v12037_v32, %v12036_v63  ;;  %v6425_v3 = vpack.c.bf16 %v12051_v12, %v12050_v24  ;;  %v12072_v32 = vld [vmem:[#allocation163_spill] sm:$0xff]  ;;  %v12087_v24 = vld [vmem:[#allocation402_spill] sm:$0xff] }
 0x9c5   :  { %6370 = vmatprep.subr.bf16.mxu0 %v6369_v50  ;;  %v6597_v50 = vpack.c.bf16 %v12039_v6, %v12038_v33  ;;  %v12074_v6 = vld [vmem:[#allocation181_spill] sm:$0xff] }
 0x9c7   :  { %6588 = vmatpush3.bf16.msra.mxu1 %v6587_v10  ;;  %v6427_v10 = vpack.c.bf16 %v12057_v18, %v12056_v16  ;;  %v12092_v16 = vld [vmem:[#allocation385_spill] sm:$0xff]  ;;  %v12093_v18 = vld [vmem:[#allocation386_spill] sm:$0xff] }
 0x9c8   :  { %6372 = vmatpush3.bf16.msra.mxu0 %v6371_v17  ;;  %6590 = vmatprep.subr.bf16.mxu1 %v6589_v5  ;;  %v6599_v17 = vpack.c.bf16 %v12045_v34, %v12044_v53  ;;  %v6429_v5 = vpack.c.bf16 %v12059_v36, %v12058_v62  ;;  %v12080_v53 = vld [vmem:[#allocation165_spill] sm:$0xff]  ;;  %v12081_v34 = vld [vmem:[#allocation166_spill] sm:$0xff]  ;;  %v12094_v62 = vld [vmem:[#allocation403_spill] sm:$0xff] }
 0x9c9   :  { %6374 = vmatprep.subr.bf16.mxu0 %v6373_v14  ;;  %v6601_v14 = vpack.c.bf16 %v12047_v0, %v12046_v4  ;;  %v12082_v4 = vld [vmem:[#allocation183_spill] sm:$0xff]  ;;  %v12083_v0 = vld [vmem:[#allocation184_spill] sm:$0xff] }
 0x9ca   :  { %v12095_v36 = vld [vmem:[#allocation404_spill] sm:$0xff] }
 0x9cb   :  { %6592 = vmatpush3.bf16.msra.mxu1 %v6591_v29  ;;  %v6431_v29 = vpack.c.bf16 %v12065_v9, %v12064_v28  ;;  %v12100_v28 = vld [vmem:[#allocation387_spill] sm:$0xff]  ;;  %v12101_v9 = vld [vmem:[#allocation388_spill] sm:$0xff] }
 0x9cc   :  { %6376 = vmatpush3.bf16.msra.mxu0 %v6375_v52  ;;  %6594 = vmatprep.subr.bf16.mxu1 %v6593_v31  ;;  %v6603_v52 = vpack.c.bf16 %v12053_v41, %v12052_v11  ;;  %v6433_v31 = vpack.c.bf16 %v12067_v30, %v12066_v45  ;;  %v12089_v11 = vld [vmem:[#allocation168_spill] sm:$0xff]  ;;  %v12102_v45 = vld [vmem:[#allocation405_spill] sm:$0xff]  ;;  %v12103_v30 = vld [vmem:[#allocation406_spill] sm:$0xff] }
 0x9cd   :  { %6378 = vmatprep.subr.bf16.mxu0 %v6377_v7  ;;  %v10916_v7 = vld [vmem:[#allocation5 + $0x30] sm:$0xff] }
 0x9ce   :  { %v10926_v42 = vrot.slane %v10916_v7, %v10565_v39 }
 0x9cf   :  { %6596 = vmatpush3.bf16.msra.mxu1 %v6595_v57  ;;  %v12073_v57 = vld [vmem:[#allocation164_spill] sm:$0xff] }
 0x9d0   :  { %6380 = vmatpush3.bf16.msra.mxu0 %v6379_v19  ;;  %6598 = vmatprep.subr.bf16.mxu1 %v6597_v50  ;;  %v6607_v19 = vpack.c.bf16 %v12061_v59, %v12060_v2  ;;  %v4056_v60 = vcombine.high %v10926_v42, %v10926_v42  ;;  %v6435_v33 = vpack.c.bf16 %v12073_v57, %v12072_v32  ;;  %v12075_v50 = vld [vmem:[#allocation182_spill] sm:$0xff]  ;;  %v12096_v2 = vld [vmem:[#allocation169_spill] sm:$0xff] }
 0x9d1   :  { %6382 = vmatprep.subr.bf16.mxu0 %v6381_v26  ;;  %v6641_v26 = vpack.c.bf16 %v12063_v61, %v12062_v43  ;;  %v6437_v51 = vpack.c.bf16 %v12075_v50, %v12074_v6  ;;  %v12097_v59 = vld [vmem:[#allocation170_spill] sm:$0xff]  ;;  %v12099_v61 = vld [vmem:[#allocation236_spill] sm:$0xff]  ;;  %v12108_v32 = vld [vmem:[#allocation389_spill] sm:$0xff] }
 0x9d2   :  { %v12109_v57 = vld [vmem:[#allocation390_spill] sm:$0xff]  ;;  %v12110_v6 = vld [vmem:[#allocation407_spill] sm:$0xff]  ;;  %v12111_v50 = vld [vmem:[#allocation408_spill] sm:$0xff] }
 0x9d3   :  { %6600 = vmatpush3.bf16.msra.mxu1 %v6599_v17  ;;  %v6439_v17 = vpack.c.bf16 %v12081_v34, %v12080_v53  ;;  %v12116_v53 = vld [vmem:[#allocation391_spill] sm:$0xff]  ;;  %v12117_v34 = vld [vmem:[#allocation392_spill] sm:$0xff] }
 0x9d4   :  { %6384 = vmatpush3.bf16.msra.mxu0 %v6383_v48  ;;  %6602 = vmatprep.subr.bf16.mxu1 %v6601_v14  ;;  %v6643_v48 = vpack.c.bf16 %v12069_v47, %v12068_v46  ;;  %v6441_v14 = vpack.c.bf16 %v12083_v0, %v12082_v4  ;;  %v12104_v46 = vld [vmem:[#allocation219_spill] sm:$0xff]  ;;  %v12105_v47 = vld [vmem:[#allocation220_spill] sm:$0xff]  ;;  %v12118_v4 = vld [vmem:[#allocation409_spill] sm:$0xff] }
 0x9d5   :  { %6418 = vmatprep.subr.bf16.mxu0 %v6417_v40  ;;  %v12071_v40 = vld [vmem:[#allocation398_spill] sm:$0xff] }
 0x9d6   :  { %v6645_v63 = vpack.c.bf16 %v12071_v40, %v12070_v23  ;;  %v12106_v23 = vld [vmem:[#allocation237_spill] sm:$0xff]  ;;  %v12107_v40 = vld [vmem:[#allocation238_spill] sm:$0xff] }
 0x9d7   :  { %4382 = vmatmul.mubr.f32.vlgmr.msra.gmra.mrb[26].mxu0 %v10808_v13  ;;  %v12055_v13 = vld [vmem:[#allocation346_spill] sm:$0xff]  ;;  %6604 = vmatpush3.bf16.msra.mxu1 %v6603_v52  ;;  %v3990_v52 = vcombine.high %v10673_v56, %v10673_v56  ;;  %v12098_v56 = vld [vmem:[#allocation235_spill] sm:$0xff] }
 0x9d8   :  { %6420 = vmatpush3.bf16.msra.mxu0 %v6419_v1  ;;  %4521 = vmatprep.mubr.f32.mxu0 %v3989_v35  ;;  %v6605_v22 = vpack.c.bf16 %v12055_v13, %v12054_v21  ;;  %v12077_v1 = vld [vmem:[#allocation382_spill] sm:$0xff]  ;;  %v12090_v21 = vld [vmem:[#allocation185_spill] sm:$0xff] }
 0x9d9   :  { %6422 = vmatprep.subr.bf16.mxu0 %v6421_v27  ;;  %v6647_v35 = vpack.c.bf16 %v12077_v1, %v12076_v55  ;;  %v6649_v27 = vpack.c.bf16 %v12079_v38, %v12078_v25  ;;  %v12091_v13 = vld [vmem:[#allocation186_spill] sm:$0xff]  ;;  %v10970_v43 = vrot.slane %v3990_v52, %v10565_v39  ;;  %v12112_v55 = vld [vmem:[#allocation221_spill] sm:$0xff]  ;;  %v12114_v25 = vld [vmem:[#allocation239_spill] sm:$0xff] }
 0x9da   :  { %6606 = vmatprep.subr.bf16.mxu1 %v6605_v22  ;;  %v6445_v22 = vpack.c.bf16 %v12091_v13, %v12090_v21  ;;  %v12113_v1 = vld [vmem:[#allocation222_spill] sm:$0xff]  ;;  %v12115_v38 = vld [vmem:[#allocation240_spill] sm:$0xff]  ;;  %v12126_v21 = vld [vmem:[#allocation459_spill] sm:$0xff] }
 0x9db   :  { %6608 = vmatpush3.bf16.msra.mxu1 %v6607_v19  ;;  %v6447_v19 = vpack.c.bf16 %v12097_v59, %v12096_v2  ;;  %v12127_v13 = vld [vmem:[#allocation460_spill] sm:$0xff]  ;;  %v12132_v2 = vld [vmem:[#allocation443_spill] sm:$0xff] }
 0x9dc   :  { %6424 = vmatpush3.bf16.msra.mxu0 %v6423_v54  ;;  %6642 = vmatprep.subr.bf16.mxu1 %v6641_v26  ;;  %v12086_v54 = vld [vmem:[#allocation401_spill] sm:$0xff]  ;;  %v6481_v26 = vpack.c.bf16 %v12099_v61, %v12098_v56  ;;  %v12133_v59 = vld [vmem:[#allocation444_spill] sm:$0xff] }
 0x9dd   :  { %6426 = vmatprep.subr.bf16.mxu0 %v6425_v3  ;;  %v6653_v12 = vpack.c.bf16 %v12087_v24, %v12086_v54  ;;  %v12088_v3 = vld [vmem:[#allocation167_spill] sm:$0xff]  ;;  %v12122_v54 = vld [vmem:[#allocation241_spill] sm:$0xff]  ;;  %v12123_v24 = vld [vmem:[#allocation242_spill] sm:$0xff] }
 0x9de   :  { %4872 = vmatmul.mubr.f32.vlgmr.msra.gmra.mrb[22].mxu1 %v10845_v49  ;;  %v12085_v49 = vld [vmem:[#allocation384_spill] sm:$0xff]  ;;  %v6443_v41 = vpack.c.bf16 %v12089_v11, %v12088_v3  ;;  %v12124_v3 = vld [vmem:[#allocation393_spill] sm:$0xff]  ;;  %v12125_v11 = vld [vmem:[#allocation394_spill] sm:$0xff] }
 0x9df   :  { %6644 = vmatpush3.bf16.msra.mxu1 %v6643_v48  ;;  %5011 = vmatprep.mubr.f32.mxu1 %v4056_v60  ;;  %v6651_v37 = vpack.c.bf16 %v12085_v49, %v12084_v20  ;;  %v6483_v48 = vpack.c.bf16 %v12105_v47, %v12104_v46  ;;  %v4006_v60 = vcombine.high %v10970_v43, %v10970_v43  ;;  %v12120_v20 = vld [vmem:[#allocation223_spill] sm:$0xff]  ;;  %v12121_v49 = vld [vmem:[#allocation224_spill] sm:$0xff]  ;;  %v12134_v61 = vld [vmem:[#allocation461_spill] sm:$0xff] }
 0x9e0   :  { %6428 = vmatpush3.bf16.msra.mxu0 %v6427_v10  ;;  %6646 = vmatprep.subr.bf16.mxu1 %v6645_v63  ;;  %v6655_v10 = vpack.c.bf16 %v12093_v18, %v12092_v16  ;;  %v6485_v63 = vpack.c.bf16 %v12107_v40, %v12106_v23  ;;  %v12128_v16 = vld [vmem:[#allocation225_spill] sm:$0xff]  ;;  %v12129_v18 = vld [vmem:[#allocation226_spill] sm:$0xff]  ;;  %v12142_v23 = vld [vmem:[#allocation463_spill] sm:$0xff] }
 0x9e1   :  { %6430 = vmatprep.subr.bf16.mxu0 %v6429_v5  ;;  %v6657_v5 = vpack.c.bf16 %v12095_v36, %v12094_v62  ;;  %v12130_v62 = vld [vmem:[#allocation243_spill] sm:$0xff]  ;;  %v12131_v36 = vld [vmem:[#allocation244_spill] sm:$0xff]  ;;  %v12140_v47 = vld [vmem:[#allocation445_spill] sm:$0xff] }
 0x9e2   :  { %v12143_v40 = vld [vmem:[#allocation464_spill] sm:$0xff] }
 0x9e3   :  { %6648 = vmatpush3.bf16.msra.mxu1 %v6647_v35  ;;  %v6487_v35 = vpack.c.bf16 %v12113_v1, %v12112_v55  ;;  %v12148_v55 = vld [vmem:[#allocation447_spill] sm:$0xff] }
 0x9e4   :  { %6432 = vmatpush3.bf16.msra.mxu0 %v6431_v29  ;;  %6650 = vmatprep.subr.bf16.mxu1 %v6649_v27  ;;  %v6659_v29 = vpack.c.bf16 %v12101_v9, %v12100_v28  ;;  %v6489_v27 = vpack.c.bf16 %v12115_v38, %v12114_v25  ;;  %v12136_v9 = vld [vmem:[#allocation227_spill] sm:$0xff]  ;;  %v12151_v25 = vld [vmem:[#allocation466_spill] sm:$0xff] }
 0x9e5   :  { %6434 = vmatprep.subr.bf16.mxu0 %v6433_v31  ;;  %v6661_v31 = vpack.c.bf16 %v12103_v30, %v12102_v45  ;;  %v12138_v30 = vld [vmem:[#allocation245_spill] sm:$0xff] }
 0x9e7   :  { %6652 = vmatpush3.bf16.msra.mxu1 %v6651_v37  ;;  %v6491_v37 = vpack.c.bf16 %v12121_v49, %v12120_v20  ;;  %v12156_v20 = vld [vmem:[#allocation449_spill] sm:$0xff]  ;;  %v12157_v49 = vld [vmem:[#allocation450_spill] sm:$0xff] }
 0x9e8   :  { %6436 = vmatpush3.bf16.msra.mxu0 %v6435_v33  ;;  %6654 = vmatprep.subr.bf16.mxu1 %v6653_v12  ;;  %v6663_v33 = vpack.c.bf16 %v12109_v57, %v12108_v32  ;;  %v6493_v12 = vpack.c.bf16 %v12123_v24, %v12122_v54  ;;  %v12144_v32 = vld [vmem:[#allocation229_spill] sm:$0xff]  ;;  %v12145_v57 = vld [vmem:[#allocation230_spill] sm:$0xff]  ;;  %v12158_v54 = vld [vmem:[#allocation467_spill] sm:$0xff] }
 0x9e9   :  { %6438 = vmatprep.subr.bf16.mxu0 %v6437_v51  ;;  %v6665_v51 = vpack.c.bf16 %v12111_v50, %v12110_v6  ;;  %v12146_v6 = vld [vmem:[#allocation247_spill] sm:$0xff]  ;;  %v12147_v50 = vld [vmem:[#allocation248_spill] sm:$0xff] }
 0x9ea   :  { %v12159_v24 = vld [vmem:[#allocation468_spill] sm:$0xff] }
 0x9eb   :  { %6656 = vmatpush3.bf16.msra.mxu1 %v6655_v10  ;;  %v6495_v10 = vpack.c.bf16 %v12129_v18, %v12128_v16  ;;  %v12164_v16 = vld [vmem:[#allocation451_spill] sm:$0xff]  ;;  %v12165_v18 = vld [vmem:[#allocation452_spill] sm:$0xff] }
 0x9ec   :  { %6440 = vmatpush3.bf16.msra.mxu0 %v6439_v17  ;;  %6658 = vmatprep.subr.bf16.mxu1 %v6657_v5  ;;  %v6667_v17 = vpack.c.bf16 %v12117_v34, %v12116_v53  ;;  %v6497_v5 = vpack.c.bf16 %v12131_v36, %v12130_v62  ;;  %v12153_v53 = vld [vmem:[#allocation232_spill] sm:$0xff]  ;;  %v12166_v62 = vld [vmem:[#allocation469_spill] sm:$0xff]  ;;  %v12167_v36 = vld [vmem:[#allocation470_spill] sm:$0xff] }
 0x9ed   :  { %6442 = vmatprep.subr.bf16.mxu0 %v6441_v14  ;;  %v10997_v14 = vld [vmem:[#allocation5 + $0x38] sm:$0xff] }
 0x9ee   :  { %v11007_v52 = vrot.slane %v10997_v14, %v10565_v39 }
 0x9ef   :  { %6660 = vmatpush3.bf16.msra.mxu1 %v6659_v29  ;;  %v12137_v29 = vld [vmem:[#allocation228_spill] sm:$0xff] }
 0x9f0   :  { %6444 = vmatpush3.bf16.msra.mxu0 %v6443_v41  ;;  %6662 = vmatprep.subr.bf16.mxu1 %v6661_v31  ;;  %v6671_v41 = vpack.c.bf16 %v12125_v11, %v12124_v3  ;;  %v4073_v56 = vcombine.high %v11007_v52, %v11007_v52  ;;  %v6499_v45 = vpack.c.bf16 %v12137_v29, %v12136_v9  ;;  %v12139_v31 = vld [vmem:[#allocation246_spill] sm:$0xff]  ;;  %v12160_v3 = vld [vmem:[#allocation233_spill] sm:$0xff] }
 0x9f1   :  { %6446 = vmatprep.subr.bf16.mxu0 %v6445_v22  ;;  %v6705_v22 = vpack.c.bf16 %v12127_v13, %v12126_v21  ;;  %v6501_v46 = vpack.c.bf16 %v12139_v31, %v12138_v30  ;;  %v12161_v11 = vld [vmem:[#allocation234_spill] sm:$0xff]  ;;  %v12163_v13 = vld [vmem:[#allocation300_spill] sm:$0xff]  ;;  %v12172_v9 = vld [vmem:[#allocation453_spill] sm:$0xff] }
 0x9f2   :  { %v12173_v29 = vld [vmem:[#allocation454_spill] sm:$0xff]  ;;  %v12174_v30 = vld [vmem:[#allocation471_spill] sm:$0xff]  ;;  %v12175_v31 = vld [vmem:[#allocation472_spill] sm:$0xff] }
 0x9f3   :  { %6664 = vmatpush3.bf16.msra.mxu1 %v6663_v33  ;;  %v6503_v33 = vpack.c.bf16 %v12145_v57, %v12144_v32  ;;  %v12180_v32 = vld [vmem:[#allocation455_spill] sm:$0xff]  ;;  %v12181_v57 = vld [vmem:[#allocation456_spill] sm:$0xff] }
 0x9f4   :  { %6448 = vmatpush3.bf16.msra.mxu0 %v6447_v19  ;;  %6666 = vmatprep.subr.bf16.mxu1 %v6665_v51  ;;  %v6707_v19 = vpack.c.bf16 %v12133_v59, %v12132_v2  ;;  %v6505_v51 = vpack.c.bf16 %v12147_v50, %v12146_v6  ;;  %v12168_v2 = vld [vmem:[#allocation283_spill] sm:$0xff]  ;;  %v12169_v59 = vld [vmem:[#allocation284_spill] sm:$0xff]  ;;  %v12182_v6 = vld [vmem:[#allocation473_spill] sm:$0xff] }
 0x9f5   :  { %6482 = vmatprep.subr.bf16.mxu0 %v6481_v26  ;;  %v12135_v26 = vld [vmem:[#allocation462_spill] sm:$0xff] }
 0x9f6   :  { %v6709_v28 = vpack.c.bf16 %v12135_v26, %v12134_v61  ;;  %v12170_v61 = vld [vmem:[#allocation301_spill] sm:$0xff]  ;;  %v12171_v26 = vld [vmem:[#allocation302_spill] sm:$0xff] }
 0x9f7   :  { %4522 = vmatmul.mubr.f32.vlgmr.msra.gmra.mrb[28].mxu0 %v10889_v8  ;;  %v12119_v8 = vld [vmem:[#allocation410_spill] sm:$0xff]  ;;  %6668 = vmatpush3.bf16.msra.mxu1 %v6667_v17  ;;  %v4007_v17 = vcombine.high %v10754_v58, %v10754_v58  ;;  %v12162_v58 = vld [vmem:[#allocation299_spill] sm:$0xff] }
 0x9f8   :  { %6484 = vmatpush3.bf16.msra.mxu0 %v6483_v48  ;;  %4661 = vmatprep.mubr.f32.mxu0 %v4006_v60  ;;  %v6669_v0 = vpack.c.bf16 %v12119_v8, %v12118_v4  ;;  %v12141_v48 = vld [vmem:[#allocation446_spill] sm:$0xff]  ;;  %v12154_v4 = vld [vmem:[#allocation249_spill] sm:$0xff] }
 0x9f9   :  { %6486 = vmatprep.subr.bf16.mxu0 %v6485_v63  ;;  %v6711_v60 = vpack.c.bf16 %v12141_v48, %v12140_v47  ;;  %v6713_v63 = vpack.c.bf16 %v12143_v40, %v12142_v23  ;;  %v12155_v8 = vld [vmem:[#allocation250_spill] sm:$0xff]  ;;  %v4021_v21 = vrot.slane %v4007_v17, %v10565_v39  ;;  %v12176_v47 = vld [vmem:[#allocation285_spill] sm:$0xff]  ;;  %v12178_v23 = vld [vmem:[#allocation303_spill] sm:$0xff] }
 0x9fa   :  { %6670 = vmatprep.subr.bf16.mxu1 %v6669_v0  ;;  %v6509_v0 = vpack.c.bf16 %v12155_v8, %v12154_v4  ;;  %v12177_v48 = vld [vmem:[#allocation286_spill] sm:$0xff]  ;;  %v12179_v40 = vld [vmem:[#allocation304_spill] sm:$0xff]  ;;  %v12192_v8 = vld [vmem:[#allocation307_spill] sm:$0xff] }
 0x9fb   :  { %6672 = vmatpush3.bf16.msra.mxu1 %v6671_v41  ;;  %v6511_v41 = vpack.c.bf16 %v12161_v11, %v12160_v3  ;;  %v12191_v17 = vld [vmem:[#allocation290_spill] sm:$0xff]  ;;  %v12198_v11 = vld [vmem:[#allocation293_spill] sm:$0xff] }
 0x9fc   :  { %6488 = vmatpush3.bf16.msra.mxu0 %v6487_v35  ;;  %6706 = vmatprep.subr.bf16.mxu1 %v6705_v22  ;;  %v12150_v35 = vld [vmem:[#allocation465_spill] sm:$0xff]  ;;  %v6545_v22 = vpack.c.bf16 %v12163_v13, %v12162_v58  ;;  %v12200_v13 = vld [vmem:[#allocation311_spill] sm:$0xff] }
 0x9fd   :  { %6490 = vmatprep.subr.bf16.mxu0 %v6489_v27  ;;  %v6717_v38 = vpack.c.bf16 %v12151_v25, %v12150_v35  ;;  %v12152_v27 = vld [vmem:[#allocation231_spill] sm:$0xff]  ;;  %v12187_v35 = vld [vmem:[#allocation306_spill] sm:$0xff] }
 0x9fe   :  { %5012 = vmatmul.mubr.f32.vlgmr.msra.gmra.mrb[24].mxu1 %v10926_v42  ;;  %v12149_v42 = vld [vmem:[#allocation448_spill] sm:$0xff]  ;;  %v6507_v34 = vpack.c.bf16 %v12153_v53, %v12152_v27  ;;  %v12189_v27 = vld [vmem:[#allocation458_spill] sm:$0xff] }
 0x9ff   :  { %6708 = vmatpush3.bf16.msra.mxu1 %v6707_v19  ;;  %5151 = vmatprep.mubr.f32.mxu1 %v4073_v56  ;;  %v6715_v1 = vpack.c.bf16 %v12149_v42, %v12148_v55  ;;  %v6547_v19 = vpack.c.bf16 %v12169_v59, %v12168_v2  ;;  %v4023_v56 = vcombine.high %v4021_v21, %v4021_v21  ;;  %v12185_v55 = vld [vmem:[#allocation288_spill] sm:$0xff]  ;;  %v12205_v2 = vld [vmem:[#allocation314_spill] sm:$0xff] }
 0xa00   :  { %6492 = vmatpush3.bf16.msra.mxu0 %v6491_v37  ;;  %6710 = vmatprep.subr.bf16.mxu1 %v6709_v28  ;;  %v6719_v37 = vpack.c.bf16 %v12157_v49, %v12156_v20  ;;  %v6549_v28 = vpack.c.bf16 %v12171_v26, %v12170_v61  ;;  %v12194_v49 = vld [vmem:[#allocation291_spill] sm:$0xff] }
 0xa01   :  { %6494 = vmatprep.subr.bf16.mxu0 %v6493_v12  ;;  %v6721_v12 = vpack.c.bf16 %v12159_v24, %v12158_v54  ;;  %v12196_v24 = vld [vmem:[#allocation309_spill] sm:$0xff]  ;;  %v12208_v26 = vld [vmem:[#allocation363_spill] sm:$0xff] }
 0xa03   :  { %6712 = vmatpush3.bf16.msra.mxu1 %v6711_v60  ;;  %v6551_v60 = vpack.c.bf16 %v12177_v48, %v12176_v47  ;;  %v12214_v48 = vld [vmem:[#allocation349_spill] sm:$0xff] }
 0xa04   :  { %6496 = vmatpush3.bf16.msra.mxu0 %v6495_v10  ;;  %6714 = vmatprep.subr.bf16.mxu1 %v6713_v63  ;;  %v6723_v10 = vpack.c.bf16 %v12165_v18, %v12164_v16  ;;  %v6553_v63 = vpack.c.bf16 %v12179_v40, %v12178_v23  ;;  %v12202_v18 = vld [vmem:[#allocation295_spill] sm:$0xff] }
 0xa05   :  { %6498 = vmatprep.subr.bf16.mxu0 %v6497_v5  ;;  %v6725_v5 = vpack.c.bf16 %v12167_v36, %v12166_v62  ;;  %v4024_v36 = vcombine.high %v10835_v44, %v10835_v44  ;;  %v12212_v44 = vld [vmem:[#allocation365_spill] sm:$0xff]  ;;  %v12216_v40 = vld [vmem:[#allocation367_spill] sm:$0xff] }
 0xa07   :  { %6716 = vmatpush3.bf16.msra.mxu1 %v6715_v1  ;;  %v12186_v1 = vld [vmem:[#allocation305_spill] sm:$0xff]  ;;  %v4038_v61 = vrot.slane %v4024_v36, %v10565_v39 }
 0xa08   :  { %6500 = vmatpush3.bf16.msra.mxu0 %v6499_v45  ;;  %6718 = vmatprep.subr.bf16.mxu1 %v6717_v38  ;;  %v6727_v45 = vpack.c.bf16 %v12173_v29, %v12172_v9  ;;  %v6557_v25 = vpack.c.bf16 %v12187_v35, %v12186_v1  ;;  %v12188_v38 = vld [vmem:[#allocation457_spill] sm:$0xff]  ;;  %v12210_v29 = vld [vmem:[#allocation347_spill] sm:$0xff]  ;;  %v12225_v35 = vld [vmem:[#allocation372_spill] sm:$0xff] }
 0xa09   :  { %6502 = vmatprep.subr.bf16.mxu0 %v6501_v46  ;;  %v6729_v46 = vpack.c.bf16 %v12175_v31, %v12174_v30  ;;  %v6735_v53 = vpack.c.bf16 %v12189_v27, %v12188_v38  ;;  %v4040_v31 = vcombine.high %v4038_v61, %v4038_v61  ;;  %v12224_v1 = vld [vmem:[#allocation371_spill] sm:$0xff]  ;;  %v12227_v27 = vld [vmem:[#allocation356_spill] sm:$0xff] }
 0xa0a   :  { %v12226_v38 = vld [vmem:[#allocation355_spill] sm:$0xff] }
 0xa0b   :  { %6720 = vmatpush3.bf16.msra.mxu1 %v6719_v37  ;;  %v12195_v37 = vld [vmem:[#allocation292_spill] sm:$0xff] }
 0xa0c   :  { %6504 = vmatpush3.bf16.msra.mxu0 %v6503_v33  ;;  %6722 = vmatprep.subr.bf16.mxu1 %v6721_v12  ;;  %v6731_v33 = vpack.c.bf16 %v12181_v57, %v12180_v32  ;;  %v6563_v54 = vpack.c.bf16 %v12195_v37, %v12194_v49  ;;  %v12197_v12 = vld [vmem:[#allocation310_spill] sm:$0xff]  ;;  %v12218_v57 = vld [vmem:[#allocation351_spill] sm:$0xff]  ;;  %v12233_v37 = vld [vmem:[#allocation376_spill] sm:$0xff] }
 0xa0d   :  { %6506 = vmatprep.subr.bf16.mxu0 %v6505_v51  ;;  %v12184_v51 = vld [vmem:[#allocation287_spill] sm:$0xff]  ;;  %v6565_v3 = vpack.c.bf16 %v12197_v12, %v12196_v24 }
 0xa0e   :  { %v6555_v42 = vpack.c.bf16 %v12185_v55, %v12184_v51  ;;  %v12222_v55 = vld [vmem:[#allocation353_spill] sm:$0xff]  ;;  %v12232_v49 = vld [vmem:[#allocation375_spill] sm:$0xff] }
 0xa0f   :  { %6724 = vmatpush3.bf16.msra.mxu1 %v6723_v10  ;;  %v12203_v10 = vld [vmem:[#allocation296_spill] sm:$0xff] }
 0xa10   :  { %6508 = vmatpush3.bf16.msra.mxu0 %v6507_v34  ;;  %6726 = vmatprep.subr.bf16.mxu1 %v6725_v5  ;;  %v12190_v34 = vld [vmem:[#allocation289_spill] sm:$0xff]  ;;  %v6571_v62 = vpack.c.bf16 %v12203_v10, %v12202_v18 }
 0xa11   :  { %6510 = vmatprep.subr.bf16.mxu0 %v6509_v0  ;;  %v6559_v4 = vpack.c.bf16 %v12191_v17, %v12190_v34  ;;  %v12193_v0 = vld [vmem:[#allocation308_spill] sm:$0xff]  ;;  %v12204_v5 = vld [vmem:[#allocation313_spill] sm:$0xff]  ;;  %v12229_v17 = vld [vmem:[#allocation374_spill] sm:$0xff] }
 0xa12   :  { %v6561_v20 = vpack.c.bf16 %v12193_v0, %v12192_v8  ;;  %v6573_v59 = vpack.c.bf16 %v12205_v2, %v12204_v5  ;;  %v12228_v34 = vld [vmem:[#allocation373_spill] sm:$0xff]  ;;  %v12231_v0 = vld [vmem:[#allocation358_spill] sm:$0xff]  ;;  %v12240_v2 = vld [vmem:[#allocation427_spill] sm:$0xff] }
 0xa13   :  { %6728 = vmatpush3.bf16.msra.mxu1 %v6727_v45  ;;  %v12211_v45 = vld [vmem:[#allocation348_spill] sm:$0xff]  ;;  %v12230_v8 = vld [vmem:[#allocation357_spill] sm:$0xff] }
 0xa14   :  { %6512 = vmatpush3.bf16.msra.mxu0 %v6511_v41  ;;  %6730 = vmatprep.subr.bf16.mxu1 %v6729_v46  ;;  %v12199_v41 = vld [vmem:[#allocation294_spill] sm:$0xff]  ;;  %v6611_v30 = vpack.c.bf16 %v12211_v45, %v12210_v29  ;;  %v12238_v10 = vld [vmem:[#allocation361_spill] sm:$0xff] }
 0xa15   :  { %6546 = vmatprep.subr.bf16.mxu0 %v6545_v22  ;;  %v6567_v58 = vpack.c.bf16 %v12199_v41, %v12198_v11  ;;  %v12201_v22 = vld [vmem:[#allocation312_spill] sm:$0xff]  ;;  %v12213_v46 = vld [vmem:[#allocation366_spill] sm:$0xff]  ;;  %v12234_v11 = vld [vmem:[#allocation359_spill] sm:$0xff] }
 0xa16   :  { %v6569_v16 = vpack.c.bf16 %v12201_v22, %v12200_v13  ;;  %v6613_v47 = vpack.c.bf16 %v12213_v46, %v12212_v44  ;;  %v12235_v41 = vld [vmem:[#allocation360_spill] sm:$0xff]  ;;  %v4041_v13 = vcombine.high %v10916_v7, %v10916_v7  ;;  %v12236_v22 = vld [vmem:[#allocation377_spill] sm:$0xff]  ;;  %v12248_v46 = vld [vmem:[#allocation431_spill] sm:$0xff] }
 0xa17   :  { %4662 = vmatmul.mubr.f32.vlgmr.msra.gmra.mrb[30].mxu0 %v10970_v43  ;;  %v12183_v43 = vld [vmem:[#allocation474_spill] sm:$0xff]  ;;  %6732 = vmatpush3.bf16.msra.mxu1 %v6731_v33  ;;  %v12219_v33 = vld [vmem:[#allocation352_spill] sm:$0xff]  ;;  %v12244_v7 = vld [vmem:[#allocation429_spill] sm:$0xff] }
 0xa18   :  { %6548 = vmatpush3.bf16.msra.mxu0 %v6547_v19  ;;  %4801 = vmatprep.mubr.f32.mxu0 %v4023_v56  ;;  %v6733_v50 = vpack.c.bf16 %v12183_v43, %v12182_v6  ;;  %v12207_v19 = vld [vmem:[#allocation298_spill] sm:$0xff]  ;;  %v6619_v6 = vpack.c.bf16 %v12219_v33, %v12218_v57  ;;  %v12220_v43 = vld [vmem:[#allocation369_spill] sm:$0xff]  ;;  %v4055_v5 = vrot.slane %v4041_v13, %v10565_v39 }
 0xa19   :  { %6550 = vmatprep.subr.bf16.mxu0 %v6549_v28  ;;  %v12209_v28 = vld [vmem:[#allocation364_spill] sm:$0xff]  ;;  %v12246_v45 = vld [vmem:[#allocation413_spill] sm:$0xff] }
 0xa1a   :  { %6734 = vmatprep.subr.bf16.mxu1 %v6733_v50  ;;  %v6609_v9 = vpack.c.bf16 %v12209_v28, %v12208_v26  ;;  %v12221_v50 = vld [vmem:[#allocation370_spill] sm:$0xff]  ;;  %v4057_v28 = vcombine.high %v4055_v5, %v4055_v5  ;;  %v12252_v57 = vld [vmem:[#allocation433_spill] sm:$0xff] }
 0xa1b   :  { %6736 = vmatpush3.bf16.msra.mxu1 %v6735_v53  ;;  %v6621_v51 = vpack.c.bf16 %v12221_v50, %v12220_v43  ;;  %v6627_v53 = vpack.c.bf16 %v12227_v27, %v12226_v38  ;;  %v12255_v43 = vld [vmem:[#allocation418_spill] sm:$0xff]  ;;  %v12268_v13 = vld [vmem:[#allocation441_spill] sm:$0xff] }
 0xa1c   :  { %6552 = vmatpush3.bf16.msra.mxu0 %v6551_v60  ;;  %v12215_v60 = vld [vmem:[#allocation350_spill] sm:$0xff] }
 0xa1d   :  { %6554 = vmatprep.subr.bf16.mxu0 %v6553_v63  ;;  %v6615_v23 = vpack.c.bf16 %v12215_v60, %v12214_v48  ;;  %v12217_v63 = vld [vmem:[#allocation368_spill] sm:$0xff]  ;;  %v12261_v38 = vld [vmem:[#allocation438_spill] sm:$0xff] }
 0xa1e   :  { %5152 = vmatmul.mubr.f32.vlgmr.msra.gmra.mrb[26].mxu1 %v11007_v52  ;;  %v12206_v52 = vld [vmem:[#allocation297_spill] sm:$0xff]  ;;  %v6617_v32 = vpack.c.bf16 %v12217_v63, %v12216_v40  ;;  %v12250_v40 = vld [vmem:[#allocation415_spill] sm:$0xff]  ;;  %v12251_v63 = vld [vmem:[#allocation416_spill] sm:$0xff] }
 0xa1f   :  { %v6575_v56 = vpack.c.bf16 %v12207_v19, %v12206_v52  ;;  %v12242_v19 = vld [vmem:[#allocation411_spill] sm:$0xff]  ;;  %6078 = vmatprep.mubr.msk.f32.mxu1 %vm6985_vm4, %v11791_v15 }
 0xa20   :  { %6556 = vmatpush3.bf16.msra.mxu0 %v6555_v42 }
 0xa21   :  { %6558 = vmatprep.subr.bf16.mxu0 %v6557_v25  ;;  %v6625_v25 = vpack.c.bf16 %v12225_v35, %v12224_v1  ;;  %v12259_v1 = vld [vmem:[#allocation420_spill] sm:$0xff] }
 0xa24   :  { %6560 = vmatpush3.bf16.msra.mxu0 %v6559_v4  ;;  %v6629_v4 = vpack.c.bf16 %v12229_v17, %v12228_v34  ;;  %v12263_v34 = vld [vmem:[#allocation422_spill] sm:$0xff] }
 0xa25   :  { %6562 = vmatprep.subr.bf16.mxu0 %v6561_v20  ;;  %v6631_v20 = vpack.c.bf16 %v12231_v0, %v12230_v8  ;;  %v12264_v8 = vld [vmem:[#allocation439_spill] sm:$0xff]  ;;  %v12265_v0 = vld [vmem:[#allocation440_spill] sm:$0xff] }
 0xa28   :  { %6564 = vmatpush3.bf16.msra.mxu0 %v6563_v54  ;;  %v6633_v54 = vpack.c.bf16 %v12233_v37, %v12232_v49 }
 0xa29   :  { %6566 = vmatprep.subr.bf16.mxu0 %v6565_v3 }
 0xa2c   :  { %6568 = vmatpush3.bf16.msra.mxu0 %v6567_v58  ;;  %v6635_v58 = vpack.c.bf16 %v12235_v41, %v12234_v11  ;;  %v12267_v11 = vld [vmem:[#allocation424_spill] sm:$0xff] }
 0xa2d   :  { %6570 = vmatprep.subr.bf16.mxu0 %v6569_v16  ;;  %v12237_v16 = vld [vmem:[#allocation378_spill] sm:$0xff] }
 0xa2e   :  { %v6637_v18 = vpack.c.bf16 %v12237_v16, %v12236_v22  ;;  %v12269_v22 = vld [vmem:[#allocation442_spill] sm:$0xff] }
 0xa2f   :  { %v6701_v16 = vpack.c.bf16 %v12269_v22, %v12268_v13  ;;  %v12303_v13 = vld [vmem:[#allocation490_spill] sm:$0xff] }
 0xa30   :  { %6572 = vmatpush3.bf16.msra.mxu0 %v6571_v62  ;;  %v12239_v62 = vld [vmem:[#allocation362_spill] sm:$0xff] }
 0xa31   :  { %6574 = vmatprep.subr.bf16.mxu0 %v6573_v59  ;;  %v6639_v36 = vpack.c.bf16 %v12239_v62, %v12238_v10  ;;  %v12241_v59 = vld [vmem:[#allocation428_spill] sm:$0xff]  ;;  %v12270_v10 = vld [vmem:[#allocation425_spill] sm:$0xff]  ;;  %v12271_v62 = vld [vmem:[#allocation426_spill] sm:$0xff] }
 0xa32   :  { %v6673_v52 = vpack.c.bf16 %v12241_v59, %v12240_v2  ;;  %v12273_v59 = vld [vmem:[#allocation492_spill] sm:$0xff] }
 0xa34   :  { %6576 = vmatpush3.bf16.msra.mxu0 %v6575_v56  ;;  %v12243_v56 = vld [vmem:[#allocation412_spill] sm:$0xff] }
 0xa35   :  { %6610 = vmatprep.subr.bf16.mxu0 %v6609_v9  ;;  %v6675_v26 = vpack.c.bf16 %v12243_v56, %v12242_v19  ;;  %v12245_v9 = vld [vmem:[#allocation430_spill] sm:$0xff]  ;;  %v12274_v19 = vld [vmem:[#allocation475_spill] sm:$0xff]  ;;  %v12275_v56 = vld [vmem:[#allocation476_spill] sm:$0xff] }
 0xa36   :  { %v6677_v29 = vpack.c.bf16 %v12245_v9, %v12244_v7  ;;  %v12277_v7 = vld [vmem:[#allocation494_spill] sm:$0xff] }
 0xa37   :  { %4802 = vmatmul.mubr.f32.vlgmr.msra.gmra.mrb[32].mxu0 %v4021_v21  ;;  %v12223_v21 = vld [vmem:[#allocation354_spill] sm:$0xff] }
 0xa38   :  { %6612 = vmatpush3.bf16.msra.mxu0 %v6611_v30  ;;  %4941 = vmatprep.mubr.f32.mxu0 %v4040_v31  ;;  %v6623_v42 = vpack.c.bf16 %v12223_v21, %v12222_v55  ;;  %v12247_v30 = vld [vmem:[#allocation414_spill] sm:$0xff]  ;;  %v12257_v55 = vld [vmem:[#allocation436_spill] sm:$0xff] }
 0xa39   :  { %6614 = vmatprep.subr.bf16.mxu0 %v6613_v47  ;;  %v6679_v31 = vpack.c.bf16 %v12247_v30, %v12246_v45  ;;  %v12249_v47 = vld [vmem:[#allocation432_spill] sm:$0xff]  ;;  %v12279_v45 = vld [vmem:[#allocation478_spill] sm:$0xff] }
 0xa3a   :  { %v6681_v48 = vpack.c.bf16 %v12249_v47, %v12248_v46 }
 0xa3c   :  { %6616 = vmatpush3.bf16.msra.mxu0 %v6615_v23 }
 0xa3d   :  { %6618 = vmatprep.subr.bf16.mxu0 %v6617_v32  ;;  %v6683_v32 = vpack.c.bf16 %v12251_v63, %v12250_v40  ;;  %v12283_v40 = vld [vmem:[#allocation480_spill] sm:$0xff] }
 0xa40   :  { %6620 = vmatpush3.bf16.msra.mxu0 %v6619_v6  ;;  %v12254_v6 = vld [vmem:[#allocation417_spill] sm:$0xff] }
 0xa41   :  { %6622 = vmatprep.subr.bf16.mxu0 %v6621_v51  ;;  %v6687_v50 = vpack.c.bf16 %v12255_v43, %v12254_v6  ;;  %v12256_v51 = vld [vmem:[#allocation435_spill] sm:$0xff] }
 0xa42   :  { %v6689_v21 = vpack.c.bf16 %v12257_v55, %v12256_v51  ;;  %v12288_v43 = vld [vmem:[#allocation499_spill] sm:$0xff] }
 0xa43   :  { %v12290_v55 = vld [vmem:[#allocation483_spill] sm:$0xff] }
 0xa44   :  { %6624 = vmatpush3.bf16.msra.mxu0 %v6623_v42  ;;  %v12258_v42 = vld [vmem:[#allocation419_spill] sm:$0xff] }
 0xa45   :  { %6626 = vmatprep.subr.bf16.mxu0 %v6625_v25  ;;  %v6691_v35 = vpack.c.bf16 %v12259_v1, %v12258_v42  ;;  %v12260_v25 = vld [vmem:[#allocation437_spill] sm:$0xff] }
 0xa46   :  { %v6693_v27 = vpack.c.bf16 %v12261_v38, %v12260_v25  ;;  %v12292_v1 = vld [vmem:[#allocation501_spill] sm:$0xff] }
 0xa47   :  { %v12294_v38 = vld [vmem:[#allocation485_spill] sm:$0xff] }
 0xa48   :  { %6628 = vmatpush3.bf16.msra.mxu0 %v6627_v53  ;;  %v12262_v53 = vld [vmem:[#allocation421_spill] sm:$0xff] }
 0xa49   :  { %6630 = vmatprep.subr.bf16.mxu0 %v6629_v4  ;;  %v6695_v17 = vpack.c.bf16 %v12263_v34, %v12262_v53  ;;  %v5452_v4 = vld [vmem:[%s11285_s5] ss:$0 sm:$0xff]  ;;  %v12296_v34 = vld [vmem:[#allocation503_spill] sm:$0xff] }
 0xa4a   :  { %v5493_v24 = vpop.f32.mrb[20].mxu0 }
 0xa4b   :  { %v5494_v12 = vpop.f32.mrb[21].mxu0 }
 0xa4c   :  { %v5495_v3 = vadd.f32 %v5494_v12, %v5493_v24  ;;  %6632 = vmatpush3.bf16.msra.mxu0 %v6631_v20  ;;  %v6697_v20 = vpack.c.bf16 %v12265_v0, %v12264_v8  ;;  %v12266_v12 = vld [vmem:[#allocation423_spill] sm:$0xff] }
 0xa4d   :  { %6634 = vmatprep.subr.bf16.mxu0 %v6633_v54  ;;  %v6699_v41 = vpack.c.bf16 %v12267_v11, %v12266_v12  ;;  %v12301_v12 = vld [vmem:[#allocation506_spill] sm:$0xff] }
 0xa4e   :  { %v4174_v54 = vadd.f32 %v5495_v3, %v5452_v4  ;;  %v12272_v3 = vld [vmem:[#allocation491_spill] sm:$0xff] }
 0xa50   :  { %6636 = vmatpush3.bf16.msra.mxu0 %v6635_v58  ;;  %v4058_v58 = vcombine.high %v10997_v14, %v10997_v14 }
 0xa51   :  { %6638 = vmatprep.subr.bf16.mxu0 %v6637_v18  ;;  %v5633_v44 = vpop.f32.mrb[16].mxu1 }
 0xa52   :  { %v5634_v60 = vpop.f32.mrb[17].mxu1  ;;  %v4072_v2 = vrot.slane %v4058_v58, %v10565_v39  ;;  %v12302_v58 = vld [vmem:[#allocation489_spill] sm:$0xff] }
 0xa53   :  { %v11147_v23 = vadd.f32 %v5634_v60, %v5633_v44  ;;  %v12281_v44 = vld [vmem:[#allocation496_spill] sm:$0xff]  ;;  %v12282_v60 = vld [vmem:[#allocation479_spill] sm:$0xff]  ;;  %v6767_v22 = vpack.c.bf16 %v12303_v13, %v12302_v58 }
 0xa54   :  { %6640 = vmatpush3.bf16.msra.mxu0 %v6639_v36  ;;  %v6703_v36 = vpack.c.bf16 %v12271_v62, %v12270_v10  ;;  %v4074_v14 = vcombine.high %v4072_v2, %v4072_v2  ;;  %v6747_v63 = vpack.c.bf16 %v12283_v40, %v12282_v60  ;;  %v5234_v40 = vld [vmem:[%s11284_s4 + $0x30] sm:$0xff] }
 0xa55   :  { %6674 = vmatprep.subr.bf16.mxu0 %v6673_v52  ;;  %v6737_v52 = vpack.c.bf16 %v12273_v59, %v12272_v3 }
 0xa57   :  { %4942 = vmatmul.mubr.f32.vlgmr.msra.gmra.mrb[34].mxu0 %v4038_v61  ;;  %v12253_v61 = vld [vmem:[#allocation434_spill] sm:$0xff] }
 0xa58   :  { %6676 = vmatpush3.bf16.msra.mxu0 %v6675_v26  ;;  %5081 = vmatprep.mubr.f32.mxu0 %v4057_v28  ;;  %v6685_v33 = vpack.c.bf16 %v12253_v61, %v12252_v57  ;;  %v6739_v26 = vpack.c.bf16 %v12275_v56, %v12274_v19  ;;  %v12276_v28 = vld [vmem:[#allocation493_spill] sm:$0xff]  ;;  %v12285_v57 = vld [vmem:[#allocation498_spill] sm:$0xff] }
 0xa59   :  { %6678 = vmatprep.subr.bf16.mxu0 %v6677_v29  ;;  %v6741_v9 = vpack.c.bf16 %v12277_v7, %v12276_v28  ;;  %v12278_v29 = vld [vmem:[#allocation477_spill] sm:$0xff] }
 0xa5a   :  { %v6743_v30 = vpack.c.bf16 %v12279_v45, %v12278_v29  ;;  %v12286_v61 = vld [vmem:[#allocation481_spill] sm:$0xff]  ;;  %v5229_v45 = vld [vmem:[%s11284_s4 + $0x8] sm:$0xff] }
 0xa5c   :  { %6680 = vmatpush3.bf16.msra.mxu0 %v6679_v31  ;;  %v12280_v31 = vld [vmem:[#allocation495_spill] sm:$0xff] }
 0xa5d   :  { %6682 = vmatprep.subr.bf16.mxu0 %v6681_v48  ;;  %v6745_v46 = vpack.c.bf16 %v12281_v44, %v12280_v31  ;;  %v5231_v31 = vld [vmem:[%s11284_s4 + $0x18] sm:$0xff] }
 0xa60   :  { %6684 = vmatpush3.bf16.msra.mxu0 %v6683_v32  ;;  %v12284_v32 = vld [vmem:[#allocation497_spill] sm:$0xff] }
 0xa61   :  { %6686 = vmatprep.subr.bf16.mxu0 %v6685_v33  ;;  %v12287_v33 = vld [vmem:[#allocation482_spill] sm:$0xff] }
 0xa62   :  { %v6751_v6 = vpack.c.bf16 %v12287_v33, %v12286_v61  ;;  %v5236_v61 = vld [vmem:[%s11284_s4 + $0x40] sm:$0xff]  ;;  %v5237_v33 = vld [vmem:[%s11284_s4 + $0x48] sm:$0xff] }
 0xa64   :  { %6688 = vmatpush3.bf16.msra.mxu0 %v6687_v50  ;;  %v12289_v50 = vld [vmem:[#allocation500_spill] sm:$0xff] }
 0xa65   :  { %6690 = vmatprep.subr.bf16.mxu0 %v6689_v21  ;;  %v6753_v51 = vpack.c.bf16 %v12289_v50, %v12288_v43  ;;  %v12291_v21 = vld [vmem:[#allocation484_spill] sm:$0xff]  ;;  %v5239_v50 = vld [vmem:[%s11284_s4 + $0x58] sm:$0xff] }
 0xa66   :  { %v6755_v42 = vpack.c.bf16 %v12291_v21, %v12290_v55  ;;  %v5238_v43 = vld [vmem:[%s11284_s4 + $0x50] sm:$0xff]  ;;  %v5240_v55 = vld [vmem:[%s11284_s4 + $0x60] sm:$0xff]  ;;  %v5241_v21 = vld [vmem:[%s11284_s4 + $0x68] sm:$0xff] }
 0xa68   :  { %6692 = vmatpush3.bf16.msra.mxu0 %v6691_v35  ;;  %v12293_v35 = vld [vmem:[#allocation502_spill] sm:$0xff] }
 0xa69   :  { %6694 = vmatprep.subr.bf16.mxu0 %v6693_v27  ;;  %v6757_v25 = vpack.c.bf16 %v12293_v35, %v12292_v1  ;;  %v12295_v27 = vld [vmem:[#allocation486_spill] sm:$0xff] }
 0xa6a   :  { %v5528_v49 = vpop.f32.mrb[22].mxu0  ;;  %v6759_v53 = vpack.c.bf16 %v12295_v27, %v12294_v38  ;;  %v5242_v38 = vld [vmem:[%s11284_s4 + $0x70] sm:$0xff]  ;;  %v5243_v27 = vld [vmem:[%s11284_s4 + $0x78] sm:$0xff] }
 0xa6b   :  { %v5529_v37 = vpop.f32.mrb[23].mxu0 }
 0xa6c   :  { %v5530_v24 = vadd.f32 %v5529_v37, %v5528_v49  ;;  %6696 = vmatpush3.bf16.msra.mxu0 %v6695_v17  ;;  %v12297_v17 = vld [vmem:[#allocation504_spill] sm:$0xff]  ;;  %v12298_v49 = vld [vmem:[#allocation487_spill] sm:$0xff] }
 0xa6d   :  { %6698 = vmatprep.subr.bf16.mxu0 %v6697_v20  ;;  %v6761_v4 = vpack.c.bf16 %v12297_v17, %v12296_v34  ;;  %v12299_v37 = vld [vmem:[#allocation488_spill] sm:$0xff] }
 0xa6e   :  { %v4244_v18 = vadd.f32 %v5530_v24, %v4174_v54  ;;  %v6763_v54 = vpack.c.bf16 %v12299_v37, %v12298_v49  ;;  %v12300_v24 = vld [vmem:[#allocation505_spill] sm:$0xff] }
 0xa6f   :  { %v6765_v11 = vpack.c.bf16 %v12301_v12, %v12300_v24 }
 0xa70   :  { %6700 = vmatpush3.bf16.msra.mxu0 %v6699_v41 }
 0xa71   :  { %6702 = vmatprep.subr.bf16.mxu0 %v6701_v16  ;;  %v5703_v39 = vpop.f32.mrb[18].mxu1 }
 0xa72   :  { %v5704_v47 = vpop.f32.mrb[19].mxu1 }
 0xa73   :  { %v5705_v48 = vadd.f32 %v5704_v47, %v5703_v39  ;;  %v5233_v47 = vld [vmem:[%s11284_s4 + $0x28] sm:$0xff] }
 0xa74   :  { %6704 = vmatpush3.bf16.msra.mxu0 %v6703_v36 }
 0xa75   :  { %6738 = vmatprep.subr.bf16.mxu0 %v6737_v52 }
 0xa77   :  { %5082 = vmatmul.mubr.f32.vlgmr.msra.gmra.mrb[36].mxu0 %v4055_v5  ;;  %v6749_v5 = vpack.c.bf16 %v12285_v57, %v12284_v32 }
 0xa78   :  { %6740 = vmatpush3.bf16.msra.mxu0 %v6739_v26  ;;  %5221 = vmatprep.mubr.f32.mxu0 %v4074_v14 }
 0xa79   :  { %6742 = vmatprep.subr.bf16.mxu0 %v6741_v9 }
 0xa7c   :  { %6744 = vmatpush3.bf16.msra.mxu0 %v6743_v30  ;;  %v6984_v30 = vmov 0.0|0.0  }
 0xa7d   :  { %6746 = vmatprep.subr.bf16.mxu0 %v6745_v46  ;;  %6769 = vmatprep.subr.bf16.mxu1 %v6984_v30  ;;  %v5232_v46 = vld [vmem:[%s11284_s4 + $0x20] sm:$0xff] }
 0xa80   :  { %6748 = vmatpush3.bf16.msra.mxu0 %v6747_v63  ;;  %v5235_v63 = vld [vmem:[%s11284_s4 + $0x38] sm:$0xff] }
 0xa81   :  { %6750 = vmatprep.subr.bf16.mxu0 %v6749_v5  ;;  %v6779_v5 = vpack.c.bf16 %v5235_v63, %v5234_v40 }
 0xa84   :  { %6752 = vmatpush3.bf16.msra.mxu0 %v6751_v6  ;;  %v6782_v6 = vpack.c.bf16 %v5237_v33, %v5236_v61 }
 0xa85   :  { %6754 = vmatprep.subr.bf16.mxu0 %v6753_v51  ;;  %v6785_v51 = vpack.c.bf16 %v5239_v50, %v5238_v43 }
 0xa88   :  { %6756 = vmatpush3.bf16.msra.mxu0 %v6755_v42  ;;  %v6788_v42 = vpack.c.bf16 %v5241_v21, %v5240_v55 }
 0xa89   :  { %6758 = vmatprep.subr.bf16.mxu0 %v6757_v25 }
 0xa8a   :  { %v5563_v8 = vpop.f32.mrb[24].mxu0 }
 0xa8b   :  { %v5564_v0 = vpop.f32.mrb[25].mxu0 }
 0xa8c   :  { %v5565_v20 = vadd.f32 %v5564_v0, %v5563_v8  ;;  %6760 = vmatpush3.bf16.msra.mxu0 %v6759_v53  ;;  %v6791_v53 = vpack.c.bf16 %v5243_v27, %v5242_v38 }
 0xa8d   :  { %6762 = vmatprep.subr.bf16.mxu0 %v6761_v4 }
 0xa8e   :  { %v4314_v41 = vadd.f32 %v5565_v20, %v4244_v18 }
 0xa90   :  { %6764 = vmatpush3.bf16.msra.mxu0 %v6763_v54 }
 0xa91   :  { %6766 = vmatprep.subr.bf16.mxu0 %v6765_v11  ;;  %v5773_v16 = vpop.f32.mrb[20].mxu1 }
 0xa92   :  { %v5774_v10 = vpop.f32.mrb[21].mxu1 }
 0xa93   :  { %v5775_v62 = vadd.f32 %v5774_v10, %v5773_v16 }
 0xa94   :  { %6768 = vmatpush3.bf16.msra.mxu0 %v6767_v22 }
 0xa97   :  { %5222 = vmatmul.mubr.f32.vlgmr.msra.gmra.mrb[38].mxu0 %v4072_v2  ;;  %v5228_v2 = vld [vmem:[%s11284_s4] sm:$0xff] }
 0xa98   :  { %v6770_v39 = vpack.c.bf16 %v5229_v45, %v5228_v2 }
 0xa9a   :  { %6771 = vmatpush3.bf16.msra.mxu1 %v6770_v39 }
 0xa9b   :  { %6772 = vmatprep.subr.bf16.mxu1 %v6984_v30 }
 0xaaa   :  { %v5598_v36 = vpop.f32.mrb[26].mxu0 }
 0xaab   :  { %v5599_v3 = vpop.f32.mrb[27].mxu0 }
 0xaac   :  { %v5600_v59 = vadd.f32 %v5599_v3, %v5598_v36 }
 0xaae   :  { %v4384_v52 = vadd.f32 %v5600_v59, %v4314_v41 }
 0xab0   :  { %v4454_v19 = vadd.f32 %v11147_v23, %v4384_v52  ;;  %v5230_v23 = vld [vmem:[%s11284_s4 + $0x10] sm:$0xff] }
 0xab1   :  { %v5843_v56 = vpop.f32.mrb[22].mxu1  ;;  %v6773_v44 = vpack.c.bf16 %v5231_v31, %v5230_v23 }
 0xab2   :  { %v5844_v26 = vpop.f32.mrb[23].mxu1 }
 0xab3   :  { %v11210_v14 = vadd.f32 %v5844_v26, %v5843_v56  ;;  %6774 = vmatpush3.bf16.msra.mxu1 %v6773_v44  ;;  %v5453_v56 = vld [vmem:[%s11285_s5 + $0x1] ss:$0 sm:$0xff]  ;;  %s6937_s5 = scalar_lea.vmem %s5340_s2, 32 }
 0xab4   :  { %6775 = vmatprep.subr.bf16.mxu1 %v6984_v30  ;;  %p6938_p0 = scmp.ne.s32.totalorder %s5340_s2, %s6937_s5  ;;  %p6943_p2 = scmp.lt.s32.totalorder %s6937_s5, %s6937_s5 }
 0xab6   :  { %p6944_p3 = por %p6943_p2, %p6942_p1 }
 0xab8   :  { %p6945_p4 = pnand %p6944_p3, %p6938_p0 }
 0xaca   :  { %v5668_v18 = vpop.f32.mrb[28].mxu0 }
 0xacb   :  { %v5669_v28 = vpop.f32.mrb[29].mxu0 }
 0xacc   :  { %v5670_v7 = vadd.f32 %v5669_v28, %v5668_v18 }
 0xace   :  { %v4524_v9 = vadd.f32 %v5670_v7, %v4454_v19 }
 0xad0   :  { %v4594_v29 = vadd.f32 %v5705_v48, %v4524_v9  ;;  %v6776_v48 = vpack.c.bf16 %v5233_v47, %v5232_v46 }
 0xad1   :  { %v5913_v60 = vpop.f32.mrb[24].mxu1 }
 0xad2   :  { %v5914_v32 = vpop.f32.mrb[25].mxu1  ;;  %6777 = vmatpush3.bf16.msra.mxu1 %v6776_v48 }
 0xad3   :  { %v5915_v57 = vadd.f32 %v5914_v32, %v5913_v60  ;;  %6778 = vmatprep.subr.bf16.mxu1 %v6984_v30 }
 0xad6   :  { %6780 = vmatpush3.bf16.msra.mxu1 %v6779_v5 }
 0xad7   :  { %6781 = vmatprep.subr.bf16.mxu1 %v6984_v30 }
 0xada   :  { %6783 = vmatpush3.bf16.msra.mxu1 %v6782_v6 }
 0xadb   :  { %6784 = vmatprep.subr.bf16.mxu1 %v6984_v30 }
 0xade   :  { %6786 = vmatpush3.bf16.msra.mxu1 %v6785_v51 }
 0xadf   :  { %6787 = vmatprep.subr.bf16.mxu1 %v6984_v30 }
 0xae2   :  { %6789 = vmatpush3.bf16.msra.mxu1 %v6788_v42 }
 0xae3   :  { %6790 = vmatprep.subr.bf16.mxu1 %v6984_v30 }
 0xae6   :  { %6792 = vmatpush3.bf16.msra.mxu1 %v6791_v53 }
 0xaea   :  { %v5738_v1 = vpop.f32.mrb[30].mxu0 }
 0xaeb   :  { %v5739_v35 = vpop.f32.mrb[31].mxu0 }
 0xaec   :  { %v5740_v25 = vadd.f32 %v5739_v35, %v5738_v1 }
 0xaee   :  { %v4664_v34 = vadd.f32 %v5740_v25, %v4594_v29 }
 0xaf0   :  { %v4734_v17 = vadd.f32 %v5775_v62, %v4664_v34 }
 0xaf1   :  { %v5983_v4 = vpop.f32.mrb[26].mxu1 }
 0xaf2   :  { %v5984_v8 = vpop.f32.mrb[27].mxu1 }
 0xaf3   :  { %v5985_v0 = vadd.f32 %v5984_v8, %v5983_v4 }
 0xb0a   :  { %v5808_v20 = vpop.f32.mrb[32].mxu0 }
 0xb0b   :  { %v5809_v49 = vpop.f32.mrb[33].mxu0 }
 0xb0c   :  { %v5810_v37 = vadd.f32 %v5809_v49, %v5808_v20 }
 0xb0e   :  { %v4804_v54 = vadd.f32 %v5810_v37, %v4734_v17 }
 0xb10   :  { %v4874_v24 = vadd.f32 %v11210_v14, %v4804_v54 }
 0xb2a   :  { %v5878_v12 = vpop.f32.mrb[34].mxu0 }
 0xb2b   :  { %v5879_v11 = vpop.f32.mrb[35].mxu0 }
 0xb2c   :  { %v5880_v41 = vadd.f32 %v5879_v11, %v5878_v12 }
 0xb2e   :  { %v4944_v58 = vadd.f32 %v5880_v41, %v4874_v24 }
 0xb30   :  { %v5014_v13 = vadd.f32 %v5915_v57, %v4944_v58 }
 0xb4a   :  { %v5948_v22 = vpop.f32.mrb[36].mxu0 }
 0xb4b   :  { %v5949_v16 = vpop.f32.mrb[37].mxu0 }
 0xb4c   :  { %v5950_v10 = vadd.f32 %v5949_v16, %v5948_v22 }
 0xb4e   :  { %v5084_v62 = vadd.f32 %v5950_v10, %v5014_v13 }
 0xb50   :  { %v5154_v36 = vadd.f32 %v5985_v0, %v5084_v62 }
 0xb6a   :  { %v6018_v15 = vpop.f32.mrb[38].mxu0 }
 0xb6b   :  { %v6019_v3 = vpop.f32.mrb[39].mxu0 }
 0xb6c   :  { %v6020_v59 = vadd.f32 %v6019_v3, %v6018_v15 }
 0xb6e   :  { %v5224_v52 = vadd.f32 %v6020_v59, %v5154_v36 }
 0xb70   :  { %v5227_v19 = vmax.f32 %v5224_v52, 0.0 }
 0xb72   :  { %6079 = vmatmul.mubr.f32.vlgmr.msra.gmra.mrb[28].mxu1 %v5227_v19 }
 0xc45   :  { %v5316_v26 = vpop.f32.mrb[28].mxu1 }
 0xc46   :  { %v5317_v14 = vadd.f32 %v5453_v56, %v5316_v26  ;;  %v6080_v18 = vpop.f32.mrb[29].mxu1 }
 0xc48   :  { %v5321_v28 = vsel %vm5320_vm5, %v5317_v14, -inf }
 0xc49   :  { %5322 = vmax.xlane.f32.xlu0 %v5321_v28 }
 0xcd6   :  { %v5323_v7 = vpop.xlane.xlu0 %5322 }
 0xcd7   :  { %v5324_v9 = vsub.f32 %v5317_v14, %v5323_v7 }
 0xcd9   :  { %v5325_v29 = vmul.f32 1.442695, %v5324_v9 }
 0xcdb   :  { %6933 = vpow2.f32 %v5325_v29 }
 0xce5   :  { %v6934_v2 = vpop.eup %6933 }
 0xce6   :  { %v5327_v45 = vsel %vm5320_vm5, %v6934_v2, 0.0 }
 0xce7   :  { %5328 = vadd.xlane.f32.xlu0 %v5327_v45 }
 0xd74   :  { %v5329_v23 = vpop.xlane.xlu0 %5328 }
 0xd75   :  { %6935 = vrcp.f32 %v5329_v23 }
 0xd7f   :  { %v6936_v30 = vpop.eup %6935 }
 0xd80   :  { %v5331_v39 = vmul.f32 %v6936_v30, %v6934_v2 }
 0xd82   :  { %5332 = vst.msk [vmem:[#allocation7] sm:$0x3] %vm5320_vm5, %v5331_v39 }
 0xd83   :  { %6948 = shalt.err (!%p6945_p4)
}
 0xd84   :  { %s6949_s12 = scalar_lea.hbm %s11288_s8, 32 }
 0xd85   :  { %p6950_p5 = scmp.ne.s32.totalorder %s11288_s8, %s6949_s12  ;;  %p6953_p6 = scmp.lt.u32.totalorder %s6949_s12, %s11288_s8 }
 0xd87   :  { %p6955_p7 = pnand %p6953_p6, %p6950_p5 }
 0xd89   :  { %6958 = shalt.err (!%p6955_p7)
}
 0xd8a   :  { %5342 = dma.vmem_to_hbm [thread:$0]  %s5340_s2, 32, %s11288_s8, [#allocation8]  }
 0xd8b   :  { %6963 = dma.done.wait [#allocation8], 32  }
 0xd8c   :  { %6964 = vsyncadd [#allocation8], 4294967264 }
 0xd8d   :  { %5346 = vsyncpa [#allocation8], 1 }
 0xd8e   :  { %5347 = vsyncmov [#allocation6] }
 0xd91   :  { %s5348_s18 = vpop.sfrf %5347 }
 0xd92   :  { %p5454_p8 = scmp.ne.s32.totalorder %s5348_s18, 0 }
 0xd94   :  { %5352 = shalt.err (%p5454_p8)  }
 0xd95   :  { %5354 = vsyncmov [#allocation6 + $0x1] }
 0xd98   :  { %s5355_s7 = vpop.sfrf %5354 }
 0xd99   :  { %p5455_p9 = scmp.ne.s32.totalorder %s5355_s7, 0 }
 0xd9b   :  { %5359 = shalt.err (%p5455_p9)  }

</bundles_post_ra>
